<compile_context>
chip_gen: v6e
topology: v6e:2x2x1
jax: 0.10.0
libtpu: 0.0.40
codegen_flags: <defaults>
</compile_context>

<pallas_src>
import functools

import jax
import jax.numpy as jnp
from jax.experimental import pallas as pl
from jax.experimental.pallas import tpu as pltpu


# -------------------- loss hyper-parameters (module __init__) ----------------
ROT_BODY = 1.2
ROT_HAND = 1.2
JOINTS_BODY = 0.75
JOINTS_HAND = 0.75
ROOT = 1.0
COMMIT = 0.02

MOTION_DIM = 315            # 3 (transl) + 132 (body rot) + 180 (30 hand joints * 6)
NB_JOINTS = 52              # 22 body + 30 hand
JOINT_FEAT = NB_JOINTS * 3  # 156

# Leading "core" grid axis: splits work across the 2 TensorCores of a v7x
# megacore; on single-TC v5e/v6e it is simply one extra serial outer step.
NUM_CORES = 2

# Lane index of each partial sum in the packed (8, 128) per-core output block.
_TRANSL, _ROT_BODY_L, _ROT_HAND_L, _JBODY, _JHAND = range(5)


def _loss_sums_kernel(m_gt_ref, m_pred_ref, j_gt_ref, j_pred_ref,
                      out_ref, acc_m_ref, acc_j_ref):
    """Streaming sum-of-squared-error reduction.

    Hot loop: diff, square, row-axis (sublane) reduction into per-lane f32
    accumulators.  The masked cross-lane reductions run once, at the last
    inner grid step, and are written into one lane-dense output block.
    """
    i = pl.program_id(1)

    @pl.when(i == 0)
    def _init():
        acc_m_ref[...] = jnp.zeros_like(acc_m_ref)
        acc_j_ref[...] = jnp.zeros_like(acc_j_ref)

    dm = m_gt_ref[...].astype(jnp.float32) - m_pred_ref[...].astype(jnp.float32)
    acc_m_ref[...] += jnp.sum(dm * dm, axis=0, keepdims=True)

    dj = j_gt_ref[...].astype(jnp.float32) - j_pred_ref[...].astype(jnp.float32)
    acc_j_ref[...] += jnp.sum(dj * dj, axis=0, keepdims=True)

    @pl.when(i == pl.num_programs(1) - 1)
    def _finalize():
        acc_m = acc_m_ref[...]
        acc_j = acc_j_ref[...]
        zm = jnp.zeros_like(acc_m)
        zj = jnp.zeros_like(acc_j)

        # motion lanes: [0,3) transl | [3,135) body rot | [135,315) hand cont6d
        lane_m = jax.lax.broadcasted_iota(jnp.int32, acc_m.shape, 1)
        transl_sum = jnp.sum(jnp.where(lane_m < 3, acc_m, zm))
        rot_body_sum = jnp.sum(jnp.where((lane_m >= 3) & (lane_m < 135), acc_m, zm))
        rot_hand_sum = jnp.sum(jnp.where(lane_m >= 135, acc_m, zm))

        # joints (3 lanes/joint): body joints 1..21 -> lanes [3,66);
        # hand joints 22..51 -> lanes [66,156); root joint 0 excluded.
        lane_j = jax.lax.broadcasted_iota(jnp.int32, acc_j.shape, 1)
        jbody_sum = jnp.sum(jnp.where((lane_j >= 3) & (lane_j < 66), acc_j, zj))
        jhand_sum = jnp.sum(jnp.where(lane_j >= 66, acc_j, zj))

        lane_o = jax.lax.broadcasted_iota(jnp.int32, out_ref.shape, 1)
        out_ref[...] = (
            jnp.where(lane_o == _TRANSL, transl_sum, 0.0)
            + jnp.where(lane_o == _ROT_BODY_L, rot_body_sum, 0.0)
            + jnp.where(lane_o == _ROT_HAND_L, rot_hand_sum, 0.0)
            + jnp.where(lane_o == _JBODY, jbody_sum, 0.0)
            + jnp.where(lane_o == _JHAND, jhand_sum, 0.0)
        ).astype(out_ref.dtype)


def _loss_dict_from_sums(sums, rows, commit_loss):
    n = jnp.float32(rows)
    return {
        "transl_loss": ROOT * sums[_TRANSL] / (n * 3.0),
        "rot_body_loss": ROT_BODY * sums[_ROT_BODY_L] / (n * 132.0),
        "rot_hand_loss": ROT_HAND * sums[_ROT_HAND_L] / (n * 180.0),
        "joints_body_loss": JOINTS_BODY * sums[_JBODY] / (n * 21.0 * 3.0),
        "joints_hand_loss": JOINTS_HAND * sums[_JHAND] / (n * 30.0 * 3.0),
        "commit_loss": COMMIT * commit_loss,
    }


def _group_sq_sums(m_gt, m_pred, j_gt, j_pred):
    """Per-group sum of squared errors (pure JAX, fused by XLA). 5-vector."""
    dm = jnp.square(m_gt.astype(jnp.float32) - m_pred.astype(jnp.float32))
    dj = jnp.square(j_gt.astype(jnp.float32) - j_pred.astype(jnp.float32))
    return jnp.stack([
        jnp.sum(dm[..., :3]),          # transl
        jnp.sum(dm[..., 3:135]),       # body rot
        jnp.sum(dm[..., 135:]),        # hand cont6d
        jnp.sum(dj[..., 3:66]),        # body joints 1..21
        jnp.sum(dj[..., 66:]),         # hand joints 22..51
    ])


def _reference(gt_motion, pred_motion, gt_joints, pred_joints, commit_loss):
    """Pure-JAX path mirroring the torch module (also the small-input fallback)."""
    mse = lambda a, b: jnp.mean(
        jnp.square(a.astype(jnp.float32) - b.astype(jnp.float32)))
    return {
        "transl_loss": ROOT * mse(gt_motion[..., :3], pred_motion[..., :3]),
        "rot_body_loss": ROT_BODY * mse(gt_motion[..., 3:135],
                                        pred_motion[..., 3:135]),
        "rot_hand_loss": ROT_HAND * mse(gt_motion[..., 135:],
                                        pred_motion[..., 135:]),
        "joints_body_loss": JOINTS_BODY * mse(gt_joints[:, :, 1:22],
                                              pred_joints[:, :, 1:22]),
        "joints_hand_loss": JOINTS_HAND * mse(gt_joints[:, :, 22:],
                                              pred_joints[:, :, 22:]),
        "commit_loss": COMMIT * commit_loss,
    }


@functools.partial(jax.jit, static_argnames=("row_tile",))
def transl_cont6d_loss(gt_motion, pred_motion, gt_joints, pred_joints,
                       commit_loss, row_tile=1024):
    """Returns the loss dict of TranslCont6dLoss.forward (recons_type='l2').

    Accepts f32 or bf16 motion/joint tensors (cast to f32 inside the kernel).
    """
    B, T, D = gt_motion.shape
    assert D == MOTION_DIM
    assert pred_motion.shape == gt_motion.shape
    assert gt_joints.shape == (B, T, NB_JOINTS, 3)
    assert pred_joints.shape == gt_joints.shape
    assert row_tile % 8 == 0

    rows = B * T
    chunk = NUM_CORES * row_tile

    if rows < chunk:
        # Tiny inputs: a 1-2 step pallas_call is pure launch/pipeline overhead;
        # the fused pure-JAX reduction is already optimal there.
        return _reference(gt_motion, pred_motion, gt_joints, pred_joints,
                          commit_loss)

    m_gt = gt_motion.reshape(rows, MOTION_DIM)
    m_pred = pred_motion.reshape(rows, MOTION_DIM)
    j_gt = gt_joints.reshape(rows, JOINT_FEAT)
    j_pred = pred_joints.reshape(rows, JOINT_FEAT)

    # Kernel covers the largest prefix that splits evenly into full blocks;
    # the ragged tail is handled by a small fused pure-JAX reduction below
    # (no full-array padding copy through HBM).
    rows_main = (rows // chunk) * chunk
    inner = rows_main // chunk     # inner ('arbitrary') grid steps per core

    out = pl.pallas_call(
        _loss_sums_kernel,
        out_shape=jax.ShapeDtypeStruct((NUM_CORES * 8, 128), jnp.float32),
        grid_spec=pltpu.PrefetchScalarGridSpec(
            num_scalar_prefetch=0,
            grid=(NUM_CORES, inner),
            in_specs=[
                pl.BlockSpec((row_tile, MOTION_DIM),
                             lambda c, i: (c * inner + i, 0)),
                pl.BlockSpec((row_tile, MOTION_DIM),
                             lambda c, i: (c * inner + i, 0)),
                pl.BlockSpec((row_tile, JOINT_FEAT),
                             lambda c, i: (c * inner + i, 0)),
                pl.BlockSpec((row_tile, JOINT_FEAT),
                             lambda c, i: (c * inner + i, 0)),
            ],
            out_specs=pl.BlockSpec((8, 128), lambda c, i: (c, 0)),
            scratch_shapes=[pltpu.VMEM((1, MOTION_DIM), jnp.float32),
                            pltpu.VMEM((1, JOINT_FEAT), jnp.float32)],
        ),
        compiler_params=pltpu.CompilerParams(
            dimension_semantics=("parallel", "arbitrary"),
            vmem_limit_bytes=32 * 1024 * 1024),
    )(m_gt, m_pred, j_gt, j_pred)

    # Per-core partial sums live in sublane 0, lanes 0..4 of each 8-row slab.
    sums = jnp.sum(out.reshape(NUM_CORES, 8, 128)[:, 0, :5], axis=0)

    if rows_main != rows:
        # Ragged tail (< NUM_CORES*row_tile rows): fused slice+square+sum,
        # negligible HBM traffic relative to the streamed main part.
        sums = sums + _group_sq_sums(m_gt[rows_main:], m_pred[rows_main:],
                                     j_gt[rows_main:], j_pred[rows_main:])

    return _loss_dict_from_sums(sums, rows, commit_loss)


if __name__ == "__main__":
    key = jax.random.PRNGKey(0)
    k1, k2, k3, k4, k5 = jax.random.split(key, 5)

    commit_loss = jax.random.uniform(k5, (), dtype=jnp.float32)

    def check(B, T, rtol, atol):
        args = (
            jax.random.normal(k1, (B, T, MOTION_DIM), dtype=jnp.float32),
            jax.random.normal(k2, (B, T, MOTION_DIM), dtype=jnp.float32),
            jax.random.normal(k3, (B, T, NB_JOINTS, 3), dtype=jnp.float32),
            jax.random.normal(k4, (B, T, NB_JOINTS, 3), dtype=jnp.float32),
        )
        out = jax.block_until_ready(transl_cont6d_loss(*args, commit_loss))
        ref = _reference(*args, commit_loss)
        for name in ref:
            assert jnp.allclose(out[name], ref[name], rtol=rtol, atol=atol), (
                name, out[name], ref[name])

    # Kernel path with inner=2 per core AND a ragged tail (rows=4600 -> main
    # 4096 rows handled by the kernel, 504-row tail handled in pure JAX).
    check(2, 2300, rtol=1e-4, atol=1e-5)

    # Kernel path with rows an exact multiple of the chunk (no tail).
    check(2, 1024, rtol=1e-4, atol=1e-5)

    # Tiny case exercises the pure-JAX fallback path of the wrapper.
    check(2, 8, rtol=1e-5, atol=1e-6)

    print("KERNEL_OK")
</pallas_src>

<mosaic_0001>
module attributes {stable_mosaic.version = 11 : i64} {
  func.func @_loss_sums_kernel(%arg0: i32, %arg1: i32, %arg2: memref<1024x315xf32, #tpu.memory_space<vmem>>, %arg3: memref<1024x315xf32, #tpu.memory_space<vmem>>, %arg4: memref<1024x156xf32, #tpu.memory_space<vmem>>, %arg5: memref<1024x156xf32, #tpu.memory_space<vmem>>, %arg6: memref<8x128xf32, #tpu.memory_space<vmem>>, %arg7: memref<1x315xf32, #tpu.memory_space<vmem>>, %arg8: memref<1x156xf32, #tpu.memory_space<vmem>>) attributes {dimension_semantics = [#tpu.dimension_semantics<parallel>, #tpu.dimension_semantics<arbitrary>], iteration_bounds = array<i64: 2, 2>, scalar_prefetch = 0 : i64, scratch_operands = 2 : i64, tpu.core_type = #tpu.core_type<tc>, window_params = [{transform_indices = @transform_0, window_bounds = array<i64: 1024, 315>}, {transform_indices = @transform_1, window_bounds = array<i64: 1024, 315>}, {transform_indices = @transform_2, window_bounds = array<i64: 1024, 156>}, {transform_indices = @transform_3, window_bounds = array<i64: 1024, 156>}, {transform_indices = @transform_4, window_bounds = array<i64: 8, 128>}]} {
    %c0_i32 = arith.constant 0 : i32
    %0 = arith.cmpi eq, %arg1, %c0_i32 : i32
    %1 = arith.extui %0 : i1 to i32
    %c0_i32_0 = arith.constant 0 : i32
    %2 = arith.cmpi ne, %1, %c0_i32_0 : i32
    scf.if %2 {
      %cst_18 = arith.constant 0.000000e+00 : f32
      %24 = vector.broadcast %cst_18 : f32 to vector<1x315xf32>
      %c0_19 = arith.constant 0 : index
      %c0_20 = arith.constant 0 : index
      %25 = vector.load %arg7[%c0_19, %c0_20] : memref<1x315xf32, #tpu.memory_space<vmem>>, vector<1x315xf32>
      tpu.vector_store %arg7[%c0_19, %c0_20], %24 {strides = array<i32>} : memref<1x315xf32, #tpu.memory_space<vmem>>, vector<1x315xf32>,
      %cst_21 = arith.constant 0.000000e+00 : f32
      %26 = vector.broadcast %cst_21 : f32 to vector<1x156xf32>
      %c0_22 = arith.constant 0 : index
      %c0_23 = arith.constant 0 : index
      %27 = vector.load %arg8[%c0_22, %c0_23] : memref<1x156xf32, #tpu.memory_space<vmem>>, vector<1x156xf32>
      tpu.vector_store %arg8[%c0_22, %c0_23], %26 {strides = array<i32>} : memref<1x156xf32, #tpu.memory_space<vmem>>, vector<1x156xf32>,
    } else {
    }
    %c0 = arith.constant 0 : index
    %c0_1 = arith.constant 0 : index
    %3 = vector.load %arg2[%c0, %c0_1] : memref<1024x315xf32, #tpu.memory_space<vmem>>, vector<1024x315xf32>
    %c0_2 = arith.constant 0 : index
    %c0_3 = arith.constant 0 : index
    %4 = vector.load %arg3[%c0_2, %c0_3] : memref<1024x315xf32, #tpu.memory_space<vmem>>, vector<1024x315xf32>
    %5 = arith.subf %3, %4 : vector<1024x315xf32>
    %c0_4 = arith.constant 0 : index
    %c0_5 = arith.constant 0 : index
    %6 = vector.load %arg7[%c0_4, %c0_5] : memref<1x315xf32, #tpu.memory_space<vmem>>, vector<1x315xf32>
    %7 = arith.mulf %5, %5 : vector<1024x315xf32>
    %cst = arith.constant dense<0.000000e+00> : vector<315xf32>
    %8 = vector.multi_reduction <add>, %7, %cst [0] : vector<1024x315xf32> to vector<315xf32>
    %9 = vector.shape_cast %8 : vector<315xf32> to vector<1x315xf32>
    %10 = arith.addf %6, %9 : vector<1x315xf32>
    %c0_6 = arith.constant 0 : index
    %c0_7 = arith.constant 0 : index
    %11 = vector.load %arg7[%c0_6, %c0_7] : memref<1x315xf32, #tpu.memory_space<vmem>>, vector<1x315xf32>
    tpu.vector_store %arg7[%c0_6, %c0_7], %10 {strides = array<i32>} : memref<1x315xf32, #tpu.memory_space<vmem>>, vector<1x315xf32>,
    %c0_8 = arith.constant 0 : index
    %c0_9 = arith.constant 0 : index
    %12 = vector.load %arg4[%c0_8, %c0_9] : memref<1024x156xf32, #tpu.memory_space<vmem>>, vector<1024x156xf32>
    %c0_10 = arith.constant 0 : index
    %c0_11 = arith.constant 0 : index
    %13 = vector.load %arg5[%c0_10, %c0_11] : memref<1024x156xf32, #tpu.memory_space<vmem>>, vector<1024x156xf32>
    %14 = arith.subf %12, %13 : vector<1024x156xf32>
    %c0_12 = arith.constant 0 : index
    %c0_13 = arith.constant 0 : index
    %15 = vector.load %arg8[%c0_12, %c0_13] : memref<1x156xf32, #tpu.memory_space<vmem>>, vector<1x156xf32>
    %16 = arith.mulf %14, %14 : vector<1024x156xf32>
    %cst_14 = arith.constant dense<0.000000e+00> : vector<156xf32>
    %17 = vector.multi_reduction <add>, %16, %cst_14 [0] : vector<1024x156xf32> to vector<156xf32>
    %18 = vector.shape_cast %17 : vector<156xf32> to vector<1x156xf32>
    %19 = arith.addf %15, %18 : vector<1x156xf32>
    %c0_15 = arith.constant 0 : index
    %c0_16 = arith.constant 0 : index
    %20 = vector.load %arg8[%c0_15, %c0_16] : memref<1x156xf32, #tpu.memory_space<vmem>>, vector<1x156xf32>
    tpu.vector_store %arg8[%c0_15, %c0_16], %19 {strides = array<i32>} : memref<1x156xf32, #tpu.memory_space<vmem>>, vector<1x156xf32>,
    %c1_i32 = arith.constant 1 : i32
    %21 = arith.cmpi eq, %arg1, %c1_i32 : i32
    %22 = arith.extui %21 : i1 to i32
    %c0_i32_17 = arith.constant 0 : i32
    %23 = arith.cmpi ne, %22, %c0_i32_17 : i32
    scf.if %23 {
      %c0_18 = arith.constant 0 : index
      %c0_19 = arith.constant 0 : index
      %24 = vector.load %arg7[%c0_18, %c0_19] : memref<1x315xf32, #tpu.memory_space<vmem>>, vector<1x315xf32>
      %c0_20 = arith.constant 0 : index
      %c0_21 = arith.constant 0 : index
      %25 = vector.load %arg8[%c0_20, %c0_21] : memref<1x156xf32, #tpu.memory_space<vmem>>, vector<1x156xf32>
      %cst_22 = arith.constant 0.000000e+00 : f32
      %26 = vector.broadcast %cst_22 : f32 to vector<1x315xf32>
      %cst_23 = arith.constant 0.000000e+00 : f32
      %27 = vector.broadcast %cst_23 : f32 to vector<1x156xf32>
      %28 = tpu.iota {dimensions = array<i32: 1>} : vector<1x315xi32>
      %c3_i32 = arith.constant 3 : i32
      %29 = vector.broadcast %c3_i32 : i32 to vector<1x315xi32>
      %30 = arith.cmpi slt, %28, %29 : vector<1x315xi32>
      %31 = arith.select %30, %24, %26 : vector<1x315xi1>, vector<1x315xf32>
      %32 = vector.shape_cast %31 : vector<1x315xf32> to vector<1x1x315xf32>
      %cst_24 = arith.constant dense<0.000000e+00> : vector<1xf32>
      %33 = vector.multi_reduction <add>, %32, %cst_24 [1, 2] : vector<1x1x315xf32> to vector<1xf32>
      %34 = vector.shape_cast %33 : vector<1xf32> to vector<1x1x1xf32>
      %35 = vector.extract %34[0, 0, 0] : f32 from vector<1x1x1xf32>
      %c3_i32_25 = arith.constant 3 : i32
      %36 = vector.broadcast %c3_i32_25 : i32 to vector<1x315xi32>
      %37 = arith.cmpi sge, %28, %36 : vector<1x315xi32>
      %c135_i32 = arith.constant 135 : i32
      %38 = vector.broadcast %c135_i32 : i32 to vector<1x315xi32>
      %39 = arith.cmpi slt, %28, %38 : vector<1x315xi32>
      %40 = arith.andi %37, %39 : vector<1x315xi1>
      %41 = arith.select %40, %24, %26 : vector<1x315xi1>, vector<1x315xf32>
      %42 = vector.shape_cast %41 : vector<1x315xf32> to vector<1x1x315xf32>
      %cst_26 = arith.constant dense<0.000000e+00> : vector<1xf32>
      %43 = vector.multi_reduction <add>, %42, %cst_26 [1, 2] : vector<1x1x315xf32> to vector<1xf32>
      %44 = vector.shape_cast %43 : vector<1xf32> to vector<1x1x1xf32>
      %45 = vector.extract %44[0, 0, 0] : f32 from vector<1x1x1xf32>
      %c135_i32_27 = arith.constant 135 : i32
      %46 = vector.broadcast %c135_i32_27 : i32 to vector<1x315xi32>
      %47 = arith.cmpi sge, %28, %46 : vector<1x315xi32>
      %48 = arith.select %47, %24, %26 : vector<1x315xi1>, vector<1x315xf32>
      %49 = vector.shape_cast %48 : vector<1x315xf32> to vector<1x1x315xf32>
      %cst_28 = arith.constant dense<0.000000e+00> : vector<1xf32>
      %50 = vector.multi_reduction <add>, %49, %cst_28 [1, 2] : vector<1x1x315xf32> to vector<1xf32>
      %51 = vector.shape_cast %50 : vector<1xf32> to vector<1x1x1xf32>
      %52 = vector.extract %51[0, 0, 0] : f32 from vector<1x1x1xf32>
      %53 = tpu.iota {dimensions = array<i32: 1>} : vector<1x156xi32>
      %c3_i32_29 = arith.constant 3 : i32
      %54 = vector.broadcast %c3_i32_29 : i32 to vector<1x156xi32>
      %55 = arith.cmpi sge, %53, %54 : vector<1x156xi32>
      %c66_i32 = arith.constant 66 : i32
      %56 = vector.broadcast %c66_i32 : i32 to vector<1x156xi32>
      %57 = arith.cmpi slt, %53, %56 : vector<1x156xi32>
      %58 = arith.andi %55, %57 : vector<1x156xi1>
      %59 = arith.select %58, %25, %27 : vector<1x156xi1>, vector<1x156xf32>
      %60 = vector.shape_cast %59 : vector<1x156xf32> to vector<1x1x156xf32>
      %cst_30 = arith.constant dense<0.000000e+00> : vector<1xf32>
      %61 = vector.multi_reduction <add>, %60, %cst_30 [1, 2] : vector<1x1x156xf32> to vector<1xf32>
      %62 = vector.shape_cast %61 : vector<1xf32> to vector<1x1x1xf32>
      %63 = vector.extract %62[0, 0, 0] : f32 from vector<1x1x1xf32>
      %c66_i32_31 = arith.constant 66 : i32
      %64 = vector.broadcast %c66_i32_31 : i32 to vector<1x156xi32>
      %65 = arith.cmpi sge, %53, %64 : vector<1x156xi32>
      %66 = arith.select %65, %25, %27 : vector<1x156xi1>, vector<1x156xf32>
      %67 = vector.shape_cast %66 : vector<1x156xf32> to vector<1x1x156xf32>
      %cst_32 = arith.constant dense<0.000000e+00> : vector<1xf32>
      %68 = vector.multi_reduction <add>, %67, %cst_32 [1, 2] : vector<1x1x156xf32> to vector<1xf32>
      %69 = vector.shape_cast %68 : vector<1xf32> to vector<1x1x1xf32>
      %70 = vector.extract %69[0, 0, 0] : f32 from vector<1x1x1xf32>
      %71 = tpu.iota {dimensions = array<i32: 1>} : vector<8x128xi32>
      %c0_i32_33 = arith.constant 0 : i32
      %72 = vector.broadcast %c0_i32_33 : i32 to vector<8x128xi32>
      %73 = arith.cmpi eq, %71, %72 : vector<8x128xi32>
      %cst_34 = arith.constant 0.000000e+00 : f32
      %74 = vector.broadcast %35 : f32 to vector<8x128xf32>
      %75 = vector.broadcast %cst_34 : f32 to vector<8x128xf32>
      %76 = arith.select %73, %74, %75 : vector<8x128xi1>, vector<8x128xf32>
      %c1_i32_35 = arith.constant 1 : i32
      %77 = vector.broadcast %c1_i32_35 : i32 to vector<8x128xi32>
      %78 = arith.cmpi eq, %71, %77 : vector<8x128xi32>
      %cst_36 = arith.constant 0.000000e+00 : f32
      %79 = vector.broadcast %45 : f32 to vector<8x128xf32>
      %80 = vector.broadcast %cst_36 : f32 to vector<8x128xf32>
      %81 = arith.select %78, %79, %80 : vector<8x128xi1>, vector<8x128xf32>
      %82 = arith.addf %76, %81 : vector<8x128xf32>
      %c2_i32 = arith.constant 2 : i32
      %83 = vector.broadcast %c2_i32 : i32 to vector<8x128xi32>
      %84 = arith.cmpi eq, %71, %83 : vector<8x128xi32>
      %cst_37 = arith.constant 0.000000e+00 : f32
      %85 = vector.broadcast %52 : f32 to vector<8x128xf32>
      %86 = vector.broadcast %cst_37 : f32 to vector<8x128xf32>
      %87 = arith.select %84, %85, %86 : vector<8x128xi1>, vector<8x128xf32>
      %88 = arith.addf %82, %87 : vector<8x128xf32>
      %c3_i32_38 = arith.constant 3 : i32
      %89 = vector.broadcast %c3_i32_38 : i32 to vector<8x128xi32>
      %90 = arith.cmpi eq, %71, %89 : vector<8x128xi32>
      %cst_39 = arith.constant 0.000000e+00 : f32
      %91 = vector.broadcast %63 : f32 to vector<8x128xf32>
      %92 = vector.broadcast %cst_39 : f32 to vector<8x128xf32>
      %93 = arith.select %90, %91, %92 : vector<8x128xi1>, vector<8x128xf32>
      %94 = arith.addf %88, %93 : vector<8x128xf32>
      %c4_i32 = arith.constant 4 : i32
      %95 = vector.broadcast %c4_i32 : i32 to vector<8x128xi32>
      %96 = arith.cmpi eq, %71, %95 : vector<8x128xi32>
      %cst_40 = arith.constant 0.000000e+00 : f32
      %97 = vector.broadcast %70 : f32 to vector<8x128xf32>
      %98 = vector.broadcast %cst_40 : f32 to vector<8x128xf32>
      %99 = arith.select %96, %97, %98 : vector<8x128xi1>, vector<8x128xf32>
      %100 = arith.addf %94, %99 : vector<8x128xf32>
      %c0_41 = arith.constant 0 : index
      %c0_42 = arith.constant 0 : index
      %101 = vector.load %arg6[%c0_41, %c0_42] : memref<8x128xf32, #tpu.memory_space<vmem>>, vector<8x128xf32>
      tpu.vector_store %arg6[%c0_41, %c0_42], %100 {strides = array<i32>} : memref<8x128xf32, #tpu.memory_space<vmem>>, vector<8x128xf32>,
    } else {
    }
    return
  }
  func.func @transform_0(%arg0: i32, %arg1: i32) -> (i32, i32) {
    %c2_i32 = arith.constant 2 : i32
    %0 = arith.muli %arg0, %c2_i32 : i32
    %1 = arith.addi %0, %arg1 : i32
    %c0_i32 = arith.constant 0 : i32
    %c0_i32_0 = arith.constant 0 : i32
    return %1, %c0_i32 : i32, i32
  }
  func.func @transform_1(%arg0: i32, %arg1: i32) -> (i32, i32) {
    %c2_i32 = arith.constant 2 : i32
    %0 = arith.muli %arg0, %c2_i32 : i32
    %1 = arith.addi %0, %arg1 : i32
    %c0_i32 = arith.constant 0 : i32
    %c0_i32_0 = arith.constant 0 : i32
    return %1, %c0_i32 : i32, i32
  }
  func.func @transform_2(%arg0: i32, %arg1: i32) -> (i32, i32) {
    %c2_i32 = arith.constant 2 : i32
    %0 = arith.muli %arg0, %c2_i32 : i32
    %1 = arith.addi %0, %arg1 : i32
    %c0_i32 = arith.constant 0 : i32
    %c0_i32_0 = arith.constant 0 : i32
    return %1, %c0_i32 : i32, i32
  }
  func.func @transform_3(%arg0: i32, %arg1: i32) -> (i32, i32) {
    %c2_i32 = arith.constant 2 : i32
    %0 = arith.muli %arg0, %c2_i32 : i32
    %1 = arith.addi %0, %arg1 : i32
    %c0_i32 = arith.constant 0 : i32
    %c0_i32_0 = arith.constant 0 : i32
    return %1, %c0_i32 : i32, i32
  }
  func.func @transform_4(%arg0: i32, %arg1: i32) -> (i32, i32) {
    %c0_i32 = arith.constant 0 : i32
    %c0_i32_0 = arith.constant 0 : i32
    return %arg0, %c0_i32 : i32, i32
  }
}

</mosaic_0001>

<bundles_post_ra>
// kernel: transl_cont6d_loss.1
= control target key start
LH: loop header
LB: loop body
LE: loop exit
PB: predicated region body
PF: predicated region fallthrough
CT: control target
= control target key end

     0   :  { %s4410_s15 = smov 0   ;;  %s4412_s16 = smov 0   ;;  %s7948_s0 = inlined_call_operand.vmem [shape: f32[4600,315], index: 0, kind: input, shape index: {}]   ;;  %s7949_s1 = inlined_call_operand.vmem [shape: f32[4600,315], index: 1, kind: input, shape index: {}]   ;;  %s7950_s2 = inlined_call_operand.vmem [shape: f32[4600,156], index: 2, kind: input, shape index: {}]   ;;  %s7951_s3 = inlined_call_operand.vmem [shape: f32[4600,156], index: 3, kind: input, shape index: {}]   ;;  %s7952_s4 = inlined_call_operand.vmem [shape: f32[16,128], index: 4, kind: output, shape index: {}]  }
   0x1   :  { %s4414_s17 = smov 0   ;;  %s4416_s18 = smov 0  }
   0x2   :  { %s4418_s19 = smov 0  }
   0x3 LB: > { %s23_s20 = sadd.s32 1, %s4373_s17  ;;  %s26_s21 = sadd.s32 1, %s4377_s18  ;;  %s4381_s19 = sphi %s4418_s19, %s14_s19   ;;  %s4377_s18 = sphi %s4416_s18, %s8578_s18   ;;  %s4373_s17 = sphi %s4414_s17, %s8577_s17   ;;  %s4369_s16 = sphi %s4412_s16, %s8576_s16   ;;  %s4365_s15 = sphi %s4410_s15, %s8575_s15  }
   0x4   : > { %p24_p0 = scmp.ge.s32.totalorder %s23_s20, 2  ;;  %p4268_p1 = scmp.ge.s32.totalorder %s4381_s19, 1 }
   0x5   : > { %p284_p2 = scmp.lt.s32.totalorder %s4381_s19, 5 }
   0x6   : > { %s8580_s20 = smov (%p24_p0, %s23_s20), 0  ;;  %s8582_s21 = smov (!%p24_p0, %s26_s21), %s4377_s18 }
   0x7   : > { %p285_p3 = pnand %p4268_p1, %p284_p2  ;;  %p28_p4 = scmp.ge.s32.totalorder %s8582_s21, 2 }
   0x9   : > { %s8584_s21 = smov (%p28_p4, %s8582_s21), 0  ;;  %288 = sbr.rel (%p285_p3) target bundleno = 980 (0x3d4), region = 36 }
   0xe   : > { %s4269_s22 = sshll.u32 %s4369_s16, 1  ;;  %p440_p5 = scmp.lt.s32.totalorder %s4369_s16, 1 }
   0xf   : > { %s357_s23 = sadd.s32 %s4365_s15, %s4269_s22  ;;  %p4284_p7 = scmp.ne.s32.totalorder %s4365_s15, 0 }
  0x10   : > { %s4270_s24 = sshll.u32 %s357_s23, 7  ;;  %s8586_s16 = smov (!%p440_p5, %s4369_s16), 1 }
  0x11   : > { %p364_p6 = scmp.lt.s32.totalorder %s4270_s24, 574  ;;  %s4283_s25 = sshll.u32 %s8586_s16, 3 }
  0x12   : > { %s4466_s22 = scalar_lea.vmem %s7952_s4, %s4283_s25  ;;  %447 = sbr.rel (%p4284_p7) target bundleno = 28 (0x1c), region = 40 }
  0x13   : > { %s8588_s24 = smov (!%p364_p6, %s4270_s24), 574 }
  0x14   : > { %s4290_s26 = smul.u32 24, %s8588_s24  ;;  %s4288_s27 = sshll.u32 %s8588_s24, 4 }
  0x15   : > { %s4446_s30 = scalar_lea.vmem %s7950_s2, %s4288_s27  ;;  %s4451_s7 = scalar_lea.vmem %s7951_s3, %s4288_s27 }
  0x16   : > { %s4456_s10 = scalar_lea.vmem %s7948_s0, %s4290_s26  ;;  %s4461_s13 = scalar_lea.vmem %s7949_s1, %s4290_s26 }
  0x17   : > { %v448_v0 = vlaneseq  ;;  %v4383_v1 = vmov 0.0  }
  0x19   : > { %vm450_vm0 = vcmp.lt.s32.totalorder %v448_v0, 315  ;;  %vm453_vm1 = vcmp.lt.s32.totalorder %v448_v0, 156 }
  0x1a   : > { %452 = vst.msk [vmem:[#allocation2] sm:$0x7] %vm450_vm0, %v4383_v1 }
  0x1b   : > { %455 = vst.msk [vmem:[#allocation3] sm:$0x3] %vm453_vm1, %v4383_v1 }
  0x1c PF: > { %v456_v2 = vld [vmem:[%s4456_s10] sm:$0xff]  ;;  %v457_v3 = vld [vmem:[%s4456_s10 + $0x8] sm:$0xff]  ;;  %v458_v4 = vld [vmem:[%s4456_s10 + $0x10] sm:$0xff]  ;;  %vm2259_vm2 = vcmask 482304   ;;  %vm3712_vm3 = vcmask 228352   ;;  %p4285_p8 = scmp.ne.s32.totalorder %s4365_s15, 1 }
  0x1d   : > { %v459_v5 = vld [vmem:[%s4456_s10 + $0x18] sm:$0xff]  ;;  %v840_v6 = vld [vmem:[%s4461_s13] sm:$0xff]  ;;  %v461_v8 = vld [vmem:[%s4456_s10 + $0x28] sm:$0xff] }
  0x1e   : > { %v460_v7 = vld [vmem:[%s4456_s10 + $0x20] sm:$0xff]  ;;  %v462_v9 = vld [vmem:[%s4456_s10 + $0x30] sm:$0xff]  ;;  %v463_v10 = vld [vmem:[%s4456_s10 + $0x38] sm:$0xff]  ;;  %v1224_v24 = vsub.f32 %v456_v2, %v840_v6 }
  0x1f   : > { %v841_v11 = vld [vmem:[%s4461_s13 + $0x8] sm:$0xff]  ;;  %v464_v12 = vld [vmem:[%s4456_s10 + $0x40] sm:$0xff]  ;;  %v466_v14 = vld [vmem:[%s4456_s10 + $0x50] sm:$0xff] }
  0x20   : > { %v465_v13 = vld [vmem:[%s4456_s10 + $0x48] sm:$0xff]  ;;  %v842_v15 = vld [vmem:[%s4461_s13 + $0x10] sm:$0xff]  ;;  %v843_v16 = vld [vmem:[%s4461_s13 + $0x18] sm:$0xff]  ;;  %v1225_v31 = vsub.f32 %v457_v3, %v841_v11  ;;  %v4525_v59 = vmul.f32 %v1224_v24, %v1224_v24 }
  0x21   : > { %v844_v17 = vld [vmem:[%s4461_s13 + $0x20] sm:$0xff]  ;;  %v467_v18 = vld [vmem:[%s4456_s10 + $0x58] sm:$0xff]  ;;  %v469_v20 = vld [vmem:[%s4456_s10 + $0x68] sm:$0xff]  ;;  %v1226_v38 = vsub.f32 %v458_v4, %v842_v15  ;;  %v1227_v39 = vsub.f32 %v459_v5, %v843_v16 }
  0x22   : > { %v468_v19 = vld [vmem:[%s4456_s10 + $0x60] sm:$0xff]  ;;  %v845_v21 = vld [vmem:[%s4461_s13 + $0x28] sm:$0xff]  ;;  %v846_v22 = vld [vmem:[%s4461_s13 + $0x30] sm:$0xff]  ;;  %v1228_v46 = vsub.f32 %v460_v7, %v844_v17  ;;  %7953 = vst [vmem:[#allocation4_spill] sm:$0xff] %v4525_v59  ;;  %v4539_v5 = vmul.f32 %v1225_v31, %v1225_v31 }
  0x23   : > { %v847_v23 = vld [vmem:[%s4461_s13 + $0x38] sm:$0xff]  ;;  %v470_v25 = vld [vmem:[%s4456_s10 + $0x70] sm:$0xff]  ;;  %v472_v27 = vld [vmem:[%s4456_s10 + $0x80] sm:$0xff]  ;;  %v1229_v47 = vsub.f32 %v461_v8, %v845_v21  ;;  %v4509_v48 = vsub.f32 %v462_v9, %v846_v22  ;;  %v4553_v15 = vmul.f32 %v1226_v38, %v1226_v38 }
  0x24   : > { %v471_v26 = vld [vmem:[%s4456_s10 + $0x78] sm:$0xff]  ;;  %v848_v28 = vld [vmem:[%s4461_s13 + $0x40] sm:$0xff]  ;;  %v849_v29 = vld [vmem:[%s4461_s13 + $0x48] sm:$0xff]  ;;  %v4511_v49 = vsub.f32 %v463_v10, %v847_v23  ;;  %7954 = vst [vmem:[#allocation5_spill] sm:$0xff] %v4539_v5 }
  0x25   : > { %v850_v30 = vld [vmem:[%s4461_s13 + $0x50] sm:$0xff]  ;;  %v473_v32 = vld [vmem:[%s4456_s10 + $0x88] sm:$0xff]  ;;  %v475_v34 = vld [vmem:[%s4456_s10 + $0x98] sm:$0xff]  ;;  %v4519_v56 = vsub.f32 %v464_v12, %v848_v28  ;;  %v4521_v57 = vsub.f32 %v465_v13, %v849_v29  ;;  %7955 = vst [vmem:[#allocation6_spill] sm:$0xff] %v4553_v15 }
  0x26   : > { %v474_v33 = vld [vmem:[%s4456_s10 + $0x90] sm:$0xff]  ;;  %v851_v35 = vld [vmem:[%s4461_s13 + $0x58] sm:$0xff]  ;;  %v852_v36 = vld [vmem:[%s4461_s13 + $0x60] sm:$0xff]  ;;  %v4523_v58 = vsub.f32 %v466_v14, %v850_v30 }
  0x27   : > { %v853_v37 = vld [vmem:[%s4461_s13 + $0x68] sm:$0xff]  ;;  %v476_v40 = vld [vmem:[%s4456_s10 + $0xa0] sm:$0xff]  ;;  %v478_v42 = vld [vmem:[%s4456_s10 + $0xb0] sm:$0xff]  ;;  %v4533_v2 = vsub.f32 %v467_v18, %v851_v35  ;;  %v4535_v3 = vsub.f32 %v468_v19, %v852_v36  ;;  %v4581_v35 = vmul.f32 %v1228_v46, %v1228_v46 }
  0x28   : > { %v477_v41 = vld [vmem:[%s4456_s10 + $0xa8] sm:$0xff]  ;;  %v854_v43 = vld [vmem:[%s4461_s13 + $0x70] sm:$0xff]  ;;  %v855_v44 = vld [vmem:[%s4461_s13 + $0x78] sm:$0xff]  ;;  %v4537_v4 = vsub.f32 %v469_v20, %v853_v37 }
  0x29   : > { %v856_v45 = vld [vmem:[%s4461_s13 + $0x80] sm:$0xff]  ;;  %v479_v50 = vld [vmem:[%s4456_s10 + $0xb8] sm:$0xff]  ;;  %v481_v52 = vld [vmem:[%s4456_s10 + $0xc8] sm:$0xff]  ;;  %v4547_v12 = vsub.f32 %v470_v25, %v854_v43  ;;  %v4549_v13 = vsub.f32 %v471_v26, %v855_v44  ;;  %v4567_v25 = vmul.f32 %v1227_v39, %v1227_v39  ;;  %7957 = vst [vmem:[#allocation8_spill] sm:$0xff] %v4581_v35 }
  0x2a   : > { %v480_v51 = vld [vmem:[%s4456_s10 + $0xc0] sm:$0xff]  ;;  %v857_v53 = vld [vmem:[%s4461_s13 + $0x88] sm:$0xff]  ;;  %v858_v54 = vld [vmem:[%s4461_s13 + $0x90] sm:$0xff]  ;;  %v4551_v14 = vsub.f32 %v472_v27, %v856_v45  ;;  %v4595_v45 = vmul.f32 %v1229_v47, %v1229_v47  ;;  %v4611_v47 = vmul.f32 %v4509_v48, %v4509_v48  ;;  %v4627_v48 = vmul.f32 %v4511_v49, %v4511_v49 }
  0x2b   : > { %v859_v55 = vld [vmem:[%s4461_s13 + $0x98] sm:$0xff]  ;;  %v482_v60 = vld [vmem:[%s4456_s10 + $0xd0] sm:$0xff]  ;;  %v484_v62 = vld [vmem:[%s4456_s10 + $0xe0] sm:$0xff]  ;;  %v4561_v22 = vsub.f32 %v473_v32, %v857_v53  ;;  %v4563_v23 = vsub.f32 %v474_v33, %v858_v54  ;;  %7956 = vst [vmem:[#allocation7_spill] sm:$0xff] %v4567_v25  ;;  %v4643_v49 = vmul.f32 %v4519_v56, %v4519_v56  ;;  %v4659_v56 = vmul.f32 %v4521_v57, %v4521_v57 }
  0x2c   : > { %v483_v61 = vld [vmem:[%s4456_s10 + $0xd8] sm:$0xff]  ;;  %v860_v63 = vld [vmem:[%s4461_s13 + $0xa0] sm:$0xff]  ;;  %v861_v0 = vld [vmem:[%s4461_s13 + $0xa8] sm:$0xff]  ;;  %v4565_v24 = vsub.f32 %v475_v34, %v859_v55  ;;  %7958 = vst [vmem:[#allocation9_spill] sm:$0xff] %v4595_v45  ;;  %v4675_v57 = vmul.f32 %v4523_v58, %v4523_v58  ;;  %v4691_v58 = vmul.f32 %v4533_v2, %v4533_v2  ;;  %v4707_v2 = vmul.f32 %v4535_v3, %v4535_v3 }
  0x2d   : > { %v862_v1 = vld [vmem:[%s4461_s13 + $0xb0] sm:$0xff]  ;;  %v485_v6 = vld [vmem:[%s4456_s10 + $0xe8] sm:$0xff]  ;;  %v487_v8 = vld [vmem:[%s4456_s10 + $0xf8] sm:$0xff]  ;;  %v4575_v32 = vsub.f32 %v476_v40, %v860_v63  ;;  %v4577_v33 = vsub.f32 %v477_v41, %v861_v0  ;;  %7959 = vst [vmem:[#allocation10_spill] sm:$0xff] %v4611_v47  ;;  %v4723_v3 = vmul.f32 %v4537_v4, %v4537_v4  ;;  %v4739_v4 = vmul.f32 %v4547_v12, %v4547_v12 }
  0x2e   : > { %v486_v7 = vld [vmem:[%s4456_s10 + $0xf0] sm:$0xff]  ;;  %v863_v9 = vld [vmem:[%s4461_s13 + $0xb8] sm:$0xff]  ;;  %v864_v10 = vld [vmem:[%s4461_s13 + $0xc0] sm:$0xff]  ;;  %v4579_v34 = vsub.f32 %v478_v42, %v862_v1  ;;  %7960 = vst [vmem:[#allocation11_spill] sm:$0xff] %v4627_v48  ;;  %v4755_v12 = vmul.f32 %v4549_v13, %v4549_v13  ;;  %v4771_v13 = vmul.f32 %v4551_v14, %v4551_v14  ;;  %v4787_v14 = vmul.f32 %v4561_v22, %v4561_v22 }
  0x2f   : > { %v865_v11 = vld [vmem:[%s4461_s13 + $0xc8] sm:$0xff]  ;;  %v488_v16 = vld [vmem:[%s4456_s10 + $0x100] sm:$0xff]  ;;  %v490_v18 = vld [vmem:[%s4456_s10 + $0x110] sm:$0xff]  ;;  %v4589_v40 = vsub.f32 %v479_v50, %v863_v9  ;;  %v4591_v41 = vsub.f32 %v480_v51, %v864_v10  ;;  %7962 = vst [vmem:[#allocation13_spill] sm:$0xff] %v4643_v49  ;;  %v4803_v22 = vmul.f32 %v4563_v23, %v4563_v23  ;;  %v4819_v23 = vmul.f32 %v4565_v24, %v4565_v24 }
  0x30   : > { %v489_v17 = vld [vmem:[%s4456_s10 + $0x108] sm:$0xff]  ;;  %v866_v19 = vld [vmem:[%s4461_s13 + $0xd0] sm:$0xff]  ;;  %v867_v20 = vld [vmem:[%s4461_s13 + $0xd8] sm:$0xff]  ;;  %v4593_v42 = vsub.f32 %v481_v52, %v865_v11  ;;  %7965 = vst [vmem:[#allocation16_spill] sm:$0xff] %v4659_v56  ;;  %v4835_v24 = vmul.f32 %v4575_v32, %v4575_v32  ;;  %v4851_v32 = vmul.f32 %v4577_v33, %v4577_v33  ;;  %v4867_v33 = vmul.f32 %v4579_v34, %v4579_v34 }
  0x31   : > { %v868_v21 = vld [vmem:[%s4461_s13 + $0xe0] sm:$0xff]  ;;  %v491_v26 = vld [vmem:[%s4456_s10 + $0x118] sm:$0xff]  ;;  %v493_v28 = vld [vmem:[%s4456_s10 + $0x128] sm:$0xff]  ;;  %v4603_v50 = vsub.f32 %v482_v60, %v866_v19  ;;  %v4605_v51 = vsub.f32 %v483_v61, %v867_v20  ;;  %7968 = vst [vmem:[#allocation19_spill] sm:$0xff] %v4675_v57  ;;  %v4883_v34 = vmul.f32 %v4589_v40, %v4589_v40  ;;  %v4899_v40 = vmul.f32 %v4591_v41, %v4591_v41 }
  0x32   : > { %v492_v27 = vld [vmem:[%s4456_s10 + $0x120] sm:$0xff]  ;;  %v869_v29 = vld [vmem:[%s4461_s13 + $0xe8] sm:$0xff]  ;;  %v870_v30 = vld [vmem:[%s4461_s13 + $0xf0] sm:$0xff]  ;;  %v4607_v52 = vsub.f32 %v484_v62, %v868_v21  ;;  %7971 = vst [vmem:[#allocation22_spill] sm:$0xff] %v4691_v58  ;;  %v4915_v41 = vmul.f32 %v4593_v42, %v4593_v42 }
  0x33   : > { %v871_v31 = vld [vmem:[%s4461_s13 + $0xf8] sm:$0xff]  ;;  %v494_v36 = vld [vmem:[%s4456_s10 + $0x130] sm:$0xff]  ;;  %v496_v38 = vld [vmem:[%s4456_s10 + $0x140] sm:$0xff]  ;;  %v4619_v19 = vsub.f32 %v485_v6, %v869_v29  ;;  %v4621_v61 = vsub.f32 %v486_v7, %v870_v30  ;;  %7974 = vst [vmem:[#allocation25_spill] sm:$0xff] %v4707_v2  ;;  %v4931_v42 = vmul.f32 %v4603_v50, %v4603_v50  ;;  %v4947_v50 = vmul.f32 %v4605_v51, %v4605_v51 }
  0x34   : > { %v495_v37 = vld [vmem:[%s4456_s10 + $0x138] sm:$0xff]  ;;  %v872_v39 = vld [vmem:[%s4461_s13 + $0x100] sm:$0xff]  ;;  %v873_v43 = vld [vmem:[%s4461_s13 + $0x108] sm:$0xff]  ;;  %v4623_v62 = vsub.f32 %v487_v8, %v871_v31  ;;  %7977 = vst [vmem:[#allocation28_spill] sm:$0xff] %v4723_v3  ;;  %v4963_v51 = vmul.f32 %v4607_v52, %v4607_v52 }
  0x35   : > { %v874_v44 = vld [vmem:[%s4461_s13 + $0x110] sm:$0xff]  ;;  %v497_v46 = vld [vmem:[%s4456_s10 + $0x148] sm:$0xff]  ;;  %v499_v54 = vld [vmem:[%s4456_s10 + $0x158] sm:$0xff]  ;;  %v4635_v29 = vsub.f32 %v488_v16, %v872_v39  ;;  %v4637_v7 = vsub.f32 %v489_v17, %v873_v43  ;;  %7980 = vst [vmem:[#allocation31_spill] sm:$0xff] %v4739_v4  ;;  %v4979_v52 = vmul.f32 %v4619_v19, %v4619_v19  ;;  %v4995_v19 = vmul.f32 %v4621_v61, %v4621_v61 }
  0x36   : > { %v498_v53 = vld [vmem:[%s4456_s10 + $0x150] sm:$0xff]  ;;  %v875_v55 = vld [vmem:[%s4461_s13 + $0x118] sm:$0xff]  ;;  %v876_v63 = vld [vmem:[%s4461_s13 + $0x120] sm:$0xff]  ;;  %v4639_v8 = vsub.f32 %v490_v18, %v874_v44  ;;  %7983 = vst [vmem:[#allocation34_spill] sm:$0xff] %v4755_v12  ;;  %v5011_v61 = vmul.f32 %v4623_v62, %v4623_v62 }
  0x37   : > { %v877_v0 = vld [vmem:[%s4461_s13 + $0x128] sm:$0xff]  ;;  %v500_v1 = vld [vmem:[%s4456_s10 + $0x160] sm:$0xff]  ;;  %v502_v10 = vld [vmem:[%s4456_s10 + $0x170] sm:$0xff]  ;;  %v4651_v39 = vsub.f32 %v491_v26, %v875_v55  ;;  %v4653_v17 = vsub.f32 %v492_v27, %v876_v63  ;;  %7986 = vst [vmem:[#allocation37_spill] sm:$0xff] %v4771_v13  ;;  %v5027_v62 = vmul.f32 %v4635_v29, %v4635_v29  ;;  %v5043_v29 = vmul.f32 %v4637_v7, %v4637_v7 }
  0x38   : > { %v501_v9 = vld [vmem:[%s4456_s10 + $0x168] sm:$0xff]  ;;  %v878_v11 = vld [vmem:[%s4461_s13 + $0x130] sm:$0xff]  ;;  %v879_v45 = vld [vmem:[%s4461_s13 + $0x138] sm:$0xff]  ;;  %7961 = vst [vmem:[#allocation12_spill] sm:$0xff] %v4639_v8  ;;  %v4655_v18 = vsub.f32 %v493_v28, %v877_v0 }
  0x39   : > { %v880_v60 = vld [vmem:[%s4461_s13 + $0x140] sm:$0xff]  ;;  %v503_v20 = vld [vmem:[%s4456_s10 + $0x178] sm:$0xff]  ;;  %v505_v15 = vld [vmem:[%s4456_s10 + $0x188] sm:$0xff]  ;;  %7963 = vst [vmem:[#allocation14_spill] sm:$0xff] %v4653_v17  ;;  %v4667_v55 = vsub.f32 %v494_v36, %v878_v11  ;;  %v4669_v27 = vsub.f32 %v495_v37, %v879_v45 }
  0x3a   : > { %v504_v21 = vld [vmem:[%s4456_s10 + $0x180] sm:$0xff]  ;;  %v881_v47 = vld [vmem:[%s4461_s13 + $0x148] sm:$0xff]  ;;  %v882_v35 = vld [vmem:[%s4461_s13 + $0x150] sm:$0xff]  ;;  %7964 = vst [vmem:[#allocation15_spill] sm:$0xff] %v4655_v18  ;;  %v4671_v28 = vsub.f32 %v496_v38, %v880_v60 }
  0x3b   : > { %v883_v6 = vld [vmem:[%s4461_s13 + $0x158] sm:$0xff]  ;;  %v506_v30 = vld [vmem:[%s4456_s10 + $0x190] sm:$0xff]  ;;  %v508_v48 = vld [vmem:[%s4456_s10 + $0x1a0] sm:$0xff]  ;;  %7966 = vst [vmem:[#allocation17_spill] sm:$0xff] %v4669_v27  ;;  %v4683_v11 = vsub.f32 %v497_v46, %v881_v47  ;;  %v4685_v37 = vsub.f32 %v498_v53, %v882_v35 }
  0x3c   : > { %v507_v31 = vld [vmem:[%s4456_s10 + $0x198] sm:$0xff]  ;;  %v884_v5 = vld [vmem:[%s4461_s13 + $0x160] sm:$0xff]  ;;  %v885_v25 = vld [vmem:[%s4461_s13 + $0x168] sm:$0xff]  ;;  %7967 = vst [vmem:[#allocation18_spill] sm:$0xff] %v4671_v28  ;;  %v4687_v38 = vsub.f32 %v499_v54, %v883_v6 }
  0x3d   : > { %v886_v16 = vld [vmem:[%s4461_s13 + $0x170] sm:$0xff]  ;;  %v509_v43 = vld [vmem:[%s4456_s10 + $0x1a8] sm:$0xff]  ;;  %v511_v49 = vld [vmem:[%s4456_s10 + $0x1b8] sm:$0xff]  ;;  %7969 = vst [vmem:[#allocation20_spill] sm:$0xff] %v4685_v37  ;;  %v4699_v47 = vsub.f32 %v500_v1, %v884_v5  ;;  %v4701_v35 = vsub.f32 %v501_v9, %v885_v25 }
  0x3e   : > { %v510_v44 = vld [vmem:[%s4456_s10 + $0x1b0] sm:$0xff]  ;;  %v887_v59 = vld [vmem:[%s4461_s13 + $0x178] sm:$0xff]  ;;  %v888_v8 = vld [vmem:[%s4461_s13 + $0x180] sm:$0xff]  ;;  %7970 = vst [vmem:[#allocation21_spill] sm:$0xff] %v4687_v38  ;;  %v4703_v53 = vsub.f32 %v502_v10, %v886_v16 }
  0x3f   : > { %v889_v26 = vld [vmem:[%s4461_s13 + $0x188] sm:$0xff]  ;;  %v512_v63 = vld [vmem:[%s4456_s10 + $0x1c0] sm:$0xff]  ;;  %v514_v56 = vld [vmem:[%s4456_s10 + $0x1d0] sm:$0xff]  ;;  %7972 = vst [vmem:[#allocation23_spill] sm:$0xff] %v4701_v35  ;;  %v4715_v1 = vsub.f32 %v503_v20, %v887_v59  ;;  %v4717_v25 = vsub.f32 %v504_v21, %v888_v8 }
  0x40   : > { %v513_v0 = vld [vmem:[%s4456_s10 + $0x1c8] sm:$0xff]  ;;  %v890_v18 = vld [vmem:[%s4461_s13 + $0x190] sm:$0xff]  ;;  %v891_v17 = vld [vmem:[%s4461_s13 + $0x198] sm:$0xff]  ;;  %7973 = vst [vmem:[#allocation24_spill] sm:$0xff] %v4703_v53  ;;  %v4719_v9 = vsub.f32 %v505_v15, %v889_v26 }
  0x41   : > { %v892_v36 = vld [vmem:[%s4461_s13 + $0x1a0] sm:$0xff]  ;;  %v515_v45 = vld [vmem:[%s4456_s10 + $0x1d8] sm:$0xff]  ;;  %v517_v57 = vld [vmem:[%s4456_s10 + $0x1e8] sm:$0xff]  ;;  %7975 = vst [vmem:[#allocation26_spill] sm:$0xff] %v4717_v25  ;;  %v4731_v20 = vsub.f32 %v506_v30, %v890_v18  ;;  %v4733_v21 = vsub.f32 %v507_v31, %v891_v17 }
  0x42   : > { %v516_v60 = vld [vmem:[%s4456_s10 + $0x1e0] sm:$0xff]  ;;  %v893_v28 = vld [vmem:[%s4461_s13 + $0x1a8] sm:$0xff]  ;;  %v894_v27 = vld [vmem:[%s4461_s13 + $0x1b0] sm:$0xff]  ;;  %7976 = vst [vmem:[#allocation27_spill] sm:$0xff] %v4719_v9  ;;  %v4735_v15 = vsub.f32 %v508_v48, %v892_v36 }
  0x43   : > { %v895_v46 = vld [vmem:[%s4461_s13 + $0x1b8] sm:$0xff]  ;;  %v518_v54 = vld [vmem:[%s4456_s10 + $0x1f0] sm:$0xff]  ;;  %v520_v58 = vld [vmem:[%s4456_s10 + $0x200] sm:$0xff]  ;;  %7978 = vst [vmem:[#allocation29_spill] sm:$0xff] %v4733_v21  ;;  %v4747_v18 = vsub.f32 %v509_v43, %v893_v28  ;;  %v4749_v31 = vsub.f32 %v510_v44, %v894_v27 }
  0x44   : > { %v519_v6 = vld [vmem:[%s4456_s10 + $0x1f8] sm:$0xff]  ;;  %v896_v38 = vld [vmem:[%s4461_s13 + $0x1c0] sm:$0xff]  ;;  %v897_v37 = vld [vmem:[%s4461_s13 + $0x1c8] sm:$0xff]  ;;  %7979 = vst [vmem:[#allocation30_spill] sm:$0xff] %v4735_v15  ;;  %v4751_v48 = vsub.f32 %v511_v49, %v895_v46 }
  0x45   : > { %v898_v5 = vld [vmem:[%s4461_s13 + $0x1d0] sm:$0xff]  ;;  %v521_v10 = vld [vmem:[%s4456_s10 + $0x208] sm:$0xff]  ;;  %v523_v2 = vld [vmem:[%s4456_s10 + $0x218] sm:$0xff]  ;;  %7981 = vst [vmem:[#allocation32_spill] sm:$0xff] %v4749_v31  ;;  %v4763_v28 = vsub.f32 %v512_v63, %v896_v38  ;;  %v4765_v44 = vsub.f32 %v513_v0, %v897_v37 }
  0x46   : > { %v522_v16 = vld [vmem:[%s4456_s10 + $0x210] sm:$0xff]  ;;  %v899_v53 = vld [vmem:[%s4461_s13 + $0x1d8] sm:$0xff]  ;;  %v900_v35 = vld [vmem:[%s4461_s13 + $0x1e0] sm:$0xff]  ;;  %7982 = vst [vmem:[#allocation33_spill] sm:$0xff] %v4751_v48  ;;  %v4767_v49 = vsub.f32 %v514_v56, %v898_v5 }
  0x47   : > { %v901_v59 = vld [vmem:[%s4461_s13 + $0x1e8] sm:$0xff]  ;;  %v524_v8 = vld [vmem:[%s4456_s10 + $0x220] sm:$0xff]  ;;  %v526_v3 = vld [vmem:[%s4456_s10 + $0x230] sm:$0xff]  ;;  %7984 = vst [vmem:[#allocation35_spill] sm:$0xff] %v4765_v44  ;;  %v4779_v38 = vsub.f32 %v515_v45, %v899_v53  ;;  %v4781_v0 = vsub.f32 %v516_v60, %v900_v35 }
  0x48   : > { %v525_v26 = vld [vmem:[%s4456_s10 + $0x228] sm:$0xff]  ;;  %v902_v9 = vld [vmem:[%s4461_s13 + $0x1f0] sm:$0xff]  ;;  %v903_v25 = vld [vmem:[%s4461_s13 + $0x1f8] sm:$0xff]  ;;  %7985 = vst [vmem:[#allocation36_spill] sm:$0xff] %v4767_v49  ;;  %v4783_v56 = vsub.f32 %v517_v57, %v901_v59 }
  0x49   : > { %v904_v30 = vld [vmem:[%s4461_s13 + $0x200] sm:$0xff]  ;;  %v527_v17 = vld [vmem:[%s4456_s10 + $0x238] sm:$0xff]  ;;  %v529_v4 = vld [vmem:[%s4456_s10 + $0x248] sm:$0xff]  ;;  %7987 = vst [vmem:[#allocation38_spill] sm:$0xff] %v4781_v0  ;;  %v4795_v53 = vsub.f32 %v518_v54, %v902_v9  ;;  %v4797_v60 = vsub.f32 %v519_v6, %v903_v25 }
  0x4a   : > { %v528_v36 = vld [vmem:[%s4456_s10 + $0x240] sm:$0xff]  ;;  %v905_v15 = vld [vmem:[%s4461_s13 + $0x208] sm:$0xff]  ;;  %v906_v21 = vld [vmem:[%s4461_s13 + $0x210] sm:$0xff]  ;;  %7988 = vst [vmem:[#allocation39_spill] sm:$0xff] %v4783_v56  ;;  %v4799_v57 = vsub.f32 %v520_v58, %v904_v30 }
  0x4b   : > { %v907_v43 = vld [vmem:[%s4461_s13 + $0x218] sm:$0xff]  ;;  %v530_v27 = vld [vmem:[%s4456_s10 + $0x250] sm:$0xff]  ;;  %v532_v12 = vld [vmem:[%s4456_s10 + $0x260] sm:$0xff]  ;;  %7989 = vst [vmem:[#allocation40_spill] sm:$0xff] %v4787_v14  ;;  %v4811_v9 = vsub.f32 %v521_v10, %v905_v15  ;;  %v4813_v6 = vsub.f32 %v522_v16, %v906_v21 }
  0x4c   : > { %v531_v46 = vld [vmem:[%s4456_s10 + $0x258] sm:$0xff]  ;;  %v908_v48 = vld [vmem:[%s4461_s13 + $0x220] sm:$0xff]  ;;  %v909_v31 = vld [vmem:[%s4461_s13 + $0x228] sm:$0xff]  ;;  %7990 = vst [vmem:[#allocation41_spill] sm:$0xff] %v4797_v60  ;;  %v4815_v58 = vsub.f32 %v523_v2, %v907_v43 }
  0x4d   : > { %v910_v63 = vld [vmem:[%s4461_s13 + $0x230] sm:$0xff]  ;;  %v533_v37 = vld [vmem:[%s4456_s10 + $0x268] sm:$0xff]  ;;  %v535_v13 = vld [vmem:[%s4456_s10 + $0x278] sm:$0xff]  ;;  %7991 = vst [vmem:[#allocation42_spill] sm:$0xff] %v4799_v57  ;;  %v4827_v15 = vsub.f32 %v524_v8, %v908_v48  ;;  %v4829_v16 = vsub.f32 %v525_v26, %v909_v31 }
  0x4e   : > { %v534_v5 = vld [vmem:[%s4456_s10 + $0x270] sm:$0xff]  ;;  %v911_v49 = vld [vmem:[%s4461_s13 + $0x238] sm:$0xff]  ;;  %v912_v44 = vld [vmem:[%s4461_s13 + $0x240] sm:$0xff]  ;;  %7992 = vst [vmem:[#allocation43_spill] sm:$0xff] %v4803_v22  ;;  %v4831_v2 = vsub.f32 %v526_v3, %v910_v63 }
  0x4f   : > { %v913_v45 = vld [vmem:[%s4461_s13 + $0x248] sm:$0xff]  ;;  %v536_v35 = vld [vmem:[%s4456_s10 + $0x280] sm:$0xff]  ;;  %v538_v14 = vld [vmem:[%s4456_s10 + $0x290] sm:$0xff]  ;;  %7993 = vst [vmem:[#allocation44_spill] sm:$0xff] %v4813_v6  ;;  %v4843_v48 = vsub.f32 %v527_v17, %v911_v49  ;;  %v4845_v26 = vsub.f32 %v528_v36, %v912_v44 }
  0x50   : > { %v537_v59 = vld [vmem:[%s4456_s10 + $0x288] sm:$0xff]  ;;  %v914_v56 = vld [vmem:[%s4461_s13 + $0x250] sm:$0xff]  ;;  %v915_v0 = vld [vmem:[%s4461_s13 + $0x258] sm:$0xff]  ;;  %7994 = vst [vmem:[#allocation45_spill] sm:$0xff] %v4815_v58  ;;  %v4847_v3 = vsub.f32 %v529_v4, %v913_v45 }
  0x51   : > { %v916_v54 = vld [vmem:[%s4461_s13 + $0x260] sm:$0xff]  ;;  %7995 = vst [vmem:[#allocation46_spill] sm:$0xff] %v4819_v23  ;;  %v539_v25 = vld [vmem:[%s4456_s10 + $0x298] sm:$0xff]  ;;  %v541_v22 = vld [vmem:[%s4456_s10 + $0x2a8] sm:$0xff]  ;;  %v4859_v49 = vsub.f32 %v530_v27, %v914_v56  ;;  %v4861_v36 = vsub.f32 %v531_v46, %v915_v0 }
  0x52   : > { %v540_v30 = vld [vmem:[%s4456_s10 + $0x2a0] sm:$0xff]  ;;  %v917_v57 = vld [vmem:[%s4461_s13 + $0x268] sm:$0xff]  ;;  %v918_v60 = vld [vmem:[%s4461_s13 + $0x270] sm:$0xff]  ;;  %7996 = vst [vmem:[#allocation47_spill] sm:$0xff] %v4829_v16  ;;  %v4863_v4 = vsub.f32 %v532_v12, %v916_v54 }
  0x53   : > { %v919_v10 = vld [vmem:[%s4461_s13 + $0x278] sm:$0xff]  ;;  %7997 = vst [vmem:[#allocation48_spill] sm:$0xff] %v4831_v2  ;;  %7998 = vst [vmem:[#allocation49_spill] sm:$0xff] %v4835_v24  ;;  %v542_v21 = vld [vmem:[%s4456_s10 + $0x2b0] sm:$0xff]  ;;  %v4875_v56 = vsub.f32 %v533_v37, %v917_v57  ;;  %v4877_v46 = vsub.f32 %v534_v5, %v918_v60 }
  0x54   : > { %v543_v43 = vld [vmem:[%s4456_s10 + $0x2b8] sm:$0xff]  ;;  %v544_v23 = vld [vmem:[%s4456_s10 + $0x2c0] sm:$0xff]  ;;  %v921_v6 = vld [vmem:[%s4461_s13 + $0x288] sm:$0xff]  ;;  %7999 = vst [vmem:[#allocation50_spill] sm:$0xff] %v4845_v26  ;;  %v4879_v12 = vsub.f32 %v535_v13, %v919_v10 }
  0x55   : > { %v920_v58 = vld [vmem:[%s4461_s13 + $0x280] sm:$0xff]  ;;  %v922_v8 = vld [vmem:[%s4461_s13 + $0x290] sm:$0xff]  ;;  %8000 = vst [vmem:[#allocation51_spill] sm:$0xff] %v4847_v3  ;;  %8001 = vst [vmem:[#allocation52_spill] sm:$0xff] %v4851_v32  ;;  %v4893_v5 = vsub.f32 %v537_v59, %v921_v6 }
  0x56   : > { %v545_v31 = vld [vmem:[%s4456_s10 + $0x2c8] sm:$0xff]  ;;  %v546_v63 = vld [vmem:[%s4456_s10 + $0x2d0] sm:$0xff]  ;;  %v547_v24 = vld [vmem:[%s4456_s10 + $0x2d8] sm:$0xff]  ;;  %8002 = vst [vmem:[#allocation53_spill] sm:$0xff] %v4861_v36  ;;  %v4891_v57 = vsub.f32 %v536_v35, %v920_v58  ;;  %v4895_v13 = vsub.f32 %v538_v14, %v922_v8 }
  0x57   : > { %v923_v2 = vld [vmem:[%s4461_s13 + $0x298] sm:$0xff]  ;;  %v924_v16 = vld [vmem:[%s4461_s13 + $0x2a0] sm:$0xff]  ;;  %v925_v17 = vld [vmem:[%s4461_s13 + $0x2a8] sm:$0xff]  ;;  %8003 = vst [vmem:[#allocation54_spill] sm:$0xff] %v4863_v4 }
  0x58   : > { %8004 = vst [vmem:[#allocation55_spill] sm:$0xff] %v4867_v33  ;;  %v548_v44 = vld [vmem:[%s4456_s10 + $0x2e0] sm:$0xff]  ;;  %v549_v45 = vld [vmem:[%s4456_s10 + $0x2e8] sm:$0xff]  ;;  %v550_v32 = vld [vmem:[%s4456_s10 + $0x2f0] sm:$0xff]  ;;  %v4907_v58 = vsub.f32 %v539_v25, %v923_v2  ;;  %v4909_v59 = vsub.f32 %v540_v30, %v924_v16  ;;  %v4911_v14 = vsub.f32 %v541_v22, %v925_v17 }
  0x59   : > { %v926_v3 = vld [vmem:[%s4461_s13 + $0x2b0] sm:$0xff]  ;;  %v927_v26 = vld [vmem:[%s4461_s13 + $0x2b8] sm:$0xff]  ;;  %v928_v27 = vld [vmem:[%s4461_s13 + $0x2c0] sm:$0xff]  ;;  %8005 = vst [vmem:[#allocation56_spill] sm:$0xff] %v4875_v56 }
  0x5a   : > { %8006 = vst [vmem:[#allocation57_spill] sm:$0xff] %v4877_v46  ;;  %8007 = vst [vmem:[#allocation58_spill] sm:$0xff] %v4879_v12  ;;  %v551_v0 = vld [vmem:[%s4456_s10 + $0x2f8] sm:$0xff]  ;;  %v552_v54 = vld [vmem:[%s4456_s10 + $0x300] sm:$0xff]  ;;  %v4923_v2 = vsub.f32 %v542_v21, %v926_v3  ;;  %v4925_v30 = vsub.f32 %v543_v43, %v927_v26  ;;  %v4927_v22 = vsub.f32 %v544_v23, %v928_v27 }
  0x5b   : > { %v553_v4 = vld [vmem:[%s4456_s10 + $0x308] sm:$0xff]  ;;  %v930_v33 = vld [vmem:[%s4461_s13 + $0x2d0] sm:$0xff]  ;;  %v931_v37 = vld [vmem:[%s4461_s13 + $0x2d8] sm:$0xff]  ;;  %8008 = vst [vmem:[#allocation59_spill] sm:$0xff] %v4891_v57 }
  0x5c   : > { %v929_v36 = vld [vmem:[%s4461_s13 + $0x2c8] sm:$0xff]  ;;  %8009 = vst [vmem:[#allocation60_spill] sm:$0xff] %v4893_v5  ;;  %8010 = vst [vmem:[#allocation61_spill] sm:$0xff] %v4895_v13  ;;  %v554_v60 = vld [vmem:[%s4456_s10 + $0x310] sm:$0xff]  ;;  %v4941_v43 = vsub.f32 %v546_v63, %v930_v33  ;;  %v4943_v23 = vsub.f32 %v547_v24, %v931_v37 }
  0x5d   : > { %v555_v10 = vld [vmem:[%s4456_s10 + $0x318] sm:$0xff]  ;;  %v556_v12 = vld [vmem:[%s4456_s10 + $0x320] sm:$0xff]  ;;  %v933_v56 = vld [vmem:[%s4461_s13 + $0x2e8] sm:$0xff]  ;;  %8011 = vst [vmem:[#allocation62_spill] sm:$0xff] %v4907_v58  ;;  %v4939_v3 = vsub.f32 %v545_v31, %v929_v36 }
  0x5e   : > { %v932_v46 = vld [vmem:[%s4461_s13 + $0x2e0] sm:$0xff]  ;;  %v934_v35 = vld [vmem:[%s4461_s13 + $0x2f0] sm:$0xff]  ;;  %8012 = vst [vmem:[#allocation63_spill] sm:$0xff] %v4909_v59  ;;  %8013 = vst [vmem:[#allocation64_spill] sm:$0xff] %v4911_v14  ;;  %v4957_v63 = vsub.f32 %v549_v45, %v933_v56 }
  0x5f   : > { %v557_v6 = vld [vmem:[%s4456_s10 + $0x328] sm:$0xff]  ;;  %v558_v8 = vld [vmem:[%s4456_s10 + $0x330] sm:$0xff]  ;;  %v559_v13 = vld [vmem:[%s4456_s10 + $0x338] sm:$0xff]  ;;  %8014 = vst [vmem:[#allocation65_spill] sm:$0xff] %v4923_v2  ;;  %v4955_v36 = vsub.f32 %v548_v44, %v932_v46  ;;  %v4959_v24 = vsub.f32 %v550_v32, %v934_v35 }
  0x60   : > { %v935_v5 = vld [vmem:[%s4461_s13 + $0x2f8] sm:$0xff]  ;;  %v936_v57 = vld [vmem:[%s4461_s13 + $0x300] sm:$0xff]  ;;  %v937_v25 = vld [vmem:[%s4461_s13 + $0x308] sm:$0xff]  ;;  %8015 = vst [vmem:[#allocation66_spill] sm:$0xff] %v4925_v30 }
  0x61   : > { %8016 = vst [vmem:[#allocation67_spill] sm:$0xff] %v4927_v22  ;;  %v560_v16 = vld [vmem:[%s4456_s10 + $0x340] sm:$0xff]  ;;  %v561_v17 = vld [vmem:[%s4456_s10 + $0x348] sm:$0xff]  ;;  %v562_v14 = vld [vmem:[%s4456_s10 + $0x350] sm:$0xff]  ;;  %v4971_v46 = vsub.f32 %v551_v0, %v935_v5  ;;  %v4973_v45 = vsub.f32 %v552_v54, %v936_v57  ;;  %v4975_v32 = vsub.f32 %v553_v4, %v937_v25 }
  0x62   : > { %v938_v59 = vld [vmem:[%s4461_s13 + $0x310] sm:$0xff]  ;;  %v939_v58 = vld [vmem:[%s4461_s13 + $0x318] sm:$0xff]  ;;  %v940_v21 = vld [vmem:[%s4461_s13 + $0x320] sm:$0xff]  ;;  %8017 = vst [vmem:[#allocation68_spill] sm:$0xff] %v4939_v3 }
  0x63   : > { %8018 = vst [vmem:[#allocation69_spill] sm:$0xff] %v4941_v43  ;;  %8019 = vst [vmem:[#allocation70_spill] sm:$0xff] %v4943_v23  ;;  %v563_v26 = vld [vmem:[%s4456_s10 + $0x358] sm:$0xff]  ;;  %v564_v27 = vld [vmem:[%s4456_s10 + $0x360] sm:$0xff]  ;;  %v4987_v5 = vsub.f32 %v554_v60, %v938_v59  ;;  %v4989_v54 = vsub.f32 %v555_v10, %v939_v58  ;;  %v4991_v4 = vsub.f32 %v556_v12, %v940_v21 }
  0x64   : > { %v565_v22 = vld [vmem:[%s4456_s10 + $0x368] sm:$0xff]  ;;  %v942_v2 = vld [vmem:[%s4461_s13 + $0x330] sm:$0xff]  ;;  %v943_v31 = vld [vmem:[%s4461_s13 + $0x338] sm:$0xff]  ;;  %8020 = vst [vmem:[#allocation71_spill] sm:$0xff] %v4955_v36 }
  0x65   : > { %v941_v30 = vld [vmem:[%s4461_s13 + $0x328] sm:$0xff]  ;;  %8021 = vst [vmem:[#allocation72_spill] sm:$0xff] %v4957_v63  ;;  %8022 = vst [vmem:[#allocation73_spill] sm:$0xff] %v4959_v24  ;;  %v566_v33 = vld [vmem:[%s4456_s10 + $0x370] sm:$0xff]  ;;  %v5005_v10 = vsub.f32 %v558_v8, %v942_v2  ;;  %v5007_v12 = vsub.f32 %v559_v13, %v943_v31 }
  0x66   : > { %v567_v37 = vld [vmem:[%s4456_s10 + $0x378] sm:$0xff]  ;;  %v568_v23 = vld [vmem:[%s4456_s10 + $0x380] sm:$0xff]  ;;  %v945_v3 = vld [vmem:[%s4461_s13 + $0x348] sm:$0xff]  ;;  %8023 = vst [vmem:[#allocation74_spill] sm:$0xff] %v4971_v46  ;;  %v5003_v59 = vsub.f32 %v557_v6, %v941_v30 }
  0x67   : > { %v944_v43 = vld [vmem:[%s4461_s13 + $0x340] sm:$0xff]  ;;  %v946_v44 = vld [vmem:[%s4461_s13 + $0x350] sm:$0xff]  ;;  %8024 = vst [vmem:[#allocation75_spill] sm:$0xff] %v4973_v45  ;;  %8025 = vst [vmem:[#allocation76_spill] sm:$0xff] %v4975_v32  ;;  %v5021_v8 = vsub.f32 %v561_v17, %v945_v3 }
  0x68   : > { %v569_v56 = vld [vmem:[%s4456_s10 + $0x388] sm:$0xff]  ;;  %v570_v35 = vld [vmem:[%s4456_s10 + $0x390] sm:$0xff]  ;;  %v571_v24 = vld [vmem:[%s4456_s10 + $0x398] sm:$0xff]  ;;  %8026 = vst [vmem:[#allocation77_spill] sm:$0xff] %v4987_v5  ;;  %v5019_v30 = vsub.f32 %v560_v16, %v944_v43  ;;  %v5023_v13 = vsub.f32 %v562_v14, %v946_v44 }
  0x69   : > { %v947_v63 = vld [vmem:[%s4461_s13 + $0x358] sm:$0xff]  ;;  %v948_v36 = vld [vmem:[%s4461_s13 + $0x360] sm:$0xff]  ;;  %v949_v0 = vld [vmem:[%s4461_s13 + $0x368] sm:$0xff]  ;;  %8027 = vst [vmem:[#allocation78_spill] sm:$0xff] %v4989_v54 }
  0x6a   : > { %8028 = vst [vmem:[#allocation79_spill] sm:$0xff] %v4991_v4  ;;  %v572_v57 = vld [vmem:[%s4456_s10 + $0x3a0] sm:$0xff]  ;;  %v573_v25 = vld [vmem:[%s4456_s10 + $0x3a8] sm:$0xff]  ;;  %v574_v32 = vld [vmem:[%s4456_s10 + $0x3b0] sm:$0xff]  ;;  %v5035_v43 = vsub.f32 %v563_v26, %v947_v63  ;;  %v5037_v17 = vsub.f32 %v564_v27, %v948_v36  ;;  %v5039_v14 = vsub.f32 %v565_v22, %v949_v0 }
  0x6b   : > { %v950_v45 = vld [vmem:[%s4461_s13 + $0x370] sm:$0xff]  ;;  %v951_v46 = vld [vmem:[%s4461_s13 + $0x378] sm:$0xff]  ;;  %v952_v60 = vld [vmem:[%s4461_s13 + $0x380] sm:$0xff]  ;;  %8029 = vst [vmem:[#allocation80_spill] sm:$0xff] %v5003_v59 }
  0x6c   : > { %8030 = vst [vmem:[#allocation81_spill] sm:$0xff] %v5005_v10  ;;  %8031 = vst [vmem:[#allocation82_spill] sm:$0xff] %v5007_v12  ;;  %v575_v58 = vld [vmem:[%s4456_s10 + $0x3b8] sm:$0xff]  ;;  %v576_v21 = vld [vmem:[%s4456_s10 + $0x3c0] sm:$0xff]  ;;  %v5051_v63 = vsub.f32 %v566_v33, %v950_v45  ;;  %v5053_v27 = vsub.f32 %v567_v37, %v951_v46  ;;  %v5055_v22 = vsub.f32 %v568_v23, %v952_v60 }
  0x6d   : > { %v577_v4 = vld [vmem:[%s4456_s10 + $0x3c8] sm:$0xff]  ;;  %v954_v5 = vld [vmem:[%s4461_s13 + $0x390] sm:$0xff]  ;;  %v955_v6 = vld [vmem:[%s4461_s13 + $0x398] sm:$0xff]  ;;  %8032 = vst [vmem:[#allocation83_spill] sm:$0xff] %v5019_v30  ;;  %v5075_v46 = vmul.f32 %v4651_v39, %v4651_v39 }
  0x6e   : > { %v953_v54 = vld [vmem:[%s4461_s13 + $0x388] sm:$0xff]  ;;  %8033 = vst [vmem:[#allocation84_spill] sm:$0xff] %v5021_v8  ;;  %8034 = vst [vmem:[#allocation85_spill] sm:$0xff] %v5023_v13  ;;  %v578_v2 = vld [vmem:[%s4456_s10 + $0x3d0] sm:$0xff]  ;;  %v5069_v37 = vsub.f32 %v570_v35, %v954_v5  ;;  %v5071_v23 = vsub.f32 %v571_v24, %v955_v6 }
  0x6f   : > { %v579_v31 = vld [vmem:[%s4456_s10 + $0x3d8] sm:$0xff]  ;;  %v580_v12 = vld [vmem:[%s4456_s10 + $0x3e0] sm:$0xff]  ;;  %v957_v59 = vld [vmem:[%s4461_s13 + $0x3a8] sm:$0xff]  ;;  %8035 = vst [vmem:[#allocation86_spill] sm:$0xff] %v5035_v43  ;;  %v5067_v45 = vsub.f32 %v569_v56, %v953_v54 }
  0x70   : > { %v956_v10 = vld [vmem:[%s4461_s13 + $0x3a0] sm:$0xff]  ;;  %v958_v16 = vld [vmem:[%s4461_s13 + $0x3b0] sm:$0xff]  ;;  %8036 = vst [vmem:[#allocation87_spill] sm:$0xff] %v5037_v17  ;;  %8037 = vst [vmem:[#allocation88_spill] sm:$0xff] %v5039_v14  ;;  %v5085_v35 = vsub.f32 %v573_v25, %v957_v59 }
  0x71   : > { %8038 = vst [vmem:[#allocation89_spill] sm:$0xff] %v5043_v29  ;;  %v581_v3 = vld [vmem:[%s4456_s10 + $0x3e8] sm:$0xff]  ;;  %v582_v44 = vld [vmem:[%s4456_s10 + $0x3f0] sm:$0xff]  ;;  %v583_v13 = vld [vmem:[%s4456_s10 + $0x3f8] sm:$0xff]  ;;  %v5083_v54 = vsub.f32 %v572_v57, %v956_v10  ;;  %v5087_v24 = vsub.f32 %v574_v32, %v958_v16 }
  0x72   : > { %v959_v8 = vld [vmem:[%s4461_s13 + $0x3b8] sm:$0xff]  ;;  %v960_v30 = vld [vmem:[%s4461_s13 + $0x3c0] sm:$0xff]  ;;  %v961_v26 = vld [vmem:[%s4461_s13 + $0x3c8] sm:$0xff]  ;;  %8039 = vst [vmem:[#allocation90_spill] sm:$0xff] %v5051_v63 }
  0x73   : > { %8040 = vst [vmem:[#allocation91_spill] sm:$0xff] %v5053_v27  ;;  %8041 = vst [vmem:[#allocation92_spill] sm:$0xff] %v5055_v22  ;;  %v8042_v36 = vld [vmem:[#allocation12_spill] sm:$0xff]  ;;  %v586_v17 = vld [vmem:[%s4456_s10 + $0x410] sm:$0xff]  ;;  %v5099_v10 = vsub.f32 %v575_v58, %v959_v8  ;;  %v5101_v25 = vsub.f32 %v576_v21, %v960_v30  ;;  %v5103_v32 = vsub.f32 %v577_v4, %v961_v26 }
  0x74   : > { %v5059_v7 = vmul.f32 %v8042_v36, %v8042_v36  ;;  %v584_v0 = vld [vmem:[%s4456_s10 + $0x400] sm:$0xff]  ;;  %v585_v14 = vld [vmem:[%s4456_s10 + $0x408] sm:$0xff]  ;;  %v962_v43 = vld [vmem:[%s4461_s13 + $0x3d0] sm:$0xff]  ;;  %8043 = vst [vmem:[#allocation12_spill] sm:$0xff] %v5067_v45  ;;  %v5123_v30 = vmul.f32 %v4667_v55, %v4667_v55 }
  0x75   : > { %v963_v29 = vld [vmem:[%s4461_s13 + $0x3d8] sm:$0xff]  ;;  %v964_v33 = vld [vmem:[%s4461_s13 + $0x3e0] sm:$0xff]  ;;  %8044 = vst [vmem:[#allocation93_spill] sm:$0xff] %v5069_v37  ;;  %8045 = vst [vmem:[#allocation94_spill] sm:$0xff] %v5071_v23  ;;  %v5115_v8 = vsub.f32 %v578_v2, %v962_v43 }
  0x76   : > { %8046 = vst [vmem:[#allocation95_spill] sm:$0xff] %v5075_v46  ;;  %v587_v60 = vld [vmem:[%s4456_s10 + $0x418] sm:$0xff]  ;;  %v588_v36 = vld [vmem:[%s4456_s10 + $0x420] sm:$0xff]  ;;  %v589_v22 = vld [vmem:[%s4456_s10 + $0x428] sm:$0xff]  ;;  %v5117_v21 = vsub.f32 %v579_v31, %v963_v29  ;;  %v5119_v4 = vsub.f32 %v580_v12, %v964_v33 }
  0x77   : > { %v965_v27 = vld [vmem:[%s4461_s13 + $0x3e8] sm:$0xff]  ;;  %v966_v63 = vld [vmem:[%s4461_s13 + $0x3f0] sm:$0xff]  ;;  %v967_v56 = vld [vmem:[%s4461_s13 + $0x3f8] sm:$0xff]  ;;  %8047 = vst [vmem:[#allocation96_spill] sm:$0xff] %v5083_v54 }
  0x78   : > { %8048 = vst [vmem:[#allocation97_spill] sm:$0xff] %v5085_v35  ;;  %8049 = vst [vmem:[#allocation98_spill] sm:$0xff] %v5087_v24  ;;  %v8050_v5 = vld [vmem:[#allocation14_spill] sm:$0xff]  ;;  %v592_v37 = vld [vmem:[%s4456_s10 + $0x440] sm:$0xff]  ;;  %v5131_v43 = vsub.f32 %v581_v3, %v965_v27  ;;  %v5133_v31 = vsub.f32 %v582_v44, %v966_v63  ;;  %v5135_v12 = vsub.f32 %v583_v13, %v967_v56 }
  0x79   : > { %v5091_v39 = vmul.f32 %v8050_v5, %v8050_v5  ;;  %v590_v6 = vld [vmem:[%s4456_s10 + $0x430] sm:$0xff]  ;;  %v591_v23 = vld [vmem:[%s4456_s10 + $0x438] sm:$0xff]  ;;  %v968_v45 = vld [vmem:[%s4461_s13 + $0x400] sm:$0xff]  ;;  %8052 = vst [vmem:[#allocation99_spill] sm:$0xff] %v5099_v10 }
  0x7a   : > { %v969_v46 = vld [vmem:[%s4461_s13 + $0x408] sm:$0xff]  ;;  %v970_v57 = vld [vmem:[%s4461_s13 + $0x410] sm:$0xff]  ;;  %8053 = vst [vmem:[#allocation100_spill] sm:$0xff] %v5101_v25  ;;  %8054 = vst [vmem:[#allocation101_spill] sm:$0xff] %v5103_v32  ;;  %v5147_v27 = vsub.f32 %v584_v0, %v968_v45 }
  0x7b   : > { %8051 = vst [vmem:[#allocation14_spill] sm:$0xff] %v5091_v39  ;;  %v8055_v59 = vld [vmem:[#allocation15_spill] sm:$0xff]  ;;  %v593_v5 = vld [vmem:[%s4456_s10 + $0x448] sm:$0xff]  ;;  %v594_v24 = vld [vmem:[%s4456_s10 + $0x450] sm:$0xff]  ;;  %v5149_v44 = vsub.f32 %v585_v14, %v969_v46  ;;  %v5151_v13 = vsub.f32 %v586_v17, %v970_v57  ;;  %v5171_v46 = vmul.f32 %v4683_v11, %v4683_v11 }
  0x7c   : > { %v5107_v16 = vmul.f32 %v8055_v59, %v8055_v59  ;;  %v595_v35 = vld [vmem:[%s4456_s10 + $0x458] sm:$0xff]  ;;  %v972_v39 = vld [vmem:[%s4461_s13 + $0x420] sm:$0xff]  ;;  %v973_v58 = vld [vmem:[%s4461_s13 + $0x428] sm:$0xff]  ;;  %8056 = vst [vmem:[#allocation15_spill] sm:$0xff] %v5115_v8 }
  0x7d   : > { %v971_v54 = vld [vmem:[%s4461_s13 + $0x418] sm:$0xff]  ;;  %8057 = vst [vmem:[#allocation102_spill] sm:$0xff] %v5117_v21  ;;  %8058 = vst [vmem:[#allocation103_spill] sm:$0xff] %v5119_v4  ;;  %v596_v26 = vld [vmem:[%s4456_s10 + $0x460] sm:$0xff]  ;;  %v5165_v14 = vsub.f32 %v588_v36, %v972_v39  ;;  %v5167_v17 = vsub.f32 %v589_v22, %v973_v58 }
  0x7e   : > { %8059 = vst [vmem:[#allocation104_spill] sm:$0xff] %v5123_v30  ;;  %v597_v59 = vld [vmem:[%s4456_s10 + $0x468] sm:$0xff]  ;;  %v598_v32 = vld [vmem:[%s4456_s10 + $0x470] sm:$0xff]  ;;  %v975_v10 = vld [vmem:[%s4461_s13 + $0x438] sm:$0xff]  ;;  %v5163_v45 = vsub.f32 %v587_v60, %v971_v54 }
  0x7f   : > { %v974_v25 = vld [vmem:[%s4461_s13 + $0x430] sm:$0xff]  ;;  %v976_v2 = vld [vmem:[%s4461_s13 + $0x440] sm:$0xff]  ;;  %8060 = vst [vmem:[#allocation105_spill] sm:$0xff] %v5131_v43  ;;  %8061 = vst [vmem:[#allocation106_spill] sm:$0xff] %v5133_v31  ;;  %v5181_v36 = vsub.f32 %v591_v23, %v975_v10 }
  0x80   : > { %8062 = vst [vmem:[#allocation107_spill] sm:$0xff] %v5135_v12  ;;  %v8063_v29 = vld [vmem:[#allocation17_spill] sm:$0xff]  ;;  %v599_v33 = vld [vmem:[%s4456_s10 + $0x478] sm:$0xff]  ;;  %v600_v4 = vld [vmem:[%s4456_s10 + $0x480] sm:$0xff]  ;;  %v5179_v54 = vsub.f32 %v590_v6, %v974_v25  ;;  %v5183_v22 = vsub.f32 %v592_v37, %v976_v2 }
  0x81   : > { %v5139_v55 = vmul.f32 %v8063_v29, %v8063_v29  ;;  %v601_v21 = vld [vmem:[%s4456_s10 + $0x488] sm:$0xff]  ;;  %v978_v30 = vld [vmem:[%s4461_s13 + $0x450] sm:$0xff]  ;;  %v979_v3 = vld [vmem:[%s4461_s13 + $0x458] sm:$0xff]  ;;  %8065 = vst [vmem:[#allocation108_spill] sm:$0xff] %v5147_v27 }
  0x82   : > { %v977_v8 = vld [vmem:[%s4461_s13 + $0x448] sm:$0xff]  ;;  %8066 = vst [vmem:[#allocation109_spill] sm:$0xff] %v5149_v44  ;;  %8067 = vst [vmem:[#allocation110_spill] sm:$0xff] %v5151_v13  ;;  %v8068_v63 = vld [vmem:[#allocation18_spill] sm:$0xff]  ;;  %v5197_v23 = vsub.f32 %v594_v24, %v978_v30  ;;  %v5199_v37 = vsub.f32 %v595_v35, %v979_v3  ;;  %v5219_v30 = vmul.f32 %v4699_v47, %v4699_v47 }
  0x83   : > { %8064 = vst [vmem:[#allocation17_spill] sm:$0xff] %v5139_v55  ;;  %v5155_v56 = vmul.f32 %v8068_v63, %v8068_v63  ;;  %v602_v29 = vld [vmem:[%s4456_s10 + $0x490] sm:$0xff]  ;;  %v603_v12 = vld [vmem:[%s4456_s10 + $0x498] sm:$0xff]  ;;  %v604_v31 = vld [vmem:[%s4456_s10 + $0x4a0] sm:$0xff]  ;;  %v5195_v25 = vsub.f32 %v593_v5, %v977_v8 }
  0x84   : > { %v980_v43 = vld [vmem:[%s4461_s13 + $0x460] sm:$0xff]  ;;  %v981_v55 = vld [vmem:[%s4461_s13 + $0x468] sm:$0xff]  ;;  %v982_v0 = vld [vmem:[%s4461_s13 + $0x470] sm:$0xff]  ;;  %8069 = vst [vmem:[#allocation18_spill] sm:$0xff] %v5163_v45 }
  0x85   : > { %8070 = vst [vmem:[#allocation111_spill] sm:$0xff] %v5165_v14  ;;  %8071 = vst [vmem:[#allocation112_spill] sm:$0xff] %v5167_v17  ;;  %v605_v57 = vld [vmem:[%s4456_s10 + $0x4a8] sm:$0xff]  ;;  %v606_v63 = vld [vmem:[%s4456_s10 + $0x4b0] sm:$0xff]  ;;  %v5211_v8 = vsub.f32 %v596_v26, %v980_v43  ;;  %v5213_v24 = vsub.f32 %v597_v59, %v981_v55  ;;  %v5215_v35 = vsub.f32 %v598_v32, %v982_v0 }
  0x86   : > { %8072 = vst [vmem:[#allocation113_spill] sm:$0xff] %v5171_v46  ;;  %v607_v13 = vld [vmem:[%s4456_s10 + $0x4b8] sm:$0xff]  ;;  %v984_v27 = vld [vmem:[%s4461_s13 + $0x480] sm:$0xff]  ;;  %v985_v60 = vld [vmem:[%s4461_s13 + $0x488] sm:$0xff] }
  0x87   : > { %v983_v44 = vld [vmem:[%s4461_s13 + $0x478] sm:$0xff]  ;;  %8073 = vst [vmem:[#allocation114_spill] sm:$0xff] %v5179_v54  ;;  %8074 = vst [vmem:[#allocation115_spill] sm:$0xff] %v5181_v36  ;;  %v8076_v39 = vld [vmem:[#allocation20_spill] sm:$0xff]  ;;  %v5229_v59 = vsub.f32 %v600_v4, %v984_v27  ;;  %v5231_v32 = vsub.f32 %v601_v21, %v985_v60 }
  0x88   : > { %8075 = vst [vmem:[#allocation116_spill] sm:$0xff] %v5183_v22  ;;  %v5187_v11 = vmul.f32 %v8076_v39, %v8076_v39  ;;  %v608_v58 = vld [vmem:[%s4456_s10 + $0x4c0] sm:$0xff]  ;;  %v609_v17 = vld [vmem:[%s4456_s10 + $0x4c8] sm:$0xff]  ;;  %v610_v14 = vld [vmem:[%s4456_s10 + $0x4d0] sm:$0xff]  ;;  %v5227_v43 = vsub.f32 %v599_v33, %v983_v44 }
  0x89   : > { %v986_v45 = vld [vmem:[%s4461_s13 + $0x490] sm:$0xff]  ;;  %v987_v46 = vld [vmem:[%s4461_s13 + $0x498] sm:$0xff]  ;;  %v988_v6 = vld [vmem:[%s4461_s13 + $0x4a0] sm:$0xff]  ;;  %8078 = vst [vmem:[#allocation117_spill] sm:$0xff] %v5195_v25 }
  0x8a   : > { %8077 = vst [vmem:[#allocation20_spill] sm:$0xff] %v5187_v11  ;;  %8079 = vst [vmem:[#allocation118_spill] sm:$0xff] %v5197_v23  ;;  %v8081_v10 = vld [vmem:[#allocation21_spill] sm:$0xff]  ;;  %v611_v39 = vld [vmem:[%s4456_s10 + $0x4d8] sm:$0xff]  ;;  %v5243_v44 = vsub.f32 %v602_v29, %v986_v45  ;;  %v5245_v4 = vsub.f32 %v603_v12, %v987_v46  ;;  %v5247_v21 = vsub.f32 %v604_v31, %v988_v6 }
  0x8b   : > { %8080 = vst [vmem:[#allocation119_spill] sm:$0xff] %v5199_v37  ;;  %v5203_v2 = vmul.f32 %v8081_v10, %v8081_v10  ;;  %v612_v22 = vld [vmem:[%s4456_s10 + $0x4e0] sm:$0xff]  ;;  %v613_v36 = vld [vmem:[%s4456_s10 + $0x4e8] sm:$0xff]  ;;  %v990_v11 = vld [vmem:[%s4461_s13 + $0x4b0] sm:$0xff]  ;;  %v5267_v46 = vmul.f32 %v4715_v1, %v4715_v1 }
  0x8c   : > { %v989_v54 = vld [vmem:[%s4461_s13 + $0x4a8] sm:$0xff]  ;;  %v991_v5 = vld [vmem:[%s4461_s13 + $0x4b8] sm:$0xff]  ;;  %8082 = vst [vmem:[#allocation21_spill] sm:$0xff] %v5211_v8  ;;  %8083 = vst [vmem:[#allocation120_spill] sm:$0xff] %v5213_v24  ;;  %v5261_v12 = vsub.f32 %v606_v63, %v990_v11 }
  0x8d   : > { %8084 = vst [vmem:[#allocation121_spill] sm:$0xff] %v5215_v35  ;;  %8085 = vst [vmem:[#allocation122_spill] sm:$0xff] %v5219_v30  ;;  %v614_v3 = vld [vmem:[%s4456_s10 + $0x4f0] sm:$0xff]  ;;  %v615_v10 = vld [vmem:[%s4456_s10 + $0x4f8] sm:$0xff]  ;;  %v5259_v45 = vsub.f32 %v605_v57, %v989_v54  ;;  %v5263_v31 = vsub.f32 %v607_v13, %v991_v5 }
  0x8e   : > { %v616_v37 = vld [vmem:[%s4456_s10 + $0x500] sm:$0xff]  ;;  %v993_v25 = vld [vmem:[%s4461_s13 + $0x4c8] sm:$0xff]  ;;  %v994_v26 = vld [vmem:[%s4461_s13 + $0x4d0] sm:$0xff]  ;;  %8086 = vst [vmem:[#allocation123_spill] sm:$0xff] %v5227_v43 }
  0x8f   : > { %v992_v23 = vld [vmem:[%s4461_s13 + $0x4c0] sm:$0xff]  ;;  %8087 = vst [vmem:[#allocation124_spill] sm:$0xff] %v5229_v59  ;;  %8088 = vst [vmem:[#allocation125_spill] sm:$0xff] %v5231_v32  ;;  %v617_v0 = vld [vmem:[%s4456_s10 + $0x508] sm:$0xff]  ;;  %v5277_v63 = vsub.f32 %v609_v17, %v993_v25  ;;  %v5279_v13 = vsub.f32 %v610_v14, %v994_v26 }
  0x90   : > { %v8089_v55 = vld [vmem:[#allocation23_spill] sm:$0xff]  ;;  %v618_v35 = vld [vmem:[%s4456_s10 + $0x510] sm:$0xff]  ;;  %v997_v33 = vld [vmem:[%s4461_s13 + $0x4e8] sm:$0xff]  ;;  %8091 = vst [vmem:[#allocation126_spill] sm:$0xff] %v5243_v44  ;;  %v5275_v54 = vsub.f32 %v608_v58, %v992_v23 }
  0x91   : > { %v5235_v47 = vmul.f32 %v8089_v55, %v8089_v55  ;;  %v619_v24 = vld [vmem:[%s4456_s10 + $0x518] sm:$0xff]  ;;  %v996_v30 = vld [vmem:[%s4461_s13 + $0x4e0] sm:$0xff]  ;;  %8092 = vst [vmem:[#allocation127_spill] sm:$0xff] %v5245_v4  ;;  %8093 = vst [vmem:[#allocation128_spill] sm:$0xff] %v5247_v21  ;;  %v5295_v14 = vsub.f32 %v613_v36, %v997_v33 }
  0x92   : > { %v995_v8 = vld [vmem:[%s4461_s13 + $0x4d8] sm:$0xff]  ;;  %v8094_v27 = vld [vmem:[#allocation24_spill] sm:$0xff]  ;;  %v622_v59 = vld [vmem:[%s4456_s10 + $0x530] sm:$0xff]  ;;  %8096 = vst [vmem:[#allocation129_spill] sm:$0xff] %v5261_v12  ;;  %v5293_v17 = vsub.f32 %v612_v22, %v996_v30  ;;  %v5315_v30 = vmul.f32 %v4731_v20, %v4731_v20 }
  0x93   : > { %8090 = vst [vmem:[#allocation23_spill] sm:$0xff] %v5235_v47  ;;  %v5251_v60 = vmul.f32 %v8094_v27, %v8094_v27  ;;  %v620_v55 = vld [vmem:[%s4456_s10 + $0x520] sm:$0xff]  ;;  %v621_v32 = vld [vmem:[%s4456_s10 + $0x528] sm:$0xff]  ;;  %v998_v43 = vld [vmem:[%s4461_s13 + $0x4f0] sm:$0xff]  ;;  %v5291_v23 = vsub.f32 %v611_v39, %v995_v8 }
  0x94   : > { %v999_v47 = vld [vmem:[%s4461_s13 + $0x4f8] sm:$0xff]  ;;  %v1000_v29 = vld [vmem:[%s4461_s13 + $0x500] sm:$0xff]  ;;  %8095 = vst [vmem:[#allocation24_spill] sm:$0xff] %v5259_v45  ;;  %8097 = vst [vmem:[#allocation130_spill] sm:$0xff] %v5263_v31  ;;  %v5307_v8 = vsub.f32 %v614_v3, %v998_v43 }
  0x95   : > { %8098 = vst [vmem:[#allocation131_spill] sm:$0xff] %v5267_v46  ;;  %v623_v6 = vld [vmem:[%s4456_s10 + $0x538] sm:$0xff]  ;;  %v624_v27 = vld [vmem:[%s4456_s10 + $0x540] sm:$0xff]  ;;  %v625_v21 = vld [vmem:[%s4456_s10 + $0x548] sm:$0xff]  ;;  %v5309_v22 = vsub.f32 %v615_v10, %v999_v47  ;;  %v5311_v36 = vsub.f32 %v616_v37, %v1000_v29 }
  0x96   : > { %v1001_v4 = vld [vmem:[%s4461_s13 + $0x508] sm:$0xff]  ;;  %v1002_v44 = vld [vmem:[%s4461_s13 + $0x510] sm:$0xff]  ;;  %v1003_v57 = vld [vmem:[%s4461_s13 + $0x518] sm:$0xff]  ;;  %8099 = vst [vmem:[#allocation132_spill] sm:$0xff] %v5275_v54 }
  0x97   : > { %8100 = vst [vmem:[#allocation133_spill] sm:$0xff] %v5277_v63  ;;  %8101 = vst [vmem:[#allocation134_spill] sm:$0xff] %v5279_v13  ;;  %v8102_v11 = vld [vmem:[#allocation26_spill] sm:$0xff]  ;;  %v628_v12 = vld [vmem:[%s4456_s10 + $0x560] sm:$0xff]  ;;  %v5323_v43 = vsub.f32 %v617_v0, %v1001_v4  ;;  %v5325_v10 = vsub.f32 %v618_v35, %v1002_v44  ;;  %v5327_v37 = vsub.f32 %v619_v24, %v1003_v57 }
  0x98   : > { %v5283_v1 = vmul.f32 %v8102_v11, %v8102_v11  ;;  %v626_v5 = vld [vmem:[%s4456_s10 + $0x550] sm:$0xff]  ;;  %v627_v31 = vld [vmem:[%s4456_s10 + $0x558] sm:$0xff]  ;;  %v1004_v45 = vld [vmem:[%s4461_s13 + $0x520] sm:$0xff]  ;;  %8104 = vst [vmem:[#allocation135_spill] sm:$0xff] %v5291_v23 }
  0x99   : > { %v1005_v46 = vld [vmem:[%s4461_s13 + $0x528] sm:$0xff]  ;;  %v1006_v58 = vld [vmem:[%s4461_s13 + $0x530] sm:$0xff]  ;;  %8105 = vst [vmem:[#allocation136_spill] sm:$0xff] %v5293_v17  ;;  %8106 = vst [vmem:[#allocation137_spill] sm:$0xff] %v5295_v14  ;;  %v5339_v4 = vsub.f32 %v620_v55, %v1004_v45 }
  0x9a   : > { %8103 = vst [vmem:[#allocation26_spill] sm:$0xff] %v5283_v1  ;;  %v8107_v25 = vld [vmem:[#allocation27_spill] sm:$0xff]  ;;  %v629_v11 = vld [vmem:[%s4456_s10 + $0x568] sm:$0xff]  ;;  %v630_v13 = vld [vmem:[%s4456_s10 + $0x570] sm:$0xff]  ;;  %v5341_v35 = vsub.f32 %v621_v32, %v1005_v46  ;;  %v5343_v24 = vsub.f32 %v622_v59, %v1006_v58  ;;  %v5363_v46 = vmul.f32 %v4747_v18, %v4747_v18 }
  0x9b   : > { %v5299_v26 = vmul.f32 %v8107_v25, %v8107_v25  ;;  %v631_v63 = vld [vmem:[%s4456_s10 + $0x578] sm:$0xff]  ;;  %v1008_v1 = vld [vmem:[%s4461_s13 + $0x540] sm:$0xff]  ;;  %v1009_v39 = vld [vmem:[%s4461_s13 + $0x548] sm:$0xff]  ;;  %8108 = vst [vmem:[#allocation27_spill] sm:$0xff] %v5307_v8 }
  0x9c   : > { %v1007_v54 = vld [vmem:[%s4461_s13 + $0x538] sm:$0xff]  ;;  %8109 = vst [vmem:[#allocation138_spill] sm:$0xff] %v5309_v22  ;;  %8110 = vst [vmem:[#allocation139_spill] sm:$0xff] %v5311_v36  ;;  %v632_v33 = vld [vmem:[%s4456_s10 + $0x580] sm:$0xff]  ;;  %v5357_v32 = vsub.f32 %v624_v27, %v1008_v1  ;;  %v5359_v59 = vsub.f32 %v625_v21, %v1009_v39 }
  0x9d   : > { %8111 = vst [vmem:[#allocation140_spill] sm:$0xff] %v5315_v30  ;;  %v633_v25 = vld [vmem:[%s4456_s10 + $0x588] sm:$0xff]  ;;  %v634_v14 = vld [vmem:[%s4456_s10 + $0x590] sm:$0xff]  ;;  %v1011_v23 = vld [vmem:[%s4461_s13 + $0x558] sm:$0xff]  ;;  %v5355_v45 = vsub.f32 %v623_v6, %v1007_v54 }
  0x9e   : > { %v1010_v17 = vld [vmem:[%s4461_s13 + $0x550] sm:$0xff]  ;;  %v1012_v3 = vld [vmem:[%s4461_s13 + $0x560] sm:$0xff]  ;;  %8112 = vst [vmem:[#allocation141_spill] sm:$0xff] %v5323_v43  ;;  %8113 = vst [vmem:[#allocation142_spill] sm:$0xff] %v5325_v10  ;;  %v5373_v27 = vsub.f32 %v627_v31, %v1011_v23 }
  0x9f   : > { %8114 = vst [vmem:[#allocation143_spill] sm:$0xff] %v5327_v37  ;;  %v8115_v47 = vld [vmem:[#allocation29_spill] sm:$0xff]  ;;  %v635_v29 = vld [vmem:[%s4456_s10 + $0x598] sm:$0xff]  ;;  %v636_v36 = vld [vmem:[%s4456_s10 + $0x5a0] sm:$0xff]  ;;  %v5371_v54 = vsub.f32 %v626_v5, %v1010_v17  ;;  %v5375_v21 = vsub.f32 %v628_v12, %v1012_v3 }
  0xa0   : > { %v5331_v20 = vmul.f32 %v8115_v47, %v8115_v47  ;;  %v637_v22 = vld [vmem:[%s4456_s10 + $0x5a8] sm:$0xff]  ;;  %v1014_v30 = vld [vmem:[%s4461_s13 + $0x570] sm:$0xff]  ;;  %v1015_v0 = vld [vmem:[%s4461_s13 + $0x578] sm:$0xff]  ;;  %8117 = vst [vmem:[#allocation144_spill] sm:$0xff] %v5339_v4 }
  0xa1   : > { %v1013_v8 = vld [vmem:[%s4461_s13 + $0x568] sm:$0xff]  ;;  %8118 = vst [vmem:[#allocation145_spill] sm:$0xff] %v5341_v35  ;;  %8119 = vst [vmem:[#allocation146_spill] sm:$0xff] %v5343_v24  ;;  %v8120_v44 = vld [vmem:[#allocation30_spill] sm:$0xff]  ;;  %v5389_v31 = vsub.f32 %v630_v13, %v1014_v30  ;;  %v5391_v12 = vsub.f32 %v631_v63, %v1015_v0  ;;  %v5411_v30 = vmul.f32 %v4763_v28, %v4763_v28 }
  0xa2   : > { %8116 = vst [vmem:[#allocation29_spill] sm:$0xff] %v5331_v20  ;;  %v5347_v57 = vmul.f32 %v8120_v44, %v8120_v44  ;;  %v638_v47 = vld [vmem:[%s4456_s10 + $0x5b0] sm:$0xff]  ;;  %v639_v37 = vld [vmem:[%s4456_s10 + $0x5b8] sm:$0xff]  ;;  %v640_v10 = vld [vmem:[%s4456_s10 + $0x5c0] sm:$0xff]  ;;  %v5387_v17 = vsub.f32 %v629_v11, %v1013_v8 }
  0xa3   : > { %v1016_v43 = vld [vmem:[%s4461_s13 + $0x580] sm:$0xff]  ;;  %v1017_v20 = vld [vmem:[%s4461_s13 + $0x588] sm:$0xff]  ;;  %v1018_v55 = vld [vmem:[%s4461_s13 + $0x590] sm:$0xff]  ;;  %8121 = vst [vmem:[#allocation30_spill] sm:$0xff] %v5355_v45 }
  0xa4   : > { %8122 = vst [vmem:[#allocation147_spill] sm:$0xff] %v5357_v32  ;;  %8123 = vst [vmem:[#allocation148_spill] sm:$0xff] %v5359_v59  ;;  %v641_v58 = vld [vmem:[%s4456_s10 + $0x5c8] sm:$0xff]  ;;  %v642_v44 = vld [vmem:[%s4456_s10 + $0x5d0] sm:$0xff]  ;;  %v5403_v8 = vsub.f32 %v632_v33, %v1016_v43  ;;  %v5405_v13 = vsub.f32 %v633_v25, %v1017_v20  ;;  %v5407_v63 = vsub.f32 %v634_v14, %v1018_v55 }
  0xa5   : > { %8124 = vst [vmem:[#allocation149_spill] sm:$0xff] %v5363_v46  ;;  %v643_v24 = vld [vmem:[%s4456_s10 + $0x5d8] sm:$0xff]  ;;  %v1020_v4 = vld [vmem:[%s4461_s13 + $0x5a0] sm:$0xff]  ;;  %v1021_v6 = vld [vmem:[%s4461_s13 + $0x5a8] sm:$0xff] }
  0xa6   : > { %v1019_v35 = vld [vmem:[%s4461_s13 + $0x598] sm:$0xff]  ;;  %8125 = vst [vmem:[#allocation150_spill] sm:$0xff] %v5371_v54  ;;  %8126 = vst [vmem:[#allocation151_spill] sm:$0xff] %v5373_v27  ;;  %v8128_v1 = vld [vmem:[#allocation32_spill] sm:$0xff]  ;;  %v5421_v25 = vsub.f32 %v636_v36, %v1020_v4  ;;  %v5423_v14 = vsub.f32 %v637_v22, %v1021_v6 }
  0xa7   : > { %8127 = vst [vmem:[#allocation152_spill] sm:$0xff] %v5375_v21  ;;  %v5379_v18 = vmul.f32 %v8128_v1, %v8128_v1  ;;  %v644_v39 = vld [vmem:[%s4456_s10 + $0x5e0] sm:$0xff]  ;;  %v645_v59 = vld [vmem:[%s4456_s10 + $0x5e8] sm:$0xff]  ;;  %v646_v32 = vld [vmem:[%s4456_s10 + $0x5f0] sm:$0xff]  ;;  %v5419_v43 = vsub.f32 %v635_v29, %v1019_v35 }
  0xa8   : > { %v1022_v45 = vld [vmem:[%s4461_s13 + $0x5b0] sm:$0xff]  ;;  %v1023_v46 = vld [vmem:[%s4461_s13 + $0x5b8] sm:$0xff]  ;;  %v1024_v5 = vld [vmem:[%s4461_s13 + $0x5c0] sm:$0xff]  ;;  %8130 = vst [vmem:[#allocation153_spill] sm:$0xff] %v5387_v17 }
  0xa9   : > { %8129 = vst [vmem:[#allocation32_spill] sm:$0xff] %v5379_v18  ;;  %8131 = vst [vmem:[#allocation154_spill] sm:$0xff] %v5389_v31  ;;  %v8133_v23 = vld [vmem:[#allocation33_spill] sm:$0xff]  ;;  %v647_v1 = vld [vmem:[%s4456_s10 + $0x5f8] sm:$0xff]  ;;  %v5435_v35 = vsub.f32 %v638_v47, %v1022_v45  ;;  %v5437_v36 = vsub.f32 %v639_v37, %v1023_v46  ;;  %v5439_v22 = vsub.f32 %v640_v10, %v1024_v5 }
  0xaa   : > { %8132 = vst [vmem:[#allocation155_spill] sm:$0xff] %v5391_v12  ;;  %v5395_v3 = vmul.f32 %v8133_v23, %v8133_v23  ;;  %v648_v21 = vld [vmem:[%s4456_s10 + $0x600] sm:$0xff]  ;;  %v649_v27 = vld [vmem:[%s4456_s10 + $0x608] sm:$0xff]  ;;  %v1026_v18 = vld [vmem:[%s4461_s13 + $0x5d0] sm:$0xff]  ;;  %v5459_v46 = vmul.f32 %v4779_v38, %v4779_v38 }
  0xab   : > { %v1025_v54 = vld [vmem:[%s4461_s13 + $0x5c8] sm:$0xff]  ;;  %v1027_v11 = vld [vmem:[%s4461_s13 + $0x5d8] sm:$0xff]  ;;  %8134 = vst [vmem:[#allocation33_spill] sm:$0xff] %v5403_v8  ;;  %8135 = vst [vmem:[#allocation156_spill] sm:$0xff] %v5405_v13  ;;  %v5453_v37 = vsub.f32 %v642_v44, %v1026_v18 }
  0xac   : > { %8136 = vst [vmem:[#allocation157_spill] sm:$0xff] %v5407_v63  ;;  %8137 = vst [vmem:[#allocation158_spill] sm:$0xff] %v5411_v30  ;;  %v650_v0 = vld [vmem:[%s4456_s10 + $0x610] sm:$0xff]  ;;  %v651_v23 = vld [vmem:[%s4456_s10 + $0x618] sm:$0xff]  ;;  %v5451_v45 = vsub.f32 %v641_v58, %v1025_v54  ;;  %v5455_v10 = vsub.f32 %v643_v24, %v1027_v11 }
  0xad   : > { %v652_v12 = vld [vmem:[%s4456_s10 + $0x620] sm:$0xff]  ;;  %v1029_v17 = vld [vmem:[%s4461_s13 + $0x5e8] sm:$0xff]  ;;  %v1030_v33 = vld [vmem:[%s4461_s13 + $0x5f0] sm:$0xff]  ;;  %8138 = vst [vmem:[#allocation159_spill] sm:$0xff] %v5419_v43 }
  0xae   : > { %v1028_v31 = vld [vmem:[%s4461_s13 + $0x5e0] sm:$0xff]  ;;  %8139 = vst [vmem:[#allocation160_spill] sm:$0xff] %v5421_v25  ;;  %8140 = vst [vmem:[#allocation161_spill] sm:$0xff] %v5423_v14  ;;  %v653_v55 = vld [vmem:[%s4456_s10 + $0x628] sm:$0xff]  ;;  %v5469_v44 = vsub.f32 %v645_v59, %v1029_v17  ;;  %v5471_v24 = vsub.f32 %v646_v32, %v1030_v33 }
  0xaf   : > { %v8141_v20 = vld [vmem:[#allocation35_spill] sm:$0xff]  ;;  %v654_v63 = vld [vmem:[%s4456_s10 + $0x630] sm:$0xff]  ;;  %v1033_v29 = vld [vmem:[%s4461_s13 + $0x608] sm:$0xff]  ;;  %8143 = vst [vmem:[#allocation162_spill] sm:$0xff] %v5435_v35  ;;  %v5467_v54 = vsub.f32 %v644_v39, %v1028_v31 }
  0xb0   : > { %v5427_v28 = vmul.f32 %v8141_v20, %v8141_v20  ;;  %v655_v13 = vld [vmem:[%s4456_s10 + $0x638] sm:$0xff]  ;;  %v1032_v30 = vld [vmem:[%s4461_s13 + $0x600] sm:$0xff]  ;;  %8144 = vst [vmem:[#allocation163_spill] sm:$0xff] %v5437_v36  ;;  %8145 = vst [vmem:[#allocation164_spill] sm:$0xff] %v5439_v22  ;;  %v5487_v32 = vsub.f32 %v649_v27, %v1033_v29 }
  0xb1   : > { %v1031_v8 = vld [vmem:[%s4461_s13 + $0x5f8] sm:$0xff]  ;;  %v8146_v4 = vld [vmem:[#allocation36_spill] sm:$0xff]  ;;  %v658_v25 = vld [vmem:[%s4456_s10 + $0x650] sm:$0xff]  ;;  %8148 = vst [vmem:[#allocation165_spill] sm:$0xff] %v5453_v37  ;;  %v5485_v59 = vsub.f32 %v648_v21, %v1032_v30  ;;  %v5507_v30 = vmul.f32 %v4795_v53, %v4795_v53 }
  0xb2   : > { %8142 = vst [vmem:[#allocation35_spill] sm:$0xff] %v5427_v28  ;;  %v5443_v6 = vmul.f32 %v8146_v4, %v8146_v4  ;;  %v656_v20 = vld [vmem:[%s4456_s10 + $0x640] sm:$0xff]  ;;  %v657_v14 = vld [vmem:[%s4456_s10 + $0x648] sm:$0xff]  ;;  %v1034_v43 = vld [vmem:[%s4461_s13 + $0x610] sm:$0xff]  ;;  %v5483_v31 = vsub.f32 %v647_v1, %v1031_v8 }
  0xb3   : > { %v1035_v28 = vld [vmem:[%s4461_s13 + $0x618] sm:$0xff]  ;;  %v1036_v47 = vld [vmem:[%s4461_s13 + $0x620] sm:$0xff]  ;;  %8147 = vst [vmem:[#allocation36_spill] sm:$0xff] %v5451_v45  ;;  %8149 = vst [vmem:[#allocation166_spill] sm:$0xff] %v5455_v10  ;;  %v5499_v8 = vsub.f32 %v650_v0, %v1034_v43 }
  0xb4   : > { %8150 = vst [vmem:[#allocation167_spill] sm:$0xff] %v5459_v46  ;;  %v659_v5 = vld [vmem:[%s4456_s10 + $0x658] sm:$0xff]  ;;  %v660_v4 = vld [vmem:[%s4456_s10 + $0x660] sm:$0xff]  ;;  %v661_v22 = vld [vmem:[%s4456_s10 + $0x668] sm:$0xff]  ;;  %v5501_v21 = vsub.f32 %v651_v23, %v1035_v28  ;;  %v5503_v27 = vsub.f32 %v652_v12, %v1036_v47 }
  0xb5   : > { %v1037_v36 = vld [vmem:[%s4461_s13 + $0x628] sm:$0xff]  ;;  %v1038_v35 = vld [vmem:[%s4461_s13 + $0x630] sm:$0xff]  ;;  %v1039_v58 = vld [vmem:[%s4461_s13 + $0x638] sm:$0xff]  ;;  %8151 = vst [vmem:[#allocation168_spill] sm:$0xff] %v5467_v54 }
  0xb6   : > { %8152 = vst [vmem:[#allocation169_spill] sm:$0xff] %v5469_v44  ;;  %8153 = vst [vmem:[#allocation170_spill] sm:$0xff] %v5471_v24  ;;  %v8154_v18 = vld [vmem:[#allocation38_spill] sm:$0xff]  ;;  %v664_v37 = vld [vmem:[%s4456_s10 + $0x680] sm:$0xff]  ;;  %v5515_v43 = vsub.f32 %v653_v55, %v1037_v36  ;;  %v5517_v23 = vsub.f32 %v654_v63, %v1038_v35  ;;  %v5519_v12 = vsub.f32 %v655_v13, %v1039_v58 }
  0xb7   : > { %v5475_v38 = vmul.f32 %v8154_v18, %v8154_v18  ;;  %v662_v11 = vld [vmem:[%s4456_s10 + $0x670] sm:$0xff]  ;;  %v663_v10 = vld [vmem:[%s4456_s10 + $0x678] sm:$0xff]  ;;  %v1040_v45 = vld [vmem:[%s4461_s13 + $0x640] sm:$0xff]  ;;  %8156 = vst [vmem:[#allocation171_spill] sm:$0xff] %v5483_v31 }
  0xb8   : > { %v1041_v46 = vld [vmem:[%s4461_s13 + $0x648] sm:$0xff]  ;;  %v1042_v39 = vld [vmem:[%s4461_s13 + $0x650] sm:$0xff]  ;;  %8157 = vst [vmem:[#allocation172_spill] sm:$0xff] %v5485_v59  ;;  %8158 = vst [vmem:[#allocation173_spill] sm:$0xff] %v5487_v32 }
  0xb9   : > { %8155 = vst [vmem:[#allocation38_spill] sm:$0xff] %v5475_v38  ;;  %v8159_v17 = vld [vmem:[#allocation39_spill] sm:$0xff]  ;;  %v665_v18 = vld [vmem:[%s4456_s10 + $0x688] sm:$0xff]  ;;  %v666_v24 = vld [vmem:[%s4456_s10 + $0x690] sm:$0xff]  ;;  %v5533_v55 = vsub.f32 %v658_v25, %v1042_v39  ;;  %v5551_v25 = vmul.f32 %v4811_v9, %v4811_v9 }
  0xba   : > { %v5491_v33 = vmul.f32 %v8159_v17, %v8159_v17  ;;  %v667_v44 = vld [vmem:[%s4456_s10 + $0x698] sm:$0xff]  ;;  %v1044_v38 = vld [vmem:[%s4461_s13 + $0x660] sm:$0xff]  ;;  %v1045_v1 = vld [vmem:[%s4461_s13 + $0x668] sm:$0xff]  ;;  %8161 = vst [vmem:[#allocation174_spill] sm:$0xff] %v5499_v8 }
  0xbb   : > { %v1043_v54 = vld [vmem:[%s4461_s13 + $0x658] sm:$0xff]  ;;  %8162 = vst [vmem:[#allocation175_spill] sm:$0xff] %v5501_v21  ;;  %8163 = vst [vmem:[#allocation176_spill] sm:$0xff] %v5503_v27  ;;  %v668_v29 = vld [vmem:[%s4456_s10 + $0x6a0] sm:$0xff] }
  0xbc   : > { %8160 = vst [vmem:[#allocation39_spill] sm:$0xff] %v5491_v33  ;;  %8164 = vst [vmem:[#allocation177_spill] sm:$0xff] %v5507_v30  ;;  %v669_v17 = vld [vmem:[%s4456_s10 + $0x6a8] sm:$0xff]  ;;  %v670_v32 = vld [vmem:[%s4456_s10 + $0x6b0] sm:$0xff]  ;;  %v5529_v30 = vsub.f32 %v656_v20, %v1040_v45  ;;  %v5531_v33 = vsub.f32 %v657_v14, %v1041_v46  ;;  %v5547_v20 = vsub.f32 %v661_v22, %v1045_v1 }
  0xbd   : > { %v1046_v59 = vld [vmem:[%s4461_s13 + $0x670] sm:$0xff]  ;;  %v1047_v31 = vld [vmem:[%s4461_s13 + $0x678] sm:$0xff]  ;;  %v1048_v0 = vld [vmem:[%s4461_s13 + $0x680] sm:$0xff]  ;;  %8165 = vst [vmem:[#allocation178_spill] sm:$0xff] %v5517_v23  ;;  %v5545_v23 = vsub.f32 %v660_v4, %v1044_v38 }
  0xbe   : > { %8166 = vst [vmem:[#allocation179_spill] sm:$0xff] %v5519_v12  ;;  %v8167_v28 = vld [vmem:[#allocation41_spill] sm:$0xff]  ;;  %v671_v47 = vld [vmem:[%s4456_s10 + $0x6b8] sm:$0xff]  ;;  %v672_v35 = vld [vmem:[%s4456_s10 + $0x6c0] sm:$0xff]  ;;  %v5543_v12 = vsub.f32 %v659_v5, %v1043_v54  ;;  %v5556_v39 = vsub.f32 %v662_v11, %v1046_v59 }
  0xbf   : > { %v5523_v53 = vmul.f32 %v8167_v28, %v8167_v28  ;;  %v1049_v27 = vld [vmem:[%s4461_s13 + $0x688] sm:$0xff]  ;;  %v1050_v21 = vld [vmem:[%s4461_s13 + $0x690] sm:$0xff]  ;;  %v1051_v8 = vld [vmem:[%s4461_s13 + $0x698] sm:$0xff]  ;;  %8168 = vst [vmem:[#allocation41_spill] sm:$0xff] %v5533_v55  ;;  %v5560_v55 = vsub.f32 %v664_v37, %v1048_v0 }
  0xc0   : > { %v8169_v63 = vld [vmem:[#allocation42_spill] sm:$0xff]  ;;  %v1052_v36 = vld [vmem:[%s4461_s13 + $0x6a0] sm:$0xff]  ;;  %v1053_v58 = vld [vmem:[%s4461_s13 + $0x6a8] sm:$0xff]  ;;  %8171 = vst [vmem:[#allocation180_spill] sm:$0xff] %v5547_v20  ;;  %v5569_v38 = vsub.f32 %v665_v18, %v1049_v27  ;;  %v5571_v1 = vsub.f32 %v666_v24, %v1050_v21  ;;  %v5573_v11 = vsub.f32 %v667_v44, %v1051_v8  ;;  %v5587_v18 = vmul.f32 %v4827_v15, %v4827_v15 }
  0xc1   : > { %v5537_v13 = vmul.f32 %v8169_v63, %v8169_v63  ;;  %v1054_v28 = vld [vmem:[%s4461_s13 + $0x6b0] sm:$0xff]  ;;  %8170 = vst [vmem:[#allocation42_spill] sm:$0xff] %v5545_v23  ;;  %v673_v14 = vld [vmem:[%s4456_s10 + $0x6c8] sm:$0xff]  ;;  %v1055_v46 = vld [vmem:[%s4461_s13 + $0x6b8] sm:$0xff]  ;;  %v5558_v63 = vsub.f32 %v663_v10, %v1047_v31  ;;  %v5579_v31 = vsub.f32 %v668_v29, %v1052_v36  ;;  %v5581_v59 = vsub.f32 %v669_v17, %v1053_v58 }
  0xc2   : > { %v674_v45 = vld [vmem:[%s4456_s10 + $0x6d0] sm:$0xff]  ;;  %8172 = vst [vmem:[#allocation181_spill] sm:$0xff] %v5556_v39  ;;  %8174 = vst [vmem:[#allocation183_spill] sm:$0xff] %v5560_v55  ;;  %v8175_v5 = vld [vmem:[#allocation44_spill] sm:$0xff]  ;;  %v5583_v0 = vsub.f32 %v670_v32, %v1054_v28  ;;  %v5591_v8 = vsub.f32 %v671_v47, %v1055_v46 }
  0xc3   : > { %8173 = vst [vmem:[#allocation182_spill] sm:$0xff] %v5558_v63  ;;  %v5564_v4 = vmul.f32 %v8175_v5, %v8175_v5  ;;  %v1056_v22 = vld [vmem:[%s4461_s13 + $0x6c0] sm:$0xff]  ;;  %v1057_v54 = vld [vmem:[%s4461_s13 + $0x6c8] sm:$0xff]  ;;  %v1058_v9 = vld [vmem:[%s4461_s13 + $0x6d0] sm:$0xff] }
  0xc4   : > { %8176 = vst [vmem:[#allocation44_spill] sm:$0xff] %v5569_v38  ;;  %8177 = vst [vmem:[#allocation184_spill] sm:$0xff] %v5571_v1  ;;  %v8179_v10 = vld [vmem:[#allocation45_spill] sm:$0xff]  ;;  %v675_v24 = vld [vmem:[%s4456_s10 + $0x6d8] sm:$0xff]  ;;  %v5606_v47 = vsub.f32 %v673_v14, %v1057_v54  ;;  %v5608_v46 = vsub.f32 %v674_v45, %v1058_v9 }
  0xc5   : > { %8178 = vst [vmem:[#allocation185_spill] sm:$0xff] %v5573_v11  ;;  %v5577_v37 = vmul.f32 %v8179_v10, %v8179_v10  ;;  %8180 = vst [vmem:[#allocation45_spill] sm:$0xff] %v5579_v31  ;;  %v1059_v44 = vld [vmem:[%s4461_s13 + $0x6d8] sm:$0xff]  ;;  %v8185_v29 = vld [vmem:[#allocation4_spill] sm:$0xff] }
  0xc6   : > { %8181 = vst [vmem:[#allocation186_spill] sm:$0xff] %v5581_v59  ;;  %8182 = vst [vmem:[#allocation187_spill] sm:$0xff] %v5583_v0  ;;  %v8184_v21 = vld [vmem:[#allocation47_spill] sm:$0xff]  ;;  %v8187_v58 = vld [vmem:[#allocation5_spill] sm:$0xff]  ;;  %v5604_v0 = vsub.f32 %v672_v35, %v1056_v22  ;;  %v5622_v9 = vsub.f32 %v675_v24, %v1059_v44 }
  0xc7   : > { %8183 = vst [vmem:[#allocation188_spill] sm:$0xff] %v5591_v8  ;;  %v5595_v27 = vmul.f32 %v8184_v21, %v8184_v21  ;;  %v8186_v17 = vld [vmem:[#allocation7_spill] sm:$0xff]  ;;  %v8188_v32 = vld [vmem:[#allocation8_spill] sm:$0xff]  ;;  %8190 = vst [vmem:[#allocation4_spill] sm:$0xff] %v5606_v47 }
  0xc8   : > { %v1993_v36 = vadd.f32 %v8186_v17, %v8185_v29  ;;  %v2126_v28 = vadd.f32 %v8188_v32, %v8187_v58  ;;  %v676_v5 = vld [vmem:[%s4456_s10 + $0x6e0] sm:$0xff]  ;;  %v677_v15 = vld [vmem:[%s4456_s10 + $0x6e8] sm:$0xff]  ;;  %8189 = vst [vmem:[#allocation47_spill] sm:$0xff] %v5604_v0  ;;  %8191 = vst [vmem:[#allocation7_spill] sm:$0xff] %v5608_v46 }
  0xc9   : > { %v1060_v10 = vld [vmem:[%s4461_s13 + $0x6e0] sm:$0xff]  ;;  %v678_v21 = vld [vmem:[%s4456_s10 + $0x6f0] sm:$0xff]  ;;  %v1061_v29 = vld [vmem:[%s4461_s13 + $0x6e8] sm:$0xff]  ;;  %8196 = vst [vmem:[#allocation5_spill] sm:$0xff] %v5622_v9 }
  0xca   : > { %v1062_v17 = vld [vmem:[%s4461_s13 + $0x6f0] sm:$0xff]  ;;  %v8193_v32 = vld [vmem:[#allocation11_spill] sm:$0xff]  ;;  %v8197_v46 = vld [vmem:[#allocation48_spill] sm:$0xff]  ;;  %v5633_v0 = vsub.f32 %v676_v5, %v1060_v10  ;;  %v5642_v55 = vsub.f32 %v677_v15, %v1061_v29  ;;  %v5648_v5 = vmul.f32 %v4843_v48, %v4843_v48 }
  0xcb   : > { %v8192_v8 = vld [vmem:[#allocation10_spill] sm:$0xff]  ;;  %v2127_v59 = vadd.f32 %v2126_v28, %v8193_v32  ;;  %v8195_v35 = vld [vmem:[#allocation9_spill] sm:$0xff]  ;;  %v680_v22 = vld [vmem:[%s4456_s10 + $0x700] sm:$0xff]  ;;  %v5626_v47 = vmul.f32 %v8197_v46, %v8197_v46  ;;  %v5644_v63 = vsub.f32 %v678_v21, %v1062_v17 }
  0xcc   : > { %v1994_v58 = vadd.f32 %v1993_v36, %v8192_v8  ;;  %v8194_v31 = vld [vmem:[#allocation6_spill] sm:$0xff]  ;;  %v2261_v14 = vsel %vm2259_vm2, %v8195_v35, 0.0  ;;  %v8198_v36 = vld [vmem:[#allocation13_spill] sm:$0xff]  ;;  %v1064_v32 = vld [vmem:[%s4461_s13 + $0x700] sm:$0xff]  ;;  %8199 = vst [vmem:[#allocation8_spill] sm:$0xff] %v5633_v0 }
  0xcd   : > { %v2260_v11 = vsel %vm2259_vm2, %v8194_v31, 0.0  ;;  %v679_v45 = vld [vmem:[%s4456_s10 + $0x6f8] sm:$0xff]  ;;  %v2263_v31 = vsel %vm2259_vm2, %v8198_v36, 0.0  ;;  %v681_v28 = vld [vmem:[%s4456_s10 + $0x708] sm:$0xff]  ;;  %v1066_v36 = vld [vmem:[%s4461_s13 + $0x710] sm:$0xff]  ;;  %8203 = vst [vmem:[#allocation10_spill] sm:$0xff] %v5642_v55 }
  0xce   : > { %v1063_v54 = vld [vmem:[%s4461_s13 + $0x6f8] sm:$0xff]  ;;  %v2262_v8 = vadd.f32 %v2261_v14, %v2260_v11  ;;  %v1065_v35 = vld [vmem:[%s4461_s13 + $0x708] sm:$0xff]  ;;  %v682_v11 = vld [vmem:[%s4456_s10 + $0x710] sm:$0xff]  ;;  %8204 = vst [vmem:[#allocation11_spill] sm:$0xff] %v5644_v63 }
  0xcf   : > { %v8200_v1 = vld [vmem:[#allocation16_spill] sm:$0xff]  ;;  %v8201_v24 = vld [vmem:[#allocation19_spill] sm:$0xff]  ;;  %v8202_v9 = vld [vmem:[#allocation22_spill] sm:$0xff]  ;;  %v5664_v63 = vsub.f32 %v681_v28, %v1065_v35 }
  0xd0   : > { %v1995_v38 = vadd.f32 %v1994_v58, %v8200_v1  ;;  %v2128_v44 = vadd.f32 %v2127_v59, %v8201_v24  ;;  %v2265_v46 = vsel %vm2259_vm2, %v8202_v9, 0.0  ;;  %v683_v14 = vld [vmem:[%s4456_s10 + $0x718] sm:$0xff]  ;;  %v2264_v1 = vadd.f32 %v2263_v31, %v2262_v8  ;;  %v684_v59 = vld [vmem:[%s4456_s10 + $0x720] sm:$0xff]  ;;  %v8206_v24 = vld [vmem:[#allocation25_spill] sm:$0xff] }
  0xd1   : > { %v1067_v10 = vld [vmem:[%s4461_s13 + $0x718] sm:$0xff]  ;;  %v1068_v58 = vld [vmem:[%s4461_s13 + $0x720] sm:$0xff]  ;;  %v5653_v9 = vsub.f32 %v679_v45, %v1063_v54  ;;  %v685_v48 = vld [vmem:[%s4456_s10 + $0x728] sm:$0xff]  ;;  %v5662_v31 = vsub.f32 %v680_v22, %v1064_v32  ;;  %8210 = vst [vmem:[#allocation48_spill] sm:$0xff] %v5664_v63 }
  0xd2   : > { %v1996_v0 = vadd.f32 %v1995_v38, %v8206_v24  ;;  %v8207_v39 = vld [vmem:[#allocation28_spill] sm:$0xff]  ;;  %v8208_v29 = vld [vmem:[#allocation31_spill] sm:$0xff]  ;;  %v686_v17 = vld [vmem:[%s4456_s10 + $0x730] sm:$0xff]  ;;  %v2266_v38 = vadd.f32 %v2265_v46, %v2264_v1  ;;  %v5673_v24 = vsub.f32 %v682_v11, %v1066_v36  ;;  %v5682_v1 = vsub.f32 %v683_v14, %v1067_v10 }
  0xd3   : > { %8205 = vst [vmem:[#allocation6_spill] sm:$0xff] %v5653_v9  ;;  %v2129_v15 = vadd.f32 %v2128_v44, %v8207_v39  ;;  %v2267_v21 = vsel %vm2259_vm2, %v8208_v29, 0.0  ;;  %v1069_v8 = vld [vmem:[%s4461_s13 + $0x728] sm:$0xff]  ;;  %8209 = vst [vmem:[#allocation9_spill] sm:$0xff] %v5662_v31  ;;  %v8211_v55 = vld [vmem:[#allocation50_spill] sm:$0xff]  ;;  %v5684_v63 = vsub.f32 %v684_v59, %v1068_v58 }
  0xd4   : > { %v5668_v45 = vmul.f32 %v8211_v55, %v8211_v55  ;;  %v687_v39 = vld [vmem:[%s4456_s10 + $0x738] sm:$0xff]  ;;  %v1070_v54 = vld [vmem:[%s4461_s13 + $0x730] sm:$0xff]  ;;  %8212 = vst [vmem:[#allocation13_spill] sm:$0xff] %v5673_v24  ;;  %v8215_v32 = vld [vmem:[#allocation40_spill] sm:$0xff] }
  0xd5   : > { %v1071_v44 = vld [vmem:[%s4461_s13 + $0x738] sm:$0xff]  ;;  %v8214_v20 = vld [vmem:[#allocation37_spill] sm:$0xff]  ;;  %v2269_v28 = vsel %vm2259_vm2, %v8215_v32, 0.0  ;;  %v688_v55 = vld [vmem:[%s4456_s10 + $0x740] sm:$0xff]  ;;  %8216 = vst [vmem:[#allocation16_spill] sm:$0xff] %v5682_v1 }
  0xd6   : > { %v8213_v29 = vld [vmem:[#allocation34_spill] sm:$0xff]  ;;  %v2130_v22 = vadd.f32 %v2129_v15, %v8214_v20  ;;  %v689_v35 = vld [vmem:[%s4456_s10 + $0x748] sm:$0xff]  ;;  %v1072_v46 = vld [vmem:[%s4461_s13 + $0x740] sm:$0xff]  ;;  %8217 = vst [vmem:[#allocation19_spill] sm:$0xff] %v5684_v63  ;;  %v5704_v63 = vsub.f32 %v687_v39, %v1071_v44  ;;  %v2273_v39 = vsel %vm2259_vm2, %v4883_v34, 0.0 }
  0xd7   : > { %v1997_v9 = vadd.f32 %v1996_v0, %v8213_v29  ;;  %v8218_v31 = vld [vmem:[#allocation51_spill] sm:$0xff]  ;;  %v2268_v0 = vadd.f32 %v2267_v21, %v2266_v38  ;;  %v690_v20 = vld [vmem:[%s4456_s10 + $0x750] sm:$0xff]  ;;  %v1073_v36 = vld [vmem:[%s4461_s13 + $0x748] sm:$0xff]  ;;  %v5693_v29 = vsub.f32 %v685_v48, %v1069_v8  ;;  %v5702_v38 = vsub.f32 %v686_v17, %v1070_v54 }
  0xd8   : > { %v5688_v11 = vmul.f32 %v8218_v31, %v8218_v31  ;;  %v1074_v15 = vld [vmem:[%s4461_s13 + $0x750] sm:$0xff]  ;;  %v8220_v32 = vld [vmem:[#allocation43_spill] sm:$0xff]  ;;  %8223 = vst [vmem:[#allocation25_spill] sm:$0xff] %v5704_v63  ;;  %v5708_v48 = vmul.f32 %v4859_v49, %v4859_v49 }
  0xd9   : > { %8219 = vst [vmem:[#allocation22_spill] sm:$0xff] %v5693_v29  ;;  %v1998_v24 = vadd.f32 %v1997_v9, %v8220_v32  ;;  %v8221_v23 = vld [vmem:[#allocation46_spill] sm:$0xff]  ;;  %v8222_v10 = vld [vmem:[#allocation49_spill] sm:$0xff]  ;;  %v692_v31 = vld [vmem:[%s4456_s10 + $0x760] sm:$0xff]  ;;  %v2270_v9 = vadd.f32 %v2269_v28, %v2268_v0  ;;  %v5713_v32 = vsub.f32 %v688_v55, %v1072_v46  ;;  %v5722_v28 = vsub.f32 %v689_v35, %v1073_v36 }
  0xda   : > { %v2131_v14 = vadd.f32 %v2130_v22, %v8221_v23  ;;  %v2271_v59 = vsel %vm2259_vm2, %v8222_v10, 0.0  ;;  %v691_v58 = vld [vmem:[%s4456_s10 + $0x758] sm:$0xff]  ;;  %v693_v23 = vld [vmem:[%s4456_s10 + $0x768] sm:$0xff]  ;;  %v1076_v8 = vld [vmem:[%s4461_s13 + $0x760] sm:$0xff]  ;;  %v5724_v0 = vsub.f32 %v690_v20, %v1074_v15  ;;  %v2275_v20 = vsel %vm2259_vm2, %v4931_v42, 0.0 }
  0xdb   : > { %v1075_v21 = vld [vmem:[%s4461_s13 + $0x758] sm:$0xff]  ;;  %v1077_v22 = vld [vmem:[%s4461_s13 + $0x768] sm:$0xff]  ;;  %v694_v49 = vld [vmem:[%s4456_s10 + $0x770] sm:$0xff] }
  0xdc   : > { %v8224_v10 = vld [vmem:[#allocation52_spill] sm:$0xff]  ;;  %v8225_v1 = vld [vmem:[#allocation55_spill] sm:$0xff]  ;;  %v1078_v44 = vld [vmem:[%s4461_s13 + $0x770] sm:$0xff]  ;;  %8226 = vst [vmem:[#allocation28_spill] sm:$0xff] %v5724_v0 }
  0xdd   : > { %v1999_v29 = vadd.f32 %v1998_v24, %v8224_v10  ;;  %v2132_v17 = vadd.f32 %v2131_v14, %v8225_v1  ;;  %v695_v54 = vld [vmem:[%s4456_s10 + $0x778] sm:$0xff]  ;;  %v8227_v63 = vld [vmem:[#allocation53_spill] sm:$0xff]  ;;  %v2272_v24 = vadd.f32 %v2271_v59, %v2270_v9  ;;  %v696_v46 = vld [vmem:[%s4456_s10 + $0x780] sm:$0xff]  ;;  %v5733_v14 = vsub.f32 %v691_v58, %v1075_v21 }
  0xde   : > { %v5728_v55 = vmul.f32 %v8227_v63, %v8227_v63  ;;  %v1079_v1 = vld [vmem:[%s4461_s13 + $0x778] sm:$0xff]  ;;  %v1080_v34 = vld [vmem:[%s4461_s13 + $0x780] sm:$0xff]  ;;  %v697_v63 = vld [vmem:[%s4456_s10 + $0x788] sm:$0xff]  ;;  %v5742_v59 = vsub.f32 %v692_v31, %v1076_v8  ;;  %v5744_v9 = vsub.f32 %v693_v23, %v1077_v22  ;;  %v5753_v21 = vsub.f32 %v694_v49, %v1078_v44 }
  0xdf   : > { %v2000_v10 = vadd.f32 %v1999_v29, %v4899_v40  ;;  %v2133_v35 = vadd.f32 %v2132_v17, %v4915_v41  ;;  %v698_v36 = vld [vmem:[%s4456_s10 + $0x790] sm:$0xff]  ;;  %v1081_v15 = vld [vmem:[%s4461_s13 + $0x788] sm:$0xff]  ;;  %v2274_v40 = vadd.f32 %v2273_v39, %v2272_v24  ;;  %v699_v41 = vld [vmem:[%s4456_s10 + $0x798] sm:$0xff]  ;;  %v2277_v23 = vsel %vm2259_vm2, %v4979_v52, 0.0 }
  0xe0   : > { %8228 = vst [vmem:[#allocation31_spill] sm:$0xff] %v5744_v9  ;;  %v8229_v0 = vld [vmem:[#allocation54_spill] sm:$0xff]  ;;  %v700_v8 = vld [vmem:[%s4456_s10 + $0x7a0] sm:$0xff]  ;;  %v701_v22 = vld [vmem:[%s4456_s10 + $0x7a8] sm:$0xff]  ;;  %v5764_v24 = vsub.f32 %v696_v46, %v1080_v34  ;;  %v2279_v46 = vsel %vm2259_vm2, %v5027_v62, 0.0 }
  0xe1   : > { %v5748_v58 = vmul.f32 %v8229_v0, %v8229_v0  ;;  %v1082_v29 = vld [vmem:[%s4461_s13 + $0x790] sm:$0xff]  ;;  %v1083_v42 = vld [vmem:[%s4461_s13 + $0x798] sm:$0xff]  ;;  %v2001_v17 = vadd.f32 %v2000_v10, %v4947_v50  ;;  %v2134_v31 = vadd.f32 %v2133_v35, %v4963_v51  ;;  %v1084_v39 = vld [vmem:[%s4461_s13 + $0x7a0] sm:$0xff]  ;;  %v5762_v0 = vsub.f32 %v695_v54, %v1079_v1 }
  0xe2   : > { %8231 = vst [vmem:[#allocation34_spill] sm:$0xff] %v5764_v24  ;;  %v8232_v9 = vld [vmem:[#allocation56_spill] sm:$0xff]  ;;  %v2276_v50 = vadd.f32 %v2275_v20, %v2274_v40  ;;  %v702_v51 = vld [vmem:[%s4456_s10 + $0x7b0] sm:$0xff]  ;;  %v5773_v10 = vsub.f32 %v697_v63, %v1081_v15  ;;  %v703_v1 = vld [vmem:[%s4456_s10 + $0x7b8] sm:$0xff]  ;;  %v5784_v40 = vsub.f32 %v699_v41, %v1083_v42 }
  0xe3   : > { %8230 = vst [vmem:[#allocation50_spill] sm:$0xff] %v5762_v0  ;;  %v5768_v49 = vmul.f32 %v8232_v9, %v8232_v9  ;;  %v1085_v44 = vld [vmem:[%s4461_s13 + $0x7a8] sm:$0xff]  ;;  %v1086_v52 = vld [vmem:[%s4461_s13 + $0x7b0] sm:$0xff]  ;;  %v2002_v35 = vadd.f32 %v2001_v17, %v4995_v19  ;;  %v2135_v54 = vadd.f32 %v2134_v31, %v5011_v61  ;;  %v704_v34 = vld [vmem:[%s4456_s10 + $0x7c0] sm:$0xff]  ;;  %v5782_v9 = vsub.f32 %v698_v36, %v1082_v29 }
  0xe4   : > { %8233 = vst [vmem:[#allocation37_spill] sm:$0xff] %v5773_v10  ;;  %v1087_v20 = vld [vmem:[%s4461_s13 + $0x7b8] sm:$0xff]  ;;  %8235 = vst [vmem:[#allocation51_spill] sm:$0xff] %v5784_v40  ;;  %v8236_v24 = vld [vmem:[#allocation57_spill] sm:$0xff]  ;;  %v2278_v19 = vadd.f32 %v2277_v23, %v2276_v50  ;;  %v5793_v17 = vsub.f32 %v700_v8, %v1084_v39  ;;  %v5802_v50 = vsub.f32 %v701_v22, %v1085_v44 }
  0xe5   : > { %8234 = vst [vmem:[#allocation40_spill] sm:$0xff] %v5782_v9  ;;  %v5788_v63 = vmul.f32 %v8236_v24, %v8236_v24  ;;  %v705_v61 = vld [vmem:[%s4456_s10 + $0x7c8] sm:$0xff]  ;;  %v1088_v15 = vld [vmem:[%s4461_s13 + $0x7c0] sm:$0xff]  ;;  %v2136_v36 = vadd.f32 %v2135_v54, %v5059_v7  ;;  %v706_v42 = vld [vmem:[%s4456_s10 + $0x7d0] sm:$0xff]  ;;  %v5804_v40 = vsub.f32 %v702_v51, %v1086_v52 }
  0xe6   : > { %v1089_v62 = vld [vmem:[%s4461_s13 + $0x7c8] sm:$0xff]  ;;  %8237 = vst [vmem:[#allocation43_spill] sm:$0xff] %v5793_v17  ;;  %v8239_v29 = vld [vmem:[#allocation95_spill] sm:$0xff]  ;;  %v1090_v23 = vld [vmem:[%s4461_s13 + $0x7d0] sm:$0xff]  ;;  %v2280_v39 = vadd.f32 %v2279_v46, %v2278_v19  ;;  %v5822_v19 = vsub.f32 %v704_v34, %v1088_v15 }
  0xe7   : > { %v8238_v31 = vld [vmem:[#allocation89_spill] sm:$0xff]  ;;  %v2281_v41 = vsel %vm2259_vm2, %v8239_v29, 0.0  ;;  %v707_v24 = vld [vmem:[%s4456_s10 + $0x7d8] sm:$0xff]  ;;  %8240 = vst [vmem:[#allocation46_spill] sm:$0xff] %v5802_v50  ;;  %8241 = vst [vmem:[#allocation49_spill] sm:$0xff] %v5804_v40  ;;  %v2137_v22 = vadd.f32 %v2136_v36, %v5107_v16  ;;  %v5824_v40 = vsub.f32 %v705_v61, %v1089_v62 }
  0xe8   : > { %v2003_v10 = vadd.f32 %v2002_v35, %v8238_v31  ;;  %v8242_v9 = vld [vmem:[#allocation58_spill] sm:$0xff]  ;;  %v708_v7 = vld [vmem:[%s4456_s10 + $0x7e0] sm:$0xff]  ;;  %v5813_v31 = vsub.f32 %v703_v1, %v1087_v20  ;;  %v709_v52 = vld [vmem:[%s4456_s10 + $0x7e8] sm:$0xff]  ;;  %8246 = vst [vmem:[#allocation55_spill] sm:$0xff] %v5822_v19 }
  0xe9   : > { %v5808_v8 = vmul.f32 %v8242_v9, %v8242_v9  ;;  %v1091_v35 = vld [vmem:[%s4461_s13 + $0x7d8] sm:$0xff]  ;;  %v1092_v54 = vld [vmem:[%s4461_s13 + $0x7e0] sm:$0xff]  ;;  %v710_v9 = vld [vmem:[%s4456_s10 + $0x7f0] sm:$0xff]  ;;  %8247 = vst [vmem:[#allocation53_spill] sm:$0xff] %v5824_v40  ;;  %v2138_v34 = vadd.f32 %v2137_v22, %v5155_v56 }
  0xea   : > { %8243 = vst [vmem:[#allocation52_spill] sm:$0xff] %v5813_v31  ;;  %v8244_v29 = vld [vmem:[#allocation14_spill] sm:$0xff]  ;;  %v8245_v44 = vld [vmem:[#allocation104_spill] sm:$0xff]  ;;  %v8248_v50 = vld [vmem:[#allocation59_spill] sm:$0xff]  ;;  %v5844_v40 = vsub.f32 %v708_v7, %v1092_v54 }
  0xeb   : > { %v2004_v17 = vadd.f32 %v2003_v10, %v8244_v29  ;;  %v2283_v51 = vsel %vm2259_vm2, %v8245_v44, 0.0  ;;  %v1093_v46 = vld [vmem:[%s4461_s13 + $0x7e8] sm:$0xff]  ;;  %v5828_v1 = vmul.f32 %v8248_v50, %v8248_v50  ;;  %v2282_v10 = vadd.f32 %v2281_v41, %v2280_v39  ;;  %v711_v16 = vld [vmem:[%s4456_s10 + $0x7f8] sm:$0xff]  ;;  %v1094_v20 = vld [vmem:[%s4461_s13 + $0x7f0] sm:$0xff] }
  0xec   : > { %v1095_v36 = vld [vmem:[%s4461_s13 + $0x7f8] sm:$0xff]  ;;  %v5833_v29 = vsub.f32 %v706_v42, %v1090_v23  ;;  %v8250_v44 = vld [vmem:[#allocation17_spill] sm:$0xff]  ;;  %v712_v62 = vld [vmem:[%s4456_s10 + $0x800] sm:$0xff]  ;;  %v5842_v39 = vsub.f32 %v707_v24, %v1091_v35  ;;  %8253 = vst [vmem:[#allocation57_spill] sm:$0xff] %v5844_v40  ;;  %v2139_v24 = vadd.f32 %v2138_v34, %v5203_v2 }
  0xed   : > { %v2005_v31 = vadd.f32 %v2004_v17, %v8250_v44  ;;  %v8251_v15 = vld [vmem:[#allocation113_spill] sm:$0xff]  ;;  %v1096_v41 = vld [vmem:[%s4461_s13 + $0x800] sm:$0xff]  ;;  %v2284_v17 = vadd.f32 %v2283_v51, %v2282_v10  ;;  %v5853_v44 = vsub.f32 %v709_v52, %v1093_v46  ;;  %v8257_v35 = vld [vmem:[#allocation122_spill] sm:$0xff]  ;;  %v5862_v10 = vsub.f32 %v710_v9, %v1094_v20 }
  0xee   : > { %8249 = vst [vmem:[#allocation54_spill] sm:$0xff] %v5833_v29  ;;  %v2285_v61 = vsel %vm2259_vm2, %v8251_v15, 0.0  ;;  %v713_v50 = vld [vmem:[%s4456_s10 + $0x808] sm:$0xff]  ;;  %8252 = vst [vmem:[#allocation56_spill] sm:$0xff] %v5842_v39  ;;  %v714_v56 = vld [vmem:[%s4456_s10 + $0x810] sm:$0xff]  ;;  %v2287_v7 = vsel %vm2259_vm2, %v8257_v35, 0.0  ;;  %v5864_v40 = vsub.f32 %v711_v16, %v1095_v36  ;;  %v2140_v9 = vadd.f32 %v2139_v24, %v5251_v60 }
  0xef   : > { %v8254_v19 = vld [vmem:[#allocation60_spill] sm:$0xff]  ;;  %v1098_v22 = vld [vmem:[%s4461_s13 + $0x810] sm:$0xff]  ;;  %8255 = vst [vmem:[#allocation89_spill] sm:$0xff] %v5853_v44  ;;  %v715_v54 = vld [vmem:[%s4456_s10 + $0x818] sm:$0xff] }
  0xf0   : > { %v5848_v42 = vmul.f32 %v8254_v19, %v8254_v19  ;;  %v1097_v23 = vld [vmem:[%s4461_s13 + $0x808] sm:$0xff]  ;;  %v716_v19 = vld [vmem:[%s4456_s10 + $0x820] sm:$0xff]  ;;  %v1099_v51 = vld [vmem:[%s4461_s13 + $0x818] sm:$0xff]  ;;  %8258 = vst [vmem:[#allocation95_spill] sm:$0xff] %v5862_v10 }
  0xf1   : > { %v8256_v15 = vld [vmem:[#allocation20_spill] sm:$0xff]  ;;  %8259 = vst [vmem:[#allocation58_spill] sm:$0xff] %v5864_v40  ;;  %v8260_v39 = vld [vmem:[#allocation61_spill] sm:$0xff]  ;;  %v8262_v35 = vld [vmem:[#allocation23_spill] sm:$0xff]  ;;  %v5884_v40 = vsub.f32 %v714_v56, %v1098_v22 }
  0xf2   : > { %v2006_v29 = vadd.f32 %v2005_v31, %v8256_v15  ;;  %v5868_v52 = vmul.f32 %v8260_v39, %v8260_v39  ;;  %v2286_v31 = vadd.f32 %v2285_v61, %v2284_v17  ;;  %v717_v2 = vld [vmem:[%s4456_s10 + $0x828] sm:$0xff]  ;;  %v1100_v46 = vld [vmem:[%s4461_s13 + $0x820] sm:$0xff]  ;;  %v5873_v15 = vsub.f32 %v712_v62, %v1096_v41  ;;  %v718_v36 = vld [vmem:[%s4456_s10 + $0x830] sm:$0xff] }
  0xf3   : > { %v1101_v34 = vld [vmem:[%s4461_s13 + $0x828] sm:$0xff]  ;;  %v8263_v20 = vld [vmem:[#allocation131_spill] sm:$0xff]  ;;  %v1102_v61 = vld [vmem:[%s4461_s13 + $0x830] sm:$0xff]  ;;  %v5882_v17 = vsub.f32 %v713_v50, %v1097_v23  ;;  %8265 = vst [vmem:[#allocation59_spill] sm:$0xff] %v5884_v40  ;;  %v2141_v50 = vadd.f32 %v2140_v9, %v5299_v26 }
  0xf4   : > { %8261 = vst [vmem:[#allocation14_spill] sm:$0xff] %v5873_v15  ;;  %v2007_v44 = vadd.f32 %v2006_v29, %v8262_v35  ;;  %v2289_v16 = vsel %vm2259_vm2, %v8263_v20, 0.0  ;;  %v719_v39 = vld [vmem:[%s4456_s10 + $0x838] sm:$0xff]  ;;  %v2288_v29 = vadd.f32 %v2287_v7, %v2286_v31  ;;  %v720_v60 = vld [vmem:[%s4456_s10 + $0x840] sm:$0xff]  ;;  %v5893_v35 = vsub.f32 %v715_v54, %v1099_v51  ;;  %v721_v22 = vld [vmem:[%s4456_s10 + $0x848] sm:$0xff] }
  0xf5   : > { %8264 = vst [vmem:[#allocation104_spill] sm:$0xff] %v5882_v17  ;;  %v8266_v10 = vld [vmem:[#allocation62_spill] sm:$0xff]  ;;  %v1104_v24 = vld [vmem:[%s4461_s13 + $0x840] sm:$0xff]  ;;  %v1105_v7 = vld [vmem:[%s4461_s13 + $0x848] sm:$0xff]  ;;  %v5902_v31 = vsub.f32 %v716_v19, %v1100_v46  ;;  %v5904_v40 = vsub.f32 %v717_v2, %v1101_v34  ;;  %v2142_v19 = vadd.f32 %v2141_v50, %v5347_v57 }
  0xf6   : > { %v5888_v62 = vmul.f32 %v8266_v10, %v8266_v10  ;;  %v1103_v41 = vld [vmem:[%s4461_s13 + $0x838] sm:$0xff]  ;;  %8267 = vst [vmem:[#allocation17_spill] sm:$0xff] %v5893_v35  ;;  %v8269_v23 = vld [vmem:[#allocation140_spill] sm:$0xff]  ;;  %v722_v10 = vld [vmem:[%s4456_s10 + $0x850] sm:$0xff] }
  0xf7   : > { %v8268_v20 = vld [vmem:[#allocation26_spill] sm:$0xff]  ;;  %v2291_v56 = vsel %vm2259_vm2, %v8269_v23, 0.0  ;;  %8270 = vst [vmem:[#allocation113_spill] sm:$0xff] %v5902_v31  ;;  %8271 = vst [vmem:[#allocation60_spill] sm:$0xff] %v5904_v40  ;;  %v8272_v17 = vld [vmem:[#allocation63_spill] sm:$0xff]  ;;  %v5924_v40 = vsub.f32 %v720_v60, %v1104_v24 }
  0xf8   : > { %v2008_v15 = vadd.f32 %v2007_v44, %v8268_v20  ;;  %v5908_v54 = vmul.f32 %v8272_v17, %v8272_v17  ;;  %v2290_v44 = vadd.f32 %v2289_v16, %v2288_v29  ;;  %v723_v26 = vld [vmem:[%s4456_s10 + $0x858] sm:$0xff]  ;;  %v1106_v51 = vld [vmem:[%s4461_s13 + $0x850] sm:$0xff]  ;;  %v5913_v20 = vsub.f32 %v718_v36, %v1102_v61  ;;  %v724_v34 = vld [vmem:[%s4456_s10 + $0x860] sm:$0xff] }
  0xf9   : > { %v1107_v9 = vld [vmem:[%s4461_s13 + $0x858] sm:$0xff]  ;;  %v8274_v23 = vld [vmem:[#allocation29_spill] sm:$0xff]  ;;  %v1108_v16 = vld [vmem:[%s4461_s13 + $0x860] sm:$0xff]  ;;  %v5922_v29 = vsub.f32 %v719_v39, %v1103_v41  ;;  %8277 = vst [vmem:[#allocation61_spill] sm:$0xff] %v5924_v40  ;;  %v2143_v39 = vadd.f32 %v2142_v19, %v5395_v3 }
  0xfa   : > { %8273 = vst [vmem:[#allocation20_spill] sm:$0xff] %v5913_v20  ;;  %v2009_v35 = vadd.f32 %v2008_v15, %v8274_v23  ;;  %v8275_v46 = vld [vmem:[#allocation149_spill] sm:$0xff]  ;;  %v8278_v31 = vld [vmem:[#allocation64_spill] sm:$0xff]  ;;  %v2292_v15 = vadd.f32 %v2291_v56, %v2290_v44  ;;  %v5933_v23 = vsub.f32 %v721_v22, %v1105_v7  ;;  %v8281_v41 = vld [vmem:[#allocation158_spill] sm:$0xff]  ;;  %v5942_v44 = vsub.f32 %v722_v10, %v1106_v51 }
  0xfb   : > { %v2293_v2 = vsel %vm2259_vm2, %v8275_v46, 0.0  ;;  %v725_v17 = vld [vmem:[%s4456_s10 + $0x868] sm:$0xff]  ;;  %8276 = vst [vmem:[#allocation122_spill] sm:$0xff] %v5922_v29  ;;  %v5928_v36 = vmul.f32 %v8278_v31, %v8278_v31  ;;  %v726_v57 = vld [vmem:[%s4456_s10 + $0x870] sm:$0xff]  ;;  %v2295_v60 = vsel %vm2259_vm2, %v8281_v41, 0.0  ;;  %v727_v24 = vld [vmem:[%s4456_s10 + $0x878] sm:$0xff]  ;;  %v5944_v40 = vsub.f32 %v723_v26, %v1107_v9 }
  0xfc   : > { %v1109_v61 = vld [vmem:[%s4461_s13 + $0x868] sm:$0xff]  ;;  %v1110_v50 = vld [vmem:[%s4461_s13 + $0x870] sm:$0xff]  ;;  %8279 = vst [vmem:[#allocation23_spill] sm:$0xff] %v5933_v23  ;;  %v728_v31 = vld [vmem:[%s4456_s10 + $0x880] sm:$0xff]  ;;  %v2144_v10 = vadd.f32 %v2143_v39, %v5443_v6 }
  0xfd   : > { %v8280_v46 = vld [vmem:[#allocation32_spill] sm:$0xff]  ;;  %v1111_v56 = vld [vmem:[%s4461_s13 + $0x878] sm:$0xff]  ;;  %8282 = vst [vmem:[#allocation131_spill] sm:$0xff] %v5942_v44  ;;  %8283 = vst [vmem:[#allocation62_spill] sm:$0xff] %v5944_v40  ;;  %v5964_v40 = vsub.f32 %v726_v57, %v1110_v50 }
  0xfe   : > { %v2010_v20 = vadd.f32 %v2009_v35, %v8280_v46  ;;  %v8284_v29 = vld [vmem:[#allocation65_spill] sm:$0xff]  ;;  %v2294_v35 = vadd.f32 %v2293_v2, %v2292_v15  ;;  %v1112_v7 = vld [vmem:[%s4461_s13 + $0x880] sm:$0xff]  ;;  %v5953_v46 = vsub.f32 %v724_v34, %v1108_v16  ;;  %v5962_v15 = vsub.f32 %v725_v17, %v1109_v61  ;;  %v8290_v44 = vld [vmem:[#allocation66_spill] sm:$0xff] }
  0xff   : > { %v5948_v22 = vmul.f32 %v8284_v29, %v8284_v29  ;;  %v729_v3 = vld [vmem:[%s4456_s10 + $0x888] sm:$0xff]  ;;  %v8286_v41 = vld [vmem:[#allocation35_spill] sm:$0xff]  ;;  %v730_v9 = vld [vmem:[%s4456_s10 + $0x890] sm:$0xff]  ;;  %8289 = vst [vmem:[#allocation63_spill] sm:$0xff] %v5964_v40  ;;  %v5968_v34 = vmul.f32 %v8290_v44, %v8290_v44 }
 0x100   : > { %v1113_v19 = vld [vmem:[%s4461_s13 + $0x888] sm:$0xff]  ;;  %8285 = vst [vmem:[#allocation26_spill] sm:$0xff] %v5953_v46  ;;  %v2011_v23 = vadd.f32 %v2010_v20, %v8286_v41  ;;  %v8287_v51 = vld [vmem:[#allocation167_spill] sm:$0xff]  ;;  %v1114_v2 = vld [vmem:[%s4461_s13 + $0x890] sm:$0xff]  ;;  %v2296_v20 = vadd.f32 %v2295_v60, %v2294_v35  ;;  %v5973_v41 = vsub.f32 %v727_v24, %v1111_v56  ;;  %v5982_v35 = vsub.f32 %v728_v31, %v1112_v7 }
 0x101   : > { %v2297_v26 = vsel %vm2259_vm2, %v8287_v51, 0.0  ;;  %v731_v29 = vld [vmem:[%s4456_s10 + $0x898] sm:$0xff]  ;;  %8288 = vst [vmem:[#allocation140_spill] sm:$0xff] %v5962_v15  ;;  %v732_v6 = vld [vmem:[%s4456_s10 + $0x8a0] sm:$0xff]  ;;  %v8293_v61 = vld [vmem:[#allocation177_spill] sm:$0xff]  ;;  %v5984_v40 = vsub.f32 %v729_v3, %v1113_v19  ;;  %v2301_v3 = vsel %vm2259_vm2, %v5551_v25, 0.0 }
 0x102   : > { %v1115_v16 = vld [vmem:[%s4461_s13 + $0x898] sm:$0xff]  ;;  %v1116_v39 = vld [vmem:[%s4461_s13 + $0x8a0] sm:$0xff]  ;;  %v2299_v57 = vsel %vm2259_vm2, %v8293_v61, 0.0  ;;  %v733_v50 = vld [vmem:[%s4456_s10 + $0x8a8] sm:$0xff] }
 0x103   : > { %v8291_v51 = vld [vmem:[#allocation38_spill] sm:$0xff]  ;;  %v8292_v0 = vld [vmem:[#allocation39_spill] sm:$0xff]  ;;  %v1117_v60 = vld [vmem:[%s4461_s13 + $0x8a8] sm:$0xff]  ;;  %8294 = vst [vmem:[#allocation29_spill] sm:$0xff] %v5984_v40 }
 0x104   : > { %v2012_v46 = vadd.f32 %v2011_v23, %v8291_v51  ;;  %v2145_v17 = vadd.f32 %v2144_v10, %v8292_v0  ;;  %v734_v44 = vld [vmem:[%s4456_s10 + $0x8b0] sm:$0xff]  ;;  %v8295_v15 = vld [vmem:[#allocation67_spill] sm:$0xff]  ;;  %v2298_v23 = vadd.f32 %v2297_v26, %v2296_v20  ;;  %v5993_v51 = vsub.f32 %v730_v9, %v1114_v2  ;;  %v737_v19 = vld [vmem:[%s4456_s10 + $0x8c8] sm:$0xff] }
 0x105   : > { %v5988_v24 = vmul.f32 %v8295_v15, %v8295_v15  ;;  %v735_v0 = vld [vmem:[%s4456_s10 + $0x8b8] sm:$0xff]  ;;  %v1118_v56 = vld [vmem:[%s4461_s13 + $0x8b0] sm:$0xff]  ;;  %v736_v7 = vld [vmem:[%s4456_s10 + $0x8c0] sm:$0xff]  ;;  %v6002_v15 = vsub.f32 %v731_v29, %v1115_v16  ;;  %v6004_v20 = vsub.f32 %v732_v6, %v1116_v39  ;;  %v6013_v2 = vsub.f32 %v733_v50, %v1117_v60 }
 0x106   : > { %v1119_v10 = vld [vmem:[%s4461_s13 + $0x8b8] sm:$0xff]  ;;  %v2013_v61 = vadd.f32 %v2012_v46, %v5523_v53  ;;  %v2146_v31 = vadd.f32 %v2145_v17, %v5537_v13  ;;  %v1120_v26 = vld [vmem:[%s4461_s13 + $0x8c0] sm:$0xff]  ;;  %v2300_v53 = vadd.f32 %v2299_v57, %v2298_v23  ;;  %v738_v13 = vld [vmem:[%s4456_s10 + $0x8d0] sm:$0xff]  ;;  %v2303_v6 = vsel %vm2259_vm2, %v5587_v18, 0.0 }
 0x107   : > { %8296 = vst [vmem:[#allocation149_spill] sm:$0xff] %v6004_v20  ;;  %v8297_v40 = vld [vmem:[#allocation68_spill] sm:$0xff]  ;;  %v1122_v25 = vld [vmem:[%s4461_s13 + $0x8d0] sm:$0xff]  ;;  %v1123_v39 = vld [vmem:[%s4461_s13 + $0x8d8] sm:$0xff]  ;;  %v6022_v57 = vsub.f32 %v734_v44, %v1118_v56  ;;  %v6024_v23 = vsub.f32 %v735_v0, %v1119_v10  ;;  %v2305_v0 = vsel %vm2259_vm2, %v5648_v5, 0.0 }
 0x108   : > { %v6008_v9 = vmul.f32 %v8297_v40, %v8297_v40  ;;  %v1121_v46 = vld [vmem:[%s4461_s13 + $0x8c8] sm:$0xff]  ;;  %v2014_v17 = vadd.f32 %v2013_v61, %v5564_v4  ;;  %v2147_v29 = vadd.f32 %v2146_v31, %v5577_v37  ;;  %v739_v40 = vld [vmem:[%s4456_s10 + $0x8d8] sm:$0xff]  ;;  %v740_v16 = vld [vmem:[%s4456_s10 + $0x8e0] sm:$0xff]  ;;  %v2302_v4 = vadd.f32 %v2301_v3, %v2300_v53 }
 0x109   : > { %8298 = vst [vmem:[#allocation64_spill] sm:$0xff] %v6024_v23  ;;  %v8299_v20 = vld [vmem:[#allocation69_spill] sm:$0xff]  ;;  %v1124_v60 = vld [vmem:[%s4461_s13 + $0x8e0] sm:$0xff]  ;;  %v6033_v61 = vsub.f32 %v736_v7, %v1120_v26  ;;  %v743_v10 = vld [vmem:[%s4456_s10 + $0x8f8] sm:$0xff]  ;;  %v6044_v53 = vsub.f32 %v738_v13, %v1122_v25  ;;  %v2307_v13 = vsel %vm2259_vm2, %v5708_v48, 0.0 }
 0x10a   : > { %v6028_v50 = vmul.f32 %v8299_v20, %v8299_v20  ;;  %v741_v37 = vld [vmem:[%s4456_s10 + $0x8e8] sm:$0xff]  ;;  %v2015_v31 = vadd.f32 %v2014_v17, %v5595_v27  ;;  %v2148_v44 = vadd.f32 %v2147_v29, %v5626_v47  ;;  %v742_v56 = vld [vmem:[%s4456_s10 + $0x8f0] sm:$0xff]  ;;  %v6042_v20 = vsub.f32 %v737_v19, %v1121_v46  ;;  %v744_v47 = vld [vmem:[%s4456_s10 + $0x900] sm:$0xff] }
 0x10b   : > { %v1125_v18 = vld [vmem:[%s4461_s13 + $0x8e8] sm:$0xff]  ;;  %v1126_v3 = vld [vmem:[%s4461_s13 + $0x8f0] sm:$0xff]  ;;  %8300 = vst [vmem:[#allocation32_spill] sm:$0xff] %v6044_v53  ;;  %v2304_v27 = vadd.f32 %v2303_v6, %v2302_v4  ;;  %v1127_v26 = vld [vmem:[%s4461_s13 + $0x8f8] sm:$0xff]  ;;  %v6053_v17 = vsub.f32 %v739_v40, %v1123_v39 }
 0x10c   : > { %v8301_v23 = vld [vmem:[#allocation70_spill] sm:$0xff]  ;;  %v1128_v5 = vld [vmem:[%s4461_s13 + $0x900] sm:$0xff]  ;;  %v2016_v29 = vadd.f32 %v2015_v31, %v5668_v45  ;;  %v2149_v19 = vadd.f32 %v2148_v44, %v5688_v11  ;;  %v745_v46 = vld [vmem:[%s4456_s10 + $0x908] sm:$0xff]  ;;  %v6064_v4 = vsub.f32 %v741_v37, %v1125_v18  ;;  %v6073_v31 = vsub.f32 %v742_v56, %v1126_v3 }
 0x10d   : > { %v6048_v7 = vmul.f32 %v8301_v23, %v8301_v23  ;;  %v746_v25 = vld [vmem:[%s4456_s10 + $0x910] sm:$0xff]  ;;  %v1129_v6 = vld [vmem:[%s4461_s13 + $0x908] sm:$0xff]  ;;  %v6062_v23 = vsub.f32 %v740_v16, %v1124_v60  ;;  %v8303_v53 = vld [vmem:[#allocation71_spill] sm:$0xff]  ;;  %v2306_v45 = vadd.f32 %v2305_v0, %v2304_v27  ;;  %v2309_v37 = vsel %vm2259_vm2, %v5768_v49, 0.0 }
 0x10e   : > { %8302 = vst [vmem:[#allocation158_spill] sm:$0xff] %v6064_v4  ;;  %v6068_v40 = vmul.f32 %v8303_v53, %v8303_v53  ;;  %v747_v11 = vld [vmem:[%s4456_s10 + $0x918] sm:$0xff]  ;;  %v1130_v39 = vld [vmem:[%s4461_s13 + $0x910] sm:$0xff]  ;;  %v2017_v44 = vadd.f32 %v2016_v29, %v5728_v55  ;;  %v2150_v16 = vadd.f32 %v2149_v19, %v5748_v58  ;;  %v748_v60 = vld [vmem:[%s4456_s10 + $0x920] sm:$0xff]  ;;  %v6082_v53 = vsub.f32 %v743_v10, %v1127_v26 }
 0x10f   : > { %v1131_v48 = vld [vmem:[%s4461_s13 + $0x918] sm:$0xff]  ;;  %v749_v18 = vld [vmem:[%s4456_s10 + $0x928] sm:$0xff]  ;;  %v1132_v0 = vld [vmem:[%s4461_s13 + $0x920] sm:$0xff]  ;;  %v6084_v27 = vsub.f32 %v744_v47, %v1128_v5  ;;  %v2308_v55 = vadd.f32 %v2307_v13, %v2306_v45  ;;  %v6093_v29 = vsub.f32 %v745_v46, %v1129_v6  ;;  %v2311_v47 = vsel %vm2259_vm2, %v5828_v1, 0.0 }
 0x110   : > { %v8305_v4 = vld [vmem:[#allocation72_spill] sm:$0xff]  ;;  %v750_v58 = vld [vmem:[%s4456_s10 + $0x930] sm:$0xff]  ;;  %v2018_v19 = vadd.f32 %v2017_v44, %v5788_v63  ;;  %v2151_v10 = vadd.f32 %v2150_v16, %v5808_v8  ;;  %v751_v26 = vld [vmem:[%s4456_s10 + $0x938] sm:$0xff]  ;;  %v6104_v45 = vsub.f32 %v747_v11, %v1131_v48  ;;  %v6111_v1 = vsub.f32 %v748_v60, %v1132_v0 }
 0x111   : > { %8304 = vst [vmem:[#allocation65_spill] sm:$0xff] %v6084_v27  ;;  %v6088_v56 = vmul.f32 %v8305_v4, %v8305_v4  ;;  %v1133_v3 = vld [vmem:[%s4461_s13 + $0x928] sm:$0xff]  ;;  %v1134_v49 = vld [vmem:[%s4461_s13 + $0x930] sm:$0xff]  ;;  %8306 = vst [vmem:[#allocation35_spill] sm:$0xff] %v6093_v29  ;;  %v6102_v4 = vsub.f32 %v746_v25, %v1130_v39  ;;  %v2310_v63 = vadd.f32 %v2309_v37, %v2308_v55  ;;  %v2313_v25 = vsel %vm2259_vm2, %v5888_v62, 0.0 }
 0x112   : > { %v752_v5 = vld [vmem:[%s4456_s10 + $0x940] sm:$0xff]  ;;  %v1135_v13 = vld [vmem:[%s4461_s13 + $0x938] sm:$0xff]  ;;  %v8307_v27 = vld [vmem:[#allocation73_spill] sm:$0xff]  ;;  %8308 = vst [vmem:[#allocation167_spill] sm:$0xff] %v6111_v1  ;;  %v2019_v16 = vadd.f32 %v2018_v19, %v5848_v42  ;;  %v2152_v29 = vadd.f32 %v2151_v10, %v5868_v52  ;;  %v6122_v37 = vsub.f32 %v750_v58, %v1134_v49 }
 0x113   : > { %v1703_v46 = vmul.f32 %v8307_v27, %v8307_v27  ;;  %v753_v8 = vld [vmem:[%s4456_s10 + $0x948] sm:$0xff]  ;;  %v1136_v6 = vld [vmem:[%s4461_s13 + $0x940] sm:$0xff]  ;;  %v754_v11 = vld [vmem:[%s4456_s10 + $0x950] sm:$0xff]  ;;  %v6120_v27 = vsub.f32 %v749_v18, %v1133_v3  ;;  %v2312_v0 = vadd.f32 %v2311_v47, %v2310_v63  ;;  %v6129_v52 = vsub.f32 %v751_v26, %v1135_v13 }
 0x114   : > { %v1137_v44 = vld [vmem:[%s4461_s13 + $0x948] sm:$0xff]  ;;  %v755_v39 = vld [vmem:[%s4456_s10 + $0x958] sm:$0xff]  ;;  %v1138_v48 = vld [vmem:[%s4461_s13 + $0x950] sm:$0xff]  ;;  %v2020_v62 = vadd.f32 %v2019_v16, %v5908_v54  ;;  %v2153_v10 = vadd.f32 %v2152_v29, %v5928_v36  ;;  %v2315_v18 = vsel %vm2259_vm2, %v5948_v22, 0.0  ;;  %v6135_v58 = vsub.f32 %v752_v5, %v1136_v6 }
 0x115   : > { %v8309_v55 = vld [vmem:[#allocation74_spill] sm:$0xff]  ;;  %v756_v1 = vld [vmem:[%s4456_s10 + $0x960] sm:$0xff]  ;;  %v6137_v3 = vsub.f32 %v753_v8, %v1137_v44  ;;  %v2314_v63 = vadd.f32 %v2313_v25, %v2312_v0  ;;  %v1141_v26 = vld [vmem:[%s4461_s13 + $0x968] sm:$0xff]  ;;  %v6143_v13 = vsub.f32 %v754_v11, %v1138_v48  ;;  %v2317_v22 = vsel %vm2259_vm2, %v6008_v9, 0.0 }
 0x116   : > { %v1704_v60 = vmul.f32 %v8309_v55, %v8309_v55  ;;  %v1139_v42 = vld [vmem:[%s4461_s13 + $0x958] sm:$0xff]  ;;  %v1140_v19 = vld [vmem:[%s4461_s13 + $0x960] sm:$0xff]  ;;  %v757_v55 = vld [vmem:[%s4456_s10 + $0x968] sm:$0xff]  ;;  %v2021_v54 = vadd.f32 %v2020_v62, %v5968_v34  ;;  %v2154_v36 = vadd.f32 %v2153_v10, %v5988_v24  ;;  %v2319_v9 = vsel %vm2259_vm2, %v6068_v40, 0.0 }
 0x117   : > { %v8310_v49 = vld [vmem:[#allocation75_spill] sm:$0xff]  ;;  %v6149_v29 = vsub.f32 %v755_v39, %v1139_v42  ;;  %v6151_v5 = vsub.f32 %v756_v1, %v1140_v19  ;;  %v8311_v8 = vld [vmem:[#allocation76_spill] sm:$0xff]  ;;  %v2316_v44 = vadd.f32 %v2315_v18, %v2314_v63  ;;  %v758_v16 = vld [vmem:[%s4456_s10 + $0x970] sm:$0xff]  ;;  %v6163_v1 = vsub.f32 %v757_v55, %v1141_v26 }
 0x118   : > { %v1705_v47 = vmul.f32 %v8310_v49, %v8310_v49  ;;  %v1706_v6 = vmul.f32 %v8311_v8, %v8311_v8  ;;  %v1142_v25 = vld [vmem:[%s4461_s13 + $0x970] sm:$0xff]  ;;  %v2022_v24 = vadd.f32 %v2021_v54, %v6028_v50  ;;  %v2155_v48 = vadd.f32 %v2154_v36, %v6048_v7  ;;  %v8314_v42 = vld [vmem:[#allocation79_spill] sm:$0xff]  ;;  %v8315_v49 = vld [vmem:[#allocation80_spill] sm:$0xff] }
 0x119   : > { %v8312_v11 = vld [vmem:[#allocation77_spill] sm:$0xff]  ;;  %v8313_v39 = vld [vmem:[#allocation78_spill] sm:$0xff]  ;;  %v1709_v19 = vmul.f32 %v8314_v42, %v8314_v42  ;;  %v2318_v62 = vadd.f32 %v2317_v22, %v2316_v44  ;;  %v1710_v50 = vmul.f32 %v8315_v49, %v8315_v49  ;;  %v2321_v40 = vsel %vm2259_vm2, %v1704_v60, 0.0  ;;  %v760_v44 = vld [vmem:[%s4456_s10 + $0x980] sm:$0xff] }
 0x11a   : > { %v1707_v34 = vmul.f32 %v8312_v11, %v8312_v11  ;;  %v1708_v0 = vmul.f32 %v8313_v39, %v8313_v39  ;;  %v759_v10 = vld [vmem:[%s4456_s10 + $0x978] sm:$0xff]  ;;  %v2023_v7 = vadd.f32 %v2022_v24, %v6088_v56  ;;  %v2156_v63 = vadd.f32 %v2155_v48, %v1703_v46  ;;  %v8316_v26 = vld [vmem:[#allocation81_spill] sm:$0xff]  ;;  %v1144_v11 = vld [vmem:[%s4461_s13 + $0x980] sm:$0xff] }
 0x11b   : > { %v1143_v18 = vld [vmem:[%s4461_s13 + $0x978] sm:$0xff]  ;;  %v6175_v55 = vsub.f32 %v758_v16, %v1142_v25  ;;  %v1711_v54 = vmul.f32 %v8316_v26, %v8316_v26  ;;  %v2320_v8 = vadd.f32 %v2319_v9, %v2318_v62  ;;  %v8320_v25 = vld [vmem:[#allocation84_spill] sm:$0xff]  ;;  %v8321_v48 = vld [vmem:[#allocation85_spill] sm:$0xff] }
 0x11c   : > { %v8317_v36 = vld [vmem:[#allocation82_spill] sm:$0xff]  ;;  %v8318_v39 = vld [vmem:[#allocation83_spill] sm:$0xff]  ;;  %v2024_v56 = vadd.f32 %v2023_v7, %v1705_v47  ;;  %v2157_v46 = vadd.f32 %v2156_v63, %v1706_v6  ;;  %v2323_v60 = vsel %vm2259_vm2, %v1707_v34, 0.0  ;;  %v6186_v16 = vsub.f32 %v759_v10, %v1143_v18  ;;  %v761_v62 = vld [vmem:[%s4456_s10 + $0x988] sm:$0xff] }
 0x11d   : > { %v1712_v22 = vmul.f32 %v8317_v36, %v8317_v36  ;;  %v1713_v42 = vmul.f32 %v8318_v39, %v8318_v39  ;;  %v1714_v24 = vmul.f32 %v8320_v25, %v8320_v25  ;;  %v1715_v49 = vmul.f32 %v8321_v48, %v8321_v48  ;;  %v1145_v26 = vld [vmem:[%s4461_s13 + $0x988] sm:$0xff]  ;;  %v8322_v36 = vld [vmem:[#allocation86_spill] sm:$0xff]  ;;  %v8324_v18 = vld [vmem:[#allocation87_spill] sm:$0xff] }
 0x11e   : > { %8319 = vst [vmem:[#allocation66_spill] sm:$0xff] %v6186_v16  ;;  %v2322_v9 = vadd.f32 %v2321_v40, %v2320_v8  ;;  %v1716_v39 = vmul.f32 %v8322_v36, %v8322_v36  ;;  %v2025_v47 = vadd.f32 %v2024_v56, %v1708_v0  ;;  %v2158_v6 = vadd.f32 %v2157_v46, %v1709_v19  ;;  %v8325_v63 = vld [vmem:[#allocation88_spill] sm:$0xff]  ;;  %v762_v8 = vld [vmem:[%s4456_s10 + $0x990] sm:$0xff] }
 0x11f   : > { %v2325_v34 = vsel %vm2259_vm2, %v1710_v50, 0.0  ;;  %v6197_v10 = vsub.f32 %v760_v44, %v1144_v11  ;;  %v1717_v7 = vmul.f32 %v8324_v18, %v8324_v18  ;;  %v1718_v25 = vmul.f32 %v8325_v63, %v8325_v63  ;;  %v1146_v48 = vld [vmem:[%s4461_s13 + $0x990] sm:$0xff]  ;;  %v8328_v11 = vld [vmem:[#allocation91_spill] sm:$0xff]  ;;  %v8329_v46 = vld [vmem:[#allocation92_spill] sm:$0xff] }
 0x120   : > { %v2324_v40 = vadd.f32 %v2323_v60, %v2322_v9  ;;  %v8326_v16 = vld [vmem:[#allocation90_spill] sm:$0xff]  ;;  %v2026_v0 = vadd.f32 %v2025_v47, %v1711_v54  ;;  %v2159_v19 = vadd.f32 %v2158_v6, %v1712_v22  ;;  %v2327_v50 = vsel %vm2259_vm2, %v1713_v42, 0.0 }
 0x121   : > { %8323 = vst [vmem:[#allocation38_spill] sm:$0xff] %v6197_v10  ;;  %v1719_v36 = vmul.f32 %v8326_v16, %v8326_v16  ;;  %v6208_v44 = vsub.f32 %v761_v62, %v1145_v26  ;;  %v1720_v56 = vmul.f32 %v8328_v11, %v8328_v11  ;;  %v1721_v18 = vmul.f32 %v8329_v46, %v8329_v46  ;;  %v763_v9 = vld [vmem:[%s4456_s10 + $0x998] sm:$0xff]  ;;  %v8330_v10 = vld [vmem:[#allocation12_spill] sm:$0xff]  ;;  %v8332_v26 = vld [vmem:[#allocation93_spill] sm:$0xff] }
 0x122   : > { %v2326_v60 = vadd.f32 %v2325_v34, %v2324_v40  ;;  %v1147_v63 = vld [vmem:[%s4461_s13 + $0x998] sm:$0xff]  ;;  %v1722_v16 = vmul.f32 %v8330_v10, %v8330_v10  ;;  %v2027_v54 = vadd.f32 %v2026_v0, %v1714_v24  ;;  %v2160_v22 = vadd.f32 %v2159_v19, %v1715_v49  ;;  %v764_v40 = vld [vmem:[%s4456_s10 + $0x9a0] sm:$0xff] }
 0x123   : > { %8327 = vst [vmem:[#allocation39_spill] sm:$0xff] %v6208_v44  ;;  %v2329_v42 = vsel %vm2259_vm2, %v1716_v39, 0.0  ;;  %v6219_v62 = vsub.f32 %v762_v8, %v1146_v48  ;;  %v1723_v47 = vmul.f32 %v8332_v26, %v8332_v26  ;;  %v8333_v6 = vld [vmem:[#allocation94_spill] sm:$0xff]  ;;  %v1148_v46 = vld [vmem:[%s4461_s13 + $0x9a0] sm:$0xff]  ;;  %v2331_v39 = vsel %vm2259_vm2, %v1719_v36, 0.0  ;;  %v8336_v48 = vld [vmem:[#allocation97_spill] sm:$0xff] }
 0x124   : > { %v1724_v11 = vmul.f32 %v8333_v6, %v8333_v6  ;;  %v2328_v34 = vadd.f32 %v2327_v50, %v2326_v60  ;;  %v8334_v44 = vld [vmem:[#allocation96_spill] sm:$0xff]  ;;  %v2028_v24 = vadd.f32 %v2027_v54, %v1717_v7  ;;  %v2161_v49 = vadd.f32 %v2160_v22, %v1718_v25  ;;  %v8337_v19 = vld [vmem:[#allocation98_spill] sm:$0xff]  ;;  %v8341_v22 = vld [vmem:[#allocation101_spill] sm:$0xff] }
 0x125   : > { %8331 = vst [vmem:[#allocation177_spill] sm:$0xff] %v6219_v62  ;;  %v1725_v10 = vmul.f32 %v8334_v44, %v8334_v44  ;;  %v6230_v8 = vsub.f32 %v763_v9, %v1147_v63  ;;  %v1726_v0 = vmul.f32 %v8336_v48, %v8336_v48  ;;  %v1727_v26 = vmul.f32 %v8337_v19, %v8337_v19  ;;  %v765_v60 = vld [vmem:[%s4456_s10 + $0x9a8] sm:$0xff]  ;;  %v8338_v62 = vld [vmem:[#allocation99_spill] sm:$0xff]  ;;  %v1150_v19 = vld [vmem:[%s4461_s13 + $0x9b0] sm:$0xff] }
 0x126   : > { %v2330_v50 = vadd.f32 %v2329_v42, %v2328_v34  ;;  %v1149_v6 = vld [vmem:[%s4461_s13 + $0x9a8] sm:$0xff]  ;;  %v1728_v44 = vmul.f32 %v8338_v62, %v8338_v62  ;;  %v2029_v7 = vadd.f32 %v2028_v24, %v1720_v56  ;;  %v2162_v25 = vadd.f32 %v2161_v49, %v1721_v18  ;;  %v766_v34 = vld [vmem:[%s4456_s10 + $0x9b0] sm:$0xff]  ;;  %v8345_v49 = vld [vmem:[#allocation103_spill] sm:$0xff] }
 0x127   : > { %8335 = vst [vmem:[#allocation67_spill] sm:$0xff] %v6230_v8  ;;  %v2333_v36 = vsel %vm2259_vm2, %v1722_v16, 0.0  ;;  %v6241_v9 = vsub.f32 %v764_v40, %v1148_v46  ;;  %v8340_v63 = vld [vmem:[#allocation100_spill] sm:$0xff]  ;;  %v1730_v48 = vmul.f32 %v8341_v22, %v8341_v22  ;;  %v8342_v8 = vld [vmem:[#allocation15_spill] sm:$0xff]  ;;  %v2335_v16 = vsel %vm2259_vm2, %v1725_v10, 0.0  ;;  %v8344_v46 = vld [vmem:[#allocation102_spill] sm:$0xff] }
 0x128   : > { %v1729_v54 = vmul.f32 %v8340_v63, %v8340_v63  ;;  %v2332_v42 = vadd.f32 %v2331_v39, %v2330_v50  ;;  %v1731_v62 = vmul.f32 %v8342_v8, %v8342_v8  ;;  %v2030_v56 = vadd.f32 %v2029_v7, %v1723_v47  ;;  %v767_v50 = vld [vmem:[%s4456_s10 + $0x9b8] sm:$0xff] }
 0x129   : > { %8339 = vst [vmem:[#allocation68_spill] sm:$0xff] %v6241_v9  ;;  %v2163_v18 = vadd.f32 %v2162_v25, %v1724_v11  ;;  %v6252_v40 = vsub.f32 %v765_v60, %v1149_v6  ;;  %v1732_v24 = vmul.f32 %v8344_v46, %v8344_v46  ;;  %v1733_v63 = vmul.f32 %v8345_v49, %v8345_v49  ;;  %v1151_v22 = vld [vmem:[%s4461_s13 + $0x9b8] sm:$0xff]  ;;  %v8346_v9 = vld [vmem:[#allocation105_spill] sm:$0xff]  ;;  %v1152_v49 = vld [vmem:[%s4461_s13 + $0x9c0] sm:$0xff] }
 0x12a   : > { %v2334_v39 = vadd.f32 %v2333_v36, %v2332_v42  ;;  %v1734_v8 = vmul.f32 %v8346_v9, %v8346_v9  ;;  %v2031_v47 = vadd.f32 %v2030_v56, %v1726_v0  ;;  %v2337_v10 = vsel %vm2259_vm2, %v1728_v44, 0.0  ;;  %v8348_v6 = vld [vmem:[#allocation106_spill] sm:$0xff]  ;;  %v8349_v25 = vld [vmem:[#allocation107_spill] sm:$0xff] }
 0x12b   : > { %8343 = vst [vmem:[#allocation69_spill] sm:$0xff] %v6252_v40  ;;  %v2164_v11 = vadd.f32 %v2163_v18, %v1727_v26  ;;  %v6263_v60 = vsub.f32 %v766_v34, %v1150_v19  ;;  %v1735_v7 = vmul.f32 %v8348_v6, %v8348_v6  ;;  %v1736_v46 = vmul.f32 %v8349_v25, %v8349_v25  ;;  %v768_v42 = vld [vmem:[%s4456_s10 + $0x9c0] sm:$0xff]  ;;  %v8352_v19 = vld [vmem:[#allocation109_spill] sm:$0xff]  ;;  %v8353_v18 = vld [vmem:[#allocation110_spill] sm:$0xff] }
 0x12c   : > { %v2336_v36 = vadd.f32 %v2335_v16, %v2334_v39  ;;  %v8350_v40 = vld [vmem:[#allocation108_spill] sm:$0xff]  ;;  %v2032_v0 = vadd.f32 %v2031_v47, %v1729_v54  ;;  %v2339_v44 = vsel %vm2259_vm2, %v1731_v62, 0.0  ;;  %v6274_v34 = vsub.f32 %v767_v50, %v1151_v22  ;;  %v8356_v22 = vld [vmem:[#allocation111_spill] sm:$0xff] }
 0x12d   : > { %8347 = vst [vmem:[#allocation70_spill] sm:$0xff] %v6263_v60  ;;  %v1737_v9 = vmul.f32 %v8350_v40, %v8350_v40  ;;  %v2165_v26 = vadd.f32 %v2164_v11, %v1730_v48  ;;  %v1738_v56 = vmul.f32 %v8352_v19, %v8352_v19  ;;  %v1739_v6 = vmul.f32 %v8353_v18, %v8353_v18  ;;  %v769_v39 = vld [vmem:[%s4456_s10 + $0x9c8] sm:$0xff]  ;;  %v8354_v60 = vld [vmem:[#allocation18_spill] sm:$0xff] }
 0x12e   : > { %8351 = vst [vmem:[#allocation71_spill] sm:$0xff] %v6274_v34  ;;  %v2338_v16 = vadd.f32 %v2337_v10, %v2336_v36  ;;  %v1153_v25 = vld [vmem:[%s4461_s13 + $0x9c8] sm:$0xff]  ;;  %v1740_v40 = vmul.f32 %v8354_v60, %v8354_v60  ;;  %v2033_v54 = vadd.f32 %v2032_v0, %v1732_v24  ;;  %v2341_v62 = vsel %vm2259_vm2, %v1734_v8, 0.0  ;;  %v770_v36 = vld [vmem:[%s4456_s10 + $0x9d0] sm:$0xff] }
 0x12f   : > { %v2166_v48 = vadd.f32 %v2165_v26, %v1733_v63  ;;  %v6285_v50 = vsub.f32 %v768_v42, %v1152_v49  ;;  %v1741_v47 = vmul.f32 %v8356_v22, %v8356_v22  ;;  %v8357_v11 = vld [vmem:[#allocation112_spill] sm:$0xff]  ;;  %v1154_v18 = vld [vmem:[%s4461_s13 + $0x9d0] sm:$0xff]  ;;  %v2343_v8 = vsel %vm2259_vm2, %v1737_v9, 0.0  ;;  %v8360_v49 = vld [vmem:[#allocation115_spill] sm:$0xff] }
 0x130   : > { %v1742_v19 = vmul.f32 %v8357_v11, %v8357_v11  ;;  %v2340_v10 = vadd.f32 %v2339_v44, %v2338_v16  ;;  %v8358_v34 = vld [vmem:[#allocation114_spill] sm:$0xff]  ;;  %v2034_v24 = vadd.f32 %v2033_v54, %v1735_v7  ;;  %v6296_v42 = vsub.f32 %v769_v39, %v1153_v25  ;;  %v8361_v26 = vld [vmem:[#allocation116_spill] sm:$0xff] }
 0x131   : > { %8355 = vst [vmem:[#allocation72_spill] sm:$0xff] %v6285_v50  ;;  %v1743_v60 = vmul.f32 %v8358_v34, %v8358_v34  ;;  %v2167_v63 = vadd.f32 %v2166_v48, %v1736_v46  ;;  %v1744_v0 = vmul.f32 %v8360_v49, %v8360_v49  ;;  %v1745_v22 = vmul.f32 %v8361_v26, %v8361_v26  ;;  %v771_v16 = vld [vmem:[%s4456_s10 + $0x9d8] sm:$0xff]  ;;  %v8362_v50 = vld [vmem:[#allocation117_spill] sm:$0xff]  ;;  %v1156_v26 = vld [vmem:[%s4461_s13 + $0x9e0] sm:$0xff] }
 0x132   : > { %8359 = vst [vmem:[#allocation73_spill] sm:$0xff] %v6296_v42  ;;  %v2342_v44 = vadd.f32 %v2341_v62, %v2340_v10  ;;  %v1155_v11 = vld [vmem:[%s4461_s13 + $0x9d8] sm:$0xff]  ;;  %v1746_v34 = vmul.f32 %v8362_v50, %v8362_v50  ;;  %v2035_v7 = vadd.f32 %v2034_v24, %v1738_v56  ;;  %v2345_v9 = vsel %vm2259_vm2, %v1740_v40, 0.0  ;;  %v772_v10 = vld [vmem:[%s4456_s10 + $0x9e0] sm:$0xff]  ;;  %v8366_v42 = vld [vmem:[#allocation21_spill] sm:$0xff] }
 0x133   : > { %v2168_v46 = vadd.f32 %v2167_v63, %v1739_v6  ;;  %v6307_v39 = vsub.f32 %v770_v36, %v1154_v18  ;;  %v8364_v25 = vld [vmem:[#allocation118_spill] sm:$0xff]  ;;  %v8365_v48 = vld [vmem:[#allocation119_spill] sm:$0xff]  ;;  %v1749_v50 = vmul.f32 %v8366_v42, %v8366_v42  ;;  %v2347_v40 = vsel %vm2259_vm2, %v1743_v60, 0.0  ;;  %v8368_v18 = vld [vmem:[#allocation120_spill] sm:$0xff] }
 0x134   : > { %v1747_v54 = vmul.f32 %v8364_v25, %v8364_v25  ;;  %v1748_v49 = vmul.f32 %v8365_v48, %v8365_v48  ;;  %v2344_v62 = vadd.f32 %v2343_v8, %v2342_v44  ;;  %v2036_v56 = vadd.f32 %v2035_v7, %v1741_v47  ;;  %v8369_v63 = vld [vmem:[#allocation121_spill] sm:$0xff] }
 0x135   : > { %8363 = vst [vmem:[#allocation74_spill] sm:$0xff] %v6307_v39  ;;  %v2169_v6 = vadd.f32 %v2168_v46, %v1742_v19  ;;  %v6318_v36 = vsub.f32 %v771_v16, %v1155_v11  ;;  %v1750_v24 = vmul.f32 %v8368_v18, %v8368_v18  ;;  %v1751_v25 = vmul.f32 %v8369_v63, %v8369_v63  ;;  %v773_v44 = vld [vmem:[%s4456_s10 + $0x9e8] sm:$0xff]  ;;  %v8370_v39 = vld [vmem:[#allocation123_spill] sm:$0xff]  ;;  %v1158_v63 = vld [vmem:[%s4461_s13 + $0x9f0] sm:$0xff] }
 0x136   : > { %v2346_v8 = vadd.f32 %v2345_v9, %v2344_v62  ;;  %v1157_v48 = vld [vmem:[%s4461_s13 + $0x9e8] sm:$0xff]  ;;  %v1752_v42 = vmul.f32 %v8370_v39, %v8370_v39  ;;  %v2037_v47 = vadd.f32 %v2036_v56, %v1744_v0  ;;  %v2349_v60 = vsel %vm2259_vm2, %v1746_v34, 0.0  ;;  %v774_v62 = vld [vmem:[%s4456_s10 + $0x9f0] sm:$0xff] }
 0x137   : > { %8367 = vst [vmem:[#allocation75_spill] sm:$0xff] %v6318_v36  ;;  %v2170_v19 = vadd.f32 %v2169_v6, %v1745_v22  ;;  %v6329_v16 = vsub.f32 %v772_v10, %v1156_v26  ;;  %v8372_v11 = vld [vmem:[#allocation124_spill] sm:$0xff]  ;;  %v8373_v46 = vld [vmem:[#allocation125_spill] sm:$0xff]  ;;  %v8374_v36 = vld [vmem:[#allocation126_spill] sm:$0xff]  ;;  %v2351_v34 = vsel %vm2259_vm2, %v1749_v50, 0.0  ;;  %v6340_v10 = vsub.f32 %v773_v44, %v1157_v48 }
 0x138   : > { %v1753_v7 = vmul.f32 %v8372_v11, %v8372_v11  ;;  %v1754_v18 = vmul.f32 %v8373_v46, %v8373_v46  ;;  %v2348_v9 = vadd.f32 %v2347_v40, %v2346_v8  ;;  %v1755_v39 = vmul.f32 %v8374_v36, %v8374_v36  ;;  %v8376_v26 = vld [vmem:[#allocation127_spill] sm:$0xff]  ;;  %v8377_v6 = vld [vmem:[#allocation128_spill] sm:$0xff]  ;;  %v8380_v48 = vld [vmem:[#allocation129_spill] sm:$0xff] }
 0x139   : > { %8371 = vst [vmem:[#allocation76_spill] sm:$0xff] %v6329_v16  ;;  %v2038_v0 = vadd.f32 %v2037_v47, %v1747_v54  ;;  %v2171_v22 = vadd.f32 %v2170_v19, %v1748_v49  ;;  %8375 = vst [vmem:[#allocation77_spill] sm:$0xff] %v6340_v10  ;;  %v1756_v56 = vmul.f32 %v8376_v26, %v8376_v26  ;;  %v775_v8 = vld [vmem:[%s4456_s10 + $0x9f8] sm:$0xff]  ;;  %v8378_v16 = vld [vmem:[#allocation24_spill] sm:$0xff]  ;;  %v2353_v50 = vsel %vm2259_vm2, %v1752_v42, 0.0 }
 0x13a   : > { %v1757_v11 = vmul.f32 %v8377_v6, %v8377_v6  ;;  %v2350_v40 = vadd.f32 %v2349_v60, %v2348_v9  ;;  %v1159_v46 = vld [vmem:[%s4461_s13 + $0x9f8] sm:$0xff]  ;;  %v1758_v36 = vmul.f32 %v8378_v16, %v8378_v16  ;;  %v6351_v44 = vsub.f32 %v774_v62, %v1158_v63  ;;  %v776_v9 = vld [vmem:[%s4456_s10 + $0xa00] sm:$0xff]  ;;  %v8384_v63 = vld [vmem:[#allocation133_spill] sm:$0xff] }
 0x13b   : > { %v2039_v54 = vadd.f32 %v2038_v0, %v1750_v24  ;;  %v2172_v49 = vadd.f32 %v2171_v22, %v1751_v25  ;;  %v1759_v47 = vmul.f32 %v8380_v48, %v8380_v48  ;;  %v8381_v19 = vld [vmem:[#allocation130_spill] sm:$0xff]  ;;  %v1160_v6 = vld [vmem:[%s4461_s13 + $0xa00] sm:$0xff]  ;;  %v2355_v42 = vsel %vm2259_vm2, %v1755_v39, 0.0 }
 0x13c   : > { %8379 = vst [vmem:[#allocation78_spill] sm:$0xff] %v6351_v44  ;;  %v1760_v26 = vmul.f32 %v8381_v19, %v8381_v19  ;;  %v2352_v60 = vadd.f32 %v2351_v34, %v2350_v40  ;;  %v8382_v10 = vld [vmem:[#allocation132_spill] sm:$0xff]  ;;  %v6362_v62 = vsub.f32 %v775_v8, %v1159_v46  ;;  %v1762_v0 = vmul.f32 %v8384_v63, %v8384_v63  ;;  %v8385_v22 = vld [vmem:[#allocation134_spill] sm:$0xff]  ;;  %v8386_v44 = vld [vmem:[#allocation135_spill] sm:$0xff] }
 0x13d   : > { %v1761_v16 = vmul.f32 %v8382_v10, %v8382_v10  ;;  %v2040_v24 = vadd.f32 %v2039_v54, %v1753_v7  ;;  %v2173_v25 = vadd.f32 %v2172_v49, %v1754_v18  ;;  %v1763_v48 = vmul.f32 %v8385_v22, %v8385_v22  ;;  %v777_v40 = vld [vmem:[%s4456_s10 + $0xa08] sm:$0xff]  ;;  %v1162_v22 = vld [vmem:[%s4461_s13 + $0xa10] sm:$0xff] }
 0x13e   : > { %8383 = vst [vmem:[#allocation79_spill] sm:$0xff] %v6362_v62  ;;  %v2354_v34 = vadd.f32 %v2353_v50, %v2352_v60  ;;  %v1161_v19 = vld [vmem:[%s4461_s13 + $0xa08] sm:$0xff]  ;;  %v1764_v10 = vmul.f32 %v8386_v44, %v8386_v44  ;;  %v2357_v39 = vsel %vm2259_vm2, %v1758_v36, 0.0  ;;  %v6373_v8 = vsub.f32 %v776_v9, %v1160_v6  ;;  %v778_v60 = vld [vmem:[%s4456_s10 + $0xa10] sm:$0xff]  ;;  %v8390_v62 = vld [vmem:[#allocation27_spill] sm:$0xff] }
 0x13f   : > { %v2041_v7 = vadd.f32 %v2040_v24, %v1756_v56  ;;  %v2174_v18 = vadd.f32 %v2173_v25, %v1757_v11  ;;  %v8388_v46 = vld [vmem:[#allocation136_spill] sm:$0xff]  ;;  %v8389_v49 = vld [vmem:[#allocation137_spill] sm:$0xff]  ;;  %v1767_v44 = vmul.f32 %v8390_v62, %v8390_v62  ;;  %v2359_v36 = vsel %vm2259_vm2, %v1761_v16, 0.0  ;;  %v8392_v6 = vld [vmem:[#allocation138_spill] sm:$0xff] }
 0x140   : > { %8387 = vst [vmem:[#allocation80_spill] sm:$0xff] %v6373_v8  ;;  %v1765_v54 = vmul.f32 %v8388_v46, %v8388_v46  ;;  %v1766_v63 = vmul.f32 %v8389_v49, %v8389_v49  ;;  %v2356_v50 = vadd.f32 %v2355_v42, %v2354_v34  ;;  %v6384_v9 = vsub.f32 %v777_v40, %v1161_v19  ;;  %v8393_v25 = vld [vmem:[#allocation139_spill] sm:$0xff]  ;;  %v8394_v8 = vld [vmem:[#allocation141_spill] sm:$0xff]  ;;  %v8396_v19 = vld [vmem:[#allocation142_spill] sm:$0xff] }
 0x141   : > { %v2042_v56 = vadd.f32 %v2041_v7, %v1759_v47  ;;  %v2175_v11 = vadd.f32 %v2174_v18, %v1760_v26  ;;  %v1768_v24 = vmul.f32 %v8392_v6, %v8392_v6  ;;  %v1769_v46 = vmul.f32 %v8393_v25, %v8393_v25  ;;  %v779_v34 = vld [vmem:[%s4456_s10 + $0xa18] sm:$0xff]  ;;  %v1164_v25 = vld [vmem:[%s4461_s13 + $0xa20] sm:$0xff] }
 0x142   : > { %8391 = vst [vmem:[#allocation81_spill] sm:$0xff] %v6384_v9  ;;  %v2358_v42 = vadd.f32 %v2357_v39, %v2356_v50  ;;  %v1163_v49 = vld [vmem:[%s4461_s13 + $0xa18] sm:$0xff]  ;;  %v1770_v62 = vmul.f32 %v8394_v8, %v8394_v8  ;;  %v2361_v16 = vsel %vm2259_vm2, %v1764_v10, 0.0  ;;  %v6395_v40 = vsub.f32 %v778_v60, %v1162_v22  ;;  %v780_v50 = vld [vmem:[%s4456_s10 + $0xa20] sm:$0xff]  ;;  %v8400_v22 = vld [vmem:[#allocation145_spill] sm:$0xff] }
 0x143   : > { %v2043_v47 = vadd.f32 %v2042_v56, %v1762_v0  ;;  %v2176_v26 = vadd.f32 %v2175_v11, %v1763_v48  ;;  %v1771_v7 = vmul.f32 %v8396_v19, %v8396_v19  ;;  %v8397_v18 = vld [vmem:[#allocation143_spill] sm:$0xff]  ;;  %v8398_v9 = vld [vmem:[#allocation144_spill] sm:$0xff]  ;;  %v2363_v10 = vsel %vm2259_vm2, %v1767_v44, 0.0  ;;  %v8401_v11 = vld [vmem:[#allocation146_spill] sm:$0xff] }
 0x144   : > { %8395 = vst [vmem:[#allocation82_spill] sm:$0xff] %v6395_v40  ;;  %v1772_v6 = vmul.f32 %v8397_v18, %v8397_v18  ;;  %v2360_v39 = vadd.f32 %v2359_v36, %v2358_v42  ;;  %v1773_v8 = vmul.f32 %v8398_v9, %v8398_v9  ;;  %v6406_v60 = vsub.f32 %v779_v34, %v1163_v49  ;;  %v781_v42 = vld [vmem:[%s4456_s10 + $0xa28] sm:$0xff]  ;;  %v8402_v40 = vld [vmem:[#allocation30_spill] sm:$0xff]  ;;  %v8404_v49 = vld [vmem:[#allocation147_spill] sm:$0xff] }
 0x145   : > { %v2044_v0 = vadd.f32 %v2043_v47, %v1765_v54  ;;  %v2177_v48 = vadd.f32 %v2176_v26, %v1766_v63  ;;  %v1774_v56 = vmul.f32 %v8400_v22, %v8400_v22  ;;  %v1775_v19 = vmul.f32 %v8401_v11, %v8401_v11  ;;  %v1165_v18 = vld [vmem:[%s4461_s13 + $0xa28] sm:$0xff]  ;;  %v1166_v11 = vld [vmem:[%s4461_s13 + $0xa30] sm:$0xff] }
 0x146   : > { %8399 = vst [vmem:[#allocation83_spill] sm:$0xff] %v6406_v60  ;;  %v2362_v36 = vadd.f32 %v2361_v16, %v2360_v39  ;;  %v1776_v9 = vmul.f32 %v8402_v40, %v8402_v40  ;;  %v2365_v44 = vsel %vm2259_vm2, %v1770_v62, 0.0  ;;  %v6417_v34 = vsub.f32 %v780_v50, %v1164_v25  ;;  %v8405_v26 = vld [vmem:[#allocation148_spill] sm:$0xff]  ;;  %v782_v39 = vld [vmem:[%s4456_s10 + $0xa30] sm:$0xff]  ;;  %v8408_v25 = vld [vmem:[#allocation151_spill] sm:$0xff] }
 0x147   : > { %v2045_v54 = vadd.f32 %v2044_v0, %v1768_v24  ;;  %v2178_v63 = vadd.f32 %v2177_v48, %v1769_v46  ;;  %v1777_v47 = vmul.f32 %v8404_v49, %v8404_v49  ;;  %v1778_v22 = vmul.f32 %v8405_v26, %v8405_v26  ;;  %v8406_v60 = vld [vmem:[#allocation150_spill] sm:$0xff]  ;;  %v8409_v48 = vld [vmem:[#allocation152_spill] sm:$0xff] }
 0x148   : > { %8403 = vst [vmem:[#allocation84_spill] sm:$0xff] %v6417_v34  ;;  %v2364_v16 = vadd.f32 %v2363_v10, %v2362_v36  ;;  %v1779_v40 = vmul.f32 %v8406_v60, %v8406_v60  ;;  %v2367_v62 = vsel %vm2259_vm2, %v1773_v8, 0.0  ;;  %v6428_v50 = vsub.f32 %v781_v42, %v1165_v18  ;;  %v783_v36 = vld [vmem:[%s4456_s10 + $0xa38] sm:$0xff]  ;;  %v8410_v34 = vld [vmem:[#allocation153_spill] sm:$0xff] }
 0x149   : > { %v2046_v24 = vadd.f32 %v2045_v54, %v1771_v7  ;;  %v2179_v46 = vadd.f32 %v2178_v63, %v1772_v6  ;;  %v1780_v0 = vmul.f32 %v8408_v25, %v8408_v25  ;;  %v1781_v49 = vmul.f32 %v8409_v48, %v8409_v48  ;;  %v1167_v26 = vld [vmem:[%s4461_s13 + $0xa38] sm:$0xff]  ;;  %v1168_v48 = vld [vmem:[%s4461_s13 + $0xa40] sm:$0xff] }
 0x14a   : > { %8407 = vst [vmem:[#allocation85_spill] sm:$0xff] %v6428_v50  ;;  %v2366_v10 = vadd.f32 %v2365_v44, %v2364_v16  ;;  %v1782_v60 = vmul.f32 %v8410_v34, %v8410_v34  ;;  %v2369_v8 = vsel %vm2259_vm2, %v1776_v9, 0.0  ;;  %v6439_v42 = vsub.f32 %v782_v39, %v1166_v11  ;;  %v8412_v18 = vld [vmem:[#allocation154_spill] sm:$0xff]  ;;  %v8413_v63 = vld [vmem:[#allocation155_spill] sm:$0xff]  ;;  %v8414_v50 = vld [vmem:[#allocation33_spill] sm:$0xff] }
 0x14b   : > { %v2047_v7 = vadd.f32 %v2046_v24, %v1774_v56  ;;  %v2180_v6 = vadd.f32 %v2179_v46, %v1775_v19  ;;  %v1783_v54 = vmul.f32 %v8412_v18, %v8412_v18  ;;  %v1784_v25 = vmul.f32 %v8413_v63, %v8413_v63  ;;  %v784_v16 = vld [vmem:[%s4456_s10 + $0xa40] sm:$0xff]  ;;  %v8417_v46 = vld [vmem:[#allocation157_spill] sm:$0xff] }
 0x14c   : > { %8411 = vst [vmem:[#allocation86_spill] sm:$0xff] %v6439_v42  ;;  %v2368_v44 = vadd.f32 %v2367_v62, %v2366_v10  ;;  %v1785_v34 = vmul.f32 %v8414_v50, %v8414_v50  ;;  %v2371_v9 = vsel %vm2259_vm2, %v1779_v40, 0.0  ;;  %v6450_v39 = vsub.f32 %v783_v36, %v1167_v26  ;;  %v8416_v11 = vld [vmem:[#allocation156_spill] sm:$0xff]  ;;  %v8418_v42 = vld [vmem:[#allocation159_spill] sm:$0xff] }
 0x14d   : > { %v2048_v56 = vadd.f32 %v2047_v7, %v1777_v47  ;;  %v2181_v19 = vadd.f32 %v2180_v6, %v1778_v22  ;;  %v1786_v24 = vmul.f32 %v8416_v11, %v8416_v11  ;;  %v1787_v18 = vmul.f32 %v8417_v46, %v8417_v46  ;;  %v785_v10 = vld [vmem:[%s4456_s10 + $0xa48] sm:$0xff]  ;;  %v1170_v46 = vld [vmem:[%s4461_s13 + $0xa50] sm:$0xff] }
 0x14e   : > { %8415 = vst [vmem:[#allocation87_spill] sm:$0xff] %v6450_v39  ;;  %v2370_v62 = vadd.f32 %v2369_v8, %v2368_v44  ;;  %v1169_v63 = vld [vmem:[%s4461_s13 + $0xa48] sm:$0xff]  ;;  %v1788_v50 = vmul.f32 %v8418_v42, %v8418_v42  ;;  %v2373_v40 = vsel %vm2259_vm2, %v1782_v60, 0.0  ;;  %v6461_v36 = vsub.f32 %v784_v16, %v1168_v48  ;;  %v786_v44 = vld [vmem:[%s4456_s10 + $0xa50] sm:$0xff]  ;;  %v8424_v48 = vld [vmem:[#allocation163_spill] sm:$0xff] }
 0x14f   : > { %v2049_v47 = vadd.f32 %v2048_v56, %v1780_v0  ;;  %v2182_v22 = vadd.f32 %v2181_v19, %v1781_v49  ;;  %v8420_v26 = vld [vmem:[#allocation160_spill] sm:$0xff]  ;;  %v8421_v6 = vld [vmem:[#allocation161_spill] sm:$0xff]  ;;  %v8422_v39 = vld [vmem:[#allocation162_spill] sm:$0xff]  ;;  %v2375_v60 = vsel %vm2259_vm2, %v1785_v34, 0.0  ;;  %v6472_v16 = vsub.f32 %v785_v10, %v1169_v63 }
 0x150   : > { %8419 = vst [vmem:[#allocation88_spill] sm:$0xff] %v6461_v36  ;;  %v1789_v7 = vmul.f32 %v8420_v26, %v8420_v26  ;;  %v1790_v11 = vmul.f32 %v8421_v6, %v8421_v6  ;;  %v2372_v8 = vadd.f32 %v2371_v9, %v2370_v62  ;;  %v1791_v42 = vmul.f32 %v8422_v39, %v8422_v39  ;;  %v8425_v19 = vld [vmem:[#allocation164_spill] sm:$0xff]  ;;  %v787_v62 = vld [vmem:[%s4456_s10 + $0xa58] sm:$0xff]  ;;  %v8428_v63 = vld [vmem:[#allocation165_spill] sm:$0xff] }
 0x151   : > { %v2050_v0 = vadd.f32 %v2049_v47, %v1783_v54  ;;  %v2183_v49 = vadd.f32 %v2182_v22, %v1784_v25  ;;  %8423 = vst [vmem:[#allocation90_spill] sm:$0xff] %v6472_v16  ;;  %v1792_v56 = vmul.f32 %v8424_v48, %v8424_v48  ;;  %v1793_v26 = vmul.f32 %v8425_v19, %v8425_v19  ;;  %v1171_v6 = vld [vmem:[%s4461_s13 + $0xa58] sm:$0xff]  ;;  %v8426_v36 = vld [vmem:[#allocation36_spill] sm:$0xff] }
 0x152   : > { %v2374_v9 = vadd.f32 %v2373_v40, %v2372_v8  ;;  %v1794_v39 = vmul.f32 %v8426_v36, %v8426_v36  ;;  %v2377_v34 = vsel %vm2259_vm2, %v1788_v50, 0.0  ;;  %v6483_v10 = vsub.f32 %v786_v44, %v1170_v46  ;;  %v8429_v22 = vld [vmem:[#allocation166_spill] sm:$0xff]  ;;  %v788_v8 = vld [vmem:[%s4456_s10 + $0xa60] sm:$0xff]  ;;  %v8432_v46 = vld [vmem:[#allocation169_spill] sm:$0xff] }
 0x153   : > { %v2051_v54 = vadd.f32 %v2050_v0, %v1786_v24  ;;  %v2184_v25 = vadd.f32 %v2183_v49, %v1787_v18  ;;  %v1795_v47 = vmul.f32 %v8428_v63, %v8428_v63  ;;  %v1796_v48 = vmul.f32 %v8429_v22, %v8429_v22  ;;  %v1172_v19 = vld [vmem:[%s4461_s13 + $0xa60] sm:$0xff]  ;;  %v8433_v49 = vld [vmem:[#allocation170_spill] sm:$0xff]  ;;  %v1173_v22 = vld [vmem:[%s4461_s13 + $0xa68] sm:$0xff] }
 0x154   : > { %8427 = vst [vmem:[#allocation91_spill] sm:$0xff] %v6483_v10  ;;  %v2376_v40 = vadd.f32 %v2375_v60, %v2374_v9  ;;  %v8430_v16 = vld [vmem:[#allocation168_spill] sm:$0xff]  ;;  %v2379_v50 = vsel %vm2259_vm2, %v1791_v42, 0.0  ;;  %v6494_v44 = vsub.f32 %v787_v62, %v1171_v6  ;;  %v1798_v0 = vmul.f32 %v8432_v46, %v8432_v46  ;;  %v8434_v10 = vld [vmem:[#allocation171_spill] sm:$0xff] }
 0x155   : > { %v1797_v36 = vmul.f32 %v8430_v16, %v8430_v16  ;;  %v2052_v24 = vadd.f32 %v2051_v54, %v1789_v7  ;;  %v2185_v18 = vadd.f32 %v2184_v25, %v1790_v11  ;;  %v1799_v63 = vmul.f32 %v8433_v49, %v8433_v49  ;;  %v789_v9 = vld [vmem:[%s4456_s10 + $0xa68] sm:$0xff]  ;;  %v1174_v49 = vld [vmem:[%s4461_s13 + $0xa70] sm:$0xff] }
 0x156   : > { %8431 = vst [vmem:[#allocation92_spill] sm:$0xff] %v6494_v44  ;;  %v2378_v60 = vadd.f32 %v2377_v34, %v2376_v40  ;;  %v1800_v16 = vmul.f32 %v8434_v10, %v8434_v10  ;;  %v2381_v42 = vsel %vm2259_vm2, %v1794_v39, 0.0  ;;  %v6505_v62 = vsub.f32 %v788_v8, %v1172_v19  ;;  %v8435_v6 = vld [vmem:[#allocation172_spill] sm:$0xff]  ;;  %v8436_v25 = vld [vmem:[#allocation173_spill] sm:$0xff]  ;;  %v8437_v44 = vld [vmem:[#allocation174_spill] sm:$0xff] }
 0x157   : > { %v2053_v7 = vadd.f32 %v2052_v24, %v1792_v56  ;;  %v2186_v11 = vadd.f32 %v2185_v18, %v1793_v26  ;;  %v1801_v54 = vmul.f32 %v8435_v6, %v8435_v6  ;;  %v1802_v46 = vmul.f32 %v8436_v25, %v8436_v25  ;;  %v790_v40 = vld [vmem:[%s4456_s10 + $0xa70] sm:$0xff]  ;;  %v8438_v19 = vld [vmem:[#allocation175_spill] sm:$0xff]  ;;  %v8439_v18 = vld [vmem:[#allocation176_spill] sm:$0xff] }
 0x158   : > { %v2380_v34 = vadd.f32 %v2379_v50, %v2378_v60  ;;  %v1803_v10 = vmul.f32 %v8437_v44, %v8437_v44  ;;  %v2383_v39 = vsel %vm2259_vm2, %v1797_v36, 0.0  ;;  %v6516_v8 = vsub.f32 %v789_v9, %v1173_v22  ;;  %v791_v60 = vld [vmem:[%s4456_s10 + $0xa78] sm:$0xff] }
 0x159   : > { %v2054_v56 = vadd.f32 %v2053_v7, %v1795_v47  ;;  %v2187_v26 = vadd.f32 %v2186_v11, %v1796_v48  ;;  %v1804_v24 = vmul.f32 %v8438_v19, %v8438_v19  ;;  %v1805_v6 = vmul.f32 %v8439_v18, %v8439_v18  ;;  %v1175_v25 = vld [vmem:[%s4461_s13 + $0xa78] sm:$0xff]  ;;  %v1176_v18 = vld [vmem:[%s4461_s13 + $0xa80] sm:$0xff] }
 0x15a   : > { %v2382_v50 = vadd.f32 %v2381_v42, %v2380_v34  ;;  %v1806_v44 = vmul.f32 %v5515_v43, %v5515_v43  ;;  %v2385_v36 = vsel %vm2259_vm2, %v1800_v16, 0.0  ;;  %v6527_v9 = vsub.f32 %v790_v40, %v1174_v49  ;;  %v8440_v22 = vld [vmem:[#allocation178_spill] sm:$0xff]  ;;  %v8441_v11 = vld [vmem:[#allocation179_spill] sm:$0xff] }
 0x15b   : > { %v2055_v47 = vadd.f32 %v2054_v56, %v1798_v0  ;;  %v2188_v48 = vadd.f32 %v2187_v26, %v1799_v63  ;;  %v1807_v7 = vmul.f32 %v8440_v22, %v8440_v22  ;;  %v1808_v19 = vmul.f32 %v8441_v11, %v8441_v11  ;;  %v792_v34 = vld [vmem:[%s4456_s10 + $0xa80] sm:$0xff]  ;;  %v8442_v56 = vld [vmem:[#allocation41_spill] sm:$0xff] }
 0x15c   : > { %v2384_v42 = vadd.f32 %v2383_v39, %v2382_v50  ;;  %v1809_v43 = vmul.f32 %v5529_v30, %v5529_v30  ;;  %v2387_v16 = vsel %vm2259_vm2, %v1803_v10, 0.0  ;;  %v6538_v40 = vsub.f32 %v791_v60, %v1175_v25  ;;  %v793_v50 = vld [vmem:[%s4456_s10 + $0xa88] sm:$0xff]  ;;  %v8444_v25 = vld [vmem:[#allocation42_spill] sm:$0xff] }
 0x15d   : > { %v2056_v0 = vadd.f32 %v2055_v47, %v1801_v54  ;;  %v2189_v63 = vadd.f32 %v2188_v48, %v1802_v46  ;;  %v1810_v49 = vmul.f32 %v5531_v33, %v5531_v33  ;;  %v1811_v26 = vmul.f32 %v8442_v56, %v8442_v56  ;;  %v1177_v22 = vld [vmem:[%s4461_s13 + $0xa88] sm:$0xff]  ;;  %v794_v11 = vld [vmem:[%s4456_s10 + $0xa90] sm:$0xff] }
 0x15e   : > { %v2386_v39 = vadd.f32 %v2385_v36, %v2384_v42  ;;  %v1812_v30 = vmul.f32 %v5543_v12, %v5543_v12  ;;  %v2389_v10 = vsel %vm2259_vm2, %v1806_v44, 0.0  ;;  %v6549_v60 = vsub.f32 %v792_v34, %v1176_v18  ;;  %v8445_v47 = vld [vmem:[#allocation180_spill] sm:$0xff]  ;;  %v1178_v42 = vld [vmem:[%s4461_s13 + $0xa90] sm:$0xff] }
 0x15f   : > { %v2057_v54 = vadd.f32 %v2056_v0, %v1804_v24  ;;  %v2190_v46 = vadd.f32 %v2189_v63, %v1805_v6  ;;  %v1813_v33 = vmul.f32 %v8444_v25, %v8444_v25  ;;  %v1814_v48 = vmul.f32 %v8445_v47, %v8445_v47  ;;  %v8446_v56 = vld [vmem:[#allocation181_spill] sm:$0xff]  ;;  %v8448_v18 = vld [vmem:[#allocation182_spill] sm:$0xff]  ;;  %v8449_v63 = vld [vmem:[#allocation183_spill] sm:$0xff] }
 0x160   : > { %8443 = vst [vmem:[#allocation12_spill] sm:$0xff] %v6549_v60  ;;  %v2388_v36 = vadd.f32 %v2387_v16, %v2386_v39  ;;  %v1815_v12 = vmul.f32 %v8446_v56, %v8446_v56  ;;  %v2391_v44 = vsel %vm2259_vm2, %v1809_v43, 0.0  ;;  %v6560_v34 = vsub.f32 %v793_v50, %v1177_v22  ;;  %v795_v39 = vld [vmem:[%s4456_s10 + $0xa98] sm:$0xff]  ;;  %v8450_v60 = vld [vmem:[#allocation44_spill] sm:$0xff] }
 0x161   : > { %v2058_v24 = vadd.f32 %v2057_v54, %v1807_v7  ;;  %v2191_v6 = vadd.f32 %v2190_v46, %v1808_v19  ;;  %v1816_v0 = vmul.f32 %v8448_v18, %v8448_v18  ;;  %v1817_v25 = vmul.f32 %v8449_v63, %v8449_v63  ;;  %v1179_v47 = vld [vmem:[%s4461_s13 + $0xa98] sm:$0xff]  ;;  %v8452_v22 = vld [vmem:[#allocation184_spill] sm:$0xff]  ;;  %v8453_v46 = vld [vmem:[#allocation185_spill] sm:$0xff] }
 0x162   : > { %8447 = vst [vmem:[#allocation93_spill] sm:$0xff] %v6560_v34  ;;  %v2390_v16 = vadd.f32 %v2389_v10, %v2388_v36  ;;  %v1818_v56 = vmul.f32 %v8450_v60, %v8450_v60  ;;  %v2393_v43 = vsel %vm2259_vm2, %v1812_v30, 0.0  ;;  %v6571_v50 = vsub.f32 %v794_v11, %v1178_v42  ;;  %v796_v36 = vld [vmem:[%s4456_s10 + $0xaa0] sm:$0xff]  ;;  %v8454_v34 = vld [vmem:[#allocation45_spill] sm:$0xff]  ;;  %v8456_v42 = vld [vmem:[#allocation186_spill] sm:$0xff] }
 0x163   : > { %v2059_v7 = vadd.f32 %v2058_v24, %v1810_v49  ;;  %v2192_v19 = vadd.f32 %v2191_v6, %v1811_v26  ;;  %v1819_v54 = vmul.f32 %v8452_v22, %v8452_v22  ;;  %v1820_v18 = vmul.f32 %v8453_v46, %v8453_v46  ;;  %v1180_v63 = vld [vmem:[%s4461_s13 + $0xaa0] sm:$0xff]  ;;  %v1181_v46 = vld [vmem:[%s4461_s13 + $0xaa8] sm:$0xff] }
 0x164   : > { %8451 = vst [vmem:[#allocation94_spill] sm:$0xff] %v6571_v50  ;;  %v2392_v10 = vadd.f32 %v2391_v44, %v2390_v16  ;;  %v1821_v60 = vmul.f32 %v8454_v34, %v8454_v34  ;;  %v2395_v30 = vsel %vm2259_vm2, %v1815_v12, 0.0  ;;  %v6582_v11 = vsub.f32 %v795_v39, %v1179_v47  ;;  %v8457_v6 = vld [vmem:[#allocation187_spill] sm:$0xff]  ;;  %v797_v16 = vld [vmem:[%s4456_s10 + $0xaa8] sm:$0xff] }
 0x165   : > { %v2060_v49 = vadd.f32 %v2059_v7, %v1813_v33  ;;  %v2193_v26 = vadd.f32 %v2192_v19, %v1814_v48  ;;  %v1822_v24 = vmul.f32 %v8456_v42, %v8456_v42  ;;  %v1823_v22 = vmul.f32 %v8457_v6, %v8457_v6  ;;  %v8458_v50 = vld [vmem:[#allocation188_spill] sm:$0xff]  ;;  %v8460_v47 = vld [vmem:[#allocation47_spill] sm:$0xff]  ;;  %v1182_v6 = vld [vmem:[%s4461_s13 + $0xab0] sm:$0xff] }
 0x166   : > { %8455 = vst [vmem:[#allocation96_spill] sm:$0xff] %v6582_v11  ;;  %v2394_v44 = vadd.f32 %v2393_v43, %v2392_v10  ;;  %v1824_v34 = vmul.f32 %v8458_v50, %v8458_v50  ;;  %v2397_v12 = vsel %vm2259_vm2, %v1818_v56, 0.0  ;;  %v6593_v39 = vsub.f32 %v796_v36, %v1180_v63  ;;  %v8461_v19 = vld [vmem:[#allocation4_spill] sm:$0xff]  ;;  %v798_v10 = vld [vmem:[%s4456_s10 + $0xab0] sm:$0xff]  ;;  %v8462_v11 = vld [vmem:[#allocation7_spill] sm:$0xff] }
 0x167   : > { %v2061_v33 = vadd.f32 %v2060_v49, %v1816_v0  ;;  %v2194_v48 = vadd.f32 %v2193_v26, %v1817_v25  ;;  %v1825_v7 = vmul.f32 %v8460_v47, %v8460_v47  ;;  %v1826_v42 = vmul.f32 %v8461_v19, %v8461_v19  ;;  %v8464_v63 = vld [vmem:[#allocation5_spill] sm:$0xff]  ;;  %v8465_v26 = vld [vmem:[#allocation8_spill] sm:$0xff]  ;;  %v1183_v19 = vld [vmem:[%s4461_s13 + $0xab8] sm:$0xff] }
 0x168   : > { %8459 = vst [vmem:[#allocation97_spill] sm:$0xff] %v6593_v39  ;;  %v2396_v43 = vadd.f32 %v2395_v30, %v2394_v44  ;;  %v1827_v50 = vmul.f32 %v8462_v11, %v8462_v11  ;;  %v2399_v56 = vsel %vm2259_vm2, %v1821_v60, 0.0  ;;  %v6604_v36 = vsub.f32 %v797_v16, %v1181_v46  ;;  %v799_v44 = vld [vmem:[%s4456_s10 + $0xab8] sm:$0xff] }
 0x169   : > { %v2062_v0 = vadd.f32 %v2061_v33, %v1819_v54  ;;  %v2195_v25 = vadd.f32 %v2194_v48, %v1820_v18  ;;  %v1828_v49 = vmul.f32 %v8464_v63, %v8464_v63  ;;  %v1829_v47 = vmul.f32 %v8465_v26, %v8465_v26  ;;  %v8466_v39 = vld [vmem:[#allocation10_spill] sm:$0xff]  ;;  %v8468_v46 = vld [vmem:[#allocation11_spill] sm:$0xff] }
 0x16a   : > { %8463 = vst [vmem:[#allocation98_spill] sm:$0xff] %v6604_v36  ;;  %v2398_v30 = vadd.f32 %v2397_v12, %v2396_v43  ;;  %v1830_v11 = vmul.f32 %v8466_v39, %v8466_v39  ;;  %v2401_v60 = vsel %vm2259_vm2, %v1824_v34, 0.0  ;;  %v6615_v16 = vsub.f32 %v798_v10, %v1182_v6  ;;  %v8469_v48 = vld [vmem:[#allocation6_spill] sm:$0xff]  ;;  %v800_v43 = vld [vmem:[%s4456_s10 + $0xac0] sm:$0xff]  ;;  %v8470_v36 = vld [vmem:[#allocation9_spill] sm:$0xff] }
 0x16b   : > { %v2063_v54 = vadd.f32 %v2062_v0, %v1822_v24  ;;  %v2196_v18 = vadd.f32 %v2195_v25, %v1823_v22  ;;  %v1831_v33 = vmul.f32 %v8468_v46, %v8468_v46  ;;  %v1832_v63 = vmul.f32 %v8469_v48, %v8469_v48  ;;  %v1184_v26 = vld [vmem:[%s4461_s13 + $0xac0] sm:$0xff]  ;;  %v8472_v25 = vld [vmem:[#allocation13_spill] sm:$0xff] }
 0x16c   : > { %8467 = vst [vmem:[#allocation99_spill] sm:$0xff] %v6615_v16  ;;  %v2400_v12 = vadd.f32 %v2399_v56, %v2398_v30  ;;  %v1833_v39 = vmul.f32 %v8470_v36, %v8470_v36  ;;  %v2403_v34 = vsel %vm2259_vm2, %v1827_v50, 0.0  ;;  %v6626_v10 = vsub.f32 %v799_v44, %v1183_v19  ;;  %v8471_v6 = vld [vmem:[#allocation48_spill] sm:$0xff]  ;;  %v8474_v19 = vld [vmem:[#allocation19_spill] sm:$0xff] }
 0x16d   : > { %v2064_v24 = vadd.f32 %v2063_v54, %v1825_v7  ;;  %v2197_v22 = vadd.f32 %v2196_v18, %v1826_v42  ;;  %v1834_v0 = vmul.f32 %v8471_v6, %v8471_v6  ;;  %v1835_v46 = vmul.f32 %v8472_v25, %v8472_v25  ;;  %v801_v30 = vld [vmem:[%s4456_s10 + $0xac8] sm:$0xff]  ;;  %v8475_v18 = vld [vmem:[#allocation22_spill] sm:$0xff] }
 0x16e   : > { %v2402_v56 = vadd.f32 %v2401_v60, %v2400_v12  ;;  %v1185_v48 = vld [vmem:[%s4461_s13 + $0xac8] sm:$0xff]  ;;  %v2405_v50 = vsel %vm2259_vm2, %v1830_v11, 0.0  ;;  %v6637_v44 = vsub.f32 %v800_v43, %v1184_v26  ;;  %v1837_v54 = vmul.f32 %v8474_v19, %v8474_v19  ;;  %v802_v12 = vld [vmem:[%s4456_s10 + $0xad0] sm:$0xff]  ;;  %v1187_v19 = vld [vmem:[%s4461_s13 + $0xad8] sm:$0xff] }
 0x16f   : > { %v8473_v16 = vld [vmem:[#allocation16_spill] sm:$0xff]  ;;  %v2065_v7 = vadd.f32 %v2064_v24, %v1828_v49  ;;  %v2198_v42 = vadd.f32 %v2197_v22, %v1829_v47  ;;  %v1838_v6 = vmul.f32 %v8475_v18, %v8475_v18  ;;  %v1186_v25 = vld [vmem:[%s4461_s13 + $0xad0] sm:$0xff]  ;;  %v2407_v11 = vsel %vm2259_vm2, %v1833_v39, 0.0 }
 0x170   : > { %v1836_v36 = vmul.f32 %v8473_v16, %v8473_v16  ;;  %v2404_v60 = vadd.f32 %v2403_v34, %v2402_v56  ;;  %v1839_v16 = vmul.f32 %v5702_v38, %v5702_v38  ;;  %v6648_v43 = vsub.f32 %v801_v30, %v1185_v48  ;;  %v8476_v26 = vld [vmem:[#allocation25_spill] sm:$0xff]  ;;  %v803_v56 = vld [vmem:[%s4456_s10 + $0xad8] sm:$0xff]  ;;  %v8477_v48 = vld [vmem:[#allocation28_spill] sm:$0xff] }
 0x171   : > { %v2066_v49 = vadd.f32 %v2065_v7, %v1831_v33  ;;  %v2199_v47 = vadd.f32 %v2198_v42, %v1832_v63  ;;  %v1840_v24 = vmul.f32 %v8476_v26, %v8476_v26  ;;  %v1841_v22 = vmul.f32 %v5713_v32, %v5713_v32  ;;  %v1188_v18 = vld [vmem:[%s4461_s13 + $0xae0] sm:$0xff]  ;;  %v8479_v26 = vld [vmem:[#allocation50_spill] sm:$0xff] }
 0x172   : > { %v2406_v34 = vadd.f32 %v2405_v50, %v2404_v60  ;;  %v1842_v38 = vmul.f32 %v5722_v28, %v5722_v28  ;;  %v2409_v39 = vsel %vm2259_vm2, %v1836_v36, 0.0  ;;  %v6659_v30 = vsub.f32 %v802_v12, %v1186_v25  ;;  %v804_v50 = vld [vmem:[%s4456_s10 + $0xae0] sm:$0xff] }
 0x173   : > { %v2067_v33 = vadd.f32 %v2066_v49, %v1834_v0  ;;  %v2200_v63 = vadd.f32 %v2199_v47, %v1835_v46  ;;  %v1843_v7 = vmul.f32 %v8477_v48, %v8477_v48  ;;  %v1844_v32 = vmul.f32 %v5733_v14, %v5733_v14  ;;  %v8478_v12 = vld [vmem:[#allocation31_spill] sm:$0xff]  ;;  %v805_v47 = vld [vmem:[%s4456_s10 + $0xae8] sm:$0xff]  ;;  %v1190_v48 = vld [vmem:[%s4461_s13 + $0xaf0] sm:$0xff] }
 0x174   : > { %v2408_v42 = vadd.f32 %v2407_v11, %v2406_v34  ;;  %v1845_v28 = vmul.f32 %v5742_v59, %v5742_v59  ;;  %v2411_v36 = vsel %vm2259_vm2, %v1839_v16, 0.0  ;;  %v6670_v60 = vsub.f32 %v803_v56, %v1187_v19  ;;  %v1189_v11 = vld [vmem:[%s4461_s13 + $0xae8] sm:$0xff]  ;;  %v8480_v56 = vld [vmem:[#allocation34_spill] sm:$0xff] }
 0x175   : > { %v2068_v0 = vadd.f32 %v2067_v33, %v1837_v54  ;;  %v2201_v46 = vadd.f32 %v2200_v63, %v1838_v6  ;;  %v1846_v25 = vmul.f32 %v8478_v12, %v8478_v12  ;;  %v1847_v14 = vmul.f32 %v5753_v21, %v5753_v21  ;;  %v8481_v33 = vld [vmem:[#allocation37_spill] sm:$0xff] }
 0x176   : > { %v2410_v49 = vadd.f32 %v2409_v39, %v2408_v42  ;;  %v1848_v59 = vmul.f32 %v8479_v26, %v8479_v26  ;;  %v2413_v16 = vsel %vm2259_vm2, %v1842_v38, 0.0  ;;  %v6681_v34 = vsub.f32 %v804_v50, %v1188_v18  ;;  %v806_v39 = vld [vmem:[%s4456_s10 + $0xaf0] sm:$0xff]  ;;  %v8482_v42 = vld [vmem:[#allocation40_spill] sm:$0xff]  ;;  %v8484_v18 = vld [vmem:[#allocation51_spill] sm:$0xff] }
 0x177   : > { %v2069_v54 = vadd.f32 %v2068_v0, %v1840_v24  ;;  %v2202_v6 = vadd.f32 %v2201_v46, %v1841_v22  ;;  %v1849_v19 = vmul.f32 %v8480_v56, %v8480_v56  ;;  %v1850_v21 = vmul.f32 %v8481_v33, %v8481_v33  ;;  %v8485_v46 = vld [vmem:[#allocation43_spill] sm:$0xff]  ;;  %v8486_v33 = vld [vmem:[#allocation46_spill] sm:$0xff] }
 0x178   : > { %v2412_v63 = vadd.f32 %v2411_v36, %v2410_v49  ;;  %v1851_v12 = vmul.f32 %v8482_v42, %v8482_v42  ;;  %v2415_v38 = vsel %vm2259_vm2, %v1845_v28, 0.0  ;;  %v6692_v50 = vsub.f32 %v805_v47, %v1189_v11  ;;  %v807_v49 = vld [vmem:[%s4456_s10 + $0xaf8] sm:$0xff]  ;;  %v8488_v11 = vld [vmem:[#allocation49_spill] sm:$0xff] }
 0x179   : > { %v2070_v24 = vadd.f32 %v2069_v54, %v1843_v7  ;;  %v2203_v22 = vadd.f32 %v2202_v6, %v1844_v32  ;;  %v1852_v0 = vmul.f32 %v8484_v18, %v8484_v18  ;;  %v1853_v26 = vmul.f32 %v8485_v46, %v8485_v46  ;;  %v1191_v56 = vld [vmem:[%s4461_s13 + $0xaf8] sm:$0xff]  ;;  %v8489_v6 = vld [vmem:[#allocation52_spill] sm:$0xff] }
 0x17a   : > { %8483 = vst [vmem:[#allocation100_spill] sm:$0xff] %v6692_v50  ;;  %v2414_v36 = vadd.f32 %v2413_v16, %v2412_v63  ;;  %v1854_v42 = vmul.f32 %v8486_v33, %v8486_v33  ;;  %v2417_v28 = vsel %vm2259_vm2, %v1848_v59, 0.0  ;;  %v6703_v47 = vsub.f32 %v806_v39, %v1190_v48  ;;  %v808_v63 = vld [vmem:[%s4456_s10 + $0xb00] sm:$0xff]  ;;  %v8492_v48 = vld [vmem:[#allocation53_spill] sm:$0xff] }
 0x17b   : > { %v2071_v7 = vadd.f32 %v2070_v24, %v1846_v25  ;;  %v2204_v32 = vadd.f32 %v2203_v22, %v1847_v14  ;;  %v1855_v54 = vmul.f32 %v8488_v11, %v8488_v11  ;;  %v1856_v18 = vmul.f32 %v8489_v6, %v8489_v6  ;;  %v1192_v46 = vld [vmem:[%s4461_s13 + $0xb00] sm:$0xff]  ;;  %v8493_v22 = vld [vmem:[#allocation54_spill] sm:$0xff]  ;;  %v1193_v6 = vld [vmem:[%s4461_s13 + $0xb08] sm:$0xff] }
 0x17c   : > { %8487 = vst [vmem:[#allocation101_spill] sm:$0xff] %v6703_v47  ;;  %v2416_v16 = vadd.f32 %v2415_v38, %v2414_v36  ;;  %v8490_v50 = vld [vmem:[#allocation55_spill] sm:$0xff]  ;;  %v2419_v59 = vsel %vm2259_vm2, %v1851_v12, 0.0  ;;  %v6714_v39 = vsub.f32 %v807_v49, %v1191_v56  ;;  %v1858_v24 = vmul.f32 %v8492_v48, %v8492_v48  ;;  %v809_v36 = vld [vmem:[%s4456_s10 + $0xb08] sm:$0xff] }
 0x17d   : > { %v1857_v33 = vmul.f32 %v8490_v50, %v8490_v50  ;;  %v2072_v25 = vadd.f32 %v2071_v7, %v1849_v19  ;;  %v2205_v14 = vadd.f32 %v2204_v32, %v1850_v21  ;;  %v1859_v11 = vmul.f32 %v8493_v22, %v8493_v22  ;;  %v8494_v47 = vld [vmem:[#allocation56_spill] sm:$0xff]  ;;  %v8496_v56 = vld [vmem:[#allocation57_spill] sm:$0xff] }
 0x17e   : > { %8491 = vst [vmem:[#allocation15_spill] sm:$0xff] %v6714_v39  ;;  %v2418_v38 = vadd.f32 %v2417_v28, %v2416_v16  ;;  %v1860_v50 = vmul.f32 %v8494_v47, %v8494_v47  ;;  %v2421_v12 = vsel %vm2259_vm2, %v1854_v42, 0.0  ;;  %v6725_v49 = vsub.f32 %v808_v63, %v1192_v46  ;;  %v8497_v32 = vld [vmem:[#allocation89_spill] sm:$0xff]  ;;  %v8498_v39 = vld [vmem:[#allocation95_spill] sm:$0xff]  ;;  %v8500_v46 = vld [vmem:[#allocation58_spill] sm:$0xff] }
 0x17f   : > { %v2073_v19 = vadd.f32 %v2072_v25, %v1852_v0  ;;  %v2206_v21 = vadd.f32 %v2205_v14, %v1853_v26  ;;  %v1861_v7 = vmul.f32 %v8496_v56, %v8496_v56  ;;  %v1862_v48 = vmul.f32 %v8497_v32, %v8497_v32  ;;  %v810_v16 = vld [vmem:[%s4456_s10 + $0xb10] sm:$0xff]  ;;  %v1195_v32 = vld [vmem:[%s4461_s13 + $0xb18] sm:$0xff] }
 0x180   : > { %8495 = vst [vmem:[#allocation102_spill] sm:$0xff] %v6725_v49  ;;  %v2420_v28 = vadd.f32 %v2419_v59, %v2418_v38  ;;  %v1194_v22 = vld [vmem:[%s4461_s13 + $0xb10] sm:$0xff]  ;;  %v1863_v47 = vmul.f32 %v8498_v39, %v8498_v39  ;;  %v2423_v42 = vsel %vm2259_vm2, %v1857_v33, 0.0  ;;  %v6736_v63 = vsub.f32 %v809_v36, %v1193_v6  ;;  %v811_v38 = vld [vmem:[%s4456_s10 + $0xb18] sm:$0xff]  ;;  %v8502_v49 = vld [vmem:[#allocation104_spill] sm:$0xff] }
 0x181   : > { %v2074_v0 = vadd.f32 %v2073_v19, %v1855_v54  ;;  %v2207_v26 = vadd.f32 %v2206_v21, %v1856_v18  ;;  %v1864_v25 = vmul.f32 %v8500_v46, %v8500_v46  ;;  %v8501_v14 = vld [vmem:[#allocation14_spill] sm:$0xff]  ;;  %v1866_v39 = vmul.f32 %v8502_v49, %v8502_v49  ;;  %v8504_v6 = vld [vmem:[#allocation59_spill] sm:$0xff]  ;;  %v8505_v21 = vld [vmem:[#allocation17_spill] sm:$0xff] }
 0x182   : > { %8499 = vst [vmem:[#allocation103_spill] sm:$0xff] %v6736_v63  ;;  %v1865_v56 = vmul.f32 %v8501_v14, %v8501_v14  ;;  %v2422_v59 = vadd.f32 %v2421_v12, %v2420_v28  ;;  %v2425_v33 = vsel %vm2259_vm2, %v1860_v50, 0.0  ;;  %v6747_v36 = vsub.f32 %v810_v16, %v1194_v22  ;;  %v812_v28 = vld [vmem:[%s4456_s10 + $0xb20] sm:$0xff]  ;;  %v8506_v63 = vld [vmem:[#allocation113_spill] sm:$0xff] }
 0x183   : > { %v2075_v54 = vadd.f32 %v2074_v0, %v1858_v24  ;;  %v2208_v18 = vadd.f32 %v2207_v26, %v1859_v11  ;;  %v1867_v19 = vmul.f32 %v8504_v6, %v8504_v6  ;;  %v1868_v46 = vmul.f32 %v8505_v21, %v8505_v21  ;;  %v1196_v14 = vld [vmem:[%s4461_s13 + $0xb20] sm:$0xff]  ;;  %v1197_v21 = vld [vmem:[%s4461_s13 + $0xb28] sm:$0xff] }
 0x184   : > { %8503 = vst [vmem:[#allocation105_spill] sm:$0xff] %v6747_v36  ;;  %v2424_v12 = vadd.f32 %v2423_v42, %v2422_v59  ;;  %v1869_v49 = vmul.f32 %v8506_v63, %v8506_v63  ;;  %v2427_v50 = vsel %vm2259_vm2, %v1863_v47, 0.0  ;;  %v6758_v16 = vsub.f32 %v811_v38, %v1195_v32  ;;  %v8508_v22 = vld [vmem:[#allocation60_spill] sm:$0xff]  ;;  %v8510_v36 = vld [vmem:[#allocation122_spill] sm:$0xff]  ;;  %v8512_v32 = vld [vmem:[#allocation61_spill] sm:$0xff] }
 0x185   : > { %v2076_v24 = vadd.f32 %v2075_v54, %v1861_v7  ;;  %v2209_v11 = vadd.f32 %v2208_v18, %v1862_v48  ;;  %v1870_v0 = vmul.f32 %v8508_v22, %v8508_v22  ;;  %v8509_v26 = vld [vmem:[#allocation20_spill] sm:$0xff]  ;;  %v1872_v63 = vmul.f32 %v8510_v36, %v8510_v36  ;;  %v8513_v18 = vld [vmem:[#allocation23_spill] sm:$0xff] }
 0x186   : > { %8507 = vst [vmem:[#allocation106_spill] sm:$0xff] %v6758_v16  ;;  %v1871_v6 = vmul.f32 %v8509_v26, %v8509_v26  ;;  %v2426_v42 = vadd.f32 %v2425_v33, %v2424_v12  ;;  %v813_v59 = vld [vmem:[%s4456_s10 + $0xb28] sm:$0xff]  ;;  %v2429_v47 = vsel %vm2259_vm2, %v1866_v39, 0.0  ;;  %v6769_v38 = vsub.f32 %v812_v28, %v1196_v14  ;;  %v814_v12 = vld [vmem:[%s4456_s10 + $0xb30] sm:$0xff]  ;;  %v8514_v16 = vld [vmem:[#allocation131_spill] sm:$0xff] }
 0x187   : > { %v2077_v7 = vadd.f32 %v2076_v24, %v1864_v25  ;;  %v2210_v48 = vadd.f32 %v2209_v11, %v1865_v56  ;;  %v1873_v54 = vmul.f32 %v8512_v32, %v8512_v32  ;;  %v1874_v22 = vmul.f32 %v8513_v18, %v8513_v18  ;;  %v1198_v26 = vld [vmem:[%s4461_s13 + $0xb30] sm:$0xff]  ;;  %v1199_v18 = vld [vmem:[%s4461_s13 + $0xb38] sm:$0xff] }
 0x188   : > { %8511 = vst [vmem:[#allocation107_spill] sm:$0xff] %v6769_v38  ;;  %v2428_v33 = vadd.f32 %v2427_v50, %v2426_v42  ;;  %v1875_v36 = vmul.f32 %v8514_v16, %v8514_v16  ;;  %v2431_v39 = vsel %vm2259_vm2, %v1869_v49, 0.0  ;;  %v6780_v28 = vsub.f32 %v813_v59, %v1197_v21  ;;  %v8515_v14 = vld [vmem:[#allocation62_spill] sm:$0xff]  ;;  %v8517_v38 = vld [vmem:[#allocation140_spill] sm:$0xff]  ;;  %v8518_v21 = vld [vmem:[#allocation63_spill] sm:$0xff] }
 0x189   : > { %v2078_v25 = vadd.f32 %v2077_v7, %v1867_v19  ;;  %v2211_v56 = vadd.f32 %v2210_v48, %v1868_v46  ;;  %v1876_v24 = vmul.f32 %v8515_v14, %v8515_v14  ;;  %v8516_v11 = vld [vmem:[#allocation26_spill] sm:$0xff]  ;;  %v1878_v16 = vmul.f32 %v8517_v38, %v8517_v38  ;;  %v1200_v14 = vld [vmem:[%s4461_s13 + $0xb40] sm:$0xff] }
 0x18a   : > { %v1877_v32 = vmul.f32 %v8516_v11, %v8516_v11  ;;  %v2430_v50 = vadd.f32 %v2429_v47, %v2428_v33  ;;  %v815_v42 = vld [vmem:[%s4456_s10 + $0xb38] sm:$0xff]  ;;  %v2433_v49 = vsel %vm2259_vm2, %v1872_v63, 0.0  ;;  %v6791_v59 = vsub.f32 %v814_v12, %v1198_v26  ;;  %v816_v33 = vld [vmem:[%s4456_s10 + $0xb40] sm:$0xff]  ;;  %v8519_v26 = vld [vmem:[#allocation29_spill] sm:$0xff] }
 0x18b   : > { %v2079_v19 = vadd.f32 %v2078_v25, %v1870_v0  ;;  %v2212_v46 = vadd.f32 %v2211_v56, %v1871_v6  ;;  %v1879_v7 = vmul.f32 %v8518_v21, %v8518_v21  ;;  %v1880_v48 = vmul.f32 %v5973_v41, %v5973_v41  ;;  %v1201_v11 = vld [vmem:[%s4461_s13 + $0xb48] sm:$0xff] }
 0x18c   : > { %v2432_v47 = vadd.f32 %v2431_v39, %v2430_v50  ;;  %v1881_v38 = vmul.f32 %v5982_v35, %v5982_v35  ;;  %v2435_v63 = vsel %vm2259_vm2, %v1875_v36, 0.0  ;;  %v6802_v12 = vsub.f32 %v815_v42, %v1199_v18  ;;  %v817_v39 = vld [vmem:[%s4456_s10 + $0xb48] sm:$0xff] }
 0x18d   : > { %v2080_v0 = vadd.f32 %v2079_v19, %v1873_v54  ;;  %v2213_v6 = vadd.f32 %v2212_v46, %v1874_v22  ;;  %v1882_v25 = vmul.f32 %v8519_v26, %v8519_v26  ;;  %v1883_v41 = vmul.f32 %v5993_v51, %v5993_v51  ;;  %v8520_v42 = vld [vmem:[#allocation149_spill] sm:$0xff]  ;;  %v8522_v26 = vld [vmem:[#allocation32_spill] sm:$0xff] }
 0x18e   : > { %v2434_v56 = vadd.f32 %v2433_v49, %v2432_v47  ;;  %v1884_v35 = vmul.f32 %v6002_v15, %v6002_v15  ;;  %v2437_v36 = vsel %vm2259_vm2, %v1878_v16, 0.0  ;;  %v6813_v50 = vsub.f32 %v816_v33, %v1200_v14  ;;  %v818_v46 = vld [vmem:[%s4456_s10 + $0xb50] sm:$0xff]  ;;  %v8521_v47 = vld [vmem:[#allocation64_spill] sm:$0xff] }
 0x18f   : > { %v2081_v54 = vadd.f32 %v2080_v0, %v1876_v24  ;;  %v2214_v22 = vadd.f32 %v2213_v6, %v1877_v32  ;;  %v1885_v18 = vmul.f32 %v8520_v42, %v8520_v42  ;;  %v1886_v51 = vmul.f32 %v6013_v2, %v6013_v2  ;;  %v1202_v49 = vld [vmem:[%s4461_s13 + $0xb50] sm:$0xff]  ;;  %v819_v0 = vld [vmem:[%s4456_s10 + $0xb58] sm:$0xff] }
 0x190   : > { %v2436_v19 = vadd.f32 %v2435_v63, %v2434_v56  ;;  %v1887_v15 = vmul.f32 %v6022_v57, %v6022_v57  ;;  %v2439_v16 = vsel %vm2259_vm2, %v1881_v38, 0.0  ;;  %v6824_v21 = vsub.f32 %v817_v39, %v1201_v11  ;;  %v1203_v6 = vld [vmem:[%s4461_s13 + $0xb58] sm:$0xff]  ;;  %v820_v11 = vld [vmem:[%s4456_s10 + $0xb60] sm:$0xff] }
 0x191   : > { %v2082_v24 = vadd.f32 %v2081_v54, %v1879_v7  ;;  %v2215_v32 = vadd.f32 %v2214_v22, %v1880_v48  ;;  %v1888_v33 = vmul.f32 %v8521_v47, %v8521_v47  ;;  %v1889_v2 = vmul.f32 %v6033_v61, %v6033_v61  ;;  %v1204_v54 = vld [vmem:[%s4461_s13 + $0xb60] sm:$0xff] }
 0x192   : > { %v2438_v14 = vadd.f32 %v2437_v36, %v2436_v19  ;;  %v1890_v57 = vmul.f32 %v6042_v20, %v6042_v20  ;;  %v2441_v38 = vsel %vm2259_vm2, %v1884_v35, 0.0  ;;  %v6835_v63 = vsub.f32 %v818_v46, %v1202_v49  ;;  %v8523_v36 = vld [vmem:[#allocation158_spill] sm:$0xff]  ;;  %v821_v46 = vld [vmem:[%s4456_s10 + $0xb68] sm:$0xff]  ;;  %v8525_v47 = vld [vmem:[#allocation35_spill] sm:$0xff] }
 0x193   : > { %v2083_v7 = vadd.f32 %v2082_v24, %v1882_v25  ;;  %v2216_v48 = vadd.f32 %v2215_v32, %v1883_v41  ;;  %v1891_v56 = vmul.f32 %v8522_v26, %v8522_v26  ;;  %v1892_v61 = vmul.f32 %v6053_v17, %v6053_v17  ;;  %v1205_v49 = vld [vmem:[%s4461_s13 + $0xb68] sm:$0xff] }
 0x194   : > { %v2440_v39 = vadd.f32 %v2439_v16, %v2438_v14  ;;  %v1893_v20 = vmul.f32 %v6062_v23, %v6062_v23  ;;  %v2443_v35 = vsel %vm2259_vm2, %v1887_v15, 0.0  ;;  %v6846_v22 = vsub.f32 %v819_v0, %v1203_v6  ;;  %v8524_v32 = vld [vmem:[#allocation65_spill] sm:$0xff] }
 0x195   : > { %v2084_v25 = vadd.f32 %v2083_v7, %v1885_v18  ;;  %v2217_v41 = vadd.f32 %v2216_v48, %v1886_v51  ;;  %v1894_v42 = vmul.f32 %v8523_v36, %v8523_v36  ;;  %v1895_v17 = vmul.f32 %v6073_v31, %v6073_v31  ;;  %v822_v0 = vld [vmem:[%s4456_s10 + $0xb70] sm:$0xff]  ;;  %v824_v36 = vld [vmem:[%s4456_s10 + $0xb80] sm:$0xff] }
 0x196   : > { %v2442_v19 = vadd.f32 %v2441_v38, %v2440_v39  ;;  %v1896_v23 = vmul.f32 %v6082_v53, %v6082_v53  ;;  %v2445_v15 = vsel %vm2259_vm2, %v1890_v57, 0.0  ;;  %v6857_v24 = vsub.f32 %v820_v11, %v1204_v54  ;;  %v1206_v6 = vld [vmem:[%s4461_s13 + $0xb70] sm:$0xff]  ;;  %v8526_v38 = vld [vmem:[#allocation167_spill] sm:$0xff] }
 0x197   : > { %v2085_v18 = vadd.f32 %v2084_v25, %v1888_v33  ;;  %v2218_v51 = vadd.f32 %v2217_v41, %v1889_v2  ;;  %v1897_v16 = vmul.f32 %v8524_v32, %v8524_v32  ;;  %v1898_v31 = vmul.f32 %v8525_v47, %v8525_v47  ;;  %v823_v11 = vld [vmem:[%s4456_s10 + $0xb78] sm:$0xff] }
 0x198   : > { %v2444_v14 = vadd.f32 %v2443_v35, %v2442_v19  ;;  %v1899_v53 = vmul.f32 %v6102_v4, %v6102_v4  ;;  %v2447_v57 = vsel %vm2259_vm2, %v1893_v20, 0.0  ;;  %v6868_v7 = vsub.f32 %v821_v46, %v1205_v49  ;;  %v1207_v54 = vld [vmem:[%s4461_s13 + $0xb78] sm:$0xff]  ;;  %v1208_v19 = vld [vmem:[%s4461_s13 + $0xb80] sm:$0xff] }
 0x199   : > { %v2086_v33 = vadd.f32 %v2085_v18, %v1891_v56  ;;  %v2219_v2 = vadd.f32 %v2218_v51, %v1892_v61  ;;  %v1900_v48 = vmul.f32 %v6104_v45, %v6104_v45  ;;  %v1901_v26 = vmul.f32 %v8526_v38, %v8526_v38  ;;  %v825_v18 = vld [vmem:[%s4456_s10 + $0xb88] sm:$0xff] }
 0x19a   : > { %v2446_v39 = vadd.f32 %v2445_v15, %v2444_v14  ;;  %v1902_v4 = vmul.f32 %v6120_v27, %v6120_v27  ;;  %v2449_v20 = vsel %vm2259_vm2, %v1896_v23, 0.0  ;;  %v6879_v25 = vsub.f32 %v822_v0, %v1206_v6  ;;  %v1209_v51 = vld [vmem:[%s4461_s13 + $0xb88] sm:$0xff]  ;;  %v826_v14 = vld [vmem:[%s4456_s10 + $0xb90] sm:$0xff] }
 0x19b   : > { %v2087_v56 = vadd.f32 %v2086_v33, %v1894_v42  ;;  %v2220_v61 = vadd.f32 %v2219_v2, %v1895_v17  ;;  %v1903_v45 = vmul.f32 %v6122_v37, %v6122_v37  ;;  %v1904_v41 = vmul.f32 %v6129_v52, %v6129_v52  ;;  %v1210_v0 = vld [vmem:[%s4461_s13 + $0xb90] sm:$0xff] }
 0x19c   : > { %v2448_v35 = vadd.f32 %v2447_v57, %v2446_v39  ;;  %v1905_v27 = vmul.f32 %v6135_v58, %v6135_v58  ;;  %v2451_v46 = vsel %vm2259_vm2, %v1899_v53, 0.0  ;;  %v6890_v49 = vsub.f32 %v823_v11, %v1207_v54  ;;  %v8527_v57 = vld [vmem:[#allocation66_spill] sm:$0xff]  ;;  %v8529_v11 = vld [vmem:[#allocation39_spill] sm:$0xff] }
 0x19d   : > { %v2088_v42 = vadd.f32 %v2087_v56, %v1897_v16  ;;  %v2221_v17 = vadd.f32 %v2220_v61, %v1898_v31  ;;  %v1906_v37 = vmul.f32 %v6137_v3, %v6137_v3  ;;  %v1907_v52 = vmul.f32 %v6143_v13, %v6143_v13  ;;  %v1211_v39 = vld [vmem:[%s4461_s13 + $0xb98] sm:$0xff] }
 0x19e   : > { %v2450_v23 = vadd.f32 %v2449_v20, %v2448_v35  ;;  %v1908_v58 = vmul.f32 %v6149_v29, %v6149_v29  ;;  %v2453_v16 = vsel %vm2259_vm2, %v1902_v4, 0.0  ;;  %v6901_v47 = vsub.f32 %v824_v36, %v1208_v19  ;;  %v8530_v20 = vld [vmem:[#allocation177_spill] sm:$0xff]  ;;  %v828_v19 = vld [vmem:[%s4456_s10 + $0xba0] sm:$0xff] }
 0x19f   : > { %v2089_v15 = vadd.f32 %v2088_v42, %v1900_v48  ;;  %v2222_v32 = vadd.f32 %v2221_v17, %v1901_v26  ;;  %v1909_v3 = vmul.f32 %v6151_v5, %v6151_v5  ;;  %v1910_v13 = vmul.f32 %v6163_v1, %v6163_v1  ;;  %v8528_v48 = vld [vmem:[#allocation38_spill] sm:$0xff]  ;;  %v8532_v42 = vld [vmem:[#allocation68_spill] sm:$0xff] }
 0x1a0   : > { %v2452_v31 = vadd.f32 %v2451_v46, %v2450_v23  ;;  %v1911_v29 = vmul.f32 %v6175_v55, %v6175_v55  ;;  %v2455_v33 = vsel %vm2259_vm2, %v1905_v27, 0.0  ;;  %v6912_v2 = vsub.f32 %v825_v18, %v1209_v51  ;;  %v827_v26 = vld [vmem:[%s4456_s10 + $0xb98] sm:$0xff]  ;;  %v1212_v27 = vld [vmem:[%s4461_s13 + $0xba0] sm:$0xff]  ;;  %v8533_v18 = vld [vmem:[#allocation69_spill] sm:$0xff] }
 0x1a1   : > { %v2090_v6 = vadd.f32 %v2089_v15, %v1903_v45  ;;  %v2223_v53 = vadd.f32 %v2222_v32, %v1904_v41  ;;  %v1912_v5 = vmul.f32 %v8527_v57, %v8527_v57  ;;  %v1913_v1 = vmul.f32 %v8528_v48, %v8528_v48  ;;  %v8531_v41 = vld [vmem:[#allocation67_spill] sm:$0xff]  ;;  %v8537_v57 = vld [vmem:[#allocation73_spill] sm:$0xff] }
 0x1a2   : > { %v2454_v38 = vadd.f32 %v2453_v16, %v2452_v31  ;;  %v1914_v55 = vmul.f32 %v8529_v11, %v8529_v11  ;;  %v2457_v56 = vsel %vm2259_vm2, %v1908_v58, 0.0  ;;  %v6923_v61 = vsub.f32 %v826_v14, %v1210_v0  ;;  %v8534_v58 = vld [vmem:[#allocation70_spill] sm:$0xff]  ;;  %v829_v16 = vld [vmem:[%s4456_s10 + $0xba8] sm:$0xff]  ;;  %v8535_v14 = vld [vmem:[#allocation71_spill] sm:$0xff] }
 0x1a3   : > { %v2091_v54 = vadd.f32 %v2090_v6, %v1906_v37  ;;  %v2224_v4 = vadd.f32 %v2223_v53, %v1907_v52  ;;  %v1915_v45 = vmul.f32 %v8530_v20, %v8530_v20  ;;  %v1916_v35 = vmul.f32 %v8531_v41, %v8531_v41  ;;  %v1213_v31 = vld [vmem:[%s4461_s13 + $0xba8] sm:$0xff]  ;;  %v8538_v11 = vld [vmem:[#allocation74_spill] sm:$0xff] }
 0x1a4   : > { %v2456_v36 = vadd.f32 %v2455_v33, %v2454_v38  ;;  %v1917_v17 = vmul.f32 %v8532_v42, %v8532_v42  ;;  %v2459_v52 = vsel %vm2259_vm2, %v1911_v29, 0.0  ;;  %v6934_v23 = vsub.f32 %v827_v26, %v1211_v39  ;;  %v8536_v53 = vld [vmem:[#allocation72_spill] sm:$0xff]  ;;  %v830_v26 = vld [vmem:[%s4456_s10 + $0xbb0] sm:$0xff]  ;;  %v1215_v42 = vld [vmem:[%s4461_s13 + $0xbb8] sm:$0xff] }
 0x1a5   : > { %v2092_v46 = vadd.f32 %v2091_v54, %v1909_v3  ;;  %v2225_v37 = vadd.f32 %v2224_v4, %v1910_v13  ;;  %v1918_v51 = vmul.f32 %v8533_v18, %v8533_v18  ;;  %v1919_v15 = vmul.f32 %v8534_v58, %v8534_v58  ;;  %v1214_v39 = vld [vmem:[%s4461_s13 + $0xbb0] sm:$0xff]  ;;  %v8540_v41 = vld [vmem:[#allocation76_spill] sm:$0xff] }
 0x1a6   : > { %v2458_v32 = vadd.f32 %v2457_v56, %v2456_v36  ;;  %v1920_v0 = vmul.f32 %v8535_v14, %v8535_v14  ;;  %v2461_v29 = vsel %vm2259_vm2, %v1914_v55, 0.0  ;;  %v6945_v6 = vsub.f32 %v828_v19, %v1212_v27  ;;  %v8539_v56 = vld [vmem:[#allocation75_spill] sm:$0xff]  ;;  %v8542_v18 = vld [vmem:[#allocation78_spill] sm:$0xff] }
 0x1a7   : > { %v2093_v3 = vadd.f32 %v2092_v46, %v1912_v5  ;;  %v2226_v13 = vadd.f32 %v2225_v37, %v1913_v1  ;;  %v1921_v33 = vmul.f32 %v8536_v53, %v8536_v53  ;;  %v1922_v48 = vmul.f32 %v8537_v57, %v8537_v57  ;;  %v831_v27 = vld [vmem:[%s4456_s10 + $0xbb8] sm:$0xff]  ;;  %v8541_v46 = vld [vmem:[#allocation77_spill] sm:$0xff]  ;;  %v832_v14 = vld [vmem:[%s4456_s10 + $0xbc0] sm:$0xff] }
 0x1a8   : > { %v2460_v38 = vadd.f32 %v2459_v52, %v2458_v32  ;;  %v1923_v54 = vmul.f32 %v8538_v11, %v8538_v11  ;;  %v2463_v55 = vsel %vm2259_vm2, %v1917_v17, 0.0  ;;  %v6956_v4 = vsub.f32 %v829_v16, %v1213_v31  ;;  %v8543_v32 = vld [vmem:[#allocation79_spill] sm:$0xff]  ;;  %v8545_v57 = vld [vmem:[#allocation81_spill] sm:$0xff] }
 0x1a9   : > { %v2094_v5 = vadd.f32 %v2093_v3, %v1915_v45  ;;  %v2227_v1 = vadd.f32 %v2226_v13, %v1916_v35  ;;  %v1924_v20 = vmul.f32 %v8539_v56, %v8539_v56  ;;  %v1925_v36 = vmul.f32 %v8540_v41, %v8540_v41  ;;  %v1216_v3 = vld [vmem:[%s4461_s13 + $0xbc0] sm:$0xff] }
 0x1aa   : > { %v2462_v19 = vadd.f32 %v2461_v29, %v2460_v38  ;;  %v1926_v37 = vmul.f32 %v8541_v46, %v8541_v46  ;;  %v2465_v17 = vsel %vm2259_vm2, %v1920_v0, 0.0  ;;  %v6967_v52 = vsub.f32 %v830_v26, %v1214_v39  ;;  %v8544_v13 = vld [vmem:[#allocation80_spill] sm:$0xff]  ;;  %v8546_v26 = vld [vmem:[#allocation82_spill] sm:$0xff] }
 0x1ab   : > { %v2095_v45 = vadd.f32 %v2094_v5, %v1918_v51  ;;  %v2228_v35 = vadd.f32 %v2227_v1, %v1919_v15  ;;  %v1927_v58 = vmul.f32 %v8542_v18, %v8542_v18  ;;  %v1928_v16 = vmul.f32 %v8543_v32, %v8543_v32  ;;  %v833_v5 = vld [vmem:[%s4456_s10 + $0xbc8] sm:$0xff]  ;;  %v8550_v18 = vld [vmem:[#allocation86_spill] sm:$0xff] }
 0x1ac   : > { %v2464_v31 = vadd.f32 %v2463_v55, %v2462_v19  ;;  %v1929_v29 = vmul.f32 %v8544_v13, %v8544_v13  ;;  %v2467_v0 = vsel %vm2259_vm2, %v1923_v54, 0.0  ;;  %v6978_v53 = vsub.f32 %v831_v27, %v1215_v42  ;;  %v1217_v1 = vld [vmem:[%s4461_s13 + $0xbc8] sm:$0xff]  ;;  %v8547_v55 = vld [vmem:[#allocation83_spill] sm:$0xff] }
 0x1ad   : > { %v2096_v51 = vadd.f32 %v2095_v45, %v1921_v33  ;;  %v2229_v15 = vadd.f32 %v2228_v35, %v1922_v48  ;;  %v1930_v38 = vmul.f32 %v8545_v57, %v8545_v57  ;;  %v1931_v39 = vmul.f32 %v8546_v26, %v8546_v26  ;;  %v8548_v19 = vld [vmem:[#allocation84_spill] sm:$0xff]  ;;  %v8549_v42 = vld [vmem:[#allocation85_spill] sm:$0xff]  ;;  %v1219_v57 = vld [vmem:[%s4461_s13 + $0xbd8] sm:$0xff] }
 0x1ae   : > { %v2466_v11 = vadd.f32 %v2465_v17, %v2464_v31  ;;  %v1932_v56 = vmul.f32 %v8547_v55, %v8547_v55  ;;  %v2469_v54 = vsel %vm2259_vm2, %v1926_v37, 0.0  ;;  %v6989_v41 = vsub.f32 %v832_v14, %v1216_v3  ;;  %v834_v35 = vld [vmem:[%s4456_s10 + $0xbd0] sm:$0xff]  ;;  %v8551_v14 = vld [vmem:[#allocation87_spill] sm:$0xff]  ;;  %v8552_v13 = vld [vmem:[#allocation88_spill] sm:$0xff] }
 0x1af   : > { %v2097_v33 = vadd.f32 %v2096_v51, %v1924_v20  ;;  %v2230_v48 = vadd.f32 %v2229_v15, %v1925_v36  ;;  %v1933_v27 = vmul.f32 %v8548_v19, %v8548_v19  ;;  %v1934_v46 = vmul.f32 %v8549_v42, %v8549_v42  ;;  %v1218_v17 = vld [vmem:[%s4461_s13 + $0xbd0] sm:$0xff]  ;;  %v836_v19 = vld [vmem:[%s4456_s10 + $0xbe0] sm:$0xff] }
 0x1b0   : > { %v2468_v45 = vadd.f32 %v2467_v0, %v2466_v11  ;;  %v1935_v32 = vmul.f32 %v8550_v18, %v8550_v18  ;;  %v2471_v37 = vsel %vm2259_vm2, %v1929_v29, 0.0  ;;  %v7000_v31 = vsub.f32 %v833_v5, %v1217_v1  ;;  %v835_v0 = vld [vmem:[%s4456_s10 + $0xbd8] sm:$0xff]  ;;  %v1220_v42 = vld [vmem:[%s4461_s13 + $0xbe0] sm:$0xff] }
 0x1b1   : > { %v2098_v20 = vadd.f32 %v2097_v33, %v1927_v58  ;;  %v2231_v36 = vadd.f32 %v2230_v48, %v1928_v16  ;;  %v1936_v3 = vmul.f32 %v8551_v14, %v8551_v14  ;;  %v1937_v51 = vmul.f32 %v8552_v13, %v8552_v13  ;;  %v8553_v26 = vld [vmem:[#allocation90_spill] sm:$0xff]  ;;  %v8554_v1 = vld [vmem:[#allocation91_spill] sm:$0xff]  ;;  %v8555_v33 = vld [vmem:[#allocation92_spill] sm:$0xff] }
 0x1b2   : > { %v2470_v15 = vadd.f32 %v2469_v54, %v2468_v45  ;;  %v1938_v11 = vmul.f32 %v8553_v26, %v8553_v26  ;;  %v2473_v29 = vsel %vm2259_vm2, %v1932_v56, 0.0  ;;  %v7011_v5 = vsub.f32 %v834_v35, %v1218_v17  ;;  %v8556_v13 = vld [vmem:[#allocation12_spill] sm:$0xff]  ;;  %v1222_v26 = vld [vmem:[%s4461_s13 + $0xbf0] sm:$0xff] }
 0x1b3   : > { %v2099_v58 = vadd.f32 %v2098_v20, %v1930_v38  ;;  %v2232_v16 = vadd.f32 %v2231_v36, %v1931_v39  ;;  %v1939_v55 = vmul.f32 %v8554_v1, %v8554_v1  ;;  %v1940_v48 = vmul.f32 %v8555_v33, %v8555_v33  ;;  %v837_v36 = vld [vmem:[%s4456_s10 + $0xbe8] sm:$0xff] }
 0x1b4   : > { %v2472_v54 = vadd.f32 %v2471_v37, %v2470_v15  ;;  %v1941_v45 = vmul.f32 %v6505_v62, %v6505_v62  ;;  %v2475_v56 = vsel %vm2259_vm2, %v1935_v32, 0.0  ;;  %v7022_v35 = vsub.f32 %v835_v0, %v1219_v57  ;;  %v1221_v37 = vld [vmem:[%s4461_s13 + $0xbe8] sm:$0xff]  ;;  %v838_v57 = vld [vmem:[%s4456_s10 + $0xbf0] sm:$0xff] }
 0x1b5   : > { %v2100_v38 = vadd.f32 %v2099_v58, %v1933_v27  ;;  %v2233_v39 = vadd.f32 %v2232_v16, %v1934_v46  ;;  %v1942_v17 = vmul.f32 %v6516_v8, %v6516_v8  ;;  %v1943_v18 = vmul.f32 %v6527_v9, %v6527_v9  ;;  %v8557_v15 = vld [vmem:[#allocation93_spill] sm:$0xff]  ;;  %v8558_v58 = vld [vmem:[#allocation94_spill] sm:$0xff] }
 0x1b6   : > { %v2474_v20 = vadd.f32 %v2473_v29, %v2472_v54  ;;  %v1944_v62 = vmul.f32 %v6538_v40, %v6538_v40  ;;  %v2477_v32 = vsel %vm2259_vm2, %v1938_v11, 0.0  ;;  %v7033_v14 = vsub.f32 %v836_v19, %v1220_v42  ;;  %v8559_v29 = vld [vmem:[#allocation96_spill] sm:$0xff]  ;;  %v8560_v33 = vld [vmem:[#allocation97_spill] sm:$0xff]  ;;  %v839_v42 = vld [vmem:[%s4456_s10 + $0xbf8] sm:$0xff] }
 0x1b7   : > { %v2101_v27 = vadd.f32 %v2100_v38, %v1936_v3  ;;  %v2234_v46 = vadd.f32 %v2233_v39, %v1937_v51  ;;  %v1945_v8 = vmul.f32 %v8556_v13, %v8556_v13  ;;  %v1946_v9 = vmul.f32 %v8557_v15, %v8557_v15  ;;  %v1223_v38 = vld [vmem:[%s4461_s13 + $0xbf8] sm:$0xff] }
 0x1b8   : > { %v2476_v0 = vadd.f32 %v2475_v56, %v2474_v20  ;;  %v1947_v40 = vmul.f32 %v8558_v58, %v8558_v58  ;;  %v2479_v16 = vsel %vm2259_vm2, %v1941_v45, 0.0  ;;  %v7044_v11 = vsub.f32 %v837_v36, %v1221_v37  ;;  %v8561_v39 = vld [vmem:[#allocation98_spill] sm:$0xff]  ;;  %v8562_v45 = vld [vmem:[#allocation99_spill] sm:$0xff] }
 0x1b9   : > { %v2102_v3 = vadd.f32 %v2101_v27, %v1939_v55  ;;  %v2235_v51 = vadd.f32 %v2234_v46, %v1940_v48  ;;  %v1948_v1 = vmul.f32 %v8559_v29, %v8559_v29  ;;  %v1949_v54 = vmul.f32 %v8560_v33, %v8560_v33 }
 0x1ba   : > { %v2478_v19 = vadd.f32 %v2477_v32, %v2476_v0  ;;  %v1950_v56 = vmul.f32 %v8561_v39, %v8561_v39  ;;  %v2481_v55 = vsel %vm2259_vm2, %v1944_v62, 0.0  ;;  %v7055_v48 = vsub.f32 %v838_v57, %v1222_v26 }
 0x1bb   : > { %v2103_v20 = vadd.f32 %v2102_v3, %v1942_v17  ;;  %v2236_v13 = vadd.f32 %v2235_v51, %v1943_v18  ;;  %v1951_v36 = vmul.f32 %v8562_v45, %v8562_v45  ;;  %v1952_v37 = vmul.f32 %v6626_v10, %v6626_v10  ;;  %v8564_v3 = vld [vmem:[#allocation101_spill] sm:$0xff] }
 0x1bc   : > { %v2480_v27 = vadd.f32 %v2479_v16, %v2478_v19  ;;  %v1953_v46 = vmul.f32 %v6637_v44, %v6637_v44  ;;  %v2483_v0 = vsel %vm2259_vm2, %v1947_v40, 0.0  ;;  %v7064_v17 = vsub.f32 %v839_v42, %v1223_v38  ;;  %v8565_v16 = vld [vmem:[#allocation15_spill] sm:$0xff]  ;;  %v8568_v42 = vld [vmem:[#allocation105_spill] sm:$0xff] }
 0x1bd   : > { %v2104_v32 = vadd.f32 %v2103_v20, %v1945_v8  ;;  %v2237_v15 = vadd.f32 %v2236_v13, %v1946_v9  ;;  %v1954_v18 = vmul.f32 %v6648_v43, %v6648_v43  ;;  %v1955_v62 = vmul.f32 %v6659_v30, %v6659_v30  ;;  %v8563_v9 = vld [vmem:[#allocation100_spill] sm:$0xff]  ;;  %v8567_v19 = vld [vmem:[#allocation103_spill] sm:$0xff] }
 0x1be   : > { %v2482_v57 = vadd.f32 %v2481_v55, %v2480_v27  ;;  %v1956_v10 = vmul.f32 %v6670_v60, %v6670_v60  ;;  %v2485_v44 = vsel %vm2259_vm2, %v1950_v56, 0.0  ;;  %v1957_v8 = vmul.f32 %v6681_v34, %v6681_v34  ;;  %v8569_v56 = vld [vmem:[#allocation106_spill] sm:$0xff] }
 0x1bf   : > { %v2105_v26 = vadd.f32 %v2104_v32, %v1948_v1  ;;  %v2238_v58 = vadd.f32 %v2237_v15, %v1949_v54  ;;  %v1958_v40 = vmul.f32 %v8563_v9, %v8563_v9  ;;  %v1959_v43 = vmul.f32 %v8564_v3, %v8564_v3  ;;  %v8566_v1 = vld [vmem:[#allocation102_spill] sm:$0xff] }
 0x1c0   : > { %v2484_v51 = vadd.f32 %v2483_v0, %v2482_v57  ;;  %v1960_v30 = vmul.f32 %v8565_v16, %v8565_v16  ;;  %v2487_v60 = vsel %vm2259_vm2, %v1953_v46, 0.0  ;;  %v1961_v54 = vmul.f32 %v8566_v1, %v8566_v1 }
 0x1c1   : > { %v2106_v29 = vadd.f32 %v2105_v26, %v1951_v36  ;;  %v2239_v33 = vadd.f32 %v2238_v58, %v1952_v37  ;;  %v1962_v34 = vmul.f32 %v8567_v19, %v8567_v19  ;;  %v1963_v38 = vmul.f32 %v8568_v42, %v8568_v42  ;;  %v8570_v36 = vld [vmem:[#allocation107_spill] sm:$0xff]  ;;  %v2555_v19 = vld [vmem:[%s4446_s30 + $0x8] sm:$0xff] }
 0x1c2   : > { %v2486_v39 = vadd.f32 %v2485_v44, %v2484_v51  ;;  %v1964_v20 = vmul.f32 %v8569_v56, %v8569_v56  ;;  %v2489_v45 = vsel %vm2259_vm2, %v1956_v10, 0.0  ;;  %v1965_v37 = vmul.f32 %v8570_v36, %v8570_v36  ;;  %v2557_v42 = vld [vmem:[%s4446_s30 + $0x18] sm:$0xff]  ;;  %v2810_v56 = vld [vmem:[%s4451_s7] sm:$0xff] }
 0x1c3   : > { %v2107_v13 = vadd.f32 %v2106_v29, %v1954_v18  ;;  %v2240_v55 = vadd.f32 %v2239_v33, %v1955_v62  ;;  %v1966_v27 = vmul.f32 %v6780_v28, %v6780_v28  ;;  %v1967_v46 = vmul.f32 %v6791_v59, %v6791_v59  ;;  %v2558_v36 = vld [vmem:[%s4446_s30 + $0x20] sm:$0xff] }
 0x1c4   : > { %v2488_v32 = vadd.f32 %v2487_v60, %v2486_v39  ;;  %v1968_v15 = vmul.f32 %v6802_v12, %v6802_v12  ;;  %v2491_v18 = vsel %vm2259_vm2, %v1959_v43, 0.0  ;;  %v1969_v62 = vmul.f32 %v6813_v50, %v6813_v50 }
 0x1c5   : > { %v2108_v0 = vadd.f32 %v2107_v13, %v1957_v8  ;;  %v2241_v57 = vadd.f32 %v2240_v55, %v1958_v40  ;;  %v1970_v10 = vmul.f32 %v6824_v21, %v6824_v21  ;;  %v1971_v28 = vmul.f32 %v6835_v63, %v6835_v63 }
 0x1c6   : > { %v2490_v26 = vadd.f32 %v2489_v45, %v2488_v32  ;;  %v1972_v59 = vmul.f32 %v6846_v22, %v6846_v22  ;;  %v2493_v12 = vsel %vm2259_vm2, %v1962_v34, 0.0  ;;  %v1973_v8 = vmul.f32 %v6857_v24, %v6857_v24  ;;  %v2556_v34 = vld [vmem:[%s4446_s30 + $0x10] sm:$0xff] }
 0x1c7   : > { %v2109_v58 = vadd.f32 %v2108_v0, %v1960_v30  ;;  %v2242_v44 = vadd.f32 %v2241_v57, %v1961_v54  ;;  %v1974_v50 = vmul.f32 %v6868_v7, %v6868_v7  ;;  %v1975_v21 = vmul.f32 %v6879_v25, %v6879_v25  ;;  %v2554_v54 = vld [vmem:[%s4446_s30] sm:$0xff]  ;;  %v2815_v57 = vld [vmem:[%s4451_s7 + $0x28] sm:$0xff] }
 0x1c8   : > { %v2492_v9 = vadd.f32 %v2491_v18, %v2490_v26  ;;  %v1976_v63 = vmul.f32 %v6890_v49, %v6890_v49  ;;  %v2495_v22 = vsel %vm2259_vm2, %v1965_v37, 0.0  ;;  %v1977_v43 = vmul.f32 %v6901_v47, %v6901_v47  ;;  %v2559_v37 = vld [vmem:[%s4446_s30 + $0x28] sm:$0xff]  ;;  %v2814_v0 = vld [vmem:[%s4451_s7 + $0x20] sm:$0xff]  ;;  %v2561_v18 = vld [vmem:[%s4446_s30 + $0x38] sm:$0xff] }
 0x1c9   : > { %v2110_v40 = vadd.f32 %v2109_v58, %v1963_v38  ;;  %v2243_v3 = vadd.f32 %v2242_v44, %v1964_v20  ;;  %v1978_v24 = vmul.f32 %v6912_v2, %v6912_v2  ;;  %v1979_v7 = vmul.f32 %v6923_v61, %v6923_v61  ;;  %v2812_v20 = vld [vmem:[%s4451_s7 + $0x10] sm:$0xff] }
 0x1ca   : > { %v2494_v51 = vadd.f32 %v2493_v12, %v2492_v9  ;;  %v1980_v25 = vmul.f32 %v6934_v23, %v6934_v23  ;;  %v2497_v30 = vsel %vm2259_vm2, %v1968_v15, 0.0  ;;  %v1981_v47 = vmul.f32 %v6945_v6, %v6945_v6  ;;  %v2560_v15 = vld [vmem:[%s4446_s30 + $0x30] sm:$0xff]  ;;  %v2563_v12 = vld [vmem:[%s4446_s30 + $0x48] sm:$0xff] }
 0x1cb   : > { %v2111_v16 = vadd.f32 %v2110_v40, %v1966_v27  ;;  %v2244_v49 = vadd.f32 %v2243_v3, %v1967_v46  ;;  %v1982_v2 = vmul.f32 %v6956_v4, %v6956_v4  ;;  %v1983_v61 = vmul.f32 %v6967_v52, %v6967_v52  ;;  %v2813_v27 = vld [vmem:[%s4451_s7 + $0x18] sm:$0xff]  ;;  %v2566_v3 = vld [vmem:[%s4446_s30 + $0x60] sm:$0xff] }
 0x1cc   : > { %v2496_v29 = vadd.f32 %v2495_v22, %v2494_v51  ;;  %v7135_v23 = vmul.f32 %v6978_v53, %v6978_v53  ;;  %v2499_v1 = vsel %vm2259_vm2, %v1971_v28, 0.0  ;;  %v7141_v6 = vmul.f32 %v6989_v41, %v6989_v41  ;;  %v2565_v40 = vld [vmem:[%s4446_s30 + $0x58] sm:$0xff] }
 0x1cd   : > { %v2112_v33 = vadd.f32 %v2111_v16, %v1969_v62  ;;  %v2245_v60 = vadd.f32 %v2244_v49, %v1970_v10  ;;  %v1986_v4 = vmul.f32 %v7000_v31, %v7000_v31  ;;  %v7147_v52 = vmul.f32 %v7011_v5, %v7011_v5  ;;  %v2811_v5 = vld [vmem:[%s4451_s7 + $0x8] sm:$0xff]  ;;  %v2562_v62 = vld [vmem:[%s4446_s30 + $0x40] sm:$0xff]  ;;  %v2816_v10 = vld [vmem:[%s4451_s7 + $0x30] sm:$0xff] }
 0x1ce   : > { %v2498_v53 = vadd.f32 %v2497_v30, %v2496_v29  ;;  %v7154_v38 = vmul.f32 %v7022_v35, %v7022_v35  ;;  %v2501_v31 = vsel %vm2259_vm2, %v1974_v50, 0.0  ;;  %v7162_v13 = vmul.f32 %v7033_v14, %v7033_v14  ;;  %v2818_v50 = vld [vmem:[%s4451_s7 + $0x40] sm:$0xff]  ;;  %v2820_v16 = vld [vmem:[%s4451_s7 + $0x50] sm:$0xff]  ;;  %v2821_v49 = vld [vmem:[%s4451_s7 + $0x58] sm:$0xff] }
 0x1cf   : > { %v2113_v41 = vadd.f32 %v2112_v33, %v1972_v59  ;;  %v2246_v39 = vadd.f32 %v2245_v60, %v1973_v8  ;;  %v7166_v35 = vmul.f32 %v7044_v11, %v7044_v11  ;;  %v7170_v55 = vmul.f32 %v7055_v48, %v7055_v48  ;;  %v2817_v8 = vld [vmem:[%s4451_s7 + $0x38] sm:$0xff]  ;;  %v2567_v60 = vld [vmem:[%s4446_s30 + $0x68] sm:$0xff] }
 0x1d0   : > { %v2500_v45 = vadd.f32 %v2499_v1, %v2498_v53  ;;  %v7177_v46 = vmul.f32 %v7064_v17, %v7064_v17  ;;  %v2503_v11 = vsel %vm2259_vm2, %v1977_v43, 0.0  ;;  %v7186_v28 = vsub.f32 %v2554_v54, %v2810_v56  ;;  %v2568_v1 = vld [vmem:[%s4446_s30 + $0x70] sm:$0xff]  ;;  %v2570_v56 = vld [vmem:[%s4446_s30 + $0x80] sm:$0xff] }
 0x1d1   : > { %v2114_v14 = vadd.f32 %v2113_v41, %v1975_v21  ;;  %v2247_v32 = vadd.f32 %v2246_v39, %v1976_v63  ;;  %v7188_v17 = vsub.f32 %v2555_v19, %v2811_v5  ;;  %v7190_v26 = vsub.f32 %v2556_v34, %v2812_v20  ;;  %v2564_v63 = vld [vmem:[%s4446_s30 + $0x50] sm:$0xff]  ;;  %v2569_v41 = vld [vmem:[%s4446_s30 + $0x78] sm:$0xff]  ;;  %v2823_v39 = vld [vmem:[%s4451_s7 + $0x68] sm:$0xff] }
 0x1d2   : > { %v2502_v48 = vadd.f32 %v2501_v31, %v2500_v45  ;;  %v2505_v44 = vsel %vm2259_vm2, %v1980_v25, 0.0  ;;  %v7196_v21 = vsub.f32 %v2557_v42, %v2813_v27  ;;  %v7201_v22 = vsub.f32 %v2558_v36, %v2814_v0  ;;  %v2819_v25 = vld [vmem:[%s4451_s7 + $0x48] sm:$0xff]  ;;  %v2572_v20 = vld [vmem:[%s4446_s30 + $0x90] sm:$0xff] }
 0x1d3   : > { %v2115_v59 = vadd.f32 %v2114_v14, %v1978_v24  ;;  %v2248_v58 = vadd.f32 %v2247_v32, %v1979_v7  ;;  %v7203_v43 = vsub.f32 %v2559_v37, %v2815_v57  ;;  %v2507_v51 = vsel %vm2259_vm2, %v1983_v61, 0.0  ;;  %v2571_v5 = vld [vmem:[%s4446_s30 + $0x88] sm:$0xff]  ;;  %v2825_v14 = vld [vmem:[%s4451_s7 + $0x78] sm:$0xff]  ;;  %v2826_v32 = vld [vmem:[%s4451_s7 + $0x80] sm:$0xff] }
 0x1d4   : > { %v2504_v9 = vadd.f32 %v2503_v11, %v2502_v48  ;;  %v7209_v30 = vsub.f32 %v2560_v15, %v2816_v10  ;;  %v2509_v33 = vsel %vm2259_vm2, %v1986_v4, 0.0  ;;  %v3074_v54 = vsub.f32 %v2562_v62, %v2818_v50  ;;  %v2824_v4 = vld [vmem:[%s4451_s7 + $0x70] sm:$0xff]  ;;  %v2827_v11 = vld [vmem:[%s4451_s7 + $0x88] sm:$0xff]  ;;  %v2573_v48 = vld [vmem:[%s4446_s30 + $0x98] sm:$0xff] }
 0x1d5   : > { %v2116_v24 = vadd.f32 %v2115_v59, %v1981_v47  ;;  %v2249_v7 = vadd.f32 %v2248_v58, %v1982_v2  ;;  %v2822_v47 = vld [vmem:[%s4451_s7 + $0x60] sm:$0xff]  ;;  %v3073_v2 = vsub.f32 %v2561_v18, %v2817_v8  ;;  %v4384_v19 = vmov 1966171168   ;;  %v2828_v18 = vld [vmem:[%s4451_s7 + $0x90] sm:$0xff]  ;;  %v2829_v62 = vld [vmem:[%s4451_s7 + $0x98] sm:$0xff] }
 0x1d6   : > { %v2506_v29 = vadd.f32 %v2505_v44, %v2504_v9  ;;  %v2526_v34 = vunpack.c.l.s4 %v4384_v19  ;;  %v2528_v42 = vlaneseq  ;;  %v3075_v45 = vsub.f32 %v2563_v12, %v2819_v25  ;;  %v2574_v44 = vld [vmem:[%s4446_s30 + $0xa0] sm:$0xff] }
 0x1d7   : > { %v2117_v61 = vadd.f32 %v2116_v24, %v7135_v23  ;;  %v2250_v53 = vadd.f32 %v2249_v7, %v7141_v6  ;;  %v3076_v23 = vsub.f32 %v2564_v63, %v2820_v16  ;;  %v7223_v36 = vsub.f32 %v2565_v40, %v2821_v49  ;;  %v2830_v12 = vld [vmem:[%s4451_s7 + $0xa0] sm:$0xff] }
 0x1d8   : > { %v2508_v31 = vadd.f32 %v2507_v51, %v2506_v29  ;;  %v2511_v27 = vsel %vm2259_vm2, %v7162_v13, 0.0  ;;  %v3078_v15 = vsub.f32 %v2566_v3, %v2822_v47  ;;  %v2513_v57 = vsel %vm2259_vm2, %v7177_v46, 0.0 }
 0x1d9   : > { %v2118_v6 = vadd.f32 %v2117_v61, %v7147_v52  ;;  %v2251_v37 = vadd.f32 %v2250_v53, %v7154_v38  ;;  %v3079_v10 = vsub.f32 %v2567_v60, %v2823_v39  ;;  %v7237_v52 = vsub.f32 %v2568_v1, %v2824_v4 }
 0x1da   : > { %v2510_v0 = vadd.f32 %v2509_v33, %v2508_v31  ;;  %v2527_v59 = vunpack.c.0.s8 %v2526_v34  ;;  %v7242_v58 = vshrl.u32 %v2528_v42, 7  ;;  %v7246_v50 = vsub.f32 %v2569_v41, %v2825_v14 }
 0x1db   : > { %v2119_v38 = vadd.f32 %v2118_v6, %v7166_v35  ;;  %v2252_v13 = vadd.f32 %v2251_v37, %v7170_v55  ;;  %v7248_v46 = vsub.f32 %v2570_v56, %v2826_v32  ;;  %v7250_v9 = vsub.f32 %v2571_v5, %v2827_v11  ;;  %v2831_v6 = vld [vmem:[%s4451_s7 + $0xa8] sm:$0xff] }
 0x1dc   : > { %v2512_v8 = vadd.f32 %v2511_v27, %v2510_v0  ;;  %v7252_v3 = vsub.f32 %v2572_v20, %v2828_v18  ;;  %v7254_v35 = vsub.f32 %v2573_v48, %v2829_v62  ;;  %v7256_v24 = vsub.f32 %v2574_v44, %v2830_v12  ;;  %v2576_v48 = vld [vmem:[%s4446_s30 + $0xb0] sm:$0xff] }
 0x1dd   : > { %v2120_v63 = vrot.slane %v2119_v38, 4  ;;  %v2253_v40 = vrot.slane %v2252_v13, 4  ;;  %v3323_v7 = vmul.f32 %v7186_v28, %v7186_v28  ;;  %v3325_v51 = vmul.f32 %v7190_v26, %v7190_v26  ;;  %v2832_v18 = vld [vmem:[%s4451_s7 + $0xb0] sm:$0xff] }
 0x1de   : > { %v2514_v55 = vadd.f32 %v2513_v57, %v2512_v8  ;;  %v7263_v49 = vsub.s32 %v2527_v59, %v7242_v58  ;;  %v3324_v29 = vmul.f32 %v7188_v17, %v7188_v17  ;;  %v3326_v60 = vmul.f32 %v7196_v21, %v7196_v21 }
 0x1df   : > { %v2121_v25 = vadd.f32 %v2120_v63, %v2119_v38  ;;  %v2254_v16 = vadd.f32 %v2253_v40, %v2252_v13  ;;  %v3327_v1 = vmul.f32 %v7201_v22, %v7201_v22  ;;  %v3328_v28 = vmul.f32 %v7203_v43, %v7203_v43  ;;  %v2578_v63 = vld [vmem:[%s4446_s30 + $0xc0] sm:$0xff]  ;;  %v2833_v40 = vld [vmem:[%s4451_s7 + $0xb8] sm:$0xff] }
 0x1e0   : > { %v2515_v33 = vrot.slane %v2514_v55, 4  ;;  %v3329_v61 = vmul.f32 %v7209_v30, %v7209_v30  ;;  %v3330_v53 = vmul.f32 %v3073_v2, %v3073_v2  ;;  %v3331_v34 = vmul.f32 %v3074_v54, %v3074_v54 }
 0x1e1   : > { %v2122_v47 = vrot.slane %v2121_v25, 2  ;;  %v2255_v26 = vrot.slane %v2254_v16, 2  ;;  %v3332_v17 = vmul.f32 %v3075_v45, %v3075_v45  ;;  %v3579_v41 = vadd.f32 %v3325_v51, %v3323_v7  ;;  %v2575_v45 = vld [vmem:[%s4446_s30 + $0xa8] sm:$0xff] }
 0x1e2   : > { %v2516_v19 = vadd.f32 %v2515_v33, %v2514_v55  ;;  %v3333_v4 = vmul.f32 %v3076_v23, %v3076_v23  ;;  %v3713_v43 = vsel %vm3712_vm3, %v3324_v29, 0.0  ;;  %v3714_v56 = vsel %vm3712_vm3, %v3326_v60, 0.0  ;;  %v2834_v55 = vld [vmem:[%s4451_s7 + $0xc0] sm:$0xff] }
 0x1e3   : > { %v2123_v39 = vadd.f32 %v2122_v47, %v2121_v25  ;;  %v2256_v21 = vadd.f32 %v2255_v26, %v2254_v16  ;;  %v3580_v31 = vadd.f32 %v3579_v41, %v3327_v1  ;;  %v3715_v2 = vadd.f32 %v3714_v56, %v3713_v43  ;;  %v2579_v16 = vld [vmem:[%s4446_s30 + $0xc8] sm:$0xff]  ;;  %v2580_v1 = vld [vmem:[%s4446_s30 + $0xd0] sm:$0xff]  ;;  %v2581_v41 = vld [vmem:[%s4446_s30 + $0xd8] sm:$0xff] }
 0x1e4   : > { %v2517_v22 = vrot.slane %v2516_v19, 2  ;;  %v3716_v54 = vsel %vm3712_vm3, %v3328_v28, 0.0  ;;  %v3334_v23 = vmul.f32 %v7223_v36, %v7223_v36  ;;  %v3718_v27 = vsel %vm3712_vm3, %v3330_v53, 0.0  ;;  %v2577_v36 = vld [vmem:[%s4446_s30 + $0xb8] sm:$0xff]  ;;  %v2835_v28 = vld [vmem:[%s4451_s7 + $0xc8] sm:$0xff]  ;;  %v2836_v47 = vld [vmem:[%s4451_s7 + $0xd0] sm:$0xff] }
 0x1e5   : > { %v2124_v5 = vrot.slane %v2123_v39, 1  ;;  %v2257_v30 = vrot.slane %v2256_v21, 1  ;;  %v3581_v37 = vadd.f32 %v3580_v31, %v3329_v61  ;;  %v3335_v11 = vmul.f32 %v3078_v15, %v3078_v15  ;;  %v2582_v31 = vld [vmem:[%s4446_s30 + $0xe0] sm:$0xff] }
 0x1e6   : > { %v2518_v20 = vadd.f32 %v2517_v22, %v2516_v19  ;;  %v3717_v0 = vadd.f32 %v3716_v54, %v3715_v2  ;;  %v3336_v62 = vmul.f32 %v3079_v10, %v3079_v10  ;;  %v3720_v13 = vsel %vm3712_vm3, %v3332_v17, 0.0  ;;  %v1608_v22 = vld [vmem:[#allocation2] sm:$0x7]  ;;  %v2583_v2 = vld [vmem:[%s4446_s30 + $0xe8] sm:$0xff] }
 0x1e7   : > { %v2125_v14 = vadd.f32 %v2124_v5, %v2123_v39  ;;  %v2258_v32 = vadd.f32 %v2257_v30, %v2256_v21  ;;  %v3582_v38 = vadd.f32 %v3581_v37, %v3331_v34  ;;  %v3087_v44 = vsub.f32 %v2575_v45, %v2831_v6  ;;  %v2837_v39 = vld [vmem:[%s4451_s7 + $0xd8] sm:$0xff]  ;;  %v2838_v54 = vld [vmem:[%s4451_s7 + $0xe0] sm:$0xff]  ;;  %v2584_v37 = vld [vmem:[%s4446_s30 + $0xf0] sm:$0xff] }
 0x1e8   : > { %v2519_v57 = vrot.slane %v2518_v20, 1  ;;  %v3337_v12 = vmul.f32 %v7237_v52, %v7237_v52  ;;  %v3719_v8 = vadd.f32 %v3718_v27, %v3717_v0  ;;  %v3338_v10 = vmul.f32 %v7246_v50, %v7246_v50  ;;  %v2840_v0 = vld [vmem:[%s4451_s7 + $0xf0] sm:$0xff] }
 0x1e9   : > { %v2524_v59 = vcombine.low %v2125_v14, %v2258_v32  ;;  %v3583_v7 = vadd.f32 %v3582_v38, %v3333_v4  ;;  %v3722_v51 = vsel %vm3712_vm3, %v3334_v23, 0.0  ;;  %v3088_v29 = vsub.f32 %v2576_v48, %v2832_v18  ;;  %v2586_v38 = vld [vmem:[%s4446_s30 + $0x100] sm:$0xff] }
 0x1ea   : > { %v2520_v15 = vadd.f32 %v2519_v57, %v2518_v20  ;;  %v3339_v52 = vmul.f32 %v7248_v46, %v7248_v46  ;;  %v3721_v33 = vadd.f32 %v3720_v13, %v3719_v8  ;;  %v3340_v50 = vmul.f32 %v7250_v9, %v7250_v9  ;;  %v2841_v57 = vld [vmem:[%s4451_s7 + $0xf8] sm:$0xff]  ;;  %v2843_v8 = vld [vmem:[%s4451_s7 + $0x108] sm:$0xff]  ;;  %v2850_v23 = vld [vmem:[%s4451_s7 + $0x140] sm:$0xff] }
 0x1eb   : > { %v2531_v25 = vrot.slane %v2524_v59, %v7263_v49  ;;  %v3584_v26 = vadd.f32 %v3583_v7, %v3335_v11  ;;  %v3724_v61 = vsel %vm3712_vm3, %v3336_v62, 0.0  ;;  %v3089_v53 = vsub.f32 %v2577_v36, %v2833_v40  ;;  %v2585_v11 = vld [vmem:[%s4446_s30 + $0xf8] sm:$0xff] }
 0x1ec   : > { %v2538_v60 = vrot.slane %v2520_v15, %v7263_v49  ;;  %v3090_v19 = vsub.f32 %v2578_v63, %v2834_v55  ;;  %v3341_v34 = vmul.f32 %v7252_v3, %v7252_v3  ;;  %v3723_v46 = vadd.f32 %v3722_v51, %v3721_v33 }
 0x1ed   : > { %v3342_v21 = vmul.f32 %v7254_v35, %v7254_v35  ;;  %v3585_v4 = vadd.f32 %v3584_v26, %v3337_v12  ;;  %v3726_v9 = vsel %vm3712_vm3, %v3338_v10, 0.0  ;;  %v3091_v43 = vsub.f32 %v2579_v16, %v2835_v28  ;;  %v2839_v35 = vld [vmem:[%s4451_s7 + $0xe8] sm:$0xff]  ;;  %v2842_v12 = vld [vmem:[%s4451_s7 + $0x100] sm:$0xff]  ;;  %v2588_v10 = vld [vmem:[%s4446_s30 + $0x110] sm:$0xff] }
 0x1ee   : > { %v2539_v17 = vcombine.low %v2531_v25, %v2538_v60  ;;  %v3092_v56 = vsub.f32 %v2580_v1, %v2836_v47  ;;  %v3343_v3 = vmul.f32 %v7256_v24, %v7256_v24  ;;  %v3725_v5 = vadd.f32 %v3724_v61, %v3723_v46  ;;  %v2589_v16 = vld [vmem:[%s4446_s30 + $0x118] sm:$0xff]  ;;  %v2590_v47 = vld [vmem:[%s4446_s30 + $0x120] sm:$0xff] }
 0x1ef   : > { %v3344_v20 = vmul.f32 %v3087_v44, %v3087_v44  ;;  %v3586_v45 = vadd.f32 %v3585_v4, %v3339_v52  ;;  %v3728_v6 = vsel %vm3712_vm3, %v3340_v50, 0.0  ;;  %vm7322_vm4 = vcmp.lt.s32.totalorder %v2528_v42, 315  ;;  %v2587_v44 = vld [vmem:[%s4446_s30 + $0x108] sm:$0xff]  ;;  %v2845_v52 = vld [vmem:[%s4451_s7 + $0x118] sm:$0xff] }
 0x1f0   : > { %v2546_v30 = vrot.slane %v2539_v17, %v7263_v49  ;;  %v3093_v24 = vsub.f32 %v2581_v41, %v2837_v39  ;;  %v3345_v27 = vmul.f32 %v3088_v29, %v3088_v29  ;;  %v3727_v14 = vadd.f32 %v3726_v9, %v3725_v5  ;;  %v2844_v29 = vld [vmem:[%s4451_s7 + $0x110] sm:$0xff] }
 0x1f1   : > { %v3346_v48 = vmul.f32 %v3089_v53, %v3089_v53  ;;  %v3587_v18 = vadd.f32 %v3586_v45, %v3341_v34  ;;  %v3730_v62 = vsel %vm3712_vm3, %v3342_v21, 0.0  ;;  %v3094_v13 = vsub.f32 %v2582_v31, %v2838_v54  ;;  %v2591_v53 = vld [vmem:[%s4446_s30 + $0x128] sm:$0xff]  ;;  %v2592_v21 = vld [vmem:[%s4446_s30 + $0x130] sm:$0xff]  ;;  %v2593_v31 = vld [vmem:[%s4446_s30 + $0x138] sm:$0xff] }
 0x1f2   : > { %v2548_v32 = vadd.f32 %v2546_v30, %v1608_v22  ;;  %v3095_v59 = vsub.f32 %v2583_v2, %v2839_v35  ;;  %v3729_v36 = vadd.f32 %v3728_v6, %v3727_v14  ;;  %v3347_v15 = vmul.f32 %v3090_v19, %v3090_v19  ;;  %v2846_v19 = vld [vmem:[%s4451_s7 + $0x120] sm:$0xff]  ;;  %v2847_v34 = vld [vmem:[%s4451_s7 + $0x128] sm:$0xff] }
 0x1f3   : > { %v3348_v63 = vmul.f32 %v3091_v43, %v3091_v43  ;;  %v3588_v40 = vadd.f32 %v3587_v18, %v3343_v3  ;;  %v3732_v55 = vsel %vm3712_vm3, %v3344_v20, 0.0  ;;  %v3096_v7 = vsub.f32 %v2584_v37, %v2840_v0  ;;  %v2848_v43 = vld [vmem:[%s4451_s7 + $0x130] sm:$0xff]  ;;  %v2594_v54 = vld [vmem:[%s4446_s30 + $0x140] sm:$0xff]  ;;  %v2595_v6 = vld [vmem:[%s4446_s30 + $0x148] sm:$0xff] }
 0x1f4   : > { %2553 = vst.msk [vmem:[#allocation2] sm:$0x7] %vm7322_vm4, %v2548_v32  ;;  %v3097_v51 = vsub.f32 %v2585_v11, %v2841_v57  ;;  %v3731_v25 = vadd.f32 %v3730_v62, %v3729_v36  ;;  %v3349_v33 = vmul.f32 %v3092_v56, %v3092_v56  ;;  %v3350_v60 = vmul.f32 %v3093_v24, %v3093_v24  ;;  %v2849_v56 = vld [vmem:[%s4451_s7 + $0x138] sm:$0xff]  ;;  %v2851_v37 = vld [vmem:[%s4451_s7 + $0x148] sm:$0xff]  ;;  %v2596_v11 = vld [vmem:[%s4446_s30 + $0x150] sm:$0xff] }
 0x1f5   : > { %v3589_v1 = vadd.f32 %v3588_v40, %v3345_v27  ;;  %v3734_v28 = vsel %vm3712_vm3, %v3346_v48, 0.0  ;;  %v3098_v50 = vsub.f32 %v2586_v38, %v2842_v12  ;;  %v3099_v26 = vsub.f32 %v2587_v44, %v2843_v8  ;;  %v2597_v18 = vld [vmem:[%s4446_s30 + $0x158] sm:$0xff]  ;;  %v2852_v62 = vld [vmem:[%s4451_s7 + $0x150] sm:$0xff]  ;;  %v2598_v12 = vld [vmem:[%s4446_s30 + $0x160] sm:$0xff] }
 0x1f6   : > { %v3733_v61 = vadd.f32 %v3732_v55, %v3731_v25  ;;  %v3351_v46 = vmul.f32 %v3094_v13, %v3094_v13  ;;  %v3352_v17 = vmul.f32 %v3095_v59, %v3095_v59  ;;  %v3736_v39 = vsel %vm3712_vm3, %v3348_v63, 0.0  ;;  %v2853_v38 = vld [vmem:[%s4451_s7 + $0x158] sm:$0xff]  ;;  %v2599_v40 = vld [vmem:[%s4446_s30 + $0x168] sm:$0xff]  ;;  %v2854_v55 = vld [vmem:[%s4451_s7 + $0x160] sm:$0xff] }
 0x1f7   : > { %v3590_v41 = vadd.f32 %v3589_v1, %v3347_v15  ;;  %v3100_v4 = vsub.f32 %v2588_v10, %v2844_v29  ;;  %v3101_v9 = vsub.f32 %v2589_v16, %v2845_v52  ;;  %v3353_v3 = vmul.f32 %v3096_v7, %v3096_v7  ;;  %v2855_v10 = vld [vmem:[%s4451_s7 + $0x168] sm:$0xff]  ;;  %v2600_v29 = vld [vmem:[%s4446_s30 + $0x170] sm:$0xff]  ;;  %v2601_v1 = vld [vmem:[%s4446_s30 + $0x178] sm:$0xff] }
 0x1f8   : > { %v3735_v22 = vadd.f32 %v3734_v28, %v3733_v61  ;;  %v3354_v5 = vmul.f32 %v3097_v51, %v3097_v51  ;;  %v3738_v2 = vsel %vm3712_vm3, %v3350_v60, 0.0  ;;  %v3102_v35 = vsub.f32 %v2590_v47, %v2846_v19  ;;  %v2856_v28 = vld [vmem:[%s4451_s7 + $0x170] sm:$0xff]  ;;  %v2857_v47 = vld [vmem:[%s4451_s7 + $0x178] sm:$0xff]  ;;  %v2602_v19 = vld [vmem:[%s4446_s30 + $0x180] sm:$0xff] }
 0x1f9   : > { %v3591_v30 = vadd.f32 %v3590_v41, %v3349_v33  ;;  %v3103_v20 = vsub.f32 %v2591_v53, %v2847_v34  ;;  %v3355_v24 = vmul.f32 %v3098_v50, %v3098_v50  ;;  %v3356_v27 = vmul.f32 %v3099_v26, %v3099_v26  ;;  %v2603_v41 = vld [vmem:[%s4446_s30 + $0x188] sm:$0xff] }
 0x1fa   : > { %v3737_v45 = vadd.f32 %v3736_v39, %v3735_v22  ;;  %v3740_v32 = vsel %vm3712_vm3, %v3352_v17, 0.0  ;;  %v3104_v0 = vsub.f32 %v2592_v21, %v2848_v43  ;;  %v3105_v57 = vsub.f32 %v2593_v31, %v2849_v56  ;;  %v2858_v39 = vld [vmem:[%s4451_s7 + $0x180] sm:$0xff]  ;;  %v2859_v21 = vld [vmem:[%s4451_s7 + $0x188] sm:$0xff]  ;;  %v2604_v43 = vld [vmem:[%s4446_s30 + $0x190] sm:$0xff] }
 0x1fb   : > { %v3592_v14 = vadd.f32 %v3591_v30, %v3351_v46  ;;  %v3357_v13 = vmul.f32 %v3100_v4, %v3100_v4  ;;  %v3358_v59 = vmul.f32 %v3101_v9, %v3101_v9  ;;  %v3742_v44 = vsel %vm3712_vm3, %v3354_v5, 0.0  ;;  %v2605_v30 = vld [vmem:[%s4446_s30 + $0x198] sm:$0xff] }
 0x1fc   : > { %v3739_v48 = vadd.f32 %v3738_v2, %v3737_v45  ;;  %v3106_v8 = vsub.f32 %v2594_v54, %v2850_v23  ;;  %v3107_v15 = vsub.f32 %v2595_v6, %v2851_v37  ;;  %v3359_v7 = vmul.f32 %v3102_v35, %v3102_v35  ;;  %v2860_v2 = vld [vmem:[%s4451_s7 + $0x190] sm:$0xff]  ;;  %v2861_v54 = vld [vmem:[%s4451_s7 + $0x198] sm:$0xff]  ;;  %v2606_v23 = vld [vmem:[%s4446_s30 + $0x1a0] sm:$0xff] }
 0x1fd   : > { %v3593_v36 = vadd.f32 %v3592_v14, %v3353_v3  ;;  %v3360_v51 = vmul.f32 %v3103_v20, %v3103_v20  ;;  %v3744_v16 = vsel %vm3712_vm3, %v3356_v27, 0.0  ;;  %v3108_v52 = vsub.f32 %v2596_v11, %v2852_v62  ;;  %v2607_v14 = vld [vmem:[%s4446_s30 + $0x1a8] sm:$0xff]  ;;  %v2608_v62 = vld [vmem:[%s4446_s30 + $0x1b0] sm:$0xff] }
 0x1fe   : > { %v3741_v63 = vadd.f32 %v3740_v32, %v3739_v48  ;;  %v3109_v33 = vsub.f32 %v2597_v18, %v2853_v38  ;;  %v3361_v50 = vmul.f32 %v3104_v0, %v3104_v0  ;;  %v3362_v26 = vmul.f32 %v3105_v57, %v3105_v57  ;;  %v2862_v32 = vld [vmem:[%s4451_s7 + $0x1a0] sm:$0xff]  ;;  %v2863_v11 = vld [vmem:[%s4451_s7 + $0x1a8] sm:$0xff] }
 0x1ff   : > { %v3594_v25 = vadd.f32 %v3593_v36, %v3355_v24  ;;  %v3746_v53 = vsel %vm3712_vm3, %v3358_v59, 0.0  ;;  %v3110_v34 = vsub.f32 %v2598_v12, %v2854_v55  ;;  %v3111_v46 = vsub.f32 %v2599_v40, %v2855_v10  ;;  %v2609_v36 = vld [vmem:[%s4446_s30 + $0x1b8] sm:$0xff]  ;;  %v2610_v55 = vld [vmem:[%s4446_s30 + $0x1c0] sm:$0xff] }
 0x200   : > { %v3743_v60 = vadd.f32 %v3742_v44, %v3741_v63  ;;  %v3363_v4 = vmul.f32 %v3106_v8, %v3106_v8  ;;  %v3364_v9 = vmul.f32 %v3107_v15, %v3107_v15  ;;  %v3748_v31 = vsel %vm3712_vm3, %v3360_v51, 0.0  ;;  %v2864_v44 = vld [vmem:[%s4451_s7 + $0x1b0] sm:$0xff]  ;;  %v2865_v12 = vld [vmem:[%s4451_s7 + $0x1b8] sm:$0xff] }
 0x201   : > { %v3595_v61 = vadd.f32 %v3594_v25, %v3357_v13  ;;  %v3112_v56 = vsub.f32 %v2600_v29, %v2856_v28  ;;  %v3113_v3 = vsub.f32 %v2601_v1, %v2857_v47  ;;  %v3365_v35 = vmul.f32 %v3108_v52, %v3108_v52  ;;  %v2611_v25 = vld [vmem:[%s4446_s30 + $0x1c8] sm:$0xff]  ;;  %v2612_v28 = vld [vmem:[%s4446_s30 + $0x1d0] sm:$0xff] }
 0x202   : > { %v3745_v17 = vadd.f32 %v3744_v16, %v3743_v60  ;;  %v3366_v20 = vmul.f32 %v3109_v33, %v3109_v33  ;;  %v3750_v6 = vsel %vm3712_vm3, %v3362_v26, 0.0  ;;  %v3114_v37 = vsub.f32 %v2602_v19, %v2858_v39  ;;  %v2866_v16 = vld [vmem:[%s4451_s7 + $0x1c0] sm:$0xff]  ;;  %v2867_v29 = vld [vmem:[%s4451_s7 + $0x1c8] sm:$0xff]  ;;  %v2869_v19 = vld [vmem:[%s4451_s7 + $0x1d8] sm:$0xff] }
 0x203   : > { %v3596_v22 = vadd.f32 %v3595_v61, %v3359_v7  ;;  %v3115_v24 = vsub.f32 %v2603_v41, %v2859_v21  ;;  %v3367_v0 = vmul.f32 %v3110_v34, %v3110_v34  ;;  %v3368_v57 = vmul.f32 %v3111_v46, %v3111_v46  ;;  %v2613_v61 = vld [vmem:[%s4446_s30 + $0x1d8] sm:$0xff]  ;;  %v2614_v39 = vld [vmem:[%s4446_s30 + $0x1e0] sm:$0xff] }
 0x204   : > { %v3747_v5 = vadd.f32 %v3746_v53, %v3745_v17  ;;  %v3752_v18 = vsel %vm3712_vm3, %v3364_v9, 0.0  ;;  %v3116_v38 = vsub.f32 %v2604_v43, %v2860_v2  ;;  %v3117_v13 = vsub.f32 %v2605_v30, %v2861_v54  ;;  %v2868_v53 = vld [vmem:[%s4451_s7 + $0x1d0] sm:$0xff]  ;;  %v2871_v43 = vld [vmem:[%s4451_s7 + $0x1e8] sm:$0xff] }
 0x205   : > { %v3597_v45 = vadd.f32 %v3596_v22, %v3361_v50  ;;  %v3369_v8 = vmul.f32 %v3112_v56, %v3112_v56  ;;  %v3370_v15 = vmul.f32 %v3113_v3, %v3113_v3  ;;  %v3754_v40 = vsel %vm3712_vm3, %v3366_v20, 0.0  ;;  %v2615_v22 = vld [vmem:[%s4446_s30 + $0x1e8] sm:$0xff]  ;;  %v2616_v2 = vld [vmem:[%s4446_s30 + $0x1f0] sm:$0xff] }
 0x206   : > { %v3749_v27 = vadd.f32 %v3748_v31, %v3747_v5  ;;  %v3118_v10 = vsub.f32 %v2606_v23, %v2862_v32  ;;  %v3119_v7 = vsub.f32 %v2607_v14, %v2863_v11  ;;  %v3371_v52 = vmul.f32 %v3114_v37, %v3114_v37  ;;  %v2870_v31 = vld [vmem:[%s4451_s7 + $0x1e0] sm:$0xff]  ;;  %v2873_v23 = vld [vmem:[%s4451_s7 + $0x1f8] sm:$0xff] }
 0x207   : > { %v3598_v48 = vadd.f32 %v3597_v45, %v3363_v4  ;;  %v3372_v33 = vmul.f32 %v3115_v24, %v3115_v24  ;;  %v3756_v1 = vsel %vm3712_vm3, %v3368_v57, 0.0  ;;  %v3120_v47 = vsub.f32 %v2608_v62, %v2864_v44  ;;  %v2617_v45 = vld [vmem:[%s4446_s30 + $0x1f8] sm:$0xff]  ;;  %v2618_v32 = vld [vmem:[%s4446_s30 + $0x200] sm:$0xff]  ;;  %v2875_v62 = vld [vmem:[%s4451_s7 + $0x208] sm:$0xff] }
 0x208   : > { %v3751_v59 = vadd.f32 %v3750_v6, %v3749_v27  ;;  %v3121_v50 = vsub.f32 %v2609_v36, %v2865_v12  ;;  %v3373_v34 = vmul.f32 %v3116_v38, %v3116_v38  ;;  %v3374_v46 = vmul.f32 %v3117_v13, %v3117_v13  ;;  %v2872_v6 = vld [vmem:[%s4451_s7 + $0x1f0] sm:$0xff] }
 0x209   : > { %v3599_v63 = vadd.f32 %v3598_v48, %v3365_v35  ;;  %v3758_v41 = vsel %vm3712_vm3, %v3370_v15, 0.0  ;;  %v3122_v21 = vsub.f32 %v2610_v55, %v2866_v16  ;;  %v3123_v4 = vsub.f32 %v2611_v25, %v2867_v29  ;;  %v2619_v48 = vld [vmem:[%s4446_s30 + $0x208] sm:$0xff]  ;;  %v2620_v44 = vld [vmem:[%s4446_s30 + $0x210] sm:$0xff]  ;;  %v2877_v55 = vld [vmem:[%s4451_s7 + $0x218] sm:$0xff] }
 0x20a   : > { %v3753_v51 = vadd.f32 %v3752_v18, %v3751_v59  ;;  %v3375_v56 = vmul.f32 %v3118_v10, %v3118_v10  ;;  %v3376_v3 = vmul.f32 %v3119_v7, %v3119_v7  ;;  %v3760_v30 = vsel %vm3712_vm3, %v3372_v33, 0.0  ;;  %v2874_v18 = vld [vmem:[%s4451_s7 + $0x200] sm:$0xff] }
 0x20b   : > { %v3600_v60 = vadd.f32 %v3599_v63, %v3367_v0  ;;  %v3124_v54 = vsub.f32 %v2612_v28, %v2868_v53  ;;  %v3125_v35 = vsub.f32 %v2613_v61, %v2869_v19  ;;  %v3377_v37 = vmul.f32 %v3120_v47, %v3120_v47  ;;  %v2621_v63 = vld [vmem:[%s4446_s30 + $0x218] sm:$0xff]  ;;  %v2622_v16 = vld [vmem:[%s4446_s30 + $0x220] sm:$0xff]  ;;  %v2879_v28 = vld [vmem:[%s4451_s7 + $0x228] sm:$0xff] }
 0x20c   : > { %v3755_v26 = vadd.f32 %v3754_v40, %v3753_v51  ;;  %v3378_v24 = vmul.f32 %v3121_v50, %v3121_v50  ;;  %v3762_v14 = vsel %vm3712_vm3, %v3374_v46, 0.0  ;;  %v3126_v11 = vsub.f32 %v2614_v39, %v2870_v31  ;;  %v2876_v40 = vld [vmem:[%s4451_s7 + $0x210] sm:$0xff]  ;;  %v2881_v39 = vld [vmem:[%s4451_s7 + $0x238] sm:$0xff]  ;;  %v2626_v31 = vld [vmem:[%s4446_s30 + $0x240] sm:$0xff] }
 0x20d   : > { %v3601_v17 = vadd.f32 %v3600_v60, %v3369_v8  ;;  %v3127_v0 = vsub.f32 %v2615_v22, %v2871_v43  ;;  %v3379_v38 = vmul.f32 %v3122_v21, %v3122_v21  ;;  %v3380_v13 = vmul.f32 %v3123_v4, %v3123_v4  ;;  %v2623_v60 = vld [vmem:[%s4446_s30 + $0x228] sm:$0xff]  ;;  %v2624_v53 = vld [vmem:[%s4446_s30 + $0x230] sm:$0xff] }
 0x20e   : > { %v3757_v9 = vadd.f32 %v3756_v1, %v3755_v26  ;;  %v3764_v36 = vsel %vm3712_vm3, %v3376_v3, 0.0  ;;  %v3128_v12 = vsub.f32 %v2616_v2, %v2872_v6  ;;  %v3129_v8 = vsub.f32 %v2617_v45, %v2873_v23  ;;  %v2878_v1 = vld [vmem:[%s4451_s7 + $0x220] sm:$0xff]  ;;  %v2883_v2 = vld [vmem:[%s4451_s7 + $0x248] sm:$0xff]  ;;  %v2628_v6 = vld [vmem:[%s4446_s30 + $0x250] sm:$0xff] }
 0x20f   : > { %v3602_v5 = vadd.f32 %v3601_v17, %v3371_v52  ;;  %v3381_v10 = vmul.f32 %v3124_v54, %v3124_v54  ;;  %v3382_v7 = vmul.f32 %v3125_v35, %v3125_v35  ;;  %v3766_v25 = vsel %vm3712_vm3, %v3378_v24, 0.0  ;;  %v2625_v17 = vld [vmem:[%s4446_s30 + $0x238] sm:$0xff] }
 0x210   : > { %v3759_v20 = vadd.f32 %v3758_v41, %v3757_v9  ;;  %v3130_v29 = vsub.f32 %v2618_v32, %v2874_v18  ;;  %v3131_v52 = vsub.f32 %v2619_v48, %v2875_v62  ;;  %v3383_v47 = vmul.f32 %v3126_v11, %v3126_v11  ;;  %v2880_v41 = vld [vmem:[%s4451_s7 + $0x230] sm:$0xff]  ;;  %v2885_v32 = vld [vmem:[%s4451_s7 + $0x258] sm:$0xff]  ;;  %v2630_v18 = vld [vmem:[%s4446_s30 + $0x260] sm:$0xff] }
 0x211   : > { %v3603_v27 = vadd.f32 %v3602_v5, %v3373_v34  ;;  %v3384_v50 = vmul.f32 %v3127_v0, %v3127_v0  ;;  %v3768_v61 = vsel %vm3712_vm3, %v3380_v13, 0.0  ;;  %v3132_v19 = vsub.f32 %v2620_v44, %v2876_v40  ;;  %v2627_v5 = vld [vmem:[%s4446_s30 + $0x248] sm:$0xff]  ;;  %v2632_v40 = vld [vmem:[%s4446_s30 + $0x270] sm:$0xff] }
 0x212   : > { %v3761_v57 = vadd.f32 %v3760_v30, %v3759_v20  ;;  %v3133_v34 = vsub.f32 %v2621_v63, %v2877_v55  ;;  %v3385_v21 = vmul.f32 %v3128_v12, %v3128_v12  ;;  %v3386_v4 = vmul.f32 %v3129_v8, %v3129_v8  ;;  %v2882_v30 = vld [vmem:[%s4451_s7 + $0x240] sm:$0xff]  ;;  %v2887_v44 = vld [vmem:[%s4451_s7 + $0x268] sm:$0xff] }
 0x213   : > { %v3604_v59 = vadd.f32 %v3603_v27, %v3375_v56  ;;  %v3770_v22 = vsel %vm3712_vm3, %v3382_v7, 0.0  ;;  %v3134_v43 = vsub.f32 %v2622_v16, %v2878_v1  ;;  %v3135_v56 = vsub.f32 %v2623_v60, %v2879_v28  ;;  %v2629_v27 = vld [vmem:[%s4446_s30 + $0x258] sm:$0xff]  ;;  %v2634_v1 = vld [vmem:[%s4446_s30 + $0x280] sm:$0xff] }
 0x214   : > { %v3763_v15 = vadd.f32 %v3762_v14, %v3761_v57  ;;  %v3387_v54 = vmul.f32 %v3130_v29, %v3130_v29  ;;  %v3388_v35 = vmul.f32 %v3131_v52, %v3131_v52  ;;  %v3772_v45 = vsel %vm3712_vm3, %v3384_v50, 0.0  ;;  %v2884_v14 = vld [vmem:[%s4451_s7 + $0x250] sm:$0xff]  ;;  %v2889_v16 = vld [vmem:[%s4451_s7 + $0x278] sm:$0xff] }
 0x215   : > { %v3605_v51 = vadd.f32 %v3604_v59, %v3377_v37  ;;  %v3136_v23 = vsub.f32 %v2624_v53, %v2880_v41  ;;  %v3137_v37 = vsub.f32 %v2625_v17, %v2881_v39  ;;  %v3389_v11 = vmul.f32 %v3132_v19, %v3132_v19  ;;  %v2631_v59 = vld [vmem:[%s4446_s30 + $0x268] sm:$0xff]  ;;  %v2636_v41 = vld [vmem:[%s4446_s30 + $0x290] sm:$0xff] }
 0x216   : > { %v3765_v33 = vadd.f32 %v3764_v36, %v3763_v15  ;;  %v3390_v0 = vmul.f32 %v3133_v34, %v3133_v34  ;;  %v3774_v48 = vsel %vm3712_vm3, %v3386_v4, 0.0  ;;  %v3138_v62 = vsub.f32 %v2626_v31, %v2882_v30  ;;  %v2886_v36 = vld [vmem:[%s4451_s7 + $0x260] sm:$0xff]  ;;  %v2891_v53 = vld [vmem:[%s4451_s7 + $0x288] sm:$0xff]  ;;  %v2893_v31 = vld [vmem:[%s4451_s7 + $0x298] sm:$0xff] }
 0x217   : > { %v3606_v26 = vadd.f32 %v3605_v51, %v3379_v38  ;;  %v3139_v38 = vsub.f32 %v2627_v5, %v2883_v2  ;;  %v3391_v12 = vmul.f32 %v3134_v43, %v3134_v43  ;;  %v3392_v8 = vmul.f32 %v3135_v56, %v3135_v56  ;;  %v2633_v51 = vld [vmem:[%s4446_s30 + $0x278] sm:$0xff]  ;;  %v2638_v30 = vld [vmem:[%s4446_s30 + $0x2a0] sm:$0xff] }
 0x218   : > { %v3767_v46 = vadd.f32 %v3766_v25, %v3765_v33  ;;  %v3776_v63 = vsel %vm3712_vm3, %v3388_v35, 0.0  ;;  %v3140_v55 = vsub.f32 %v2628_v6, %v2884_v14  ;;  %v2888_v25 = vld [vmem:[%s4451_s7 + $0x270] sm:$0xff]  ;;  %v3393_v29 = vmul.f32 %v3136_v23, %v3136_v23  ;;  %v2895_v6 = vld [vmem:[%s4451_s7 + $0x2a8] sm:$0xff] }
 0x219   : > { %v3607_v9 = vadd.f32 %v3606_v26, %v3381_v10  ;;  %v3141_v10 = vsub.f32 %v2629_v27, %v2885_v32  ;;  %v3394_v52 = vmul.f32 %v3137_v37, %v3137_v37  ;;  %v3778_v60 = vsel %vm3712_vm3, %v3390_v0, 0.0  ;;  %v2635_v26 = vld [vmem:[%s4446_s30 + $0x288] sm:$0xff]  ;;  %v2640_v14 = vld [vmem:[%s4446_s30 + $0x2b0] sm:$0xff] }
 0x21a   : > { %v3769_v3 = vadd.f32 %v3768_v61, %v3767_v46  ;;  %v3142_v28 = vsub.f32 %v2630_v18, %v2886_v36  ;;  %v2890_v61 = vld [vmem:[%s4451_s7 + $0x280] sm:$0xff]  ;;  %v3395_v19 = vmul.f32 %v3138_v62, %v3138_v62  ;;  %v3396_v34 = vmul.f32 %v3139_v38, %v3139_v38  ;;  %v2897_v18 = vld [vmem:[%s4451_s7 + $0x2b8] sm:$0xff] }
 0x21b   : > { %v3608_v20 = vadd.f32 %v3607_v9, %v3383_v47  ;;  %v3143_v47 = vsub.f32 %v2631_v59, %v2887_v44  ;;  %v3780_v17 = vsel %vm3712_vm3, %v3392_v8, 0.0  ;;  %v3144_v39 = vsub.f32 %v2632_v40, %v2888_v25  ;;  %v2637_v9 = vld [vmem:[%s4446_s30 + $0x298] sm:$0xff]  ;;  %v2642_v36 = vld [vmem:[%s4446_s30 + $0x2c0] sm:$0xff]  ;;  %v2899_v40 = vld [vmem:[%s4451_s7 + $0x2c8] sm:$0xff] }
 0x21c   : > { %v3771_v24 = vadd.f32 %v3770_v22, %v3769_v3  ;;  %v2892_v22 = vld [vmem:[%s4451_s7 + $0x290] sm:$0xff]  ;;  %v3397_v43 = vmul.f32 %v3140_v55, %v3140_v55  ;;  %v3398_v56 = vmul.f32 %v3141_v10, %v3141_v10  ;;  %v3782_v5 = vsel %vm3712_vm3, %v3394_v52, 0.0 }
 0x21d   : > { %v3609_v57 = vadd.f32 %v3608_v20, %v3385_v21  ;;  %v3145_v21 = vsub.f32 %v2633_v51, %v2889_v16  ;;  %v3146_v2 = vsub.f32 %v2634_v1, %v2890_v61  ;;  %v2639_v20 = vld [vmem:[%s4446_s30 + $0x2a8] sm:$0xff]  ;;  %v3399_v23 = vmul.f32 %v3142_v28, %v3142_v28  ;;  %v2644_v25 = vld [vmem:[%s4446_s30 + $0x2d0] sm:$0xff]  ;;  %v2901_v1 = vld [vmem:[%s4451_s7 + $0x2d8] sm:$0xff] }
 0x21e   : > { %v3773_v13 = vadd.f32 %v3772_v45, %v3771_v24  ;;  %v2894_v45 = vld [vmem:[%s4451_s7 + $0x2a0] sm:$0xff]  ;;  %v3400_v37 = vmul.f32 %v3143_v47, %v3143_v47  ;;  %v3784_v27 = vsel %vm3712_vm3, %v3396_v34, 0.0  ;;  %v3148_v32 = vsub.f32 %v2636_v41, %v2892_v22  ;;  %v2903_v41 = vld [vmem:[%s4451_s7 + $0x2e8] sm:$0xff]  ;;  %v2648_v22 = vld [vmem:[%s4446_s30 + $0x2f0] sm:$0xff] }
 0x21f   : > { %v3610_v15 = vadd.f32 %v3609_v57, %v3387_v54  ;;  %v3147_v54 = vsub.f32 %v2635_v26, %v2891_v53  ;;  %v2641_v57 = vld [vmem:[%s4446_s30 + $0x2b8] sm:$0xff]  ;;  %v3401_v62 = vmul.f32 %v3144_v39, %v3144_v39  ;;  %v3402_v38 = vmul.f32 %v3145_v21, %v3145_v21  ;;  %v2646_v61 = vld [vmem:[%s4446_s30 + $0x2e0] sm:$0xff] }
 0x220   : > { %v3775_v7 = vadd.f32 %v3774_v48, %v3773_v13  ;;  %v2896_v48 = vld [vmem:[%s4451_s7 + $0x2b0] sm:$0xff]  ;;  %v3786_v59 = vsel %vm3712_vm3, %v3398_v56, 0.0  ;;  %v3150_v44 = vsub.f32 %v2638_v30, %v2894_v45  ;;  %v3403_v55 = vmul.f32 %v3146_v2, %v3146_v2  ;;  %v2905_v30 = vld [vmem:[%s4451_s7 + $0x2f8] sm:$0xff]  ;;  %v2650_v45 = vld [vmem:[%s4446_s30 + $0x300] sm:$0xff] }
 0x221   : > { %v3611_v33 = vadd.f32 %v3610_v15, %v3389_v11  ;;  %v3149_v11 = vsub.f32 %v2637_v9, %v2893_v31  ;;  %v2643_v15 = vld [vmem:[%s4446_s30 + $0x2c8] sm:$0xff]  ;;  %v3404_v10 = vmul.f32 %v3147_v54, %v3147_v54  ;;  %v3788_v51 = vsel %vm3712_vm3, %v3400_v37, 0.0 }
 0x222   : > { %v3777_v50 = vadd.f32 %v3776_v63, %v3775_v7  ;;  %v2898_v63 = vld [vmem:[%s4451_s7 + $0x2c0] sm:$0xff]  ;;  %v3152_v16 = vsub.f32 %v2640_v14, %v2896_v48  ;;  %v3405_v28 = vmul.f32 %v3148_v32, %v3148_v32  ;;  %v3790_v26 = vsel %vm3712_vm3, %v3402_v38, 0.0  ;;  %v2907_v14 = vld [vmem:[%s4451_s7 + $0x308] sm:$0xff]  ;;  %v2652_v48 = vld [vmem:[%s4446_s30 + $0x310] sm:$0xff] }
 0x223   : > { %v3612_v46 = vadd.f32 %v3611_v33, %v3391_v12  ;;  %v3151_v12 = vsub.f32 %v2639_v20, %v2895_v6  ;;  %v2645_v33 = vld [vmem:[%s4446_s30 + $0x2d8] sm:$0xff]  ;;  %v3406_v47 = vmul.f32 %v3149_v11, %v3149_v11  ;;  %v3154_v53 = vsub.f32 %v2642_v36, %v2898_v63  ;;  %v2654_v63 = vld [vmem:[%s4446_s30 + $0x320] sm:$0xff] }
 0x224   : > { %v3779_v4 = vadd.f32 %v3778_v60, %v3777_v50  ;;  %v2900_v60 = vld [vmem:[%s4451_s7 + $0x2d0] sm:$0xff]  ;;  %v3407_v39 = vmul.f32 %v3150_v44, %v3150_v44  ;;  %v3792_v9 = vsel %vm3712_vm3, %v3404_v10, 0.0  ;;  %v3409_v2 = vmul.f32 %v3152_v16, %v3152_v16  ;;  %v2909_v36 = vld [vmem:[%s4451_s7 + $0x318] sm:$0xff] }
 0x225   : > { %v3613_v3 = vadd.f32 %v3612_v46, %v3393_v29  ;;  %v3153_v29 = vsub.f32 %v2641_v57, %v2897_v18  ;;  %v2647_v46 = vld [vmem:[%s4446_s30 + $0x2e8] sm:$0xff]  ;;  %v3408_v21 = vmul.f32 %v3151_v12, %v3151_v12  ;;  %v3156_v31 = vsub.f32 %v2644_v25, %v2900_v60  ;;  %v2657_v60 = vld [vmem:[%s4446_s30 + $0x338] sm:$0xff] }
 0x226   : > { %v3781_v35 = vadd.f32 %v3780_v17, %v3779_v4  ;;  %v2902_v17 = vld [vmem:[%s4451_s7 + $0x2e0] sm:$0xff]  ;;  %v3794_v20 = vsel %vm3712_vm3, %v3406_v47, 0.0  ;;  %v3411_v32 = vmul.f32 %v3154_v53, %v3154_v53  ;;  %v2911_v25 = vld [vmem:[%s4451_s7 + $0x328] sm:$0xff]  ;;  %vm3993_vm5 = vcmp.lt.s32.totalorder %v2528_v42, 156 }
 0x227   : > { %v3614_v24 = vadd.f32 %v3613_v3, %v3395_v19  ;;  %v3155_v19 = vsub.f32 %v2643_v15, %v2899_v40  ;;  %v2649_v3 = vld [vmem:[%s4446_s30 + $0x2f8] sm:$0xff]  ;;  %v3410_v54 = vmul.f32 %v3153_v29, %v3153_v29  ;;  %v3158_v6 = vsub.f32 %v2646_v61, %v2902_v17  ;;  %v2659_v17 = vld [vmem:[%s4446_s30 + $0x348] sm:$0xff] }
 0x228   : > { %v3783_v0 = vadd.f32 %v3782_v5, %v3781_v35  ;;  %v2904_v5 = vld [vmem:[%s4451_s7 + $0x2f0] sm:$0xff]  ;;  %v3796_v57 = vsel %vm3712_vm3, %v3408_v21, 0.0  ;;  %v3413_v44 = vmul.f32 %v3156_v31, %v3156_v31  ;;  %v2913_v61 = vld [vmem:[%s4451_s7 + $0x338] sm:$0xff] }
 0x229   : > { %v3615_v13 = vadd.f32 %v3614_v24, %v3397_v43  ;;  %v3157_v43 = vsub.f32 %v2645_v33, %v2901_v1  ;;  %v2651_v24 = vld [vmem:[%s4446_s30 + $0x308] sm:$0xff]  ;;  %v3412_v11 = vmul.f32 %v3155_v19, %v3155_v19  ;;  %v3160_v18 = vsub.f32 %v2648_v22, %v2904_v5  ;;  %v2661_v5 = vld [vmem:[%s4446_s30 + $0x358] sm:$0xff] }
 0x22a   : > { %v3785_v8 = vadd.f32 %v3784_v27, %v3783_v0  ;;  %v2906_v27 = vld [vmem:[%s4451_s7 + $0x300] sm:$0xff]  ;;  %v3798_v15 = vsel %vm3712_vm3, %v3410_v54, 0.0  ;;  %v3415_v16 = vmul.f32 %v3158_v6, %v3158_v6  ;;  %v2915_v22 = vld [vmem:[%s4451_s7 + $0x348] sm:$0xff] }
 0x22b   : > { %v3616_v7 = vadd.f32 %v3615_v13, %v3399_v23  ;;  %v3159_v23 = vsub.f32 %v2647_v46, %v2903_v41  ;;  %v2653_v13 = vld [vmem:[%s4446_s30 + $0x318] sm:$0xff]  ;;  %v3414_v12 = vmul.f32 %v3157_v43, %v3157_v43  ;;  %v3162_v40 = vsub.f32 %v2650_v45, %v2906_v27  ;;  %v2663_v27 = vld [vmem:[%s4446_s30 + $0x368] sm:$0xff] }
 0x22c   : > { %v3787_v52 = vadd.f32 %v3786_v59, %v3785_v8  ;;  %v2908_v59 = vld [vmem:[%s4451_s7 + $0x310] sm:$0xff]  ;;  %v3800_v33 = vsel %vm3712_vm3, %v3412_v11, 0.0  ;;  %v3417_v53 = vmul.f32 %v3160_v18, %v3160_v18  ;;  %v2917_v45 = vld [vmem:[%s4451_s7 + $0x358] sm:$0xff] }
 0x22d   : > { %v3617_v50 = vadd.f32 %v3616_v7, %v3401_v62  ;;  %v3161_v62 = vsub.f32 %v2649_v3, %v2905_v30  ;;  %v2655_v7 = vld [vmem:[%s4446_s30 + $0x328] sm:$0xff]  ;;  %v3416_v29 = vmul.f32 %v3159_v23, %v3159_v23  ;;  %v3164_v1 = vsub.f32 %v2652_v48, %v2908_v59  ;;  %v2665_v59 = vld [vmem:[%s4446_s30 + $0x378] sm:$0xff] }
 0x22e   : > { %v3789_v34 = vadd.f32 %v3788_v51, %v3787_v52  ;;  %v2910_v51 = vld [vmem:[%s4451_s7 + $0x320] sm:$0xff]  ;;  %v3802_v46 = vsel %vm3712_vm3, %v3414_v12, 0.0  ;;  %v3419_v31 = vmul.f32 %v3162_v40, %v3162_v40  ;;  %v2919_v48 = vld [vmem:[%s4451_s7 + $0x368] sm:$0xff] }
 0x22f   : > { %v3618_v4 = vadd.f32 %v3617_v50, %v3403_v55  ;;  %v3163_v55 = vsub.f32 %v2651_v24, %v2907_v14  ;;  %v2656_v50 = vld [vmem:[%s4446_s30 + $0x330] sm:$0xff]  ;;  %v3418_v19 = vmul.f32 %v3161_v62, %v3161_v62  ;;  %v3166_v41 = vsub.f32 %v2654_v63, %v2910_v51  ;;  %v2921_v63 = vld [vmem:[%s4451_s7 + $0x378] sm:$0xff]  ;;  %v2667_v51 = vld [vmem:[%s4446_s30 + $0x388] sm:$0xff] }
 0x230   : > { %v3791_v56 = vadd.f32 %v3790_v26, %v3789_v34  ;;  %v2912_v26 = vld [vmem:[%s4451_s7 + $0x330] sm:$0xff]  ;;  %v3804_v3 = vsel %vm3712_vm3, %v3416_v29, 0.0  ;;  %v3421_v6 = vmul.f32 %v3164_v1, %v3164_v1 }
 0x231   : > { %v3619_v35 = vadd.f32 %v3618_v4, %v3405_v28  ;;  %v3165_v28 = vsub.f32 %v2653_v13, %v2909_v36  ;;  %v2658_v4 = vld [vmem:[%s4446_s30 + $0x340] sm:$0xff]  ;;  %v3420_v43 = vmul.f32 %v3163_v55, %v3163_v55  ;;  %v3168_v30 = vsub.f32 %v2656_v50, %v2912_v26  ;;  %v2669_v26 = vld [vmem:[%s4446_s30 + $0x398] sm:$0xff] }
 0x232   : > { %v3793_v37 = vadd.f32 %v3792_v9, %v3791_v56  ;;  %v2914_v9 = vld [vmem:[%s4451_s7 + $0x340] sm:$0xff]  ;;  %v3806_v24 = vsel %vm3712_vm3, %v3418_v19, 0.0  ;;  %v3423_v18 = vmul.f32 %v3166_v41, %v3166_v41 }
 0x233   : > { %v3620_v0 = vadd.f32 %v3619_v35, %v3407_v39  ;;  %v3167_v39 = vsub.f32 %v2655_v7, %v2911_v25  ;;  %v2660_v35 = vld [vmem:[%s4446_s30 + $0x350] sm:$0xff]  ;;  %v3422_v23 = vmul.f32 %v3165_v28, %v3165_v28  ;;  %v3170_v14 = vsub.f32 %v2658_v4, %v2914_v9  ;;  %v2671_v9 = vld [vmem:[%s4446_s30 + $0x3a8] sm:$0xff] }
 0x234   : > { %v3795_v38 = vadd.f32 %v3794_v20, %v3793_v37  ;;  %v2916_v20 = vld [vmem:[%s4451_s7 + $0x350] sm:$0xff]  ;;  %v3808_v13 = vsel %vm3712_vm3, %v3420_v43, 0.0  ;;  %v3425_v40 = vmul.f32 %v3168_v30, %v3168_v30 }
 0x235   : > { %v3621_v8 = vadd.f32 %v3620_v0, %v3409_v2  ;;  %v3169_v2 = vsub.f32 %v2657_v60, %v2913_v61  ;;  %v2662_v0 = vld [vmem:[%s4446_s30 + $0x360] sm:$0xff]  ;;  %v3424_v62 = vmul.f32 %v3167_v39, %v3167_v39  ;;  %v3172_v36 = vsub.f32 %v2660_v35, %v2916_v20  ;;  %v2923_v60 = vld [vmem:[%s4451_s7 + $0x388] sm:$0xff]  ;;  %v2673_v20 = vld [vmem:[%s4446_s30 + $0x3b8] sm:$0xff] }
 0x236   : > { %v3797_v10 = vadd.f32 %v3796_v57, %v3795_v38  ;;  %v2918_v57 = vld [vmem:[%s4451_s7 + $0x360] sm:$0xff]  ;;  %v3810_v7 = vsel %vm3712_vm3, %v3422_v23, 0.0  ;;  %v3427_v1 = vmul.f32 %v3170_v14, %v3170_v14 }
 0x237   : > { %v3622_v52 = vadd.f32 %v3621_v8, %v3411_v32  ;;  %v3171_v32 = vsub.f32 %v2659_v17, %v2915_v22  ;;  %v2664_v8 = vld [vmem:[%s4446_s30 + $0x370] sm:$0xff]  ;;  %v3426_v55 = vmul.f32 %v3169_v2, %v3169_v2  ;;  %v3174_v25 = vsub.f32 %v2662_v0, %v2918_v57  ;;  %v2925_v17 = vld [vmem:[%s4451_s7 + $0x398] sm:$0xff]  ;;  %v2675_v57 = vld [vmem:[%s4446_s30 + $0x3c8] sm:$0xff] }
 0x238   : > { %v3799_v47 = vadd.f32 %v3798_v15, %v3797_v10  ;;  %v2920_v15 = vld [vmem:[%s4451_s7 + $0x370] sm:$0xff]  ;;  %v3812_v50 = vsel %vm3712_vm3, %v3424_v62, 0.0  ;;  %v3429_v41 = vmul.f32 %v3172_v36, %v3172_v36 }
 0x239   : > { %v3623_v34 = vadd.f32 %v3622_v52, %v3413_v44  ;;  %v3173_v44 = vsub.f32 %v2661_v5, %v2917_v45  ;;  %v2666_v52 = vld [vmem:[%s4446_s30 + $0x380] sm:$0xff]  ;;  %v3428_v28 = vmul.f32 %v3171_v32, %v3171_v32  ;;  %v3176_v61 = vsub.f32 %v2664_v8, %v2920_v15  ;;  %v2927_v5 = vld [vmem:[%s4451_s7 + $0x3a8] sm:$0xff]  ;;  %v2677_v15 = vld [vmem:[%s4446_s30 + $0x3d8] sm:$0xff] }
 0x23a   : > { %v3801_v21 = vadd.f32 %v3800_v33, %v3799_v47  ;;  %v2922_v33 = vld [vmem:[%s4451_s7 + $0x380] sm:$0xff]  ;;  %v3814_v4 = vsel %vm3712_vm3, %v3426_v55, 0.0  ;;  %v3431_v30 = vmul.f32 %v3174_v25, %v3174_v25 }
 0x23b   : > { %v3624_v56 = vadd.f32 %v3623_v34, %v3415_v16  ;;  %v3175_v16 = vsub.f32 %v2663_v27, %v2919_v48  ;;  %v2668_v34 = vld [vmem:[%s4446_s30 + $0x390] sm:$0xff]  ;;  %v3430_v39 = vmul.f32 %v3173_v44, %v3173_v44  ;;  %v3178_v22 = vsub.f32 %v2666_v52, %v2922_v33  ;;  %v2929_v27 = vld [vmem:[%s4451_s7 + $0x3b8] sm:$0xff]  ;;  %v2679_v33 = vld [vmem:[%s4446_s30 + $0x3e8] sm:$0xff] }
 0x23c   : > { %v3803_v54 = vadd.f32 %v3802_v46, %v3801_v21  ;;  %v2924_v46 = vld [vmem:[%s4451_s7 + $0x390] sm:$0xff]  ;;  %v3816_v35 = vsel %vm3712_vm3, %v3428_v28, 0.0  ;;  %v3433_v14 = vmul.f32 %v3176_v61, %v3176_v61 }
 0x23d   : > { %v3625_v37 = vadd.f32 %v3624_v56, %v3417_v53  ;;  %v3177_v53 = vsub.f32 %v2665_v59, %v2921_v63  ;;  %v2670_v56 = vld [vmem:[%s4446_s30 + $0x3a0] sm:$0xff]  ;;  %v3432_v2 = vmul.f32 %v3175_v16, %v3175_v16  ;;  %v3180_v45 = vsub.f32 %v2668_v34, %v2924_v46  ;;  %v2931_v59 = vld [vmem:[%s4451_s7 + $0x3c8] sm:$0xff]  ;;  %v2681_v46 = vld [vmem:[%s4446_s30 + $0x3f8] sm:$0xff] }
 0x23e   : > { %v3805_v11 = vadd.f32 %v3804_v3, %v3803_v54  ;;  %v2926_v3 = vld [vmem:[%s4451_s7 + $0x3a0] sm:$0xff]  ;;  %v3818_v0 = vsel %vm3712_vm3, %v3430_v39, 0.0  ;;  %v3435_v36 = vmul.f32 %v3178_v22, %v3178_v22 }
 0x23f   : > { %v3626_v38 = vadd.f32 %v3625_v37, %v3419_v31  ;;  %v3179_v31 = vsub.f32 %v2667_v51, %v2923_v60  ;;  %v2672_v37 = vld [vmem:[%s4446_s30 + $0x3b0] sm:$0xff]  ;;  %v3434_v32 = vmul.f32 %v3177_v53, %v3177_v53  ;;  %v3182_v48 = vsub.f32 %v2670_v56, %v2926_v3  ;;  %v2933_v51 = vld [vmem:[%s4451_s7 + $0x3d8] sm:$0xff]  ;;  %v2683_v3 = vld [vmem:[%s4446_s30 + $0x408] sm:$0xff] }
 0x240   : > { %v3807_v12 = vadd.f32 %v3806_v24, %v3805_v11  ;;  %v2928_v24 = vld [vmem:[%s4451_s7 + $0x3b0] sm:$0xff]  ;;  %v3820_v8 = vsel %vm3712_vm3, %v3432_v2, 0.0  ;;  %v3437_v25 = vmul.f32 %v3180_v45, %v3180_v45 }
 0x241   : > { %v3627_v10 = vadd.f32 %v3626_v38, %v3421_v6  ;;  %v3181_v6 = vsub.f32 %v2669_v26, %v2925_v17  ;;  %v2674_v38 = vld [vmem:[%s4446_s30 + $0x3c0] sm:$0xff]  ;;  %v3436_v44 = vmul.f32 %v3179_v31, %v3179_v31  ;;  %v3184_v63 = vsub.f32 %v2672_v37, %v2928_v24  ;;  %v2935_v26 = vld [vmem:[%s4451_s7 + $0x3e8] sm:$0xff]  ;;  %v2685_v24 = vld [vmem:[%s4446_s30 + $0x418] sm:$0xff] }
 0x242   : > { %v3809_v29 = vadd.f32 %v3808_v13, %v3807_v12  ;;  %v2930_v13 = vld [vmem:[%s4451_s7 + $0x3c0] sm:$0xff]  ;;  %v3822_v52 = vsel %vm3712_vm3, %v3434_v32, 0.0  ;;  %v3439_v61 = vmul.f32 %v3182_v48, %v3182_v48 }
 0x243   : > { %v3628_v47 = vadd.f32 %v3627_v10, %v3423_v18  ;;  %v3183_v18 = vsub.f32 %v2671_v9, %v2927_v5  ;;  %v2676_v10 = vld [vmem:[%s4446_s30 + $0x3d0] sm:$0xff]  ;;  %v3438_v16 = vmul.f32 %v3181_v6, %v3181_v6  ;;  %v3186_v60 = vsub.f32 %v2674_v38, %v2930_v13  ;;  %v2937_v9 = vld [vmem:[%s4451_s7 + $0x3f8] sm:$0xff]  ;;  %v2687_v13 = vld [vmem:[%s4446_s30 + $0x428] sm:$0xff] }
 0x244   : > { %v3811_v19 = vadd.f32 %v3810_v7, %v3809_v29  ;;  %v2932_v7 = vld [vmem:[%s4451_s7 + $0x3d0] sm:$0xff]  ;;  %v3824_v34 = vsel %vm3712_vm3, %v3436_v44, 0.0  ;;  %v3441_v22 = vmul.f32 %v3184_v63, %v3184_v63 }
 0x245   : > { %v3629_v21 = vadd.f32 %v3628_v47, %v3425_v40  ;;  %v3185_v40 = vsub.f32 %v2673_v20, %v2929_v27  ;;  %v2678_v47 = vld [vmem:[%s4446_s30 + $0x3e0] sm:$0xff]  ;;  %v3440_v53 = vmul.f32 %v3183_v18, %v3183_v18  ;;  %v3188_v17 = vsub.f32 %v2676_v10, %v2932_v7  ;;  %v2939_v20 = vld [vmem:[%s4451_s7 + $0x408] sm:$0xff]  ;;  %v2689_v7 = vld [vmem:[%s4446_s30 + $0x438] sm:$0xff] }
 0x246   : > { %v3813_v43 = vadd.f32 %v3812_v50, %v3811_v19  ;;  %v2934_v50 = vld [vmem:[%s4451_s7 + $0x3e0] sm:$0xff]  ;;  %v3826_v56 = vsel %vm3712_vm3, %v3438_v16, 0.0  ;;  %v3443_v45 = vmul.f32 %v3186_v60, %v3186_v60 }
 0x247   : > { %v3630_v54 = vadd.f32 %v3629_v21, %v3427_v1  ;;  %v3187_v1 = vsub.f32 %v2675_v57, %v2931_v59  ;;  %v2680_v21 = vld [vmem:[%s4446_s30 + $0x3f0] sm:$0xff]  ;;  %v3442_v31 = vmul.f32 %v3185_v40, %v3185_v40  ;;  %v3190_v5 = vsub.f32 %v2678_v47, %v2934_v50  ;;  %v2941_v57 = vld [vmem:[%s4451_s7 + $0x418] sm:$0xff]  ;;  %v2691_v50 = vld [vmem:[%s4446_s30 + $0x448] sm:$0xff] }
 0x248   : > { %v3815_v23 = vadd.f32 %v3814_v4, %v3813_v43  ;;  %v2936_v4 = vld [vmem:[%s4451_s7 + $0x3f0] sm:$0xff]  ;;  %v3828_v37 = vsel %vm3712_vm3, %v3440_v53, 0.0  ;;  %v3445_v48 = vmul.f32 %v3188_v17, %v3188_v17 }
 0x249   : > { %v3631_v11 = vadd.f32 %v3630_v54, %v3429_v41  ;;  %v3189_v41 = vsub.f32 %v2677_v15, %v2933_v51  ;;  %v2682_v54 = vld [vmem:[%s4446_s30 + $0x400] sm:$0xff]  ;;  %v3444_v6 = vmul.f32 %v3187_v1, %v3187_v1  ;;  %v3192_v27 = vsub.f32 %v2680_v21, %v2936_v4  ;;  %v2943_v15 = vld [vmem:[%s4451_s7 + $0x428] sm:$0xff]  ;;  %v2693_v4 = vld [vmem:[%s4446_s30 + $0x458] sm:$0xff] }
 0x24a   : > { %v3817_v62 = vadd.f32 %v3816_v35, %v3815_v23  ;;  %v2938_v35 = vld [vmem:[%s4451_s7 + $0x400] sm:$0xff]  ;;  %v3830_v38 = vsel %vm3712_vm3, %v3442_v31, 0.0  ;;  %v3447_v63 = vmul.f32 %v3190_v5, %v3190_v5 }
 0x24b   : > { %v3632_v12 = vadd.f32 %v3631_v11, %v3431_v30  ;;  %v3191_v30 = vsub.f32 %v2679_v33, %v2935_v26  ;;  %v2684_v11 = vld [vmem:[%s4446_s30 + $0x410] sm:$0xff]  ;;  %v3446_v18 = vmul.f32 %v3189_v41, %v3189_v41  ;;  %v3194_v59 = vsub.f32 %v2682_v54, %v2938_v35  ;;  %v2945_v33 = vld [vmem:[%s4451_s7 + $0x438] sm:$0xff]  ;;  %v2695_v35 = vld [vmem:[%s4446_s30 + $0x468] sm:$0xff] }
 0x24c   : > { %v3819_v55 = vadd.f32 %v3818_v0, %v3817_v62  ;;  %v2940_v0 = vld [vmem:[%s4451_s7 + $0x410] sm:$0xff]  ;;  %v3832_v10 = vsel %vm3712_vm3, %v3444_v6, 0.0  ;;  %v3449_v60 = vmul.f32 %v3192_v27, %v3192_v27 }
 0x24d   : > { %v3633_v29 = vadd.f32 %v3632_v12, %v3433_v14  ;;  %v3193_v14 = vsub.f32 %v2681_v46, %v2937_v9  ;;  %v2686_v12 = vld [vmem:[%s4446_s30 + $0x420] sm:$0xff]  ;;  %v3448_v40 = vmul.f32 %v3191_v30, %v3191_v30  ;;  %v3196_v51 = vsub.f32 %v2684_v11, %v2940_v0  ;;  %v2947_v46 = vld [vmem:[%s4451_s7 + $0x448] sm:$0xff]  ;;  %v2697_v0 = vld [vmem:[%s4446_s30 + $0x478] sm:$0xff] }
 0x24e   : > { %v3821_v28 = vadd.f32 %v3820_v8, %v3819_v55  ;;  %v2942_v8 = vld [vmem:[%s4451_s7 + $0x420] sm:$0xff]  ;;  %v3834_v47 = vsel %vm3712_vm3, %v3446_v18, 0.0  ;;  %v3451_v17 = vmul.f32 %v3194_v59, %v3194_v59 }
 0x24f   : > { %v3634_v19 = vadd.f32 %v3633_v29, %v3435_v36  ;;  %v3195_v36 = vsub.f32 %v2683_v3, %v2939_v20  ;;  %v2688_v29 = vld [vmem:[%s4446_s30 + $0x430] sm:$0xff]  ;;  %v3450_v1 = vmul.f32 %v3193_v14, %v3193_v14  ;;  %v3198_v26 = vsub.f32 %v2686_v12, %v2942_v8  ;;  %v2949_v3 = vld [vmem:[%s4451_s7 + $0x458] sm:$0xff]  ;;  %v2699_v8 = vld [vmem:[%s4446_s30 + $0x488] sm:$0xff] }
 0x250   : > { %v3823_v39 = vadd.f32 %v3822_v52, %v3821_v28  ;;  %v2944_v52 = vld [vmem:[%s4451_s7 + $0x430] sm:$0xff]  ;;  %v3836_v21 = vsel %vm3712_vm3, %v3448_v40, 0.0  ;;  %v3453_v5 = vmul.f32 %v3196_v51, %v3196_v51 }
 0x251   : > { %v3635_v43 = vadd.f32 %v3634_v19, %v3437_v25  ;;  %v3197_v25 = vsub.f32 %v2685_v24, %v2941_v57  ;;  %v2690_v19 = vld [vmem:[%s4446_s30 + $0x440] sm:$0xff]  ;;  %v3452_v41 = vmul.f32 %v3195_v36, %v3195_v36  ;;  %v3200_v9 = vsub.f32 %v2688_v29, %v2944_v52  ;;  %v2951_v24 = vld [vmem:[%s4451_s7 + $0x468] sm:$0xff]  ;;  %v2701_v52 = vld [vmem:[%s4446_s30 + $0x498] sm:$0xff] }
 0x252   : > { %v3825_v2 = vadd.f32 %v3824_v34, %v3823_v39  ;;  %v2946_v34 = vld [vmem:[%s4451_s7 + $0x440] sm:$0xff]  ;;  %v3838_v54 = vsel %vm3712_vm3, %v3450_v1, 0.0  ;;  %v3455_v27 = vmul.f32 %v3198_v26, %v3198_v26 }
 0x253   : > { %v3636_v23 = vadd.f32 %v3635_v43, %v3439_v61  ;;  %v3199_v61 = vsub.f32 %v2687_v13, %v2943_v15  ;;  %v2692_v43 = vld [vmem:[%s4446_s30 + $0x450] sm:$0xff]  ;;  %v3454_v30 = vmul.f32 %v3197_v25, %v3197_v25  ;;  %v3202_v20 = vsub.f32 %v2690_v19, %v2946_v34  ;;  %v2953_v13 = vld [vmem:[%s4451_s7 + $0x478] sm:$0xff]  ;;  %v2703_v34 = vld [vmem:[%s4446_s30 + $0x4a8] sm:$0xff] }
 0x254   : > { %v3827_v32 = vadd.f32 %v3826_v56, %v3825_v2  ;;  %v2948_v56 = vld [vmem:[%s4451_s7 + $0x450] sm:$0xff]  ;;  %v3840_v11 = vsel %vm3712_vm3, %v3452_v41, 0.0  ;;  %v3457_v59 = vmul.f32 %v3200_v9, %v3200_v9 }
 0x255   : > { %v3637_v62 = vadd.f32 %v3636_v23, %v3441_v22  ;;  %v3201_v22 = vsub.f32 %v2689_v7, %v2945_v33  ;;  %v2694_v23 = vld [vmem:[%s4446_s30 + $0x460] sm:$0xff]  ;;  %v3456_v14 = vmul.f32 %v3199_v61, %v3199_v61  ;;  %v3204_v57 = vsub.f32 %v2692_v43, %v2948_v56  ;;  %v2955_v7 = vld [vmem:[%s4451_s7 + $0x488] sm:$0xff]  ;;  %v2705_v56 = vld [vmem:[%s4446_s30 + $0x4b8] sm:$0xff] }
 0x256   : > { %v3829_v44 = vadd.f32 %v3828_v37, %v3827_v32  ;;  %v2950_v37 = vld [vmem:[%s4451_s7 + $0x460] sm:$0xff]  ;;  %v3842_v12 = vsel %vm3712_vm3, %v3454_v30, 0.0  ;;  %v3459_v51 = vmul.f32 %v3202_v20, %v3202_v20 }
 0x257   : > { %v3638_v55 = vadd.f32 %v3637_v62, %v3443_v45  ;;  %v3203_v45 = vsub.f32 %v2691_v50, %v2947_v46  ;;  %v2696_v62 = vld [vmem:[%s4446_s30 + $0x470] sm:$0xff]  ;;  %v3458_v36 = vmul.f32 %v3201_v22, %v3201_v22  ;;  %v3206_v15 = vsub.f32 %v2694_v23, %v2950_v37  ;;  %v2957_v50 = vld [vmem:[%s4451_s7 + $0x498] sm:$0xff]  ;;  %v2707_v37 = vld [vmem:[%s4446_s30 + $0x4c8] sm:$0xff] }
 0x258   : > { %v3831_v16 = vadd.f32 %v3830_v38, %v3829_v44  ;;  %v2952_v38 = vld [vmem:[%s4451_s7 + $0x470] sm:$0xff]  ;;  %v3844_v29 = vsel %vm3712_vm3, %v3456_v14, 0.0  ;;  %v3461_v26 = vmul.f32 %v3204_v57, %v3204_v57 }
 0x259   : > { %v3639_v28 = vadd.f32 %v3638_v55, %v3445_v48  ;;  %v3205_v48 = vsub.f32 %v2693_v4, %v2949_v3  ;;  %v2698_v55 = vld [vmem:[%s4446_s30 + $0x480] sm:$0xff]  ;;  %v3460_v25 = vmul.f32 %v3203_v45, %v3203_v45  ;;  %v3208_v33 = vsub.f32 %v2696_v62, %v2952_v38  ;;  %v2959_v4 = vld [vmem:[%s4451_s7 + $0x4a8] sm:$0xff]  ;;  %v2709_v38 = vld [vmem:[%s4446_s30 + $0x4d8] sm:$0xff] }
 0x25a   : > { %v3833_v53 = vadd.f32 %v3832_v10, %v3831_v16  ;;  %v2954_v10 = vld [vmem:[%s4451_s7 + $0x480] sm:$0xff]  ;;  %v3846_v19 = vsel %vm3712_vm3, %v3458_v36, 0.0  ;;  %v3463_v9 = vmul.f32 %v3206_v15, %v3206_v15 }
 0x25b   : > { %v3640_v39 = vadd.f32 %v3639_v28, %v3447_v63  ;;  %v3207_v63 = vsub.f32 %v2695_v35, %v2951_v24  ;;  %v2700_v28 = vld [vmem:[%s4446_s30 + $0x490] sm:$0xff]  ;;  %v3462_v61 = vmul.f32 %v3205_v48, %v3205_v48  ;;  %v3210_v46 = vsub.f32 %v2698_v55, %v2954_v10  ;;  %v2961_v35 = vld [vmem:[%s4451_s7 + $0x4b8] sm:$0xff]  ;;  %v2711_v10 = vld [vmem:[%s4446_s30 + $0x4e8] sm:$0xff] }
 0x25c   : > { %v3835_v31 = vadd.f32 %v3834_v47, %v3833_v53  ;;  %v2956_v47 = vld [vmem:[%s4451_s7 + $0x490] sm:$0xff]  ;;  %v3848_v43 = vsel %vm3712_vm3, %v3460_v25, 0.0  ;;  %v3465_v20 = vmul.f32 %v3208_v33, %v3208_v33 }
 0x25d   : > { %v3641_v2 = vadd.f32 %v3640_v39, %v3449_v60  ;;  %v3209_v60 = vsub.f32 %v2697_v0, %v2953_v13  ;;  %v2702_v39 = vld [vmem:[%s4446_s30 + $0x4a0] sm:$0xff]  ;;  %v3464_v22 = vmul.f32 %v3207_v63, %v3207_v63  ;;  %v3212_v3 = vsub.f32 %v2700_v28, %v2956_v47  ;;  %v2963_v0 = vld [vmem:[%s4451_s7 + $0x4c8] sm:$0xff]  ;;  %v2713_v47 = vld [vmem:[%s4446_s30 + $0x4f8] sm:$0xff] }
 0x25e   : > { %v3837_v6 = vadd.f32 %v3836_v21, %v3835_v31  ;;  %v2958_v21 = vld [vmem:[%s4451_s7 + $0x4a0] sm:$0xff]  ;;  %v3850_v23 = vsel %vm3712_vm3, %v3462_v61, 0.0  ;;  %v3467_v57 = vmul.f32 %v3210_v46, %v3210_v46 }
 0x25f   : > { %v3642_v32 = vadd.f32 %v3641_v2, %v3451_v17  ;;  %v3211_v17 = vsub.f32 %v2699_v8, %v2955_v7  ;;  %v2704_v2 = vld [vmem:[%s4446_s30 + $0x4b0] sm:$0xff]  ;;  %v3466_v45 = vmul.f32 %v3209_v60, %v3209_v60  ;;  %v3214_v24 = vsub.f32 %v2702_v39, %v2958_v21  ;;  %v2965_v8 = vld [vmem:[%s4451_s7 + $0x4d8] sm:$0xff]  ;;  %v2715_v21 = vld [vmem:[%s4446_s30 + $0x508] sm:$0xff] }
 0x260   : > { %v3839_v18 = vadd.f32 %v3838_v54, %v3837_v6  ;;  %v2960_v54 = vld [vmem:[%s4451_s7 + $0x4b0] sm:$0xff]  ;;  %v3852_v62 = vsel %vm3712_vm3, %v3464_v22, 0.0  ;;  %v3469_v15 = vmul.f32 %v3212_v3, %v3212_v3 }
 0x261   : > { %v3643_v44 = vadd.f32 %v3642_v32, %v3453_v5  ;;  %v3213_v5 = vsub.f32 %v2701_v52, %v2957_v50  ;;  %v2706_v32 = vld [vmem:[%s4446_s30 + $0x4c0] sm:$0xff]  ;;  %v3468_v48 = vmul.f32 %v3211_v17, %v3211_v17  ;;  %v3216_v13 = vsub.f32 %v2704_v2, %v2960_v54  ;;  %v2967_v52 = vld [vmem:[%s4451_s7 + $0x4e8] sm:$0xff]  ;;  %v2717_v54 = vld [vmem:[%s4446_s30 + $0x518] sm:$0xff] }
 0x262   : > { %v3841_v40 = vadd.f32 %v3840_v11, %v3839_v18  ;;  %v2962_v11 = vld [vmem:[%s4451_s7 + $0x4c0] sm:$0xff]  ;;  %v3854_v55 = vsel %vm3712_vm3, %v3466_v45, 0.0  ;;  %v3471_v33 = vmul.f32 %v3214_v24, %v3214_v24 }
 0x263   : > { %v3644_v16 = vadd.f32 %v3643_v44, %v3455_v27  ;;  %v3215_v27 = vsub.f32 %v2703_v34, %v2959_v4  ;;  %v2708_v44 = vld [vmem:[%s4446_s30 + $0x4d0] sm:$0xff]  ;;  %v3470_v63 = vmul.f32 %v3213_v5, %v3213_v5  ;;  %v3218_v7 = vsub.f32 %v2706_v32, %v2962_v11  ;;  %v2969_v34 = vld [vmem:[%s4451_s7 + $0x4f8] sm:$0xff]  ;;  %v2719_v11 = vld [vmem:[%s4446_s30 + $0x528] sm:$0xff] }
 0x264   : > { %v3843_v1 = vadd.f32 %v3842_v12, %v3841_v40  ;;  %v2964_v12 = vld [vmem:[%s4451_s7 + $0x4d0] sm:$0xff]  ;;  %v3856_v28 = vsel %vm3712_vm3, %v3468_v48, 0.0  ;;  %v3473_v46 = vmul.f32 %v3216_v13, %v3216_v13 }
 0x265   : > { %v3645_v53 = vadd.f32 %v3644_v16, %v3457_v59  ;;  %v3217_v59 = vsub.f32 %v2705_v56, %v2961_v35  ;;  %v2710_v16 = vld [vmem:[%s4446_s30 + $0x4e0] sm:$0xff]  ;;  %v3472_v60 = vmul.f32 %v3215_v27, %v3215_v27  ;;  %v3220_v50 = vsub.f32 %v2708_v44, %v2964_v12  ;;  %v2971_v56 = vld [vmem:[%s4451_s7 + $0x508] sm:$0xff]  ;;  %v2721_v12 = vld [vmem:[%s4446_s30 + $0x538] sm:$0xff] }
 0x266   : > { %v3845_v41 = vadd.f32 %v3844_v29, %v3843_v1  ;;  %v2966_v29 = vld [vmem:[%s4451_s7 + $0x4e0] sm:$0xff]  ;;  %v3858_v39 = vsel %vm3712_vm3, %v3470_v63, 0.0  ;;  %v3475_v3 = vmul.f32 %v3218_v7, %v3218_v7 }
 0x267   : > { %v3646_v31 = vadd.f32 %v3645_v53, %v3459_v51  ;;  %v3219_v51 = vsub.f32 %v2707_v37, %v2963_v0  ;;  %v2712_v53 = vld [vmem:[%s4446_s30 + $0x4f0] sm:$0xff]  ;;  %v3474_v17 = vmul.f32 %v3217_v59, %v3217_v59  ;;  %v3222_v4 = vsub.f32 %v2710_v16, %v2966_v29  ;;  %v2973_v37 = vld [vmem:[%s4451_s7 + $0x518] sm:$0xff]  ;;  %v2723_v29 = vld [vmem:[%s4446_s30 + $0x548] sm:$0xff] }
 0x268   : > { %v3847_v30 = vadd.f32 %v3846_v19, %v3845_v41  ;;  %v2968_v19 = vld [vmem:[%s4451_s7 + $0x4f0] sm:$0xff]  ;;  %v3860_v2 = vsel %vm3712_vm3, %v3472_v60, 0.0  ;;  %v3477_v24 = vmul.f32 %v3220_v50, %v3220_v50 }
 0x269   : > { %v3647_v6 = vadd.f32 %v3646_v31, %v3461_v26  ;;  %v3221_v26 = vsub.f32 %v2709_v38, %v2965_v8  ;;  %v2714_v31 = vld [vmem:[%s4446_s30 + $0x500] sm:$0xff]  ;;  %v3476_v5 = vmul.f32 %v3219_v51, %v3219_v51  ;;  %v3224_v35 = vsub.f32 %v2712_v53, %v2968_v19  ;;  %v2975_v38 = vld [vmem:[%s4451_s7 + $0x528] sm:$0xff]  ;;  %v2725_v19 = vld [vmem:[%s4446_s30 + $0x558] sm:$0xff] }
 0x26a   : > { %v3849_v14 = vadd.f32 %v3848_v43, %v3847_v30  ;;  %v2970_v43 = vld [vmem:[%s4451_s7 + $0x500] sm:$0xff]  ;;  %v3862_v32 = vsel %vm3712_vm3, %v3474_v17, 0.0  ;;  %v3479_v13 = vmul.f32 %v3222_v4, %v3222_v4 }
 0x26b   : > { %v3648_v18 = vadd.f32 %v3647_v6, %v3463_v9  ;;  %v3223_v9 = vsub.f32 %v2711_v10, %v2967_v52  ;;  %v2716_v6 = vld [vmem:[%s4446_s30 + $0x510] sm:$0xff]  ;;  %v3478_v27 = vmul.f32 %v3221_v26, %v3221_v26  ;;  %v3226_v0 = vsub.f32 %v2714_v31, %v2970_v43  ;;  %v2977_v10 = vld [vmem:[%s4451_s7 + $0x538] sm:$0xff]  ;;  %v2727_v43 = vld [vmem:[%s4446_s30 + $0x568] sm:$0xff] }
 0x26c   : > { %v3851_v36 = vadd.f32 %v3850_v23, %v3849_v14  ;;  %v2972_v23 = vld [vmem:[%s4451_s7 + $0x510] sm:$0xff]  ;;  %v3864_v44 = vsel %vm3712_vm3, %v3476_v5, 0.0  ;;  %v3481_v7 = vmul.f32 %v3224_v35, %v3224_v35 }
 0x26d   : > { %v3649_v40 = vadd.f32 %v3648_v18, %v3465_v20  ;;  %v3225_v20 = vsub.f32 %v2713_v47, %v2969_v34  ;;  %v2718_v18 = vld [vmem:[%s4446_s30 + $0x520] sm:$0xff]  ;;  %v3480_v59 = vmul.f32 %v3223_v9, %v3223_v9  ;;  %v3228_v8 = vsub.f32 %v2716_v6, %v2972_v23  ;;  %v2979_v47 = vld [vmem:[%s4451_s7 + $0x548] sm:$0xff]  ;;  %v2729_v23 = vld [vmem:[%s4446_s30 + $0x578] sm:$0xff] }
 0x26e   : > { %v3853_v25 = vadd.f32 %v3852_v62, %v3851_v36  ;;  %v2974_v62 = vld [vmem:[%s4451_s7 + $0x520] sm:$0xff]  ;;  %v3866_v16 = vsel %vm3712_vm3, %v3478_v27, 0.0  ;;  %v3483_v50 = vmul.f32 %v3226_v0, %v3226_v0 }
 0x26f   : > { %v3650_v1 = vadd.f32 %v3649_v40, %v3467_v57  ;;  %v3227_v57 = vsub.f32 %v2715_v21, %v2971_v56  ;;  %v2720_v40 = vld [vmem:[%s4446_s30 + $0x530] sm:$0xff]  ;;  %v3482_v51 = vmul.f32 %v3225_v20, %v3225_v20  ;;  %v3230_v52 = vsub.f32 %v2718_v18, %v2974_v62  ;;  %v2981_v21 = vld [vmem:[%s4451_s7 + $0x558] sm:$0xff]  ;;  %v2731_v62 = vld [vmem:[%s4446_s30 + $0x588] sm:$0xff] }
 0x270   : > { %v3855_v61 = vadd.f32 %v3854_v55, %v3853_v25  ;;  %v2976_v55 = vld [vmem:[%s4451_s7 + $0x530] sm:$0xff]  ;;  %v3868_v53 = vsel %vm3712_vm3, %v3480_v59, 0.0  ;;  %v3485_v4 = vmul.f32 %v3228_v8, %v3228_v8 }
 0x271   : > { %v3651_v41 = vadd.f32 %v3650_v1, %v3469_v15  ;;  %v3229_v15 = vsub.f32 %v2717_v54, %v2973_v37  ;;  %v2722_v1 = vld [vmem:[%s4446_s30 + $0x540] sm:$0xff]  ;;  %v3484_v26 = vmul.f32 %v3227_v57, %v3227_v57  ;;  %v3232_v34 = vsub.f32 %v2720_v40, %v2976_v55  ;;  %v2983_v54 = vld [vmem:[%s4451_s7 + $0x568] sm:$0xff]  ;;  %v2733_v55 = vld [vmem:[%s4446_s30 + $0x598] sm:$0xff] }
 0x272   : > { %v3857_v22 = vadd.f32 %v3856_v28, %v3855_v61  ;;  %v2978_v28 = vld [vmem:[%s4451_s7 + $0x540] sm:$0xff]  ;;  %v3870_v31 = vsel %vm3712_vm3, %v3482_v51, 0.0  ;;  %v3487_v35 = vmul.f32 %v3230_v52, %v3230_v52 }
 0x273   : > { %v3652_v30 = vadd.f32 %v3651_v41, %v3471_v33  ;;  %v3231_v33 = vsub.f32 %v2719_v11, %v2975_v38  ;;  %v2724_v41 = vld [vmem:[%s4446_s30 + $0x550] sm:$0xff]  ;;  %v3486_v9 = vmul.f32 %v3229_v15, %v3229_v15  ;;  %v3234_v56 = vsub.f32 %v2722_v1, %v2978_v28  ;;  %v2985_v11 = vld [vmem:[%s4451_s7 + $0x578] sm:$0xff]  ;;  %v2735_v28 = vld [vmem:[%s4446_s30 + $0x5a8] sm:$0xff] }
 0x274   : > { %v3859_v45 = vadd.f32 %v3858_v39, %v3857_v22  ;;  %v2980_v39 = vld [vmem:[%s4451_s7 + $0x550] sm:$0xff]  ;;  %v3872_v6 = vsel %vm3712_vm3, %v3484_v26, 0.0  ;;  %v3489_v0 = vmul.f32 %v3232_v34, %v3232_v34 }
 0x275   : > { %v3653_v14 = vadd.f32 %v3652_v30, %v3473_v46  ;;  %v3233_v46 = vsub.f32 %v2721_v12, %v2977_v10  ;;  %v2726_v30 = vld [vmem:[%s4446_s30 + $0x560] sm:$0xff]  ;;  %v3488_v20 = vmul.f32 %v3231_v33, %v3231_v33  ;;  %v3236_v37 = vsub.f32 %v2724_v41, %v2980_v39  ;;  %v2987_v12 = vld [vmem:[%s4451_s7 + $0x588] sm:$0xff]  ;;  %v2737_v39 = vld [vmem:[%s4446_s30 + $0x5b8] sm:$0xff] }
 0x276   : > { %v3861_v48 = vadd.f32 %v3860_v2, %v3859_v45  ;;  %v2982_v2 = vld [vmem:[%s4451_s7 + $0x560] sm:$0xff]  ;;  %v3874_v18 = vsel %vm3712_vm3, %v3486_v9, 0.0  ;;  %v3491_v8 = vmul.f32 %v3234_v56, %v3234_v56 }
 0x277   : > { %v3654_v36 = vadd.f32 %v3653_v14, %v3475_v3  ;;  %v3235_v3 = vsub.f32 %v2723_v29, %v2979_v47  ;;  %v2728_v14 = vld [vmem:[%s4446_s30 + $0x570] sm:$0xff]  ;;  %v3490_v57 = vmul.f32 %v3233_v46, %v3233_v46  ;;  %v3238_v38 = vsub.f32 %v2726_v30, %v2982_v2  ;;  %v2989_v29 = vld [vmem:[%s4451_s7 + $0x598] sm:$0xff]  ;;  %v2739_v2 = vld [vmem:[%s4446_s30 + $0x5c8] sm:$0xff] }
 0x278   : > { %v3863_v63 = vadd.f32 %v3862_v32, %v3861_v48  ;;  %v2984_v32 = vld [vmem:[%s4451_s7 + $0x570] sm:$0xff]  ;;  %v3876_v40 = vsel %vm3712_vm3, %v3488_v20, 0.0  ;;  %v3493_v52 = vmul.f32 %v3236_v37, %v3236_v37 }
 0x279   : > { %v3655_v25 = vadd.f32 %v3654_v36, %v3477_v24  ;;  %v3237_v24 = vsub.f32 %v2725_v19, %v2981_v21  ;;  %v2730_v36 = vld [vmem:[%s4446_s30 + $0x580] sm:$0xff]  ;;  %v3492_v15 = vmul.f32 %v3235_v3, %v3235_v3  ;;  %v3240_v10 = vsub.f32 %v2728_v14, %v2984_v32  ;;  %v2991_v19 = vld [vmem:[%s4451_s7 + $0x5a8] sm:$0xff]  ;;  %v2741_v32 = vld [vmem:[%s4446_s30 + $0x5d8] sm:$0xff] }
 0x27a   : > { %v3865_v60 = vadd.f32 %v3864_v44, %v3863_v63  ;;  %v2986_v44 = vld [vmem:[%s4451_s7 + $0x580] sm:$0xff]  ;;  %v3878_v1 = vsel %vm3712_vm3, %v3490_v57, 0.0  ;;  %v3495_v34 = vmul.f32 %v3238_v38, %v3238_v38 }
 0x27b   : > { %v3656_v61 = vadd.f32 %v3655_v25, %v3479_v13  ;;  %v3239_v13 = vsub.f32 %v2727_v43, %v2983_v54  ;;  %v2732_v25 = vld [vmem:[%s4446_s30 + $0x590] sm:$0xff]  ;;  %v3494_v33 = vmul.f32 %v3237_v24, %v3237_v24  ;;  %v3242_v47 = vsub.f32 %v2730_v36, %v2986_v44  ;;  %v2993_v43 = vld [vmem:[%s4451_s7 + $0x5b8] sm:$0xff]  ;;  %v2743_v44 = vld [vmem:[%s4446_s30 + $0x5e8] sm:$0xff] }
 0x27c   : > { %v3867_v17 = vadd.f32 %v3866_v16, %v3865_v60  ;;  %v2988_v16 = vld [vmem:[%s4451_s7 + $0x590] sm:$0xff]  ;;  %v3880_v41 = vsel %vm3712_vm3, %v3492_v15, 0.0  ;;  %v3497_v56 = vmul.f32 %v3240_v10, %v3240_v10 }
 0x27d   : > { %v3657_v22 = vadd.f32 %v3656_v61, %v3481_v7  ;;  %v3241_v7 = vsub.f32 %v2729_v23, %v2985_v11  ;;  %v2734_v61 = vld [vmem:[%s4446_s30 + $0x5a0] sm:$0xff]  ;;  %v3496_v46 = vmul.f32 %v3239_v13, %v3239_v13  ;;  %v3244_v21 = vsub.f32 %v2732_v25, %v2988_v16  ;;  %v2995_v23 = vld [vmem:[%s4451_s7 + $0x5c8] sm:$0xff]  ;;  %v2745_v16 = vld [vmem:[%s4446_s30 + $0x5f8] sm:$0xff] }
 0x27e   : > { %v3869_v5 = vadd.f32 %v3868_v53, %v3867_v17  ;;  %v2990_v53 = vld [vmem:[%s4451_s7 + $0x5a0] sm:$0xff]  ;;  %v3882_v30 = vsel %vm3712_vm3, %v3494_v33, 0.0  ;;  %v3499_v37 = vmul.f32 %v3242_v47, %v3242_v47 }
 0x27f   : > { %v3658_v45 = vadd.f32 %v3657_v22, %v3483_v50  ;;  %v3243_v50 = vsub.f32 %v2731_v62, %v2987_v12  ;;  %v2736_v22 = vld [vmem:[%s4446_s30 + $0x5b0] sm:$0xff]  ;;  %v3498_v3 = vmul.f32 %v3241_v7, %v3241_v7  ;;  %v3246_v54 = vsub.f32 %v2734_v61, %v2990_v53  ;;  %v2997_v62 = vld [vmem:[%s4451_s7 + $0x5d8] sm:$0xff]  ;;  %v2747_v53 = vld [vmem:[%s4446_s30 + $0x608] sm:$0xff] }
 0x280   : > { %v3871_v27 = vadd.f32 %v3870_v31, %v3869_v5  ;;  %v2992_v31 = vld [vmem:[%s4451_s7 + $0x5b0] sm:$0xff]  ;;  %v3884_v14 = vsel %vm3712_vm3, %v3496_v46, 0.0  ;;  %v3501_v38 = vmul.f32 %v3244_v21, %v3244_v21 }
 0x281   : > { %v3659_v48 = vadd.f32 %v3658_v45, %v3485_v4  ;;  %v3245_v4 = vsub.f32 %v2733_v55, %v2989_v29  ;;  %v2738_v45 = vld [vmem:[%s4446_s30 + $0x5c0] sm:$0xff]  ;;  %v3500_v24 = vmul.f32 %v3243_v50, %v3243_v50  ;;  %v3248_v11 = vsub.f32 %v2736_v22, %v2992_v31  ;;  %v2999_v55 = vld [vmem:[%s4451_s7 + $0x5e8] sm:$0xff]  ;;  %v2749_v31 = vld [vmem:[%s4446_s30 + $0x618] sm:$0xff] }
 0x282   : > { %v3873_v59 = vadd.f32 %v3872_v6, %v3871_v27  ;;  %v2994_v6 = vld [vmem:[%s4451_s7 + $0x5c0] sm:$0xff]  ;;  %v3886_v36 = vsel %vm3712_vm3, %v3498_v3, 0.0  ;;  %v3503_v10 = vmul.f32 %v3246_v54, %v3246_v54 }
 0x283   : > { %v3660_v63 = vadd.f32 %v3659_v48, %v3487_v35  ;;  %v3247_v35 = vsub.f32 %v2735_v28, %v2991_v19  ;;  %v2740_v48 = vld [vmem:[%s4446_s30 + $0x5d0] sm:$0xff]  ;;  %v3502_v13 = vmul.f32 %v3245_v4, %v3245_v4  ;;  %v3250_v12 = vsub.f32 %v2738_v45, %v2994_v6  ;;  %v3001_v28 = vld [vmem:[%s4451_s7 + $0x5f8] sm:$0xff]  ;;  %v2751_v6 = vld [vmem:[%s4446_s30 + $0x628] sm:$0xff] }
 0x284   : > { %v3875_v51 = vadd.f32 %v3874_v18, %v3873_v59  ;;  %v2996_v18 = vld [vmem:[%s4451_s7 + $0x5d0] sm:$0xff]  ;;  %v3888_v25 = vsel %vm3712_vm3, %v3500_v24, 0.0  ;;  %v3505_v47 = vmul.f32 %v3248_v11, %v3248_v11 }
 0x285   : > { %v3661_v60 = vadd.f32 %v3660_v63, %v3489_v0  ;;  %v3249_v0 = vsub.f32 %v2737_v39, %v2993_v43  ;;  %v2742_v63 = vld [vmem:[%s4446_s30 + $0x5e0] sm:$0xff]  ;;  %v3504_v7 = vmul.f32 %v3247_v35, %v3247_v35  ;;  %v3252_v29 = vsub.f32 %v2740_v48, %v2996_v18  ;;  %v3003_v39 = vld [vmem:[%s4451_s7 + $0x608] sm:$0xff]  ;;  %v2753_v18 = vld [vmem:[%s4446_s30 + $0x638] sm:$0xff] }
 0x286   : > { %v3877_v26 = vadd.f32 %v3876_v40, %v3875_v51  ;;  %v2998_v40 = vld [vmem:[%s4451_s7 + $0x5e0] sm:$0xff]  ;;  %v3890_v61 = vsel %vm3712_vm3, %v3502_v13, 0.0  ;;  %v3507_v21 = vmul.f32 %v3250_v12, %v3250_v12 }
 0x287   : > { %v3662_v17 = vadd.f32 %v3661_v60, %v3491_v8  ;;  %v3251_v8 = vsub.f32 %v2739_v2, %v2995_v23  ;;  %v2744_v60 = vld [vmem:[%s4446_s30 + $0x5f0] sm:$0xff]  ;;  %v3506_v50 = vmul.f32 %v3249_v0, %v3249_v0  ;;  %v3254_v19 = vsub.f32 %v2742_v63, %v2998_v40  ;;  %v3005_v2 = vld [vmem:[%s4451_s7 + $0x618] sm:$0xff]  ;;  %v2755_v40 = vld [vmem:[%s4446_s30 + $0x648] sm:$0xff] }
 0x288   : > { %v3879_v9 = vadd.f32 %v3878_v1, %v3877_v26  ;;  %v3000_v1 = vld [vmem:[%s4451_s7 + $0x5f0] sm:$0xff]  ;;  %v3892_v22 = vsel %vm3712_vm3, %v3504_v7, 0.0  ;;  %v3509_v54 = vmul.f32 %v3252_v29, %v3252_v29 }
 0x289   : > { %v3663_v5 = vadd.f32 %v3662_v17, %v3493_v52  ;;  %v3253_v52 = vsub.f32 %v2741_v32, %v2997_v62  ;;  %v2746_v17 = vld [vmem:[%s4446_s30 + $0x600] sm:$0xff]  ;;  %v3508_v4 = vmul.f32 %v3251_v8, %v3251_v8  ;;  %v3256_v43 = vsub.f32 %v2744_v60, %v3000_v1  ;;  %v3007_v32 = vld [vmem:[%s4451_s7 + $0x628] sm:$0xff]  ;;  %v2757_v1 = vld [vmem:[%s4446_s30 + $0x658] sm:$0xff] }
 0x28a   : > { %v3881_v20 = vadd.f32 %v3880_v41, %v3879_v9  ;;  %v3002_v41 = vld [vmem:[%s4451_s7 + $0x600] sm:$0xff]  ;;  %v3894_v45 = vsel %vm3712_vm3, %v3506_v50, 0.0  ;;  %v3511_v11 = vmul.f32 %v3254_v19, %v3254_v19 }
 0x28b   : > { %v3664_v27 = vadd.f32 %v3663_v5, %v3495_v34  ;;  %v3255_v34 = vsub.f32 %v2743_v44, %v2999_v55  ;;  %v2748_v5 = vld [vmem:[%s4446_s30 + $0x610] sm:$0xff]  ;;  %v3510_v35 = vmul.f32 %v3253_v52, %v3253_v52  ;;  %v3258_v23 = vsub.f32 %v2746_v17, %v3002_v41  ;;  %v3009_v44 = vld [vmem:[%s4451_s7 + $0x638] sm:$0xff]  ;;  %v2759_v41 = vld [vmem:[%s4446_s30 + $0x668] sm:$0xff] }
 0x28c   : > { %v3883_v57 = vadd.f32 %v3882_v30, %v3881_v20  ;;  %v3004_v30 = vld [vmem:[%s4451_s7 + $0x610] sm:$0xff]  ;;  %v3896_v48 = vsel %vm3712_vm3, %v3508_v4, 0.0  ;;  %v3513_v12 = vmul.f32 %v3256_v43, %v3256_v43 }
 0x28d   : > { %v3665_v59 = vadd.f32 %v3664_v27, %v3497_v56  ;;  %v3257_v56 = vsub.f32 %v2745_v16, %v3001_v28  ;;  %v2750_v27 = vld [vmem:[%s4446_s30 + $0x620] sm:$0xff]  ;;  %v3512_v0 = vmul.f32 %v3255_v34, %v3255_v34  ;;  %v3260_v62 = vsub.f32 %v2748_v5, %v3004_v30  ;;  %v3011_v16 = vld [vmem:[%s4451_s7 + $0x648] sm:$0xff]  ;;  %v2761_v30 = vld [vmem:[%s4446_s30 + $0x678] sm:$0xff] }
 0x28e   : > { %v3885_v15 = vadd.f32 %v3884_v14, %v3883_v57  ;;  %v3006_v14 = vld [vmem:[%s4451_s7 + $0x620] sm:$0xff]  ;;  %v3898_v63 = vsel %vm3712_vm3, %v3510_v35, 0.0  ;;  %v3515_v29 = vmul.f32 %v3258_v23, %v3258_v23 }
 0x28f   : > { %v3666_v51 = vadd.f32 %v3665_v59, %v3499_v37  ;;  %v3259_v37 = vsub.f32 %v2747_v53, %v3003_v39  ;;  %v2752_v59 = vld [vmem:[%s4446_s30 + $0x630] sm:$0xff]  ;;  %v3514_v8 = vmul.f32 %v3257_v56, %v3257_v56  ;;  %v3262_v55 = vsub.f32 %v2750_v27, %v3006_v14  ;;  %v3013_v53 = vld [vmem:[%s4451_s7 + $0x658] sm:$0xff]  ;;  %v2763_v14 = vld [vmem:[%s4446_s30 + $0x688] sm:$0xff] }
 0x290   : > { %v3887_v33 = vadd.f32 %v3886_v36, %v3885_v15  ;;  %v3008_v36 = vld [vmem:[%s4451_s7 + $0x630] sm:$0xff]  ;;  %v3900_v60 = vsel %vm3712_vm3, %v3512_v0, 0.0  ;;  %v3517_v19 = vmul.f32 %v3260_v62, %v3260_v62 }
 0x291   : > { %v3667_v26 = vadd.f32 %v3666_v51, %v3501_v38  ;;  %v3261_v38 = vsub.f32 %v2749_v31, %v3005_v2  ;;  %v2754_v51 = vld [vmem:[%s4446_s30 + $0x640] sm:$0xff]  ;;  %v3516_v52 = vmul.f32 %v3259_v37, %v3259_v37  ;;  %v3264_v28 = vsub.f32 %v2752_v59, %v3008_v36  ;;  %v3015_v31 = vld [vmem:[%s4451_s7 + $0x668] sm:$0xff]  ;;  %v2765_v36 = vld [vmem:[%s4446_s30 + $0x698] sm:$0xff] }
 0x292   : > { %v3889_v46 = vadd.f32 %v3888_v25, %v3887_v33  ;;  %v3010_v25 = vld [vmem:[%s4451_s7 + $0x640] sm:$0xff]  ;;  %v3902_v17 = vsel %vm3712_vm3, %v3514_v8, 0.0  ;;  %v3519_v43 = vmul.f32 %v3262_v55, %v3262_v55 }
 0x293   : > { %v3668_v9 = vadd.f32 %v3667_v26, %v3503_v10  ;;  %v3263_v10 = vsub.f32 %v2751_v6, %v3007_v32  ;;  %v2756_v26 = vld [vmem:[%s4446_s30 + $0x650] sm:$0xff]  ;;  %v3518_v34 = vmul.f32 %v3261_v38, %v3261_v38  ;;  %v3266_v39 = vsub.f32 %v2754_v51, %v3010_v25  ;;  %v3017_v6 = vld [vmem:[%s4451_s7 + $0x678] sm:$0xff]  ;;  %v2767_v25 = vld [vmem:[%s4446_s30 + $0x6a8] sm:$0xff] }
 0x294   : > { %v3891_v3 = vadd.f32 %v3890_v61, %v3889_v46  ;;  %v3012_v61 = vld [vmem:[%s4451_s7 + $0x650] sm:$0xff]  ;;  %v3904_v5 = vsel %vm3712_vm3, %v3516_v52, 0.0  ;;  %v3521_v23 = vmul.f32 %v3264_v28, %v3264_v28 }
 0x295   : > { %v3669_v20 = vadd.f32 %v3668_v9, %v3505_v47  ;;  %v3265_v47 = vsub.f32 %v2753_v18, %v3009_v44  ;;  %v2758_v9 = vld [vmem:[%s4446_s30 + $0x660] sm:$0xff]  ;;  %v3520_v56 = vmul.f32 %v3263_v10, %v3263_v10  ;;  %v3268_v2 = vsub.f32 %v2756_v26, %v3012_v61  ;;  %v3019_v18 = vld [vmem:[%s4451_s7 + $0x688] sm:$0xff]  ;;  %v2769_v61 = vld [vmem:[%s4446_s30 + $0x6b8] sm:$0xff] }
 0x296   : > { %v3893_v24 = vadd.f32 %v3892_v22, %v3891_v3  ;;  %v3014_v22 = vld [vmem:[%s4451_s7 + $0x660] sm:$0xff]  ;;  %v3906_v27 = vsel %vm3712_vm3, %v3518_v34, 0.0  ;;  %v3523_v62 = vmul.f32 %v3266_v39, %v3266_v39 }
 0x297   : > { %v3670_v57 = vadd.f32 %v3669_v20, %v3507_v21  ;;  %v3267_v21 = vsub.f32 %v2755_v40, %v3011_v16  ;;  %v2760_v20 = vld [vmem:[%s4446_s30 + $0x670] sm:$0xff]  ;;  %v3522_v37 = vmul.f32 %v3265_v47, %v3265_v47  ;;  %v3270_v32 = vsub.f32 %v2758_v9, %v3014_v22  ;;  %v3021_v40 = vld [vmem:[%s4451_s7 + $0x698] sm:$0xff]  ;;  %v2771_v22 = vld [vmem:[%s4446_s30 + $0x6c8] sm:$0xff] }
 0x298   : > { %v3895_v13 = vadd.f32 %v3894_v45, %v3893_v24  ;;  %v3016_v45 = vld [vmem:[%s4451_s7 + $0x670] sm:$0xff]  ;;  %v3908_v59 = vsel %vm3712_vm3, %v3520_v56, 0.0  ;;  %v3525_v55 = vmul.f32 %v3268_v2, %v3268_v2 }
 0x299   : > { %v3671_v15 = vadd.f32 %v3670_v57, %v3509_v54  ;;  %v3269_v54 = vsub.f32 %v2757_v1, %v3013_v53  ;;  %v2762_v57 = vld [vmem:[%s4446_s30 + $0x680] sm:$0xff]  ;;  %v3524_v38 = vmul.f32 %v3267_v21, %v3267_v21  ;;  %v3272_v44 = vsub.f32 %v2760_v20, %v3016_v45  ;;  %v3023_v1 = vld [vmem:[%s4451_s7 + $0x6a8] sm:$0xff]  ;;  %v2773_v45 = vld [vmem:[%s4446_s30 + $0x6d8] sm:$0xff] }
 0x29a   : > { %v3897_v7 = vadd.f32 %v3896_v48, %v3895_v13  ;;  %v3018_v48 = vld [vmem:[%s4451_s7 + $0x680] sm:$0xff]  ;;  %v3910_v51 = vsel %vm3712_vm3, %v3522_v37, 0.0  ;;  %v3527_v28 = vmul.f32 %v3270_v32, %v3270_v32 }
 0x29b   : > { %v3672_v33 = vadd.f32 %v3671_v15, %v3511_v11  ;;  %v3271_v11 = vsub.f32 %v2759_v41, %v3015_v31  ;;  %v2764_v15 = vld [vmem:[%s4446_s30 + $0x690] sm:$0xff]  ;;  %v3526_v10 = vmul.f32 %v3269_v54, %v3269_v54  ;;  %v3274_v16 = vsub.f32 %v2762_v57, %v3018_v48  ;;  %v3025_v41 = vld [vmem:[%s4451_s7 + $0x6b8] sm:$0xff]  ;;  %v2775_v48 = vld [vmem:[%s4446_s30 + $0x6e8] sm:$0xff] }
 0x29c   : > { %v3899_v50 = vadd.f32 %v3898_v63, %v3897_v7  ;;  %v3020_v63 = vld [vmem:[%s4451_s7 + $0x690] sm:$0xff]  ;;  %v3912_v26 = vsel %vm3712_vm3, %v3524_v38, 0.0  ;;  %v3529_v39 = vmul.f32 %v3272_v44, %v3272_v44 }
 0x29d   : > { %v3673_v46 = vadd.f32 %v3672_v33, %v3513_v12  ;;  %v3273_v12 = vsub.f32 %v2761_v30, %v3017_v6  ;;  %v2766_v33 = vld [vmem:[%s4446_s30 + $0x6a0] sm:$0xff]  ;;  %v3528_v47 = vmul.f32 %v3271_v11, %v3271_v11  ;;  %v3276_v53 = vsub.f32 %v2764_v15, %v3020_v63  ;;  %v3027_v30 = vld [vmem:[%s4451_s7 + $0x6c8] sm:$0xff]  ;;  %v2777_v63 = vld [vmem:[%s4446_s30 + $0x6f8] sm:$0xff] }
 0x29e   : > { %v3901_v4 = vadd.f32 %v3900_v60, %v3899_v50  ;;  %v3022_v60 = vld [vmem:[%s4451_s7 + $0x6a0] sm:$0xff]  ;;  %v3914_v9 = vsel %vm3712_vm3, %v3526_v10, 0.0  ;;  %v3531_v2 = vmul.f32 %v3274_v16, %v3274_v16 }
 0x29f   : > { %v3674_v3 = vadd.f32 %v3673_v46, %v3515_v29  ;;  %v3275_v29 = vsub.f32 %v2763_v14, %v3019_v18  ;;  %v2768_v46 = vld [vmem:[%s4446_s30 + $0x6b0] sm:$0xff]  ;;  %v3530_v21 = vmul.f32 %v3273_v12, %v3273_v12  ;;  %v3278_v31 = vsub.f32 %v2766_v33, %v3022_v60  ;;  %v3029_v14 = vld [vmem:[%s4451_s7 + $0x6d8] sm:$0xff]  ;;  %v2779_v60 = vld [vmem:[%s4446_s30 + $0x708] sm:$0xff] }
 0x2a0   : > { %v3903_v35 = vadd.f32 %v3902_v17, %v3901_v4  ;;  %v3024_v17 = vld [vmem:[%s4451_s7 + $0x6b0] sm:$0xff]  ;;  %v3916_v20 = vsel %vm3712_vm3, %v3528_v47, 0.0  ;;  %v3533_v32 = vmul.f32 %v3276_v53, %v3276_v53 }
 0x2a1   : > { %v3675_v24 = vadd.f32 %v3674_v3, %v3517_v19  ;;  %v3277_v19 = vsub.f32 %v2765_v36, %v3021_v40  ;;  %v2770_v3 = vld [vmem:[%s4446_s30 + $0x6c0] sm:$0xff]  ;;  %v3532_v54 = vmul.f32 %v3275_v29, %v3275_v29  ;;  %v3280_v6 = vsub.f32 %v2768_v46, %v3024_v17  ;;  %v3031_v36 = vld [vmem:[%s4451_s7 + $0x6e8] sm:$0xff]  ;;  %v2781_v17 = vld [vmem:[%s4446_s30 + $0x718] sm:$0xff] }
 0x2a2   : > { %v3905_v0 = vadd.f32 %v3904_v5, %v3903_v35  ;;  %v3026_v5 = vld [vmem:[%s4451_s7 + $0x6c0] sm:$0xff]  ;;  %v3918_v57 = vsel %vm3712_vm3, %v3530_v21, 0.0  ;;  %v3535_v44 = vmul.f32 %v3278_v31, %v3278_v31 }
 0x2a3   : > { %v3676_v13 = vadd.f32 %v3675_v24, %v3519_v43  ;;  %v3279_v43 = vsub.f32 %v2767_v25, %v3023_v1  ;;  %v2772_v24 = vld [vmem:[%s4446_s30 + $0x6d0] sm:$0xff]  ;;  %v3534_v11 = vmul.f32 %v3277_v19, %v3277_v19  ;;  %v3282_v18 = vsub.f32 %v2770_v3, %v3026_v5  ;;  %v3033_v25 = vld [vmem:[%s4451_s7 + $0x6f8] sm:$0xff]  ;;  %v2783_v5 = vld [vmem:[%s4446_s30 + $0x728] sm:$0xff] }
 0x2a4   : > { %v3907_v8 = vadd.f32 %v3906_v27, %v3905_v0  ;;  %v3028_v27 = vld [vmem:[%s4451_s7 + $0x6d0] sm:$0xff]  ;;  %v3920_v15 = vsel %vm3712_vm3, %v3532_v54, 0.0  ;;  %v3537_v16 = vmul.f32 %v3280_v6, %v3280_v6 }
 0x2a5   : > { %v3677_v7 = vadd.f32 %v3676_v13, %v3521_v23  ;;  %v3281_v23 = vsub.f32 %v2769_v61, %v3025_v41  ;;  %v2774_v13 = vld [vmem:[%s4446_s30 + $0x6e0] sm:$0xff]  ;;  %v3536_v12 = vmul.f32 %v3279_v43, %v3279_v43  ;;  %v3284_v40 = vsub.f32 %v2772_v24, %v3028_v27  ;;  %v3035_v61 = vld [vmem:[%s4451_s7 + $0x708] sm:$0xff]  ;;  %v2785_v27 = vld [vmem:[%s4446_s30 + $0x738] sm:$0xff] }
 0x2a6   : > { %v3909_v52 = vadd.f32 %v3908_v59, %v3907_v8  ;;  %v3030_v59 = vld [vmem:[%s4451_s7 + $0x6e0] sm:$0xff]  ;;  %v3922_v33 = vsel %vm3712_vm3, %v3534_v11, 0.0  ;;  %v3539_v53 = vmul.f32 %v3282_v18, %v3282_v18 }
 0x2a7   : > { %v3678_v50 = vadd.f32 %v3677_v7, %v3523_v62  ;;  %v3283_v62 = vsub.f32 %v2771_v22, %v3027_v30  ;;  %v2776_v7 = vld [vmem:[%s4446_s30 + $0x6f0] sm:$0xff]  ;;  %v3538_v29 = vmul.f32 %v3281_v23, %v3281_v23  ;;  %v3286_v1 = vsub.f32 %v2774_v13, %v3030_v59  ;;  %v3037_v22 = vld [vmem:[%s4451_s7 + $0x718] sm:$0xff]  ;;  %v2787_v59 = vld [vmem:[%s4446_s30 + $0x748] sm:$0xff] }
 0x2a8   : > { %v3911_v34 = vadd.f32 %v3910_v51, %v3909_v52  ;;  %v3032_v51 = vld [vmem:[%s4451_s7 + $0x6f0] sm:$0xff]  ;;  %v3924_v46 = vsel %vm3712_vm3, %v3536_v12, 0.0  ;;  %v3541_v31 = vmul.f32 %v3284_v40, %v3284_v40 }
 0x2a9   : > { %v3679_v4 = vadd.f32 %v3678_v50, %v3525_v55  ;;  %v3285_v55 = vsub.f32 %v2773_v45, %v3029_v14  ;;  %v2778_v50 = vld [vmem:[%s4446_s30 + $0x700] sm:$0xff]  ;;  %v3540_v19 = vmul.f32 %v3283_v62, %v3283_v62  ;;  %v3288_v41 = vsub.f32 %v2776_v7, %v3032_v51  ;;  %v3039_v45 = vld [vmem:[%s4451_s7 + $0x728] sm:$0xff]  ;;  %v2789_v51 = vld [vmem:[%s4446_s30 + $0x758] sm:$0xff] }
 0x2aa   : > { %v3913_v56 = vadd.f32 %v3912_v26, %v3911_v34  ;;  %v3034_v26 = vld [vmem:[%s4451_s7 + $0x700] sm:$0xff]  ;;  %v3926_v3 = vsel %vm3712_vm3, %v3538_v29, 0.0  ;;  %v3543_v6 = vmul.f32 %v3286_v1, %v3286_v1 }
 0x2ab   : > { %v3680_v35 = vadd.f32 %v3679_v4, %v3527_v28  ;;  %v3287_v28 = vsub.f32 %v2775_v48, %v3031_v36  ;;  %v2780_v4 = vld [vmem:[%s4446_s30 + $0x710] sm:$0xff]  ;;  %v3542_v43 = vmul.f32 %v3285_v55, %v3285_v55  ;;  %v3290_v30 = vsub.f32 %v2778_v50, %v3034_v26  ;;  %v3041_v48 = vld [vmem:[%s4451_s7 + $0x738] sm:$0xff]  ;;  %v2791_v26 = vld [vmem:[%s4446_s30 + $0x768] sm:$0xff] }
 0x2ac   : > { %v3915_v37 = vadd.f32 %v3914_v9, %v3913_v56  ;;  %v3036_v9 = vld [vmem:[%s4451_s7 + $0x710] sm:$0xff]  ;;  %v3928_v24 = vsel %vm3712_vm3, %v3540_v19, 0.0  ;;  %v3545_v18 = vmul.f32 %v3288_v41, %v3288_v41 }
 0x2ad   : > { %v3681_v0 = vadd.f32 %v3680_v35, %v3529_v39  ;;  %v3289_v39 = vsub.f32 %v2777_v63, %v3033_v25  ;;  %v2782_v35 = vld [vmem:[%s4446_s30 + $0x720] sm:$0xff]  ;;  %v3544_v23 = vmul.f32 %v3287_v28, %v3287_v28  ;;  %v3292_v14 = vsub.f32 %v2780_v4, %v3036_v9  ;;  %v3043_v63 = vld [vmem:[%s4451_s7 + $0x748] sm:$0xff]  ;;  %v2793_v9 = vld [vmem:[%s4446_s30 + $0x778] sm:$0xff] }
 0x2ae   : > { %v3917_v38 = vadd.f32 %v3916_v20, %v3915_v37  ;;  %v3038_v20 = vld [vmem:[%s4451_s7 + $0x720] sm:$0xff]  ;;  %v3930_v13 = vsel %vm3712_vm3, %v3542_v43, 0.0  ;;  %v3547_v40 = vmul.f32 %v3290_v30, %v3290_v30 }
 0x2af   : > { %v3682_v8 = vadd.f32 %v3681_v0, %v3531_v2  ;;  %v3291_v2 = vsub.f32 %v2779_v60, %v3035_v61  ;;  %v2784_v0 = vld [vmem:[%s4446_s30 + $0x730] sm:$0xff]  ;;  %v3546_v62 = vmul.f32 %v3289_v39, %v3289_v39  ;;  %v3294_v36 = vsub.f32 %v2782_v35, %v3038_v20  ;;  %v3045_v60 = vld [vmem:[%s4451_s7 + $0x758] sm:$0xff]  ;;  %v2795_v20 = vld [vmem:[%s4446_s30 + $0x788] sm:$0xff] }
 0x2b0   : > { %v3919_v10 = vadd.f32 %v3918_v57, %v3917_v38  ;;  %v3040_v57 = vld [vmem:[%s4451_s7 + $0x730] sm:$0xff]  ;;  %v3932_v7 = vsel %vm3712_vm3, %v3544_v23, 0.0  ;;  %v3549_v1 = vmul.f32 %v3292_v14, %v3292_v14 }
 0x2b1   : > { %v3683_v52 = vadd.f32 %v3682_v8, %v3533_v32  ;;  %v3293_v32 = vsub.f32 %v2781_v17, %v3037_v22  ;;  %v2786_v8 = vld [vmem:[%s4446_s30 + $0x740] sm:$0xff]  ;;  %v3548_v55 = vmul.f32 %v3291_v2, %v3291_v2  ;;  %v3296_v25 = vsub.f32 %v2784_v0, %v3040_v57  ;;  %v3047_v17 = vld [vmem:[%s4451_s7 + $0x768] sm:$0xff]  ;;  %v2797_v57 = vld [vmem:[%s4446_s30 + $0x798] sm:$0xff] }
 0x2b2   : > { %v3921_v47 = vadd.f32 %v3920_v15, %v3919_v10  ;;  %v3042_v15 = vld [vmem:[%s4451_s7 + $0x740] sm:$0xff]  ;;  %v3934_v50 = vsel %vm3712_vm3, %v3546_v62, 0.0  ;;  %v3551_v41 = vmul.f32 %v3294_v36, %v3294_v36 }
 0x2b3   : > { %v3684_v34 = vadd.f32 %v3683_v52, %v3535_v44  ;;  %v3295_v44 = vsub.f32 %v2783_v5, %v3039_v45  ;;  %v2788_v52 = vld [vmem:[%s4446_s30 + $0x750] sm:$0xff]  ;;  %v3550_v28 = vmul.f32 %v3293_v32, %v3293_v32  ;;  %v3298_v61 = vsub.f32 %v2786_v8, %v3042_v15  ;;  %v3049_v5 = vld [vmem:[%s4451_s7 + $0x778] sm:$0xff]  ;;  %v2799_v15 = vld [vmem:[%s4446_s30 + $0x7a8] sm:$0xff] }
 0x2b4   : > { %v3923_v21 = vadd.f32 %v3922_v33, %v3921_v47  ;;  %v3044_v33 = vld [vmem:[%s4451_s7 + $0x750] sm:$0xff]  ;;  %v3936_v4 = vsel %vm3712_vm3, %v3548_v55, 0.0  ;;  %v3553_v30 = vmul.f32 %v3296_v25, %v3296_v25 }
 0x2b5   : > { %v3685_v56 = vadd.f32 %v3684_v34, %v3537_v16  ;;  %v3297_v16 = vsub.f32 %v2785_v27, %v3041_v48  ;;  %v2790_v34 = vld [vmem:[%s4446_s30 + $0x760] sm:$0xff]  ;;  %v3552_v39 = vmul.f32 %v3295_v44, %v3295_v44  ;;  %v3300_v22 = vsub.f32 %v2788_v52, %v3044_v33  ;;  %v3051_v27 = vld [vmem:[%s4451_s7 + $0x788] sm:$0xff]  ;;  %v2801_v33 = vld [vmem:[%s4446_s30 + $0x7b8] sm:$0xff] }
 0x2b6   : > { %v3925_v54 = vadd.f32 %v3924_v46, %v3923_v21  ;;  %v3046_v46 = vld [vmem:[%s4451_s7 + $0x760] sm:$0xff]  ;;  %v3938_v35 = vsel %vm3712_vm3, %v3550_v28, 0.0  ;;  %v3555_v14 = vmul.f32 %v3298_v61, %v3298_v61 }
 0x2b7   : > { %v3686_v37 = vadd.f32 %v3685_v56, %v3539_v53  ;;  %v3299_v53 = vsub.f32 %v2787_v59, %v3043_v63  ;;  %v2792_v56 = vld [vmem:[%s4446_s30 + $0x770] sm:$0xff]  ;;  %v3554_v2 = vmul.f32 %v3297_v16, %v3297_v16  ;;  %v3302_v45 = vsub.f32 %v2790_v34, %v3046_v46  ;;  %v3053_v59 = vld [vmem:[%s4451_s7 + $0x798] sm:$0xff]  ;;  %v2803_v46 = vld [vmem:[%s4446_s30 + $0x7c8] sm:$0xff] }
 0x2b8   : > { %v3927_v11 = vadd.f32 %v3926_v3, %v3925_v54  ;;  %v3048_v3 = vld [vmem:[%s4451_s7 + $0x770] sm:$0xff]  ;;  %v3940_v0 = vsel %vm3712_vm3, %v3552_v39, 0.0  ;;  %v3557_v36 = vmul.f32 %v3300_v22, %v3300_v22 }
 0x2b9   : > { %v3687_v38 = vadd.f32 %v3686_v37, %v3541_v31  ;;  %v3301_v31 = vsub.f32 %v2789_v51, %v3045_v60  ;;  %v2794_v37 = vld [vmem:[%s4446_s30 + $0x780] sm:$0xff]  ;;  %v3556_v32 = vmul.f32 %v3299_v53, %v3299_v53  ;;  %v3304_v48 = vsub.f32 %v2792_v56, %v3048_v3  ;;  %v3055_v51 = vld [vmem:[%s4451_s7 + $0x7a8] sm:$0xff]  ;;  %v2805_v3 = vld [vmem:[%s4446_s30 + $0x7d8] sm:$0xff] }
 0x2ba   : > { %v3929_v12 = vadd.f32 %v3928_v24, %v3927_v11  ;;  %v3050_v24 = vld [vmem:[%s4451_s7 + $0x780] sm:$0xff]  ;;  %v3942_v8 = vsel %vm3712_vm3, %v3554_v2, 0.0  ;;  %v3559_v25 = vmul.f32 %v3302_v45, %v3302_v45 }
 0x2bb   : > { %v3688_v10 = vadd.f32 %v3687_v38, %v3543_v6  ;;  %v3303_v6 = vsub.f32 %v2791_v26, %v3047_v17  ;;  %v2796_v38 = vld [vmem:[%s4446_s30 + $0x790] sm:$0xff]  ;;  %v3558_v44 = vmul.f32 %v3301_v31, %v3301_v31  ;;  %v3306_v63 = vsub.f32 %v2794_v37, %v3050_v24  ;;  %v3057_v26 = vld [vmem:[%s4451_s7 + $0x7b8] sm:$0xff]  ;;  %v2807_v24 = vld [vmem:[%s4446_s30 + $0x7e8] sm:$0xff] }
 0x2bc   : > { %v3931_v29 = vadd.f32 %v3930_v13, %v3929_v12  ;;  %v3052_v13 = vld [vmem:[%s4451_s7 + $0x790] sm:$0xff]  ;;  %v3944_v52 = vsel %vm3712_vm3, %v3556_v32, 0.0  ;;  %v3561_v61 = vmul.f32 %v3304_v48, %v3304_v48 }
 0x2bd   : > { %v3689_v47 = vadd.f32 %v3688_v10, %v3545_v18  ;;  %v3305_v18 = vsub.f32 %v2793_v9, %v3049_v5  ;;  %v2798_v10 = vld [vmem:[%s4446_s30 + $0x7a0] sm:$0xff]  ;;  %v3560_v16 = vmul.f32 %v3303_v6, %v3303_v6  ;;  %v3308_v60 = vsub.f32 %v2796_v38, %v3052_v13  ;;  %v3059_v9 = vld [vmem:[%s4451_s7 + $0x7c8] sm:$0xff]  ;;  %v2809_v13 = vld [vmem:[%s4446_s30 + $0x7f8] sm:$0xff] }
 0x2be   : > { %v3933_v19 = vadd.f32 %v3932_v7, %v3931_v29  ;;  %v3054_v7 = vld [vmem:[%s4451_s7 + $0x7a0] sm:$0xff]  ;;  %v3946_v34 = vsel %vm3712_vm3, %v3558_v44, 0.0  ;;  %v3563_v22 = vmul.f32 %v3306_v63, %v3306_v63 }
 0x2bf   : > { %v3690_v21 = vadd.f32 %v3689_v47, %v3547_v40  ;;  %v3307_v40 = vsub.f32 %v2795_v20, %v3051_v27  ;;  %v2800_v47 = vld [vmem:[%s4446_s30 + $0x7b0] sm:$0xff]  ;;  %v3562_v53 = vmul.f32 %v3305_v18, %v3305_v18  ;;  %v3310_v17 = vsub.f32 %v2798_v10, %v3054_v7  ;;  %v3061_v20 = vld [vmem:[%s4451_s7 + $0x7d8] sm:$0xff] }
 0x2c0   : > { %v3935_v43 = vadd.f32 %v3934_v50, %v3933_v19  ;;  %v3056_v50 = vld [vmem:[%s4451_s7 + $0x7b0] sm:$0xff]  ;;  %v3948_v56 = vsel %vm3712_vm3, %v3560_v16, 0.0  ;;  %v3565_v45 = vmul.f32 %v3308_v60, %v3308_v60 }
 0x2c1   : > { %v3691_v54 = vadd.f32 %v3690_v21, %v3549_v1  ;;  %v3309_v1 = vsub.f32 %v2797_v57, %v3053_v59  ;;  %v2802_v21 = vld [vmem:[%s4446_s30 + $0x7c0] sm:$0xff]  ;;  %v3564_v31 = vmul.f32 %v3307_v40, %v3307_v40  ;;  %v3312_v5 = vsub.f32 %v2800_v47, %v3056_v50  ;;  %v3063_v57 = vld [vmem:[%s4451_s7 + $0x7e8] sm:$0xff] }
 0x2c2   : > { %v3937_v23 = vadd.f32 %v3936_v4, %v3935_v43  ;;  %v3058_v4 = vld [vmem:[%s4451_s7 + $0x7c0] sm:$0xff]  ;;  %v3950_v37 = vsel %vm3712_vm3, %v3562_v53, 0.0  ;;  %v3567_v48 = vmul.f32 %v3310_v17, %v3310_v17 }
 0x2c3   : > { %v3692_v11 = vadd.f32 %v3691_v54, %v3551_v41  ;;  %v3311_v41 = vsub.f32 %v2799_v15, %v3055_v51  ;;  %v2804_v54 = vld [vmem:[%s4446_s30 + $0x7d0] sm:$0xff]  ;;  %v3566_v6 = vmul.f32 %v3309_v1, %v3309_v1  ;;  %v3314_v27 = vsub.f32 %v2802_v21, %v3058_v4  ;;  %v3065_v15 = vld [vmem:[%s4451_s7 + $0x7f8] sm:$0xff] }
 0x2c4   : > { %v3939_v62 = vadd.f32 %v3938_v35, %v3937_v23  ;;  %v3060_v35 = vld [vmem:[%s4451_s7 + $0x7d0] sm:$0xff]  ;;  %v3952_v38 = vsel %vm3712_vm3, %v3564_v31, 0.0  ;;  %v3569_v63 = vmul.f32 %v3312_v5, %v3312_v5  ;;  %v3319_v51 = vsub.f32 %v2807_v24, %v3063_v57 }
 0x2c5   : > { %v3693_v12 = vadd.f32 %v3692_v11, %v3553_v30  ;;  %v3313_v30 = vsub.f32 %v2801_v33, %v3057_v26  ;;  %v2806_v11 = vld [vmem:[%s4446_s30 + $0x7e0] sm:$0xff]  ;;  %v3568_v18 = vmul.f32 %v3311_v41, %v3311_v41  ;;  %v3316_v59 = vsub.f32 %v2804_v54, %v3060_v35 }
 0x2c6   : > { %v3941_v55 = vadd.f32 %v3940_v0, %v3939_v62  ;;  %v3062_v0 = vld [vmem:[%s4451_s7 + $0x7e0] sm:$0xff]  ;;  %v3954_v10 = vsel %vm3712_vm3, %v3566_v6, 0.0  ;;  %v3571_v16 = vmul.f32 %v3314_v27, %v3314_v27  ;;  %v3321_v1 = vsub.f32 %v2809_v13, %v3065_v15 }
 0x2c7   : > { %v3694_v29 = vadd.f32 %v3693_v12, %v3555_v14  ;;  %v3315_v14 = vsub.f32 %v2803_v46, %v3059_v9  ;;  %v2808_v12 = vld [vmem:[%s4446_s30 + $0x7f0] sm:$0xff]  ;;  %v3570_v40 = vmul.f32 %v3313_v30, %v3313_v30  ;;  %v3318_v7 = vsub.f32 %v2806_v11, %v3062_v0 }
 0x2c8   : > { %v3943_v28 = vadd.f32 %v3942_v8, %v3941_v55  ;;  %v3064_v8 = vld [vmem:[%s4451_s7 + $0x7f0] sm:$0xff]  ;;  %v3956_v33 = vsel %vm3712_vm3, %v3568_v18, 0.0  ;;  %v3573_v47 = vmul.f32 %v3316_v59, %v3316_v59  ;;  %v3578_v21 = vmul.f32 %v3321_v1, %v3321_v1 }
 0x2c9   : > { %v3695_v19 = vadd.f32 %v3694_v29, %v3557_v36  ;;  %v3317_v36 = vsub.f32 %v2805_v3, %v3061_v20  ;;  %v3572_v29 = vmul.f32 %v3315_v14, %v3315_v14  ;;  %v3320_v60 = vsub.f32 %v2808_v12, %v3064_v8 }
 0x2ca   : > { %v3945_v39 = vadd.f32 %v3944_v52, %v3943_v28  ;;  %v3966_v5 = vsel %vm3712_vm3, %v3578_v21, 0.0 }
 0x2cb   : > { %v3696_v43 = vadd.f32 %v3695_v19, %v3559_v25  ;;  %v3574_v50 = vmul.f32 %v3317_v36, %v3317_v36  ;;  %v3575_v19 = vmul.f32 %v3318_v7, %v3318_v7  ;;  %v3960_v17 = vsel %vm3712_vm3, %v3572_v29, 0.0 }
 0x2cc   : > { %v3947_v2 = vadd.f32 %v3946_v34, %v3945_v39  ;;  %v3576_v34 = vmul.f32 %v3319_v51, %v3319_v51  ;;  %v3577_v39 = vmul.f32 %v3320_v60, %v3320_v60 }
 0x2cd   : > { %v3697_v23 = vadd.f32 %v3696_v43, %v3561_v61  ;;  %v3958_v61 = vsel %vm3712_vm3, %v3570_v40, 0.0  ;;  %v3962_v9 = vsel %vm3712_vm3, %v3574_v50, 0.0 }
 0x2ce   : > { %v3949_v32 = vadd.f32 %v3948_v56, %v3947_v2  ;;  %v3964_v43 = vsel %vm3712_vm3, %v3576_v34, 0.0 }
 0x2cf   : > { %v3698_v62 = vadd.f32 %v3697_v23, %v3563_v22 }
 0x2d0   : > { %v3951_v44 = vadd.f32 %v3950_v37, %v3949_v32 }
 0x2d1   : > { %v3699_v55 = vadd.f32 %v3698_v62, %v3565_v45 }
 0x2d2   : > { %v3953_v25 = vadd.f32 %v3952_v38, %v3951_v44 }
 0x2d3   : > { %v3700_v52 = vadd.f32 %v3699_v55, %v3567_v48  ;;  %v3322_v48 = vld [vmem:[#allocation3] sm:$0x3] }
 0x2d4   : > { %v3955_v28 = vadd.f32 %v3954_v10, %v3953_v25 }
 0x2d5   : > { %v3701_v26 = vadd.f32 %v3700_v52, %v3569_v63 }
 0x2d6   : > { %v3957_v53 = vadd.f32 %v3956_v33, %v3955_v28 }
 0x2d7   : > { %v3702_v46 = vadd.f32 %v3701_v26, %v3571_v16 }
 0x2d8   : > { %v3959_v41 = vadd.f32 %v3958_v61, %v3957_v53 }
 0x2d9   : > { %v3703_v4 = vadd.f32 %v3702_v46, %v3573_v47 }
 0x2da   : > { %v3961_v22 = vadd.f32 %v3960_v17, %v3959_v41 }
 0x2db   : > { %v3704_v31 = vadd.f32 %v3703_v4, %v3575_v19 }
 0x2dc   : > { %v3963_v56 = vadd.f32 %v3962_v9, %v3961_v22 }
 0x2dd   : > { %v3705_v3 = vadd.f32 %v3704_v31, %v3577_v39 }
 0x2de   : > { %v3965_v30 = vadd.f32 %v3964_v43, %v3963_v56 }
 0x2df   : > { %v3706_v2 = vrot.slane %v3705_v3, 4 }
 0x2e0   : > { %v3967_v54 = vadd.f32 %v3966_v5, %v3965_v30 }
 0x2e1   : > { %v3707_v35 = vadd.f32 %v3706_v2, %v3705_v3 }
 0x2e2   : > { %v3968_v20 = vrot.slane %v3967_v54, 4 }
 0x2e3   : > { %v3708_v45 = vrot.slane %v3707_v35, 2 }
 0x2e4   : > { %v3969_v6 = vadd.f32 %v3968_v20, %v3967_v54 }
 0x2e5   : > { %v3709_v23 = vadd.f32 %v3708_v45, %v3707_v35 }
 0x2e6   : > { %v3970_v37 = vrot.slane %v3969_v6, 2 }
 0x2e7   : > { %v3710_v24 = vrot.slane %v3709_v23, 1 }
 0x2e8   : > { %v3971_v27 = vadd.f32 %v3970_v37, %v3969_v6 }
 0x2e9   : > { %v3711_v14 = vadd.f32 %v3710_v24, %v3709_v23 }
 0x2ea   : > { %v3972_v32 = vrot.slane %v3971_v27, 1 }
 0x2ec   : > { %v3973_v11 = vadd.f32 %v3972_v32, %v3971_v27 }
 0x2ee   : > { %v3976_v0 = vcombine.low %v3711_v14, %v3973_v11 }
 0x2f0   : > { %v3983_v57 = vrot.slane %v3976_v0, %v7263_v49 }
 0x2f2   : > { %v3990_v18 = vrot.slane %v3983_v57, %v7263_v49  ;;  %3999 = sbr.rel (%p4285_p8) target bundleno = 980 (0x3d4), region = 44 }
 0x2f4   : > { %v3992_v62 = vadd.f32 %v3990_v18, %v3322_v48 }
 0x2f6   : > { %3995 = vst.msk [vmem:[#allocation3] sm:$0x3] %vm3993_vm5, %v3992_v62 }
 0x2f7   : > { %v4000_v38 = vld [vmem:[#allocation2] sm:$0x7]  ;;  %v7904_v13 = vand.u32 127, %v2528_v42  ;;  %v4012_v59 = vsub.s32 0, %v7242_v58  ;;  %v4016_v36 = vsub.s32 1, %v7242_v58  ;;  %vm4028_vm6 = vcmask 1040384  }
 0x2f8   : > { %v4020_v44 = vsub.s32 2, %v7242_v58  ;;  %vm4032_vm7 = vcmask 475136   ;;  %vm4108_vm14 = vcmask 221184  }
 0x2f9   : > { %vm4006_vm8 = vcmp.lt.s32.totalorder %v7904_v13, 3  ;;  %v4013_v12 = vrot.slane %v4000_v38, %v4012_v59  ;;  %v4004_v8 = vadd.s32 128, %v7904_v13  ;;  %v4017_v15 = vrot.slane %v4000_v38, %v4016_v36 }
 0x2fa   : > { %v4021_v63 = vrot.slane %v4000_v38, %v4020_v44  ;;  %vm4044_vm9 = vcmp.ge.s32.totalorder %v7904_v13, 3  ;;  %vm4090_vm10 = vcmp.lt.s32.totalorder %v7904_v13, 66  ;;  %vm4120_vm15 = vcmp.ge.s32.totalorder %v7904_v13, 66 }
 0x2fb   : > { %v4025_v40 = vsel %vm4006_vm8, %v4013_v12, 0.0  ;;  %vm4071_vm11 = vcmp.ge.s32.totalorder %v4004_v8, 135  ;;  %vm4048_vm12 = vcmp.lt.s32.totalorder %v4004_v8, 135  ;;  %v4053_v55 = vsel %vm4044_vm9, %v4013_v12, 0.0  ;;  %vm7913_vm13 = vmand %vm4044_vm9, %vm4090_vm10 }
 0x2fc   : > { %v4029_v10 = vsel %vm4028_vm6, %v4025_v40, 0.0  ;;  %v4074_v7 = vsel %vm4071_vm11, %v4017_v15, 0.0  ;;  %v4079_v51 = vsel %vm4032_vm7, %v4021_v63, 0.0  ;;  %v4054_v25 = vsel %vm4048_vm12, %v4017_v15, 0.0 }
 0x2fd   : > { %v4001_v49 = vld [vmem:[#allocation3] sm:$0x3]  ;;  %4035 = vadd.xlane.f32.xlu0 %v4029_v10  ;;  %v4077_v16 = vsel %vm4028_vm6, %v4074_v7, 0.0  ;;  %v4056_v29 = vsel %vm4028_vm6, %v4053_v55, 0.0  ;;  %v4057_v52 = vsel %vm4028_vm6, %v4054_v25, 0.0  ;;  %vm4136_vm0 = vcmp.eq.s32.totalorder %v7904_v13, 0 }
 0x2fe   : > { %v4098_v42 = vrot.slane %v4001_v49, %v4012_v59  ;;  %v4080_v33 = vadd.f32 %v4079_v51, %v4077_v16  ;;  %v4058_v60 = vadd.f32 %v4057_v52, %v4056_v29  ;;  %v4102_v28 = vrot.slane %v4001_v49, %v4016_v36 }
 0x2ff   : > { %vm4139_vm1 = vcmp.eq.s32.totalorder %v7904_v13, 1  ;;  %vm4143_vm2 = vcmp.eq.s32.totalorder %v7904_v13, 2  ;;  %vm4147_vm3 = vcmp.eq.s32.totalorder %v7904_v13, 3  ;;  %vm4151_vm4 = vcmp.eq.s32.totalorder %v7904_v13, 4 }
 0x300   : > { %v4105_v1 = vsel %vm7913_vm13, %v4098_v42, 0.0  ;;  %4081 = vadd.xlane.f32.xlu1 %v4080_v33  ;;  %v4122_v47 = vsel %vm4120_vm15, %v4098_v42, 0.0  ;;  %v4125_v50 = vsel %vm4108_vm14, %v4102_v28, 0.0 }
 0x301   : > { %4061 = vadd.xlane.f32.xlu0 %v4058_v60  ;;  %v4107_v26 = vsel %vm4028_vm6, %v4105_v1, 0.0  ;;  %v4124_v61 = vsel %vm4028_vm6, %v4122_v47, 0.0 }
 0x302   : > { %v4126_v53 = vadd.f32 %v4125_v50, %v4124_v61 }
 0x304   : > { %4111 = vadd.xlane.f32.xlu1 %v4107_v26 }
 0x305   : > { %4127 = vadd.xlane.f32.xlu0 %v4126_v53 }
 0x386   : > { %v4036_v19 = vpop.xlane.xlu0 %4035 }
 0x387   : > { %v4037_v34 = vrot.slane %v4036_v19, 4 }
 0x389   : > { %v4038_v46 = vadd.f32 %v4037_v34, %v4036_v19  ;;  %v4082_v17 = vpop.xlane.xlu1 %4081 }
 0x38a   : > { %v4083_v41 = vrot.slane %v4082_v17, 4  ;;  %v4062_v39 = vpop.xlane.xlu0 %4061 }
 0x38b   : > { %v4039_v21 = vrot.slane %v4038_v46, 2  ;;  %v4063_v4 = vrot.slane %v4062_v39, 4 }
 0x38c   : > { %v4084_v9 = vadd.f32 %v4083_v41, %v4082_v17 }
 0x38d   : > { %v4064_v22 = vadd.f32 %v4063_v4, %v4062_v39  ;;  %v4112_v31 = vpop.xlane.xlu1 %4111  ;;  %v4040_v43 = vadd.f32 %v4039_v21, %v4038_v46 }
 0x38e   : > { %v4085_v56 = vrot.slane %v4084_v9, 2  ;;  %v4113_v3 = vrot.slane %v4112_v31, 4  ;;  %v4128_v5 = vpop.xlane.xlu0 %4127 }
 0x38f   : > { %v4065_v30 = vrot.slane %v4064_v22, 2  ;;  %v4129_v2 = vrot.slane %v4128_v5, 4  ;;  %v4041_v54 = vrot.slane %v4040_v43, 1 }
 0x390   : > { %v4114_v35 = vadd.f32 %v4113_v3, %v4112_v31  ;;  %v4086_v20 = vadd.f32 %v4085_v56, %v4084_v9 }
 0x391   : > { %v4130_v45 = vadd.f32 %v4129_v2, %v4128_v5  ;;  %v4042_v6 = vadd.f32 %v4041_v54, %v4040_v43  ;;  %v4066_v23 = vadd.f32 %v4065_v30, %v4064_v22 }
 0x392   : > { %v4115_v37 = vrot.slane %v4114_v35, 2  ;;  %v4087_v24 = vrot.slane %v4086_v20, 1 }
 0x393   : > { %v4131_v27 = vrot.slane %v4130_v45, 2  ;;  %4291 = vpush %v4042_v6  ;;  %v4067_v14 = vrot.slane %v4066_v23, 1 }
 0x394   : > { %v4116_v32 = vadd.f32 %v4115_v37, %v4114_v35  ;;  %v4088_v11 = vadd.f32 %v4087_v24, %v4086_v20 }
 0x395   : > { %v4132_v0 = vadd.f32 %v4131_v27, %v4130_v45  ;;  %v4068_v57 = vadd.f32 %v4067_v14, %v4066_v23 }
 0x396   : > { %v4117_v48 = vrot.slane %v4116_v32, 1 }
 0x397   : > { %4293 = vpush %v4068_v57  ;;  %v4133_v18 = vrot.slane %v4132_v0, 1 }
 0x398   : > { %4295 = vpush %v4088_v11  ;;  %v4118_v62 = vadd.f32 %v4117_v48, %v4116_v32 }
 0x399   : > { %v4134_v38 = vadd.f32 %v4133_v18, %v4132_v0 }
 0x39a   : > { %4297 = vpush %v4118_v62 }
 0x39b   : > { %4299 = vpush %v4134_v38 }
 0x3c4   : > { %s4292_s15 = spop %4291 }
 0x3c5   : > { %v4137_v59 = vstv %s4292_s15 }
 0x3c6   : > { %v4138_v44 = vsel %vm4136_vm0, %v4137_v59, 0.0 }
 0x3c8   : > { %s4294_s23 = spop %4293 }
 0x3c9   : > { %v4140_v36 = vstv %s4294_s23  ;;  %s4296_s24 = spop %4295 }
 0x3ca   : > { %v4141_v49 = vsel %vm4139_vm1, %v4140_v36, 0.0  ;;  %v4144_v12 = vstv %s4296_s24 }
 0x3cb   : > { %v4142_v8 = vadd.f32 %v4141_v49, %v4138_v44  ;;  %s4298_s25 = spop %4297  ;;  %v4145_v15 = vsel %vm4143_vm2, %v4144_v12, 0.0 }
 0x3cc   : > { %v4148_v63 = vstv %s4298_s25  ;;  %s4300_s26 = spop %4299 }
 0x3cd   : > { %v4146_v42 = vadd.f32 %v4145_v15, %v4142_v8  ;;  %v4149_v40 = vsel %vm4147_vm3, %v4148_v63, 0.0  ;;  %v4152_v55 = vstv %s4300_s26 }
 0x3ce   : > { %v4153_v10 = vsel %vm4151_vm4, %v4152_v55, 0.0 }
 0x3cf   : > { %v4150_v58 = vadd.f32 %v4149_v40, %v4146_v42 }
 0x3d1   : > { %v4154_v7 = vadd.f32 %v4153_v10, %v4150_v58 }
 0x3d3   : > { %4155 = vst [vmem:[%s4466_s22] sm:$0xff] %v4154_v7 }
 0x3d4 PF: > { %s14_s19 = sadd.s32 1, %s4381_s19   ;;  %s8575_s15 = smov %s4373_s17 }
 0x3d5   : > { %p11_p9 = scmp.ge.s32.totalorder %s14_s19, 6   ;;  %s8576_s16 = smov %s4377_s18 }
 0x3d6   : > { %s8577_s17 = smov %s8580_s20  ;;  %s8578_s18 = smov %s8584_s21 }
 0x3d7   :  { %13 = sbr.rel (!%p11_p9) target bundleno = 3 (0x3), region = 83 }

</bundles_post_ra>
